<compile_context>
chip_gen: v6e
topology: v6e:2x2x1
jax: 0.10.0
libtpu: 0.0.40
codegen_flags: <defaults>
</compile_context>

<pallas_src>
import jax
import jax.numpy as jnp
from jax.experimental import pallas as pl
from jax.experimental.pallas import tpu as pltpu

DSZ = 50     # decoder input size
ISZ = 1275   # decoder output size
NN = 120     # hidden width

# lane-aligned padded sizes used inside the kernel
NN_P = 128
ISZ_P = 1280


def _softplus(x):
    # numerically-stable softplus: max(x,0) + log1p(exp(-|x|))
    return jnp.maximum(x, 0.0) + jnp.log1p(jnp.exp(-jnp.abs(x)))


def decoder_kernel(x_ref, w1_ref, b1_ref, w2a_ref, b2a_ref,
                   w2b_ref, b2b_ref, w3_ref, b3_ref, o_ref):
    # activations cast to bf16 for the MXU; accumulation and all element-wise
    # math (bias add, ReLU, softplus) stay in f32.
    x = x_ref[...].astype(jnp.bfloat16)                       # (BT, DSZ)

    # lyrD1: Linear + (folded BN) + ReLU
    h1 = jnp.dot(x, w1_ref[...],
                 preferred_element_type=jnp.float32) + b1_ref[...]
    h1 = jnp.maximum(h1, 0.0)                                 # (BT, NN_P) f32

    # lyrD2: Linear + (folded BN) + ReLU + Linear + (folded BN)
    t = jnp.dot(h1.astype(jnp.bfloat16), w2a_ref[...],
                preferred_element_type=jnp.float32) + b2a_ref[...]
    t = jnp.maximum(t, 0.0)
    h2 = jnp.dot(t.astype(jnp.bfloat16), w2b_ref[...],
                 preferred_element_type=jnp.float32) + b2b_ref[...]

    # residual + ReLU
    h = jnp.maximum(h1 + h2, 0.0)                             # (BT, NN_P) f32

    # lyrD3: Linear + Softplus
    z = jnp.dot(h.astype(jnp.bfloat16), w3_ref[...],
                preferred_element_type=jnp.float32) + b3_ref[...]
    o_ref[...] = _softplus(z)                                 # (BT, ISZ_P) f32


def fold_bn_into_linear(W, b, gamma, beta, mean, var, eps=1e-5):
    """Fold eval-mode BatchNorm1d into the preceding Linear (out-feature wise)."""
    scale = gamma / jnp.sqrt(var + eps)
    W_f = W * scale[None, :]
    b_f = b * scale + (beta - mean * scale)
    return W_f, b_f


def _round_up(n, m):
    return ((n + m - 1) // m) * m


def _pad_to(a, shape):
    pads = [(0, s - d) for d, s in zip(a.shape, shape)]
    return jnp.pad(a, pads)


def decoder_forward(x, params, *, block_batch=256):
    B = x.shape[0]
    # adaptive batch tile: big for throughput, still works for tiny batches
    bb = min(block_batch, _round_up(B, 8))
    Bp = _round_up(B, bb)
    if Bp != B:
        # BN is folded (eval), so rows are independent -> zero-padding is safe
        x = jnp.pad(x, ((0, Bp - B), (0, 0)))

    # Fold the three BatchNorms into their preceding Linears (eval semantics).
    w1, b1 = fold_bn_into_linear(params["w1"], params["b1"],
                                 params["bn1_g"], params["bn1_b"],
                                 params["bn1_m"], params["bn1_v"])
    w2a, b2a = fold_bn_into_linear(params["w2a"], params["b2a"],
                                   params["bn2a_g"], params["bn2a_b"],
                                   params["bn2a_m"], params["bn2a_v"])
    w2b, b2b = fold_bn_into_linear(params["w2b"], params["b2b"],
                                   params["bn2b_g"], params["bn2b_b"],
                                   params["bn2b_m"], params["bn2b_v"])
    w3, b3 = params["w3"], params["b3"]

    # Zero-pad NN->128 and ISZ->1280; weights to bf16 for the MXU,
    # biases stay f32 (added after the f32-accumulated matmul).
    w1p = _pad_to(w1, (DSZ, NN_P)).astype(jnp.bfloat16)
    b1p = _pad_to(b1.reshape(1, NN), (1, NN_P))
    w2ap = _pad_to(w2a, (NN_P, NN_P)).astype(jnp.bfloat16)
    b2ap = _pad_to(b2a.reshape(1, NN), (1, NN_P))
    w2bp = _pad_to(w2b, (NN_P, NN_P)).astype(jnp.bfloat16)
    b2bp = _pad_to(b2b.reshape(1, NN), (1, NN_P))
    w3p = _pad_to(w3, (NN_P, ISZ_P)).astype(jnp.bfloat16)
    b3p = _pad_to(b3.reshape(1, ISZ), (1, ISZ_P))

    grid = (Bp // bb,)
    full = lambda i: (0, 0)   # constant index_map: weights stay VMEM-resident

    out = pl.pallas_call(
        decoder_kernel,
        out_shape=jax.ShapeDtypeStruct((Bp, ISZ_P), jnp.float32),
        grid_spec=pltpu.PrefetchScalarGridSpec(
            num_scalar_prefetch=0,
            grid=grid,
            in_specs=[
                pl.BlockSpec((bb, DSZ), lambda i: (i, 0)),   # x tile
                pl.BlockSpec((DSZ, NN_P), full),             # W1
                pl.BlockSpec((1, NN_P), full),               # b1
                pl.BlockSpec((NN_P, NN_P), full),            # W2a
                pl.BlockSpec((1, NN_P), full),               # b2a
                pl.BlockSpec((NN_P, NN_P), full),            # W2b
                pl.BlockSpec((1, NN_P), full),               # b2b
                pl.BlockSpec((NN_P, ISZ_P), full),           # W3
                pl.BlockSpec((1, ISZ_P), full),              # b3
            ],
            out_specs=pl.BlockSpec((bb, ISZ_P), lambda i: (i, 0)),
        ),
        compiler_params=pltpu.CompilerParams(
            dimension_semantics=("parallel",)),
    )(x, w1p, b1p, w2ap, b2ap, w2bp, b2bp, w3p, b3p)

    # slice off batch padding and the 5 padded output lanes
    return out[:B, :ISZ]


def init_params(key):
    ks = jax.random.split(key, 22)

    def lin(kw, kb, fan_in, fan_out):
        bound = 1.0 / jnp.sqrt(fan_in)
        W = jax.random.uniform(kw, (fan_in, fan_out), jnp.float32, -bound, bound)
        b = jax.random.uniform(kb, (fan_out,), jnp.float32, -bound, bound)
        return W, b

    def bn(kg, kb, km, kv, n):
        g = 1.0 + 0.1 * jax.random.normal(kg, (n,), jnp.float32)
        b = 0.1 * jax.random.normal(kb, (n,), jnp.float32)
        m = 0.1 * jax.random.normal(km, (n,), jnp.float32)
        v = 1.0 + 0.1 * jnp.abs(jax.random.normal(kv, (n,), jnp.float32))
        return g, b, m, v

    w1, b1 = lin(ks[0], ks[1], DSZ, NN)
    bn1_g, bn1_b, bn1_m, bn1_v = bn(ks[2], ks[3], ks[4], ks[5], NN)
    w2a, b2a = lin(ks[6], ks[7], NN, NN)
    bn2a_g, bn2a_b, bn2a_m, bn2a_v = bn(ks[8], ks[9], ks[10], ks[11], NN)
    w2b, b2b = lin(ks[12], ks[13], NN, NN)
    bn2b_g, bn2b_b, bn2b_m, bn2b_v = bn(ks[14], ks[15], ks[16], ks[17], NN)
    w3, b3 = lin(ks[18], ks[19], NN, ISZ)

    return dict(w1=w1, b1=b1, bn1_g=bn1_g, bn1_b=bn1_b, bn1_m=bn1_m, bn1_v=bn1_v,
                w2a=w2a, b2a=b2a, bn2a_g=bn2a_g, bn2a_b=bn2a_b,
                bn2a_m=bn2a_m, bn2a_v=bn2a_v,
                w2b=w2b, b2b=b2b, bn2b_g=bn2b_g, bn2b_b=bn2b_b,
                bn2b_m=bn2b_m, bn2b_v=bn2b_v,
                w3=w3, b3=b3)


def reference_forward(x, params):
    """Pure-JAX f32 reference (eval-mode Decoder.forward)."""
    def bn_eval(z, g, b, m, v, eps=1e-5):
        return (z - m) / jnp.sqrt(v + eps) * g + b
    h1 = jax.nn.relu(bn_eval(x @ params["w1"] + params["b1"],
                             params["bn1_g"], params["bn1_b"],
                             params["bn1_m"], params["bn1_v"]))
    t = jax.nn.relu(bn_eval(h1 @ params["w2a"] + params["b2a"],
                            params["bn2a_g"], params["bn2a_b"],
                            params["bn2a_m"], params["bn2a_v"]))
    h2 = bn_eval(t @ params["w2b"] + params["b2b"],
                 params["bn2b_g"], params["bn2b_b"],
                 params["bn2b_m"], params["bn2b_v"])
    h = jax.nn.relu(h1 + h2)
    return jax.nn.softplus(h @ params["w3"] + params["b3"])


if __name__ == "__main__":
    key = jax.random.PRNGKey(0)
    kx, kp = jax.random.split(key)

    # B=512 with block_batch=256 -> 2 parallel grid steps (both v7x TCs busy)
    B = 512
    x = jax.random.normal(kx, (B, DSZ), jnp.float32)
    params = init_params(kp)

    out = decoder_forward(x, params, block_batch=256)
    out = jax.block_until_ready(out)

    ref = reference_forward(x, params)
    assert out.shape == (B, ISZ)
    # tolerance loosened vs. the f32 reference because matmuls run in bf16
    # (f32 accumulation); observed error is O(1e-3..1e-2) absolute.
    assert jnp.allclose(out, ref, atol=5e-2, rtol=5e-2), "mismatch vs reference"

    print("KERNEL_OK")
</pallas_src>

<mosaic_0001>
module attributes {stable_mosaic.version = 11 : i64} {
  func.func @decoder_kernel(%arg0: i32, %arg1: memref<256x50xf32, #tpu.memory_space<vmem>>, %arg2: memref<50x128xbf16, #tpu.memory_space<vmem>>, %arg3: memref<1x128xf32, #tpu.memory_space<vmem>>, %arg4: memref<128x128xbf16, #tpu.memory_space<vmem>>, %arg5: memref<1x128xf32, #tpu.memory_space<vmem>>, %arg6: memref<128x128xbf16, #tpu.memory_space<vmem>>, %arg7: memref<1x128xf32, #tpu.memory_space<vmem>>, %arg8: memref<128x1280xbf16, #tpu.memory_space<vmem>>, %arg9: memref<1x1280xf32, #tpu.memory_space<vmem>>, %arg10: memref<256x1280xf32, #tpu.memory_space<vmem>>) attributes {dimension_semantics = [#tpu.dimension_semantics<parallel>], iteration_bounds = array<i64: 2>, scalar_prefetch = 0 : i64, scratch_operands = 0 : i64, tpu.core_type = #tpu.core_type<tc>, window_params = [{transform_indices = @transform_0, window_bounds = array<i64: 256, 50>}, {pipeline_mode = #tpu.pipeline_mode<synchronous>, transform_indices = @transform_1, window_bounds = array<i64: 50, 128>}, {pipeline_mode = #tpu.pipeline_mode<synchronous>, transform_indices = @transform_2, window_bounds = array<i64: 1, 128>}, {pipeline_mode = #tpu.pipeline_mode<synchronous>, transform_indices = @transform_3, window_bounds = array<i64: 128, 128>}, {pipeline_mode = #tpu.pipeline_mode<synchronous>, transform_indices = @transform_4, window_bounds = array<i64: 1, 128>}, {pipeline_mode = #tpu.pipeline_mode<synchronous>, transform_indices = @transform_5, window_bounds = array<i64: 128, 128>}, {pipeline_mode = #tpu.pipeline_mode<synchronous>, transform_indices = @transform_6, window_bounds = array<i64: 1, 128>}, {pipeline_mode = #tpu.pipeline_mode<synchronous>, transform_indices = @transform_7, window_bounds = array<i64: 128, 1280>}, {pipeline_mode = #tpu.pipeline_mode<synchronous>, transform_indices = @transform_8, window_bounds = array<i64: 1, 1280>}, {transform_indices = @transform_9, window_bounds = array<i64: 256, 1280>}]} {
    %c0 = arith.constant 0 : index
    %c0_0 = arith.constant 0 : index
    %0 = vector.load %arg1[%c0, %c0_0] : memref<256x50xf32, #tpu.memory_space<vmem>>, vector<256x50xf32>
    %1 = arith.truncf %0 : vector<256x50xf32> to vector<256x50xbf16>
    %c0_1 = arith.constant 0 : index
    %c0_2 = arith.constant 0 : index
    %2 = vector.load %arg2[%c0_1, %c0_2] : memref<50x128xbf16, #tpu.memory_space<vmem>>, vector<50x128xbf16>
    %cst = arith.constant dense<0.000000e+00> : vector<256x128xf32>
    %3 = tpu.matmul %1, %2, %cst {dimension_numbers = #tpu.dot_dimension_numbers<[1], [0], [0], [1], [0, 0, 1, 1], [], []>} : vector<256x50xbf16>, vector<50x128xbf16>, vector<256x128xf32> -> vector<256x128xf32>
    %c0_3 = arith.constant 0 : index
    %c0_4 = arith.constant 0 : index
    %4 = vector.load %arg3[%c0_3, %c0_4] : memref<1x128xf32, #tpu.memory_space<vmem>>, vector<1x128xf32>
    %5 = vector.broadcast %4 : vector<1x128xf32> to vector<256x128xf32>
    %6 = arith.addf %3, %5 : vector<256x128xf32>
    %cst_5 = arith.constant 0.000000e+00 : f32
    %7 = vector.broadcast %cst_5 : f32 to vector<256x128xf32>
    %8 = arith.maximumf %6, %7 : vector<256x128xf32>
    %9 = arith.truncf %8 : vector<256x128xf32> to vector<256x128xbf16>
    %c0_6 = arith.constant 0 : index
    %c0_7 = arith.constant 0 : index
    %10 = vector.load %arg4[%c0_6, %c0_7] : memref<128x128xbf16, #tpu.memory_space<vmem>>, vector<128x128xbf16>
    %cst_8 = arith.constant dense<0.000000e+00> : vector<256x128xf32>
    %11 = tpu.matmul %9, %10, %cst_8 {dimension_numbers = #tpu.dot_dimension_numbers<[1], [0], [0], [1], [0, 0, 1, 1], [], []>} : vector<256x128xbf16>, vector<128x128xbf16>, vector<256x128xf32> -> vector<256x128xf32>
    %c0_9 = arith.constant 0 : index
    %c0_10 = arith.constant 0 : index
    %12 = vector.load %arg5[%c0_9, %c0_10] : memref<1x128xf32, #tpu.memory_space<vmem>>, vector<1x128xf32>
    %13 = vector.broadcast %12 : vector<1x128xf32> to vector<256x128xf32>
    %14 = arith.addf %11, %13 : vector<256x128xf32>
    %cst_11 = arith.constant 0.000000e+00 : f32
    %15 = vector.broadcast %cst_11 : f32 to vector<256x128xf32>
    %16 = arith.maximumf %14, %15 : vector<256x128xf32>
    %17 = arith.truncf %16 : vector<256x128xf32> to vector<256x128xbf16>
    %c0_12 = arith.constant 0 : index
    %c0_13 = arith.constant 0 : index
    %18 = vector.load %arg6[%c0_12, %c0_13] : memref<128x128xbf16, #tpu.memory_space<vmem>>, vector<128x128xbf16>
    %cst_14 = arith.constant dense<0.000000e+00> : vector<256x128xf32>
    %19 = tpu.matmul %17, %18, %cst_14 {dimension_numbers = #tpu.dot_dimension_numbers<[1], [0], [0], [1], [0, 0, 1, 1], [], []>} : vector<256x128xbf16>, vector<128x128xbf16>, vector<256x128xf32> -> vector<256x128xf32>
    %c0_15 = arith.constant 0 : index
    %c0_16 = arith.constant 0 : index
    %20 = vector.load %arg7[%c0_15, %c0_16] : memref<1x128xf32, #tpu.memory_space<vmem>>, vector<1x128xf32>
    %21 = vector.broadcast %20 : vector<1x128xf32> to vector<256x128xf32>
    %22 = arith.addf %19, %21 : vector<256x128xf32>
    %23 = arith.addf %8, %22 : vector<256x128xf32>
    %cst_17 = arith.constant 0.000000e+00 : f32
    %24 = vector.broadcast %cst_17 : f32 to vector<256x128xf32>
    %25 = arith.maximumf %23, %24 : vector<256x128xf32>
    %26 = arith.truncf %25 : vector<256x128xf32> to vector<256x128xbf16>
    %c0_18 = arith.constant 0 : index
    %c0_19 = arith.constant 0 : index
    %27 = vector.load %arg8[%c0_18, %c0_19] : memref<128x1280xbf16, #tpu.memory_space<vmem>>, vector<128x1280xbf16>
    %cst_20 = arith.constant dense<0.000000e+00> : vector<256x1280xf32>
    %28 = tpu.matmul %26, %27, %cst_20 {dimension_numbers = #tpu.dot_dimension_numbers<[1], [0], [0], [1], [0, 0, 1, 1], [], []>} : vector<256x128xbf16>, vector<128x1280xbf16>, vector<256x1280xf32> -> vector<256x1280xf32>
    %c0_21 = arith.constant 0 : index
    %c0_22 = arith.constant 0 : index
    %29 = vector.load %arg9[%c0_21, %c0_22] : memref<1x1280xf32, #tpu.memory_space<vmem>>, vector<1x1280xf32>
    %30 = vector.broadcast %29 : vector<1x1280xf32> to vector<256x1280xf32>
    %31 = arith.addf %28, %30 : vector<256x1280xf32>
    %cst_23 = arith.constant 0.000000e+00 : f32
    %32 = vector.broadcast %cst_23 : f32 to vector<256x1280xf32>
    %33 = arith.maximumf %31, %32 : vector<256x1280xf32>
    %34 = math.absf %31 : vector<256x1280xf32>
    %cst_24 = arith.constant 0.000000e+00 : f32
    %35 = vector.broadcast %cst_24 : f32 to vector<256x1280xf32>
    %36 = arith.subf %35, %34 : vector<256x1280xf32>
    %37 = math.exp %36 : vector<256x1280xf32>
    %38 = math.log1p %37 : vector<256x1280xf32>
    %39 = arith.addf %33, %38 : vector<256x1280xf32>
    %c0_25 = arith.constant 0 : index
    %c0_26 = arith.constant 0 : index
    %40 = vector.load %arg10[%c0_25, %c0_26] : memref<256x1280xf32, #tpu.memory_space<vmem>>, vector<256x1280xf32>
    tpu.vector_store %arg10[%c0_25, %c0_26], %39 {strides = array<i32>} : memref<256x1280xf32, #tpu.memory_space<vmem>>, vector<256x1280xf32>,
    return
  }
  func.func @transform_0(%arg0: i32) -> (i32, i32) {
    %c0_i32 = arith.constant 0 : i32
    %c0_i32_0 = arith.constant 0 : i32
    return %arg0, %c0_i32 : i32, i32
  }
  func.func @transform_1(%arg0: i32) -> (i32, i32) {
    %c0_i32 = arith.constant 0 : i32
    %c0_i32_0 = arith.constant 0 : i32
    %c0_i32_1 = arith.constant 0 : i32
    return %c0_i32, %c0_i32_0 : i32, i32
  }
  func.func @transform_2(%arg0: i32) -> (i32, i32) {
    %c0_i32 = arith.constant 0 : i32
    %c0_i32_0 = arith.constant 0 : i32
    %c0_i32_1 = arith.constant 0 : i32
    return %c0_i32, %c0_i32_0 : i32, i32
  }
  func.func @transform_3(%arg0: i32) -> (i32, i32) {
    %c0_i32 = arith.constant 0 : i32
    %c0_i32_0 = arith.constant 0 : i32
    %c0_i32_1 = arith.constant 0 : i32
    return %c0_i32, %c0_i32_0 : i32, i32
  }
  func.func @transform_4(%arg0: i32) -> (i32, i32) {
    %c0_i32 = arith.constant 0 : i32
    %c0_i32_0 = arith.constant 0 : i32
    %c0_i32_1 = arith.constant 0 : i32
    return %c0_i32, %c0_i32_0 : i32, i32
  }
  func.func @transform_5(%arg0: i32) -> (i32, i32) {
    %c0_i32 = arith.constant 0 : i32
    %c0_i32_0 = arith.constant 0 : i32
    %c0_i32_1 = arith.constant 0 : i32
    return %c0_i32, %c0_i32_0 : i32, i32
  }
  func.func @transform_6(%arg0: i32) -> (i32, i32) {
    %c0_i32 = arith.constant 0 : i32
    %c0_i32_0 = arith.constant 0 : i32
    %c0_i32_1 = arith.constant 0 : i32
    return %c0_i32, %c0_i32_0 : i32, i32
  }
  func.func @transform_7(%arg0: i32) -> (i32, i32) {
    %c0_i32 = arith.constant 0 : i32
    %c0_i32_0 = arith.constant 0 : i32
    %c0_i32_1 = arith.constant 0 : i32
    return %c0_i32, %c0_i32_0 : i32, i32
  }
  func.func @transform_8(%arg0: i32) -> (i32, i32) {
    %c0_i32 = arith.constant 0 : i32
    %c0_i32_0 = arith.constant 0 : i32
    %c0_i32_1 = arith.constant 0 : i32
    return %c0_i32, %c0_i32_0 : i32, i32
  }
  func.func @transform_9(%arg0: i32) -> (i32, i32) {
    %c0_i32 = arith.constant 0 : i32
    %c0_i32_0 = arith.constant 0 : i32
    return %arg0, %c0_i32 : i32, i32
  }
}

</mosaic_0001>

<bundles_post_ra>
// kernel: tpu_custom_call.1
= control target key start
LH: loop header
LB: loop body
LE: loop exit
PB: predicated region body
PF: predicated region fallthrough
CT: control target
= control target key end

     0   :  { %s17432_s0 = inlined_call_operand.vmem [shape: f32[512,50], index: 0, kind: input, shape index: {}]   ;;  %s17433_s1 = inlined_call_operand.hbm [shape: bf16[50,128], index: 1, kind: input, shape index: {}]   ;;  %s17434_s2 = inlined_call_operand.hbm [shape: f32[1,128], index: 2, kind: input, shape index: {}]   ;;  %s17435_s3 = inlined_call_operand.hbm [shape: bf16[128,128], index: 3, kind: input, shape index: {}]   ;;  %s17436_s4 = inlined_call_operand.hbm [shape: f32[1,128], index: 4, kind: input, shape index: {}]   ;;  %s17437_s5 = inlined_call_operand.hbm [shape: bf16[128,128], index: 5, kind: input, shape index: {}]   ;;  %s17438_s6 = inlined_call_operand.hbm [shape: f32[1,128], index: 6, kind: input, shape index: {}]   ;;  %s17439_s7 = inlined_call_operand.hbm [shape: bf16[128,1280], index: 7, kind: input, shape index: {}]   ;;  %s17440_s8 = inlined_call_operand.hbm [shape: f32[1,1280], index: 8, kind: input, shape index: {}]   ;;  %s17441_s9 = inlined_call_operand.hbm [shape: f32[512,1280], index: 9, kind: output, shape index: {}]  }
   0x1   :  { %17498 = sst [smem:[#allocation49_spill]] %s17434_s2 }
   0x2   :  { %14 = vsyncpa [#allocation3], 0 }
   0x3   :  { %15 = vsyncpa [#allocation6], 0 }
   0x4   :  { %16 = vsyncpa [#allocation9], 0 }
   0x5   :  { %17 = vsyncpa [#allocation12], 0 }
   0x6   :  { %18 = vsyncpa [#allocation15], 0 }
   0x7   :  { %19 = vsyncpa [#allocation4], 0 }
   0x8   :  { %21 = vsyncpa [#allocation4 + $0x1], 0  ;;  %s10431_s30 = smov 0   ;;  %s10433_s10 = smov 0  }
   0x9   :  { %s10435_s11 = smov 0   ;;  %s10437_s12 = smov 0  }
   0xa LB: > { %s10452_s13 = sadd.s32 4294967295, %s10363_s12   ;;  %s8156_s14 = sadd.s32 4294967294, %s10363_s12   ;;  %s10363_s12 = sphi %s10437_s12, %s18200_s12   ;;  %s10359_s11 = sphi %s10435_s11, %s18199_s11   ;;  %s10355_s10 = sphi %s10433_s10, %s18198_s10   ;;  %s10351_s30 = sphi %s10431_s30, %s18197_s30  }
   0xb   : > { %s10456_s15 = sadd.s32 1, %s10363_s12   ;;  %s228_s16 = sadd.s32 1, %s10359_s11 }
   0xc   : > { %s225_s17 = ssub.s32 %s10363_s12, %s10456_s15  ;;  %p238_p0 = scmp.ne.s32.totalorder %s10359_s11, %s10355_s10 }
   0xd   : > { %p226_p1 = scmp.eq.s32.totalorder %s225_s17, 0  ;;  %p239_p2 = scmp.eq.s32.totalorder %s10452_s13, 1 }
   0xe   : > { %p244_p3 = scmp.ne.s32.totalorder %s10355_s10, %s10351_s30  ;;  %p245_p4 = scmp.eq.s32.totalorder %s8156_s14, 1 }
   0xf   : > { %s10467_s18 = scalar_select %p226_p1, %s10359_s11, %s228_s16  }
  0x10   : > { %p10469_p5 = por %p239_p2, %p238_p0  ;;  %p10473_p6 = por %p245_p4, %p244_p3 }
  0x11   : > { %p8157_p7 = scmp.ge.s32.totalorder %s10363_s12, 1  ;;  %p252_p8 = scmp.lt.s32.totalorder %s10363_s12, 3 }
  0x12   : > { %s17499_s19 = scalar_select %p10469_p5, 1, 0 }
  0x13   : > { %s17500_s20 = scalar_select %p10473_p6, 1, 0 }
  0x14   : > { %p17442_p9 = scmp.eq.s32.totalorder %s10452_s13, 0  ;;  %p10480_p10 = pnand %p8157_p7, %p252_p8 }
  0x15   : > { %s10365_s22 = smov [#allocation5]   ;;  %s10366_s24 = smov [#allocation8]  }
  0x16   : > { %s17501_s21 = scalar_select %p10480_p10, 1, 0 }
  0x17   : > { %s278_s23 = sshll.u32 %s10365_s22, 4  ;;  %p8559_p11 = pneg %p10480_p10  ;;  %s279_s23 = int_to_ptr.vmem [resolvable:$true] %s278_s23 }
  0x18   : > { %s302_s25 = sshll.u32 %s10366_s24, 4  ;;  %s10367_s27 = smov [#allocation11]   ;;  %s303_s25 = int_to_ptr.vmem [resolvable:$true] %s302_s25 }
  0x19   : > { %p10488_p12 = pnand %p17442_p9, %p8559_p11  ;;  %s326_s28 = sshll.u32 %s10367_s27, 4  ;;  %s10492_s28 = int_to_ptr.vmem [resolvable:$true] %s326_s28 }
  0x1a   : > { %s10086_s14 = scalar_lea.vmem %s279_s23, 16  ;;  %s10093_s16 = scalar_lea.vmem %s279_s23, 32 }
  0x1b   : > { %p10496_p13 = pneg %p10488_p12  ;;  %p10087_p0 = scmp.ne.s32.totalorder %s279_s23, %s10086_s14 }
  0x1c   : > { %p10094_p3 = scmp.lt.s32.totalorder %s279_s23, %s279_s23  ;;  %p10095_p4 = scmp.lt.s32.totalorder %s10093_s16, %s10086_s14 }
  0x1d   : > { %p10089_p1 = pnand %p10087_p0, %p10496_p13 }
  0x1e   : > { %p10096_p7 = por %p10095_p4, %p10094_p3 }
  0x1f   : > { %p10090_p2 = pneg %p10089_p1 }
  0x21   : > { %p10097_p8 = pnand %p10096_p7, %p10090_p2 }
  0x23   : > { %10100 = shalt.err (!%p10097_p8)
}
  0x24   : > { %s17504_s2 = sld [smem:[#allocation49_spill]]  ;;  %s10112_s24 = scalar_lea.vmem %s303_s25, 16 }
  0x25   : > { %p10113_p11 = scmp.ne.s32.totalorder %s303_s25, %s10112_s24  ;;  %s10119_s27 = scalar_lea.vmem %s303_s25, 32 }
  0x26   : > { %p10120_p0 = scmp.lt.s32.totalorder %s303_s25, %s303_s25  ;;  %p10121_p1 = scmp.lt.s32.totalorder %s10119_s27, %s10112_s24 }
  0x27   : > { %p10115_p9 = pnand %p10113_p11, %p10496_p13 }
  0x28   : > { %p10122_p5 = por %p10121_p1, %p10120_p0 }
  0x29   : > { %p10116_p6 = pneg %p10115_p9 }
  0x2a   : > { %8565 = dma.hbm_to_vmem [thread:$0]  (!%p10488_p12), %s17504_s2, 16, %s279_s23, [#allocation6]  }
  0x2b   : > { %p10123_p10 = pnand %p10122_p5, %p10116_p6 }
  0x2d   : > { %10126 = shalt.err (!%p10123_p10)
}
  0x2e   : > { %8571 = dma.hbm_to_vmem [thread:$0]  (!%p10488_p12), %s17436_s4, 16, %s303_s25, [#allocation9]  }
  0x2f   : > { %s10138_s23 = scalar_lea.vmem %s10492_s28, 16  ;;  %s10145_s17 = scalar_lea.vmem %s10492_s28, 32 }
  0x30   : > { %p10139_p2 = scmp.ne.s32.totalorder %s10492_s28, %s10138_s23  ;;  %p10146_p5 = scmp.lt.s32.totalorder %s10492_s28, %s10492_s28 }
  0x31   : > { %p10147_p6 = scmp.lt.s32.totalorder %s10145_s17, %s10138_s23 }
  0x32   : > { %p10141_p9 = pnand %p10139_p2, %p10496_p13 }
  0x33   : > { %p10148_p10 = por %p10147_p6, %p10146_p5 }
  0x34   : > { %p10142_p3 = pneg %p10141_p9 }
  0x36   : > { %p10149_p4 = pnand %p10148_p10, %p10142_p3 }
  0x38   : > { %10152 = shalt.err (!%p10149_p4)
}
  0x39   : > { %8577 = dma.hbm_to_vmem [thread:$0]  (!%p10488_p12), %s17438_s6, 16, %s10492_s28, [#allocation12]  }
  0x3a   : > { %s10368_s25 = smov [#allocation2]  }
  0x3b   : > { %s264_s27 = sshll.u32 %s10368_s25, 4  ;;  %s265_s27 = int_to_ptr.vmem [resolvable:$true] %s264_s27 }
  0x3c   : > { %s10164_s14 = scalar_lea.vmem %s265_s27, 448  ;;  %p10172_p0 = scmp.lt.s32.totalorder %s265_s27, %s265_s27 }
  0x3d   : > { %p10165_p7 = scmp.ne.s32.totalorder %s265_s27, %s10164_s14  ;;  %p10173_p1 = scmp.lt.s32.totalorder %s10164_s14, %s10164_s14 }
  0x3f   : > { %p10167_p8 = pnand %p10165_p7, %p10496_p13  ;;  %p10174_p2 = por %p10173_p1, %p10172_p0 }
  0x41   : > { %p10168_p11 = pneg %p10167_p8 }
  0x43   : > { %p10175_p9 = pnand %p10174_p2, %p10168_p11 }
  0x45   : > { %10178 = shalt.err (!%p10175_p9)
}
  0x46   : > { %s10369_s16 = smov 64   ;;  %s10370_s23 = smov 4  }
  0x47   : > { %8562 = dma.hbm_to_vmem [thread:$0]  (!%p10488_p12), %s17433_s1, 448, %s265_s27, [#allocation3], %s10369_s16, %s10369_s16, %s10370_s23  }
  0x48   : > { %s10371_s22 = smov [#allocation7]   ;;  %s10372_s25 = smov [#allocation10]  }
  0x49   : > { %s288_s24 = sshll.u32 %s10371_s22, 4  ;;  %s312_s2 = sshll.u32 %s10372_s25, 4  ;;  %s289_s24 = int_to_ptr.vmem [resolvable:$true] %s288_s24  ;;  %s313_s2 = int_to_ptr.vmem [resolvable:$true] %s312_s2 }
  0x4a   : > { %s10190_s14 = scalar_lea.vmem %s289_s24, 1024  ;;  %p10198_p10 = scmp.lt.s32.totalorder %s289_s24, %s289_s24 }
  0x4b   : > { %p10191_p3 = scmp.ne.s32.totalorder %s289_s24, %s10190_s14  ;;  %p10199_p4 = scmp.lt.s32.totalorder %s10190_s14, %s10190_s14 }
  0x4d   : > { %p10193_p5 = pnand %p10191_p3, %p10496_p13  ;;  %p10200_p7 = por %p10199_p4, %p10198_p10 }
  0x4f   : > { %p10194_p6 = pneg %p10193_p5 }
  0x51   : > { %p10201_p8 = pnand %p10200_p7, %p10194_p6 }
  0x53   : > { %10204 = shalt.err (!%p10201_p8)
}
  0x54   : > { %8568 = dma.hbm_to_vmem [thread:$0]  (!%p10488_p12), %s17435_s3, 1024, %s289_s24, [#allocation6], %s10369_s16, %s10369_s16, %s10370_s23  }
  0x55   : > { %s10216_s17 = scalar_lea.vmem %s313_s2, 1024  ;;  %p10224_p2 = scmp.lt.s32.totalorder %s313_s2, %s313_s2 }
  0x56   : > { %p10217_p11 = scmp.ne.s32.totalorder %s313_s2, %s10216_s17  ;;  %p10225_p9 = scmp.lt.s32.totalorder %s10216_s17, %s10216_s17 }
  0x58   : > { %p10219_p0 = pnand %p10217_p11, %p10496_p13  ;;  %p10226_p3 = por %p10225_p9, %p10224_p2 }
  0x5a   : > { %p10220_p1 = pneg %p10219_p0 }
  0x5c   : > { %p10227_p5 = pnand %p10226_p3, %p10220_p1 }
  0x5e   : > { %10230 = shalt.err (!%p10227_p5)
}
  0x5f   : > { %8574 = dma.hbm_to_vmem [thread:$0]  (!%p10488_p12), %s17437_s5, 1024, %s313_s2, [#allocation9], %s10369_s16, %s10369_s16, %s10370_s23  }
  0x60   : > { %s10373_s24 = smov [#allocation13]  }
  0x61   : > { %s336_s14 = sshll.u32 %s10373_s24, 4  ;;  %s337_s14 = int_to_ptr.vmem [resolvable:$true] %s336_s14 }
  0x62   : > { %s10242_s27 = scalar_lea.vmem %s337_s14, 10240  ;;  %p10250_p7 = scmp.lt.s32.totalorder %s337_s14, %s337_s14 }
  0x63   : > { %p10243_p6 = scmp.ne.s32.totalorder %s337_s14, %s10242_s27  ;;  %p10251_p8 = scmp.lt.s32.totalorder %s10242_s27, %s10242_s27 }
  0x65   : > { %p10245_p10 = pnand %p10243_p6, %p10496_p13  ;;  %p10252_p11 = por %p10251_p8, %p10250_p7 }
  0x67   : > { %p10246_p4 = pneg %p10245_p10 }
  0x69   : > { %p10253_p0 = pnand %p10252_p11, %p10246_p4 }
  0x6b   : > { %10256 = shalt.err (!%p10253_p0)
}
  0x6c   : > { %s10374_s28 = smov 640   ;;  %s10375_s17 = smov 40  }
  0x6d   : > { %8580 = dma.hbm_to_vmem [thread:$0]  (!%p10488_p12), %s17439_s7, 10240, %s337_s14, [#allocation12], %s10374_s28, %s10374_s28, %s10375_s17  }
  0x6e   : > { %s10376_s16 = smov [#allocation14]  }
  0x6f   : > { %s350_s23 = sshll.u32 %s10376_s16, 4  ;;  %s351_s23 = int_to_ptr.vmem [resolvable:$true] %s350_s23 }
  0x70   : > { %s10268_s25 = scalar_lea.vmem %s351_s23, 160  ;;  %p10276_p3 = scmp.lt.s32.totalorder %s351_s23, %s351_s23 }
  0x71   : > { %p10269_p1 = scmp.ne.s32.totalorder %s351_s23, %s10268_s25  ;;  %p10277_p5 = scmp.lt.s32.totalorder %s10268_s25, %s10268_s25 }
  0x73   : > { %p10271_p2 = pnand %p10269_p1, %p10496_p13  ;;  %p10278_p6 = por %p10277_p5, %p10276_p3 }
  0x75   : > { %p10272_p9 = pneg %p10271_p2 }
  0x77   : > { %p10279_p10 = pnand %p10278_p6, %p10272_p9 }
  0x79   : > { %10282 = shalt.err (!%p10279_p10)
}
  0x7a   : > { %8583 = dma.hbm_to_vmem [thread:$0]  (!%p10488_p12), %s17440_s8, 160, %s351_s23, [#allocation15]  }
  0x7b   : > { %p17505_p4 = scmp.ne.s32.totalorder %s17501_s21, 0 }
  0x7d   : > { %372 = sbr.rel (%p17505_p4) target bundleno = 2299 (0x8fb), region = 56 }
  0x82   : > { %p17506_p7 = scmp.eq.s32.totalorder %s10452_s13, 0 }
  0x84   : > { %10326 = dma.done.wait (%p17506_p7), [#allocation3], 448   ;;  %p17507_p13 = pmov %p17506_p7 }
  0x85   : > { %p17508_p8 = pmov %p17506_p7 }
  0x86   : > { %10328 = vsyncadd (%p17507_p13), [#allocation3], 4294966848 }
  0x87   : > { %10330 = dma.done.wait (%p17508_p8), [#allocation6], 1040   ;;  %p17509_p11 = pmov %p17506_p7 }
  0x88   : > { %p17510_p0 = pmov %p17506_p7 }
  0x89   : > { %10332 = vsyncadd (%p17509_p11), [#allocation6], 4294966256 }
  0x8a   : > { %10334 = dma.done.wait (%p17510_p0), [#allocation9], 1040   ;;  %p17511_p12 = pmov %p17510_p0 }
  0x8b   : > { %p17512_p1 = pmov %p17510_p0 }
  0x8c   : > { %10336 = vsyncadd (%p17511_p12), [#allocation9], 4294966256 }
  0x8d   : > { %10338 = dma.done.wait (%p17512_p1), [#allocation12], 10256   ;;  %p17513_p2 = pmov %p17510_p0 }
  0x8e   : > { %p17514_p9 = pmov %p17510_p0 }
  0x8f   : > { %10340 = vsyncadd (%p17513_p2), [#allocation12], 4294957040 }
  0x90   : > { %10342 = dma.done.wait (%p17514_p9), [#allocation15], 160   ;;  %p17515_p3 = pmov %p17510_p0 }
  0x91   : > { %s8176_s21 = sshll.u32 %s10452_s13, 5  ;;  %vm576_vm0 = vcmask 1040384   ;;  %v8652_v0 = vld [vmem:[#allocation2 + $0x18] ss:$0 sps:$4 sm:$0x11]   ;;  %v8653_v1 = vld [vmem:[#allocation2 + $0x10] sm:$0xff]  }
  0x92   : > { %10344 = vsyncadd (%p17515_p3), [#allocation15], 4294967136  ;;  %p437_p5 = scmp.lt.s32.totalorder %s8176_s21, 63  ;;  %8522 = vmatprep.subr.msk.bf16.mxu0 %vm576_vm0, %v8652_v0  ;;  %v578_v2 = vsel %vm576_vm0, %v8652_v0, 0  ;;  %v8654_v4 = vld [vmem:[#allocation2 + $0x8] sm:$0xff]   ;;  %vm527_vm1 = vcmask 408576  }
  0x93   : > { %8371 = vmatpush3.bf16.msra.mxu0 %v578_v2  ;;  %v8655_v7 = vld [vmem:[#allocation2] sm:$0xff]   ;;  %v8656_v14 = vld [vmem:[#allocation7 + $0x38] sm:$0xff]   ;;  %v8657_v15 = vld [vmem:[#allocation7 + $0x30] sm:$0xff]   ;;  %s433_s17 = sand.u32 1, %s10355_s10   ;;  %s8524_s16 = smul.u32 40960, %s10452_s13 }
  0x94   : > { %s18202_s21 = smov (!%p437_p5, %s8176_s21), 63  ;;  %8372 = vmatprep.subr.bf16.mxu0 %v8653_v1  ;;  %8410 = vmatprep.subr.bf16.mxu1 %v8656_v14  ;;  %v8658_v20 = vld [vmem:[#allocation7 + $0x28] sm:$0xff]   ;;  %v8659_v21 = vld [vmem:[#allocation7 + $0x20] sm:$0xff]   ;;  %v8660_v26 = vld [vmem:[#allocation7 + $0x18] sm:$0xff]   ;;  %s11297_s22 = smul.u32 2560, %s433_s17 }
  0x95   : > { %s8177_s26 = sshll.u32 %s18202_s21, 3  ;;  %8411 = vmatpush3.bf16.msra.mxu1 %v8656_v14  ;;  %v8661_v58 = vld [vmem:[#allocation7 + $0x10] sm:$0xff]   ;;  %v8662_v59 = vld [vmem:[#allocation7 + $0x8] sm:$0xff]   ;;  %v8663_v60 = vld [vmem:[#allocation7] sm:$0xff]   ;;  %s17385_s27 = scalar_lea.hbm %s17441_s9, %s8524_s16 }
  0x96   : > { %s10597_s28 = scalar_lea.vmem %s17432_s0, %s8177_s26  ;;  %8412 = vmatprep.subr.bf16.mxu1 %v8657_v15  ;;  %v8664_v61 = vld [vmem:[#allocation10 + $0x38] sm:$0xff]   ;;  %v8665_v62 = vld [vmem:[#allocation10 + $0x30] sm:$0xff]   ;;  %v8666_v63 = vld [vmem:[#allocation10 + $0x28] sm:$0xff]   ;;  %s11350_s2 = scalar_lea.vmem [#allocation16], %s11297_s22 }
  0x97   : > { %v444_v3 = vld [vmem:[%s10597_s28] sm:$0xff]  ;;  %v445_v5 = vld [vmem:[%s10597_s28 + $0x8] sm:$0xff]  ;;  %8373 = vmatpush3.bf16.msra.mxu0 %v8653_v1  ;;  %v446_v8 = vld [vmem:[%s10597_s28 + $0x10] sm:$0xff]  ;;  %s8015_s23 = sshll.u32 %s11350_s2, 4  ;;  %s17392_s13 = scalar_lea.sflag [#allocation4], %s433_s17  ;;  %s17387_s23 = int_to_ptr.vmem [resolvable:$true] %s8015_s23 }
  0x98   : > { %v476_v6 = vpack.c.bf16 %v445_v5, %v444_v3  ;;  %8374 = vmatprep.subr.bf16.mxu0 %v8654_v4  ;;  %v447_v9 = vld [vmem:[%s10597_s28 + $0x18] sm:$0xff]  ;;  %v448_v10 = vld [vmem:[%s10597_s28 + $0x20] sm:$0xff]  ;;  %v449_v11 = vld [vmem:[%s10597_s28 + $0x28] sm:$0xff]  ;;  %s10283_s21 = scalar_lea.vmem %s17387_s23, 40960  ;;  %p18195_p10 = scmp.ne.s32.totalorder %s17499_s19, 0 }
  0x99   : > { %v477_v12 = vpack.c.bf16 %v447_v9, %v446_v8  ;;  %v478_v13 = vpack.c.bf16 %v449_v11, %v448_v10  ;;  %v450_v16 = vld [vmem:[%s10597_s28 + $0x30] sm:$0xff]  ;;  %v451_v17 = vld [vmem:[%s10597_s28 + $0x38] sm:$0xff]  ;;  %v452_v18 = vld [vmem:[%s10597_s28 + $0x40] sm:$0xff]  ;;  %8413 = vmatpush3.bf16.msra.mxu1 %v8657_v15  ;;  %p10284_p6 = scmp.ne.s32.totalorder %s17387_s23, %s10283_s21  ;;  %s10378_s26 = smov [#allocation16]  }
  0x9a   : > { %8378 = vmatprep.mubr.msk.bf16.mxu0 %vm527_vm1, %v476_v6  ;;  %v453_v19 = vld [vmem:[%s10597_s28 + $0x48] sm:$0xff]  ;;  %v479_v22 = vpack.c.bf16 %v451_v17, %v450_v16  ;;  %8414 = vmatprep.subr.bf16.mxu1 %v8658_v20  ;;  %v454_v24 = vld [vmem:[%s10597_s28 + $0x50] sm:$0xff]  ;;  %v455_v25 = vld [vmem:[%s10597_s28 + $0x58] sm:$0xff]  ;;  %s10287_s29 = sshll.u32 %s10378_s26, 4  ;;  %s10288_s29 = int_to_ptr.vmem [resolvable:$false] %s10287_s29 }
  0x9b   : > { %8375 = vmatpush3.bf16.msra.mxu0 %v8654_v4  ;;  %v480_v23 = vpack.c.bf16 %v453_v19, %v452_v18  ;;  %v456_v27 = vld [vmem:[%s10597_s28 + $0x60] sm:$0xff]  ;;  %v457_v28 = vld [vmem:[%s10597_s28 + $0x68] sm:$0xff]  ;;  %v481_v29 = vpack.c.bf16 %v455_v25, %v454_v24  ;;  %v458_v31 = vld [vmem:[%s10597_s28 + $0x70] sm:$0xff]  ;;  %p10285_p4 = pnand %p10284_p6, %p18195_p10  ;;  %s10289_s14 = scalar_lea.vmem %s10288_s29, 81920 }
  0x9c   : > { %8376 = vmatprep.subr.bf16.mxu0 %v8655_v7  ;;  %v482_v30 = vpack.c.bf16 %v457_v28, %v456_v27  ;;  %v459_v32 = vld [vmem:[%s10597_s28 + $0x78] sm:$0xff]  ;;  %v460_v33 = vld [vmem:[%s10597_s28 + $0x80] sm:$0xff]  ;;  %v461_v34 = vld [vmem:[%s10597_s28 + $0x88] sm:$0xff]  ;;  %p10290_p13 = scmp.lt.s32.totalorder %s17387_s23, %s10288_s29  ;;  %p10291_p8 = scmp.lt.s32.totalorder %s10289_s14, %s10283_s21 }
  0x9d   : > { %8415 = vmatpush3.bf16.msra.mxu1 %v8658_v20  ;;  %v483_v35 = vpack.c.bf16 %v459_v32, %v458_v31  ;;  %v484_v36 = vpack.c.bf16 %v461_v34, %v460_v33  ;;  %v462_v37 = vld [vmem:[%s10597_s28 + $0x90] sm:$0xff]  ;;  %v463_v38 = vld [vmem:[%s10597_s28 + $0x98] sm:$0xff]  ;;  %v464_v39 = vld [vmem:[%s10597_s28 + $0xa0] sm:$0xff]  ;;  %p10286_p7 = pneg %p10285_p4 }
  0x9e   : > { %8416 = vmatprep.subr.bf16.mxu1 %v8659_v21  ;;  %v465_v40 = vld [vmem:[%s10597_s28 + $0xa8] sm:$0xff]  ;;  %v485_v41 = vpack.c.bf16 %v463_v38, %v462_v37  ;;  %v466_v43 = vld [vmem:[%s10597_s28 + $0xb0] sm:$0xff]  ;;  %v467_v44 = vld [vmem:[%s10597_s28 + $0xb8] sm:$0xff]  ;;  %p10292_p11 = por %p10291_p8, %p10290_p13 }
  0x9f   : > { %8377 = vmatpush3.bf16.msra.mxu0 %v8655_v7  ;;  %v486_v42 = vpack.c.bf16 %v465_v40, %v464_v39  ;;  %v468_v45 = vld [vmem:[%s10597_s28 + $0xc0] sm:$0xff]  ;;  %v469_v46 = vld [vmem:[%s10597_s28 + $0xc8] sm:$0xff]  ;;  %v487_v47 = vpack.c.bf16 %v467_v44, %v466_v43  ;;  %v470_v49 = vld [vmem:[%s10597_s28 + $0xd0] sm:$0xff] }
  0xa0   : > { %v488_v48 = vpack.c.bf16 %v469_v46, %v468_v45  ;;  %v471_v50 = vld [vmem:[%s10597_s28 + $0xd8] sm:$0xff]  ;;  %v472_v51 = vld [vmem:[%s10597_s28 + $0xe0] sm:$0xff]  ;;  %v473_v52 = vld [vmem:[%s10597_s28 + $0xe8] sm:$0xff]  ;;  %8458 = vmatprep.subr.bf16.mxu0 %v8664_v61  ;;  %p10293_p0 = pnand %p10292_p11, %p10286_p7 }
  0xa1   : > { %8417 = vmatpush3.bf16.msra.mxu1 %v8659_v21  ;;  %v489_v53 = vpack.c.bf16 %v471_v50, %v470_v49  ;;  %v490_v54 = vpack.c.bf16 %v473_v52, %v472_v51  ;;  %v474_v55 = vld [vmem:[%s10597_s28 + $0xf0] sm:$0xff]  ;;  %v475_v56 = vld [vmem:[%s10597_s28 + $0xf8] sm:$0xff]  ;;  %v8667_v0 = vld [vmem:[#allocation10 + $0x20] sm:$0xff]  }
  0xa2   : > { %8379 = vmatmul.mubr.msk.bf16.vlgmr.msra.gmra.mxu0 %vm527_vm1, %v477_v12  ;;  %8418 = vmatprep.subr.bf16.mxu1 %v8660_v26  ;;  %v491_v57 = vpack.c.bf16 %v475_v56, %v474_v55  ;;  %v8668_v1 = vld [vmem:[#allocation10 + $0x18] sm:$0xff]   ;;  %v8669_v2 = vld [vmem:[#allocation10 + $0x10] sm:$0xff]   ;;  %v8670_v3 = vld [vmem:[#allocation10 + $0x8] sm:$0xff]  }
  0xa3   : > { %8382 = vmatprep.mubr.msk.bf16.mxu0 %vm527_vm1, %v478_v13  ;;  %8459 = vmatpush3.bf16.msra.mxu0 %v8664_v61  ;;  %v10647_v6 = vld [vmem:[#allocation5] ss:$0 sm:$0xff] }
  0xa4   : > { %8460 = vmatprep.subr.bf16.mxu0 %v8665_v62 }
  0xa5   : > { %8419 = vmatpush3.bf16.msra.mxu1 %v8660_v26 }
  0xa6   : > { %8420 = vmatprep.subr.bf16.mxu1 %v8661_v58 }
  0xa7   : > { %8461 = vmatpush3.bf16.msra.mxu0 %v8665_v62 }
  0xa8   : > { %8462 = vmatprep.subr.bf16.mxu0 %v8666_v63 }
  0xa9   : > { %8421 = vmatpush3.bf16.msra.mxu1 %v8661_v58 }
  0xaa   : > { %8383 = vmatmul.mubr.msk.bf16.gmra.mxu0 %vm527_vm1, %v479_v22  ;;  %8422 = vmatprep.subr.bf16.mxu1 %v8662_v59 }
  0xab   : > { %8386 = vmatprep.mubr.msk.bf16.mxu0 %vm527_vm1, %v480_v23  ;;  %8463 = vmatpush3.bf16.msra.mxu0 %v8666_v63 }
  0xac   : > { %8464 = vmatprep.subr.bf16.mxu0 %v8667_v0 }
  0xad   : > { %8423 = vmatpush3.bf16.msra.mxu1 %v8662_v59 }
  0xae   : > { %8424 = vmatprep.subr.bf16.mxu1 %v8663_v60 }
  0xaf   : > { %8465 = vmatpush3.bf16.msra.mxu0 %v8667_v0 }
  0xb0   : > { %8466 = vmatprep.subr.bf16.mxu0 %v8668_v1 }
  0xb1   : > { %8425 = vmatpush3.bf16.msra.mxu1 %v8663_v60 }
  0xb2   : > { %8387 = vmatmul.mubr.msk.bf16.gmra.mxu0 %vm527_vm1, %v481_v29 }
  0xb3   : > { %8390 = vmatprep.mubr.msk.bf16.mxu0 %vm527_vm1, %v482_v30  ;;  %8467 = vmatpush3.bf16.msra.mxu0 %v8668_v1 }
  0xb4   : > { %8468 = vmatprep.subr.bf16.mxu0 %v8669_v2 }
  0xb7   : > { %8469 = vmatpush3.bf16.msra.mxu0 %v8669_v2 }
  0xb8   : > { %8470 = vmatprep.subr.bf16.mxu0 %v8670_v3 }
  0xba   : > { %8391 = vmatmul.mubr.msk.bf16.gmra.mxu0 %vm527_vm1, %v483_v35 }
  0xbb   : > { %8394 = vmatprep.mubr.msk.bf16.mxu0 %vm527_vm1, %v484_v36  ;;  %8471 = vmatpush3.bf16.msra.mxu0 %v8670_v3 }
  0xc2   : > { %8395 = vmatmul.mubr.msk.bf16.gmra.mxu0 %vm527_vm1, %v485_v41 }
  0xc3   : > { %8398 = vmatprep.mubr.msk.bf16.mxu0 %vm527_vm1, %v486_v42 }
  0xca   : > { %8399 = vmatmul.mubr.msk.bf16.gmra.mxu0 %vm527_vm1, %v487_v47 }
  0xcb   : > { %8402 = vmatprep.mubr.msk.bf16.mxu0 %vm527_vm1, %v488_v48 }
  0xd2   : > { %8403 = vmatmul.mubr.msk.bf16.gmra.mxu0 %vm527_vm1, %v489_v53 }
  0xd3   : > { %8406 = vmatprep.mubr.msk.bf16.mxu0 %vm527_vm1, %v490_v54 }
  0xda   : > { %8407 = vmatmul.mubr.msk.bf16.gmra.mxu0 %vm527_vm1, %v491_v57 }
 0x162   : > { %v8380_v4 = vpop.f32.mrf.mxu0 }
 0x163   : > { %v10656_v10 = vadd.f32 %v8380_v4, %v10647_v6 }
 0x164   : > { %v614_v5 = vpop.f32.mrf.mxu0 }
 0x165   : > { %v10650_v8 = vadd.f32 %v10647_v6, %v614_v5  ;;  %v743_v17 = vmax.f32 %v10656_v10, 0.0 }
 0x166   : > { %v8381_v7 = vpop.f32.mrf.mxu0 }
 0x167   : > { %v10653_v9 = vadd.f32 %v8381_v7, %v10647_v6  ;;  %v741_v15 = vmax.f32 %v10650_v8, 0.0 }
 0x168   : > { %v617_v11 = vpop.f32.mrf.mxu0 }
 0x169   : > { %v10659_v12 = vadd.f32 %v10647_v6, %v617_v11  ;;  %v744_v13 = vmax.f32 %v10653_v9, 0.0 }
 0x16a   : > { %v8384_v14 = vpop.f32.mrf.mxu0 }
 0x16b   : > { %v742_v16 = vmax.f32 %v10659_v12, 0.0  ;;  %v774_v20 = vpack.c.bf16 %v744_v13, %v743_v17  ;;  %v10680_v24 = vadd.f32 %v8384_v14, %v10647_v6 }
 0x16c   : > { %v630_v18 = vpop.f32.mrf.mxu0 }
 0x16d   : > { %v773_v19 = vpack.c.bf16 %v742_v16, %v741_v15  ;;  %v10674_v22 = vadd.f32 %v10647_v6, %v630_v18  ;;  %v17467_v31 = vmax.f32 %v10680_v24, 0.0 }
 0x16e   : > { %v8385_v21 = vpop.f32.mrf.mxu0 }
 0x16f   : > { %v10677_v23 = vadd.f32 %v8385_v21, %v10647_v6  ;;  %8426 = vmatprep.mubr.bf16.mxu1 %v773_v19  ;;  %v17470_v29 = vmax.f32 %v10674_v22, 0.0 }
 0x170   : > { %v633_v25 = vpop.f32.mrf.mxu0  ;;  %8427 = vmatmul.mubr.bf16.vlgmr.msra.gmra.mxu1 %v774_v20 }
 0x171   : > { %v10683_v26 = vadd.f32 %v10647_v6, %v633_v25  ;;  %v17468_v27 = vmax.f32 %v10677_v23, 0.0 }
 0x172   : > { %v8388_v28 = vpop.f32.mrf.mxu0 }
 0x173   : > { %v17472_v30 = vmax.f32 %v10683_v26, 0.0  ;;  %v776_v34 = vpack.c.bf16 %v17468_v27, %v17467_v31  ;;  %v10704_v38 = vadd.f32 %v8388_v28, %v10647_v6 }
 0x174   : > { %v646_v32 = vpop.f32.mrf.mxu0 }
 0x175   : > { %v775_v33 = vpack.c.bf16 %v17472_v30, %v17470_v29  ;;  %v10698_v36 = vadd.f32 %v10647_v6, %v646_v32  ;;  %v17471_v45 = vmax.f32 %v10704_v38, 0.0 }
 0x176   : > { %v8389_v35 = vpop.f32.mrf.mxu0 }
 0x177   : > { %v10701_v37 = vadd.f32 %v8389_v35, %v10647_v6  ;;  %8430 = vmatprep.mubr.bf16.mxu1 %v775_v33  ;;  %v17462_v43 = vmax.f32 %v10698_v36, 0.0 }
 0x178   : > { %v649_v39 = vpop.f32.mrf.mxu0  ;;  %8431 = vmatmul.mubr.bf16.gmra.mxu1 %v776_v34 }
 0x179   : > { %v10707_v40 = vadd.f32 %v10647_v6, %v649_v39  ;;  %v17469_v41 = vmax.f32 %v10701_v37, 0.0 }
 0x17a   : > { %v8392_v42 = vpop.f32.mrf.mxu0 }
 0x17b   : > { %v17464_v44 = vmax.f32 %v10707_v40, 0.0  ;;  %v778_v48 = vpack.c.bf16 %v17469_v41, %v17471_v45  ;;  %v10728_v52 = vadd.f32 %v8392_v42, %v10647_v6 }
 0x17c   : > { %v662_v46 = vpop.f32.mrf.mxu0 }
 0x17d   : > { %v777_v47 = vpack.c.bf16 %v17464_v44, %v17462_v43  ;;  %v10722_v50 = vadd.f32 %v10647_v6, %v662_v46  ;;  %v17461_v59 = vmax.f32 %v10728_v52, 0.0 }
 0x17e   : > { %v8393_v49 = vpop.f32.mrf.mxu0 }
 0x17f   : > { %v10725_v51 = vadd.f32 %v8393_v49, %v10647_v6  ;;  %8434 = vmatprep.mubr.bf16.mxu1 %v777_v47  ;;  %v17466_v57 = vmax.f32 %v10722_v50, 0.0 }
 0x180   : > { %v665_v53 = vpop.f32.mrf.mxu0  ;;  %8435 = vmatmul.mubr.bf16.gmra.mxu1 %v778_v48 }
 0x181   : > { %v10731_v54 = vadd.f32 %v10647_v6, %v665_v53  ;;  %v17463_v55 = vmax.f32 %v10725_v51, 0.0 }
 0x182   : > { %v8396_v56 = vpop.f32.mrf.mxu0 }
 0x183   : > { %v17465_v58 = vmax.f32 %v10731_v54, 0.0  ;;  %v10738_v60 = vadd.f32 %v8396_v56, %v10647_v6  ;;  %v780_v0 = vpack.c.bf16 %v17463_v55, %v17461_v59 }
 0x184   : > { %v678_v61 = vpop.f32.mrf.mxu0 }
 0x185   : > { %v10741_v62 = vadd.f32 %v10647_v6, %v678_v61  ;;  %v779_v63 = vpack.c.bf16 %v17465_v58, %v17466_v57  ;;  %v17457_v3 = vmax.f32 %v10738_v60, 0.0 }
 0x186   : > { %v8397_v1 = vpop.f32.mrf.mxu0 }
 0x187   : > { %v10752_v2 = vadd.f32 %v8397_v1, %v10647_v6  ;;  %8438 = vmatprep.mubr.bf16.mxu1 %v779_v63  ;;  %v17459_v5 = vmax.f32 %v10741_v62, 0.0 }
 0x188   : > { %v681_v4 = vpop.f32.mrf.mxu0  ;;  %8439 = vmatmul.mubr.bf16.gmra.mxu1 %v780_v0 }
 0x189   : > { %v17458_v7 = vmax.f32 %v10752_v2, 0.0  ;;  %v10758_v11 = vadd.f32 %v10647_v6, %v681_v4 }
 0x18a   : > { %v8400_v14 = vpop.f32.mrf.mxu0 }
 0x18b   : > { %v17460_v18 = vmax.f32 %v10758_v11, 0.0  ;;  %v782_v19 = vpack.c.bf16 %v17458_v7, %v17457_v3  ;;  %v10766_v20 = vadd.f32 %v8400_v14, %v10647_v6 }
 0x18c   : > { %v694_v21 = vpop.f32.mrf.mxu0 }
 0x18d   : > { %v10769_v25 = vadd.f32 %v10647_v6, %v694_v21  ;;  %v781_v28 = vpack.c.bf16 %v17460_v18, %v17459_v5  ;;  %v17445_v34 = vmax.f32 %v10766_v20, 0.0 }
 0x18e   : > { %v8401_v32 = vpop.f32.mrf.mxu0 }
 0x18f   : > { %v10776_v33 = vadd.f32 %v8401_v32, %v10647_v6  ;;  %8442 = vmatprep.mubr.bf16.mxu1 %v781_v28  ;;  %v17449_v39 = vmax.f32 %v10769_v25, 0.0 }
 0x190   : > { %v697_v35 = vpop.f32.mrf.mxu0  ;;  %8443 = vmatmul.mubr.bf16.gmra.mxu1 %v782_v19 }
 0x191   : > { %v17446_v42 = vmax.f32 %v10776_v33, 0.0  ;;  %v10782_v46 = vadd.f32 %v10647_v6, %v697_v35 }
 0x192   : > { %v8404_v47 = vpop.f32.mrf.mxu0 }
 0x193   : > { %v17452_v48 = vmax.f32 %v10782_v46, 0.0  ;;  %v784_v49 = vpack.c.bf16 %v17446_v42, %v17445_v34  ;;  %v10790_v53 = vadd.f32 %v8404_v47, %v10647_v6 }
 0x194   : > { %v710_v56 = vpop.f32.mrf.mxu0 }
 0x195   : > { %v10793_v61 = vadd.f32 %v10647_v6, %v710_v56  ;;  %v783_v63 = vpack.c.bf16 %v17452_v48, %v17449_v39  ;;  %v17447_v4 = vmax.f32 %v10790_v53, 0.0  ;;  %v8680_v48 = vld [vmem:[#allocation13 + $0x194] ss:$40 sps:$4 sm:$0xff]  }
 0x196   : > { %v8405_v0 = vpop.f32.mrf.mxu0 }
 0x197   : > { %v10800_v1 = vadd.f32 %v8405_v0, %v10647_v6  ;;  %8446 = vmatprep.mubr.bf16.mxu1 %v783_v63  ;;  %v17450_v19 = vmax.f32 %v10793_v61, 0.0 }
 0x198   : > { %v713_v14 = vpop.f32.mrf.mxu0  ;;  %8447 = vmatmul.mubr.bf16.gmra.mxu1 %v784_v49 }
 0x199   : > { %v17448_v21 = vmax.f32 %v10800_v1, 0.0  ;;  %v10806_v28 = vadd.f32 %v10647_v6, %v713_v14 }
 0x19a   : > { %v8408_v32 = vpop.f32.mrf.mxu0 }
 0x19b   : > { %v17451_v35 = vmax.f32 %v10806_v28, 0.0  ;;  %v786_v47 = vpack.c.bf16 %v17448_v21, %v17447_v4  ;;  %v10814_v56 = vadd.f32 %v8408_v32, %v10647_v6 }
 0x19c   : > { %v726_v63 = vpop.f32.mrf.mxu0 }
 0x19d   : > { %v10817_v49 = vadd.f32 %v10647_v6, %v726_v63  ;;  %v785_v0 = vpack.c.bf16 %v17451_v35, %v17450_v19  ;;  %v17453_v42 = vmax.f32 %v10814_v56, 0.0  ;;  %v8674_v19 = vld [vmem:[#allocation13 + $0x234] ss:$40 sps:$4 sm:$0xff]   ;;  %v8675_v35 = vld [vmem:[#allocation13 + $0x1e0] ss:$40 sps:$4 sm:$0xff]  }
 0x19e   : > { %v8409_v14 = vpop.f32.mrf.mxu0  ;;  %8506 = vmatprep.subr.bf16.mxu1 %v8674_v19 }
 0x19f   : > { %v10824_v34 = vadd.f32 %v8409_v14, %v10647_v6  ;;  %8450 = vmatprep.mubr.bf16.mxu1 %v785_v0  ;;  %v17455_v32 = vmax.f32 %v10817_v49, 0.0 }
 0x1a0   : > { %v729_v4 = vpop.f32.mrf.mxu0  ;;  %8451 = vmatmul.mubr.bf16.gmra.mxu1 %v786_v47  ;;  %v8671_v47 = vld [vmem:[#allocation10] sm:$0xff]  }
 0x1a1   : > { %v17454_v21 = vmax.f32 %v10824_v34, 0.0  ;;  %v10830_v63 = vadd.f32 %v10647_v6, %v729_v4  ;;  %8472 = vmatprep.subr.bf16.mxu0 %v8671_v47  ;;  %v8672_v6 = vld [vmem:[#allocation13 + $0x230] ss:$40 sps:$4 sm:$0xff]   ;;  %v8677_v4 = vld [vmem:[#allocation13 + $0x1e4] ss:$40 sps:$4 sm:$0xff]  }
 0x1a2   : > { %8473 = vmatpush3.bf16.msra.mxu0 %v8671_v47  ;;  %8514 = vmatpush1.bf16.msra.mxu1 %v8672_v6  ;;  %v10841_v47 = vld [vmem:[#allocation13 + $0xf0] ss:$40 sps:$4 sm:$0xff]  }
 0x1a3   : > { %v17456_v39 = vmax.f32 %v10830_v63, 0.0  ;;  %v788_v14 = vpack.c.bf16 %v17454_v21, %v17453_v42  ;;  %1915 = vmatprep.subr.bf16.mxu0 %v8674_v19  ;;  %8507 = vmatprep.subr.bf16.mxu1 %v8677_v4  ;;  %v8678_v42 = vld [vmem:[#allocation13 + $0x190] ss:$40 sps:$4 sm:$0xff]   ;;  %v8683_v21 = vld [vmem:[#allocation13 + $0x144] ss:$40 sps:$4 sm:$0xff]  }
 0x1a5   : > { %v787_v0 = vpack.c.bf16 %v17456_v39, %v17455_v32  ;;  %v10844_v39 = vld [vmem:[#allocation8] ss:$0 sm:$0xff] }
 0x1a6   : > { %8515 = vmatpush1.bf16.msra.mxu1 %v8675_v35 }
 0x1a7   : > { %8454 = vmatprep.mubr.bf16.mxu1 %v787_v0  ;;  %8508 = vmatprep.subr.bf16.mxu1 %v8680_v48  ;;  %v8681_v0 = vld [vmem:[#allocation13 + $0x140] ss:$40 sps:$4 sm:$0xff]  }
 0x1a8   : > { %8455 = vmatmul.mubr.bf16.gmra.mxu1 %v788_v14  ;;  %v8686_v14 = vld [vmem:[#allocation13 + $0xf4] ss:$40 sps:$4 sm:$0xff]  }
 0x1aa   : > { %8516 = vmatpush1.bf16.msra.mxu1 %v8678_v42 }
 0x1ab   : > { %8509 = vmatprep.subr.bf16.mxu1 %v8683_v21 }
 0x1ae   : > { %8517 = vmatpush1.bf16.msra.mxu1 %v8681_v0 }
 0x1af   : > { %8510 = vmatprep.subr.bf16.mxu1 %v8686_v14 }
 0x1b2   : > { %8518 = vmatpush1.bf16.msra.mxu1 %v10841_v47 }
 0x230   : > { %v8428_v32 = vpop.f32.mrf.mxu1 }
 0x231   : > { %v903_v18 = vadd.f32 %v8428_v32, %v10844_v39 }
 0x232   : > { %v894_v19 = vpop.f32.mrf.mxu1 }
 0x233   : > { %v895_v7 = vadd.f32 %v10844_v39, %v894_v19  ;;  %v1023_v31 = vmax.f32 %v903_v18, 0.0 }
 0x234   : > { %v8429_v3 = vpop.f32.mrf.mxu1 }
 0x235   : > { %v906_v5 = vadd.f32 %v8429_v3, %v10844_v39  ;;  %v1021_v58 = vmax.f32 %v895_v7, 0.0 }
 0x236   : > { %v897_v59 = vpop.f32.mrf.mxu1 }
 0x237   : > { %v898_v43 = vadd.f32 %v10844_v39, %v897_v59  ;;  %v1024_v55 = vmax.f32 %v906_v5, 0.0 }
 0x238   : > { %v8432_v44 = vpop.f32.mrf.mxu1 }
 0x239   : > { %v1022_v57 = vmax.f32 %v898_v43, 0.0  ;;  %v1054_v29 = vpack.c.bf16 %v1024_v55, %v1023_v31  ;;  %v919_v3 = vadd.f32 %v8432_v44, %v10844_v39 }
 0x23a   : > { %v910_v27 = vpop.f32.mrf.mxu1 }
 0x23b   : > { %v1053_v41 = vpack.c.bf16 %v1022_v57, %v1021_v58  ;;  %v911_v30 = vadd.f32 %v10844_v39, %v910_v27  ;;  %v1027_v57 = vmax.f32 %v919_v3, 0.0 }
 0x23c   : > { %v8433_v45 = vpop.f32.mrf.mxu1 }
 0x23d   : > { %v922_v19 = vadd.f32 %v8433_v45, %v10844_v39  ;;  %8474 = vmatprep.mubr.bf16.mxu0 %v1053_v41  ;;  %v1025_v43 = vmax.f32 %v911_v30, 0.0 }
 0x23e   : > { %v913_v32 = vpop.f32.mrf.mxu1  ;;  %8475 = vmatmul.mubr.bf16.vlgmr.msra.gmra.mxu0 %v1054_v29 }
 0x23f   : > { %v914_v59 = vadd.f32 %v10844_v39, %v913_v32  ;;  %1916 = vmatpush1.bf16.msra.mxu0 %v8672_v6  ;;  %v1028_v5 = vmax.f32 %v922_v19, 0.0 }
 0x240   : > { %v8436_v7 = vpop.f32.mrf.mxu1  ;;  %1917 = vmatprep.subr.bf16.mxu0 %v8677_v4 }
 0x241   : > { %v1026_v18 = vmax.f32 %v914_v59, 0.0  ;;  %v1056_v27 = vpack.c.bf16 %v1028_v5, %v1027_v57  ;;  %v935_v29 = vadd.f32 %v8436_v7, %v10844_v39 }
 0x242   : > { %v926_v31 = vpop.f32.mrf.mxu1 }
 0x243   : > { %v1055_v55 = vpack.c.bf16 %v1026_v18, %v1025_v43  ;;  %1918 = vmatpush1.bf16.msra.mxu0 %v8675_v35  ;;  %v927_v41 = vadd.f32 %v10844_v39, %v926_v31  ;;  %v1031_v3 = vmax.f32 %v935_v29, 0.0 }
 0x244   : > { %v8437_v58 = vpop.f32.mrf.mxu1  ;;  %1919 = vmatprep.subr.bf16.mxu0 %v8680_v48 }
 0x245   : > { %v938_v44 = vadd.f32 %v8437_v58, %v10844_v39  ;;  %8478 = vmatprep.mubr.bf16.mxu0 %v1055_v55  ;;  %v1029_v19 = vmax.f32 %v927_v41, 0.0 }
 0x246   : > { %v929_v45 = vpop.f32.mrf.mxu1  ;;  %8479 = vmatmul.mubr.bf16.gmra.mxu0 %v1056_v27 }
 0x247   : > { %v930_v6 = vadd.f32 %v10844_v39, %v929_v45  ;;  %1920 = vmatpush1.bf16.msra.mxu0 %v8678_v42  ;;  %v1032_v30 = vmax.f32 %v938_v44, 0.0 }
 0x248   : > { %v8440_v4 = vpop.f32.mrf.mxu1  ;;  %1921 = vmatprep.subr.bf16.mxu0 %v8683_v21 }
 0x249   : > { %v1030_v35 = vmax.f32 %v930_v6, 0.0  ;;  %v1058_v59 = vpack.c.bf16 %v1032_v30, %v1031_v3  ;;  %v951_v18 = vadd.f32 %v8440_v4, %v10844_v39 }
 0x24a   : > { %v942_v32 = vpop.f32.mrf.mxu1 }
 0x24b   : > { %v1057_v48 = vpack.c.bf16 %v1030_v35, %v1029_v19  ;;  %1922 = vmatpush1.bf16.msra.mxu0 %v8681_v0  ;;  %v943_v43 = vadd.f32 %v10844_v39, %v942_v32  ;;  %v1035_v27 = vmax.f32 %v951_v18, 0.0 }
 0x24c   : > { %v8441_v5 = vpop.f32.mrf.mxu1  ;;  %1923 = vmatprep.subr.bf16.mxu0 %v8686_v14 }
 0x24d   : > { %v954_v7 = vadd.f32 %v8441_v5, %v10844_v39  ;;  %8482 = vmatprep.mubr.bf16.mxu0 %v1057_v48  ;;  %v1033_v55 = vmax.f32 %v943_v43, 0.0 }
 0x24e   : > { %v945_v42 = vpop.f32.mrf.mxu1  ;;  %8483 = vmatmul.mubr.bf16.gmra.mxu0 %v1058_v59 }
 0x24f   : > { %v946_v21 = vadd.f32 %v10844_v39, %v945_v42  ;;  %1924 = vmatpush1.bf16.msra.mxu0 %v10841_v47  ;;  %v1036_v57 = vmax.f32 %v954_v7, 0.0 }
 0x250   : > { %v8444_v31 = vpop.f32.mrf.mxu1 }
 0x251   : > { %v1034_v0 = vmax.f32 %v946_v21, 0.0  ;;  %v1060_v41 = vpack.c.bf16 %v1036_v57, %v1035_v27  ;;  %v967_v6 = vadd.f32 %v8444_v31, %v10844_v39 }
 0x252   : > { %v958_v58 = vpop.f32.mrf.mxu1 }
 0x253   : > { %v1059_v14 = vpack.c.bf16 %v1034_v0, %v1033_v55  ;;  %v959_v29 = vadd.f32 %v10844_v39, %v958_v58  ;;  %v1039_v32 = vmax.f32 %v967_v6, 0.0 }
 0x254   : > { %v8445_v44 = vpop.f32.mrf.mxu1 }
 0x255   : > { %v970_v45 = vadd.f32 %v8445_v44, %v10844_v39  ;;  %8486 = vmatprep.mubr.bf16.mxu0 %v1059_v14  ;;  %v1037_v35 = vmax.f32 %v959_v29, 0.0 }
 0x256   : > { %v961_v30 = vpop.f32.mrf.mxu1  ;;  %8487 = vmatmul.mubr.bf16.gmra.mxu0 %v1060_v41 }
 0x257   : > { %v962_v47 = vadd.f32 %v10844_v39, %v961_v30  ;;  %v1040_v4 = vmax.f32 %v970_v45, 0.0 }
 0x258   : > { %v8448_v19 = vpop.f32.mrf.mxu1 }
 0x259   : > { %v1038_v3 = vmax.f32 %v962_v47, 0.0  ;;  %v983_v48 = vadd.f32 %v8448_v19, %v10844_v39  ;;  %v1062_v7 = vpack.c.bf16 %v1040_v4, %v1039_v32 }
 0x25a   : > { %v974_v59 = vpop.f32.mrf.mxu1 }
 0x25b   : > { %v975_v5 = vadd.f32 %v10844_v39, %v974_v59  ;;  %v1061_v43 = vpack.c.bf16 %v1038_v3, %v1037_v35  ;;  %v1043_v21 = vmax.f32 %v983_v48, 0.0 }
 0x25c   : > { %v8449_v18 = vpop.f32.mrf.mxu1 }
 0x25d   : > { %v986_v42 = vadd.f32 %v8449_v18, %v10844_v39  ;;  %8490 = vmatprep.mubr.bf16.mxu0 %v1061_v43  ;;  %v1041_v31 = vmax.f32 %v975_v5, 0.0 }
 0x25e   : > { %v977_v57 = vpop.f32.mrf.mxu1  ;;  %8491 = vmatmul.mubr.bf16.gmra.mxu0 %v1062_v7 }
 0x25f   : > { %v1044_v55 = vmax.f32 %v986_v42, 0.0  ;;  %v978_v0 = vadd.f32 %v10844_v39, %v977_v57 }
 0x260   : > { %v8452_v27 = vpop.f32.mrf.mxu1 }
 0x261   : > { %v1042_v58 = vmax.f32 %v978_v0, 0.0  ;;  %v1064_v14 = vpack.c.bf16 %v1044_v55, %v1043_v21  ;;  %v999_v41 = vadd.f32 %v8452_v27, %v10844_v39 }
 0x262   : > { %v990_v44 = vpop.f32.mrf.mxu1 }
 0x263   : > { %v991_v29 = vadd.f32 %v10844_v39, %v990_v44  ;;  %v1063_v45 = vpack.c.bf16 %v1042_v58, %v1041_v31  ;;  %v1047_v47 = vmax.f32 %v999_v41, 0.0  ;;  %v8689_v44 = vld [vmem:[#allocation13 + $0xa4] ss:$40 sps:$4 sm:$0xff]  }
 0x264   : > { %v8453_v6 = vpop.f32.mrf.mxu1  ;;  %1925 = vmatprep.subr.bf16.mxu0 %v8689_v44  ;;  %8511 = vmatprep.subr.bf16.mxu1 %v8689_v44 }
 0x265   : > { %v1002_v30 = vadd.f32 %v8453_v6, %v10844_v39  ;;  %8494 = vmatprep.mubr.bf16.mxu0 %v1063_v45  ;;  %v1045_v19 = vmax.f32 %v991_v29, 0.0  ;;  %v8687_v29 = vld [vmem:[#allocation13 + $0xa0] ss:$40 sps:$4 sm:$0xff]   ;;  %v8692_v45 = vld [vmem:[#allocation13 + $0x54] ss:$40 sps:$4 sm:$0xff]  }
 0x266   : > { %v993_v4 = vpop.f32.mrf.mxu1  ;;  %8495 = vmatmul.mubr.bf16.gmra.mxu0 %v1064_v14  ;;  %8519 = vmatpush1.bf16.msra.mxu1 %v8687_v29  ;;  %v8690_v6 = vld [vmem:[#allocation13 + $0x50] ss:$40 sps:$4 sm:$0xff]  }
 0x267   : > { %v1048_v35 = vmax.f32 %v1002_v30, 0.0  ;;  %v994_v3 = vadd.f32 %v10844_v39, %v993_v4  ;;  %1926 = vmatpush1.bf16.msra.mxu0 %v8687_v29  ;;  %8512 = vmatprep.subr.bf16.mxu1 %v8692_v45  ;;  %v8695_v30 = vld [vmem:[#allocation13 + $0x4] ss:$40 sps:$4 sm:$0xff]  }
 0x268   : > { %v8456_v32 = vpop.f32.mrf.mxu1  ;;  %1927 = vmatprep.subr.bf16.mxu0 %v8692_v45  ;;  %v8698_v4 = vld [vmem:[#allocation13 + $0x23c] ss:$40 sps:$4 sm:$0xff]  }
 0x269   : > { %v1046_v48 = vmax.f32 %v994_v3, 0.0  ;;  %v1066_v59 = vpack.c.bf16 %v1048_v35, %v1047_v47  ;;  %v1015_v5 = vadd.f32 %v8456_v32, %v10844_v39  ;;  %v8693_v47 = vld [vmem:[#allocation13] ss:$40 sps:$4 sm:$0xff]   ;;  %v10881_v3 = vld [vmem:[#allocation11] ss:$0 sm:$0xff] }
 0x26a   : > { %v1006_v43 = vpop.f32.mrf.mxu1  ;;  %8520 = vmatpush1.bf16.msra.mxu1 %v8690_v6 }
 0x26b   : > { %v1007_v7 = vadd.f32 %v10844_v39, %v1006_v43  ;;  %v1065_v18 = vpack.c.bf16 %v1046_v48, %v1045_v19  ;;  %v1051_v57 = vmax.f32 %v1015_v5, 0.0  ;;  %1928 = vmatpush1.bf16.msra.mxu0 %v8690_v6  ;;  %8513 = vmatprep.subr.bf16.mxu1 %v8695_v30  ;;  %v8704_v19 = vld [vmem:[#allocation13 + $0x244] ss:$40 sps:$4 sm:$0xff]  }
 0x26c   : > { %v8457_v42 = vpop.f32.mrf.mxu1  ;;  %1929 = vmatprep.subr.bf16.mxu0 %v8695_v30 }
 0x26d   : > { %v1018_v21 = vadd.f32 %v8457_v42, %v10844_v39  ;;  %8498 = vmatprep.mubr.bf16.mxu0 %v1065_v18  ;;  %v1049_v55 = vmax.f32 %v1007_v7, 0.0 }
 0x26e   : > { %v1009_v31 = vpop.f32.mrf.mxu1  ;;  %8499 = vmatmul.mubr.bf16.gmra.mxu0 %v1066_v59  ;;  %8521 = vmatpush1.bf16.msra.mxu1 %v8693_v47 }
 0x26f   : > { %v1052_v0 = vmax.f32 %v1018_v21, 0.0  ;;  %v1010_v27 = vadd.f32 %v10844_v39, %v1009_v31  ;;  %1930 = vmatpush1.bf16.msra.mxu0 %v8693_v47  ;;  %v17475_v39 = vmov 0   ;;  %2301 = vmatprep.subr.bf16.mxu1 %v8704_v19  ;;  %v8705_v47 = vld [vmem:[#allocation13 + $0x198] ss:$40 sps:$4 sm:$0xff]   ;;  %v17516_v19 = vmax.f32 %v10683_v26, 0.0 }
 0x270   : > { %1997 = vmatprep.mubr.bf16.mxu1 %v17475_v39  ;;  %2108 = vmatprep.subr.bf16.mxu0 %v8698_v4  ;;  %v8708_v26 = vld [vmem:[#allocation13 + $0x148] ss:$40 sps:$4 sm:$0xff]  }
 0x271   : > { %v1050_v58 = vmax.f32 %v1010_v27, 0.0  ;;  %v1068_v14 = vpack.c.bf16 %v1052_v0, %v1051_v57 }
 0x273   : > { %v1067_v41 = vpack.c.bf16 %v1050_v58, %v1049_v55  ;;  %v8696_v58 = vld [vmem:[#allocation13 + $0x238] ss:$40 sps:$4 sm:$0xff]  }
 0x275   : > { %8502 = vmatprep.mubr.bf16.mxu0 %v1067_v41 }
 0x276   : > { %8503 = vmatmul.mubr.bf16.gmra.mxu0 %v1068_v14 }
 0x277   : > { %1947 = vmatprep.mubr.bf16.mxu0 %v17475_v39 }
 0x2fe   : > { %v8476_v35 = vpop.f32.mrf.mxu0 }
 0x2ff   : > { %v1183_v31 = vadd.f32 %v8476_v35, %v10881_v3 }
 0x300   : > { %v1174_v32 = vpop.f32.mrf.mxu0 }
 0x301   : > { %v1175_v48 = vadd.f32 %v10881_v3, %v1174_v32  ;;  %v1303_v44 = vadd.f32 %v1183_v31, %v743_v17  ;;  %v17517_v32 = vmax.f32 %v10704_v38, 0.0 }
 0x302   : > { %v8477_v59 = vpop.f32.mrf.mxu0 }
 0x303   : > { %v1301_v43 = vadd.f32 %v1175_v48, %v741_v15  ;;  %v1186_v42 = vadd.f32 %v8477_v59, %v10881_v3  ;;  %v8701_v15 = vld [vmem:[#allocation13 + $0x1ec] ss:$40 sps:$4 sm:$0xff]   ;;  %v1335_v30 = vmax.f32 %v1303_v44, 0.0 }
 0x304   : > { %v1177_v5 = vpop.f32.mrf.mxu0 }
 0x305   : > { %v1178_v7 = vadd.f32 %v10881_v3, %v1177_v5  ;;  %v1333_v55 = vmax.f32 %v1301_v43, 0.0  ;;  %v1304_v14 = vadd.f32 %v1186_v42, %v744_v13  ;;  %v8707_v13 = vld [vmem:[#allocation13 + $0x19c] ss:$40 sps:$4 sm:$0xff]   ;;  %v8710_v5 = vld [vmem:[#allocation13 + $0x14c] ss:$40 sps:$4 sm:$0xff]  }
 0x306   : > { %v8480_v18 = vpop.f32.mrf.mxu0 }
 0x307   : > { %v1302_v21 = vadd.f32 %v1178_v7, %v742_v16  ;;  %v8699_v16 = vld [vmem:[#allocation13 + $0x1e8] ss:$40 sps:$4 sm:$0xff]   ;;  %v1336_v29 = vmax.f32 %v1304_v14, 0.0  ;;  %v17518_v7 = vmax.f32 %v10674_v22, 0.0  ;;  %v8713_v14 = vld [vmem:[#allocation13 + $0xfc] ss:$40 sps:$4 sm:$0xff]   ;;  %v1199_v22 = vadd.f32 %v8480_v18, %v10881_v3 }
 0x308   : > { %v1190_v57 = vpop.f32.mrf.mxu0  ;;  %v8719_v18 = vld [vmem:[#allocation13 + $0xac] ss:$40 sps:$4 sm:$0xff]  }
 0x309   : > { %v1334_v0 = vmax.f32 %v1302_v21, 0.0  ;;  %v1191_v10 = vadd.f32 %v10881_v3, %v1190_v57  ;;  %v10904_v4 = vpack.c.bf16 %v1336_v29, %v1335_v30  ;;  %v17519_v21 = vmax.f32 %v10701_v37, 0.0 }
 0x30a   : > { %v8481_v27 = vpop.f32.mrf.mxu0  ;;  %v17522_v30 = vmax.f32 %v10680_v24, 0.0  ;;  %v8717_v24 = vld [vmem:[#allocation13 + $0xa8] ss:$40 sps:$4 sm:$0xff]  }
 0x30b   : > { %v10893_v8 = vpack.c.bf16 %v1334_v0, %v1333_v55  ;;  %v1305_v42 = vadd.f32 %v1191_v10, %v17518_v7  ;;  %v1202_v38 = vadd.f32 %v8481_v27, %v10881_v3  ;;  %v17521_v27 = vmax.f32 %v10677_v23, 0.0 }
 0x30c   : > { %v1193_v41 = vpop.f32.mrf.mxu0  ;;  %v1307_v10 = vadd.f32 %v1199_v22, %v17522_v30 }
 0x30d   : > { %1948 = vmatmul.mubr.bf16.vlgmr.msra.gmra.mxu0 %v10893_v8  ;;  %v1194_v45 = vadd.f32 %v10881_v3, %v1193_v41  ;;  %v8702_v41 = vld [vmem:[#allocation13 + $0x240] ss:$40 sps:$4 sm:$0xff]   ;;  %v1337_v37 = vmax.f32 %v1305_v42, 0.0 }
 0x30e   : > { %v8484_v12 = vpop.f32.mrf.mxu0  ;;  %1957 = vmatprep.mubr.bf16.mxu0 %v17475_v39  ;;  %2109 = vmatpush1.bf16.msra.mxu0 %v8696_v58 }
 0x30f   : > { %v1215_v9 = vadd.f32 %v8484_v12, %v10881_v3  ;;  %2110 = vmatprep.subr.bf16.mxu0 %v8701_v15  ;;  %v1306_v35 = vadd.f32 %v1194_v45, %v17516_v19  ;;  %v8711_v45 = vld [vmem:[#allocation13 + $0xf8] ss:$40 sps:$4 sm:$0xff]   ;;  %v17523_v19 = vmax.f32 %v10722_v50, 0.0  ;;  %v17524_v50 = vmax.f32 %v10731_v54, 0.0 }
 0x310   : > { %v10901_v6 = vpop.f32.mrf.mxu0  ;;  %v17525_v54 = vmax.f32 %v10707_v40, 0.0  ;;  %v8734_v40 = vld [vmem:[#allocation13 + $0x104] ss:$40 sps:$4 sm:$0xff]  }
 0x311   : > { %v1311_v48 = vadd.f32 %v1215_v9, %v17517_v32  ;;  %v1338_v55 = vmax.f32 %v1306_v35, 0.0  ;;  %v1308_v9 = vadd.f32 %v1202_v38, %v17521_v27  ;;  %v8728_v32 = vld [vmem:[#allocation13 + $0x1a4] ss:$40 sps:$4 sm:$0xff]   ;;  %v8726_v38 = vld [vmem:[#allocation13 + $0x1a0] ss:$40 sps:$4 sm:$0xff]   ;;  %v17528_v27 = vmax.f32 %v10698_v36, 0.0 }
 0x312   : > { %v8485_v17 = vpop.f32.mrf.mxu0  ;;  %2111 = vmatpush1.bf16.msra.mxu0 %v8699_v16  ;;  %v8716_v16 = vld [vmem:[#allocation13 + $0x1f4] ss:$40 sps:$4 sm:$0xff]  }
 0x313   : > { %v1218_v59 = vadd.f32 %v8485_v17, %v10881_v3  ;;  %2112 = vmatprep.subr.bf16.mxu0 %v8707_v13  ;;  %v1343_v0 = vmax.f32 %v1311_v48, 0.0  ;;  %v10924_v13 = vpack.c.bf16 %v1338_v55, %v1337_v37  ;;  %v1207_v55 = vadd.f32 %v10881_v3, %v10901_v6  ;;  %v8731_v6 = vld [vmem:[#allocation13 + $0x154] ss:$40 sps:$4 sm:$0xff]  }
 0x314   : > { %v1209_v43 = vpop.f32.mrf.mxu0 }
 0x315   : > { %v1312_v57 = vadd.f32 %v1218_v59, %v17519_v21  ;;  %1958 = vmatmul.mubr.bf16.gmra.mxu0 %v10904_v4  ;;  %v1340_v59 = vmax.f32 %v1308_v9, 0.0  ;;  %v8722_v21 = vld [vmem:[#allocation13 + $0x5c] ss:$40 sps:$4 sm:$0xff]   ;;  %v1309_v9 = vadd.f32 %v1207_v55, %v17528_v27 }
 0x316   : > { %v8488_v31 = vpop.f32.mrf.mxu0  ;;  %1967 = vmatprep.mubr.bf16.mxu0 %v17475_v39  ;;  %2113 = vmatpush1.bf16.msra.mxu0 %v8705_v47  ;;  %v8714_v47 = vld [vmem:[#allocation13 + $0x1f0] ss:$40 sps:$4 sm:$0xff]  }
 0x317   : > { %v1344_v58 = vmax.f32 %v1312_v57, 0.0  ;;  %2114 = vmatprep.subr.bf16.mxu0 %v8710_v5  ;;  %v1210_v5 = vadd.f32 %v10881_v3, %v1209_v43  ;;  %v1339_v57 = vmax.f32 %v1307_v10, 0.0 }
 0x318   : > { %v1222_v15 = vpop.f32.mrf.mxu0 }
 0x319   : > { %v10919_v44 = vpack.c.bf16 %v1344_v58, %v1343_v0  ;;  %v1223_v12 = vadd.f32 %v10881_v3, %v1222_v15  ;;  %v1231_v0 = vadd.f32 %v8488_v31, %v10881_v3  ;;  %v10944_v22 = vpack.c.bf16 %v1340_v59, %v1339_v57  ;;  %v8725_v31 = vld [vmem:[#allocation13 + $0xc] ss:$40 sps:$4 sm:$0xff]  }
 0x31a   : > { %v8489_v29 = vpop.f32.mrf.mxu0  ;;  %2115 = vmatpush1.bf16.msra.mxu0 %v8708_v26  ;;  %v1310_v15 = vadd.f32 %v1210_v5, %v17525_v54  ;;  %v17532_v5 = vmax.f32 %v10758_v11, 0.0  ;;  %v17533_v57 = vmax.f32 %v10741_v62, 0.0  ;;  %v17534_v54 = vmax.f32 %v10752_v2, 0.0 }
 0x31b   : > { %17520 = vst [vmem:[#allocation23_spill] sm:$0xff] %v10919_v44  ;;  %1998 = vmatmul.mubr.bf16.vlgmr.msra.gmra.mxu1 %v10919_v44  ;;  %2116 = vmatprep.subr.bf16.mxu0 %v8713_v14  ;;  %v1313_v35 = vadd.f32 %v1223_v12, %v17523_v19  ;;  %v1234_v7 = vadd.f32 %v8489_v29, %v10881_v3  ;;  %v8746_v19 = vld [vmem:[#allocation13 + $0x24c] ss:$40 sps:$4 sm:$0xff]  }
 0x31c   : > { %v1225_v17 = vpop.f32.mrf.mxu0  ;;  %2302 = vmatpush1.bf16.msra.mxu1 %v8702_v41  ;;  %2007 = vmatprep.mubr.bf16.mxu1 %v17475_v39  ;;  %v17526_v41 = vmax.f32 %v10725_v51, 0.0  ;;  %v1342_v51 = vmax.f32 %v1310_v15, 0.0 }
 0x31d   : > { %v1226_v23 = vadd.f32 %v10881_v3, %v1225_v17  ;;  %1968 = vmatmul.mubr.bf16.gmra.mxu0 %v10924_v13  ;;  %2303 = vmatprep.subr.bf16.mxu1 %v8716_v16  ;;  %v1345_v58 = vmax.f32 %v1313_v35, 0.0  ;;  %v8720_v16 = vld [vmem:[#allocation13 + $0x58] ss:$40 sps:$4 sm:$0xff]   ;;  %v1341_v35 = vmax.f32 %v1309_v9, 0.0 }
 0x31e   : > { %v10934_v48 = vpop.f32.mrf.mxu0  ;;  %1977 = vmatprep.mubr.bf16.mxu0 %v17475_v39  ;;  %2117 = vmatpush1.bf16.msra.mxu0 %v8711_v45  ;;  %v1316_v37 = vadd.f32 %v1234_v7, %v17526_v41  ;;  %v8729_v45 = vld [vmem:[#allocation13 + $0x150] ss:$40 sps:$4 sm:$0xff]  }
 0x31f   : > { %v1314_v42 = vadd.f32 %v1226_v23, %v17524_v50  ;;  %2118 = vmatprep.subr.bf16.mxu0 %v8719_v18  ;;  %v17529_v18 = vmax.f32 %v10728_v52, 0.0  ;;  %v8732_v52 = vld [vmem:[#allocation13 + $0x100] ss:$40 sps:$4 sm:$0xff]   ;;  %v8737_v50 = vld [vmem:[#allocation13 + $0xb4] ss:$40 sps:$4 sm:$0xff]   ;;  %v1247_v62 = vadd.f32 %v10934_v48, %v10881_v3 }
 0x320   : > { %v1238_v26 = vpop.f32.mrf.mxu0  ;;  %2304 = vmatpush1.bf16.msra.mxu1 %v8714_v47  ;;  %v1348_v10 = vmax.f32 %v1316_v37, 0.0  ;;  %v8723_v47 = vld [vmem:[#allocation13 + $0x8] ss:$40 sps:$4 sm:$0xff]   ;;  %v8743_v37 = vld [vmem:[#allocation13 + $0x14] ss:$40 sps:$4 sm:$0xff]  }
 0x321   : > { %v1346_v14 = vmax.f32 %v1314_v42, 0.0  ;;  %2305 = vmatprep.subr.bf16.mxu1 %v8728_v32  ;;  %v1315_v30 = vadd.f32 %v1231_v0, %v17529_v18  ;;  %v1239_v32 = vadd.f32 %v10881_v3, %v1238_v26  ;;  %v8740_v26 = vld [vmem:[#allocation13 + $0x64] ss:$40 sps:$4 sm:$0xff]   ;;  %v8749_v48 = vld [vmem:[#allocation13 + $0x254] ss:$40 sps:$4 sm:$0xff]  }
 0x322   : > { %v8493_v43 = vpop.f32.mrf.mxu0  ;;  %2119 = vmatpush1.bf16.msra.mxu0 %v8717_v24  ;;  %v10964_v24 = vpack.c.bf16 %v1342_v51, %v1341_v35  ;;  %v8750_v9 = vld [vmem:[#allocation13 + $0x1f8] ss:$40 sps:$4 sm:$0xff]   ;;  %v17538_v35 = vmax.f32 %v10769_v25, 0.0 }
 0x323   : > { %v10950_v12 = vpack.c.bf16 %v1346_v14, %v1345_v58  ;;  %2120 = vmatprep.subr.bf16.mxu0 %v8722_v21  ;;  %v1347_v23 = vmax.f32 %v1315_v30, 0.0  ;;  %v8735_v21 = vld [vmem:[#allocation13 + $0xb0] ss:$40 sps:$4 sm:$0xff]   ;;  %v1250_v11 = vadd.f32 %v8493_v43, %v10881_v3  ;;  %v8738_v58 = vld [vmem:[#allocation13 + $0x60] ss:$40 sps:$4 sm:$0xff]  }
 0x324   : > { %v1241_v29 = vpop.f32.mrf.mxu0  ;;  %2306 = vmatpush1.bf16.msra.mxu1 %v8726_v38  ;;  %17530 = vst [vmem:[#allocation25_spill] sm:$0xff] %v10964_v24  ;;  %v1317_v38 = vadd.f32 %v1239_v32, %v17533_v57  ;;  %v8741_v43 = vld [vmem:[#allocation13 + $0x10] ss:$40 sps:$4 sm:$0xff]  }
 0x325   : > { %17527 = vst [vmem:[#allocation24_spill] sm:$0xff] %v10950_v12  ;;  %1978 = vmatmul.mubr.bf16.gmra.mxu0 %v10944_v22  ;;  %2008 = vmatmul.mubr.bf16.gmra.mxu1 %v10950_v12  ;;  %v1242_v17 = vadd.f32 %v10881_v3, %v1241_v29  ;;  %v10966_v59 = vpack.c.bf16 %v1348_v10, %v1347_v23  ;;  %v8752_v29 = vld [vmem:[#allocation13 + $0x1fc] ss:$40 sps:$4 sm:$0xff]   ;;  %v17537_v10 = vmax.f32 %v10782_v46, 0.0 }
 0x326   : > { %1987 = vmatprep.mubr.bf16.mxu0 %v17475_v39  ;;  %2017 = vmatprep.mubr.bf16.mxu1 %v17475_v39  ;;  %v10961_v36 = vpop.f32.mrf.mxu0  ;;  %v1349_v14 = vmax.f32 %v1317_v38, 0.0  ;;  %v1320_v15 = vadd.f32 %v1250_v11, %v17534_v54  ;;  %v8776_v54 = vld [vmem:[#allocation13 + $0x6c] ss:$40 sps:$4 sm:$0xff]  }
 0x327   : > { %2121 = vmatpush1.bf16.msra.mxu0 %v8720_v16  ;;  %2307 = vmatprep.subr.bf16.mxu1 %v8731_v6  ;;  %17531 = vst [vmem:[#allocation26_spill] sm:$0xff] %v10966_v59  ;;  %v1318_v7 = vadd.f32 %v1242_v17, %v17532_v5  ;;  %v8744_v16 = vld [vmem:[#allocation13 + $0x248] ss:$40 sps:$4 sm:$0xff]   ;;  %v8762_v5 = vld [vmem:[#allocation13 + $0x158] ss:$40 sps:$4 sm:$0xff]   ;;  %v1263_v25 = vadd.f32 %v10961_v36, %v10881_v3 }
 0x328   : > { %2122 = vmatprep.subr.bf16.mxu0 %v8725_v31  ;;  %2308 = vmatpush1.bf16.msra.mxu1 %v8729_v45  ;;  %v1254_v42 = vpop.f32.mrf.mxu0  ;;  %v17536_v31 = vmax.f32 %v10738_v60, 0.0  ;;  %v1352_v2 = vmax.f32 %v1320_v15, 0.0  ;;  %v8758_v60 = vld [vmem:[#allocation13 + $0x1ac] ss:$40 sps:$4 sm:$0xff]  }
 0x329   : > { %2309 = vmatprep.subr.bf16.mxu1 %v8734_v40  ;;  %v1350_v55 = vmax.f32 %v1318_v7, 0.0  ;;  %v1255_v40 = vadd.f32 %v10881_v3, %v1254_v42 }
 0x32a   : > { %v8497_v0 = vpop.f32.mrf.mxu0  ;;  %v1319_v45 = vadd.f32 %v1247_v62, %v17536_v31  ;;  %v8771_v62 = vld [vmem:[#allocation13 + $0xb8] ss:$40 sps:$4 sm:$0xff]   ;;  %v8779_v31 = vld [vmem:[#allocation13 + $0x1c] ss:$40 sps:$4 sm:$0xff]  }
 0x32b   : > { %2123 = vmatpush1.bf16.msra.mxu0 %v8723_v47  ;;  %v10981_v41 = vpack.c.bf16 %v1350_v55, %v1349_v14  ;;  %v8756_v47 = vld [vmem:[#allocation13 + $0x1a8] ss:$40 sps:$4 sm:$0xff]   ;;  %v1321_v23 = vadd.f32 %v1255_v40, %v17538_v35  ;;  %v1266_v32 = vadd.f32 %v8497_v0, %v10881_v3  ;;  %v8773_v55 = vld [vmem:[#allocation13 + $0xbc] ss:$40 sps:$4 sm:$0xff]   ;;  %v17541_v0 = vmax.f32 %v10766_v20, 0.0 }
 0x32c   : > { %2310 = vmatpush1.bf16.msra.mxu1 %v8732_v52  ;;  %2494 = vmatprep.subr.bf16.mxu0 %v8746_v19  ;;  %v1257_v6 = vpop.f32.mrf.mxu0  ;;  %v1351_v30 = vmax.f32 %v1319_v45, 0.0  ;;  %v8764_v19 = vld [vmem:[#allocation13 + $0x15c] ss:$40 sps:$4 sm:$0xff]   ;;  %v17544_v45 = vmax.f32 %v10793_v61, 0.0 }
 0x32d   : > { %1988 = vmatmul.mubr.bf16.gmra.mxu0 %v10964_v24  ;;  %2018 = vmatmul.mubr.bf16.gmra.mxu1 %v10966_v59  ;;  %17535 = vst [vmem:[#allocation27_spill] sm:$0xff] %v10981_v41  ;;  %v1258_v27 = vadd.f32 %v10881_v3, %v1257_v6  ;;  %v1353_v42 = vmax.f32 %v1321_v23, 0.0 }
 0x32e   : > { %2027 = vmatprep.mubr.bf16.mxu1 %v17475_v39  ;;  %2140 = vmatprep.mubr.bf16.mxu0 %v17475_v39  ;;  %v10990_v18 = vpop.f32.mrf.mxu0  ;;  %v10993_v51 = vpack.c.bf16 %v1352_v2, %v1351_v30  ;;  %v17545_v30 = vmax.f32 %v10800_v1, 0.0 }
 0x32f   : > { %2311 = vmatprep.subr.bf16.mxu1 %v8737_v50  ;;  %v1322_v17 = vadd.f32 %v1258_v27, %v17537_v10  ;;  %v8770_v50 = vld [vmem:[#allocation13 + $0x10c] ss:$40 sps:$4 sm:$0xff]   ;;  %v8777_v27 = vld [vmem:[#allocation13 + $0x18] ss:$40 sps:$4 sm:$0xff]  }
 0x330   : > { %2312 = vmatpush1.bf16.msra.mxu1 %v8735_v21  ;;  %v1270_v52 = vpop.f32.mrf.mxu0  ;;  %v17539_v21 = vmax.f32 %v10776_v33, 0.0 }
 0x331   : > { %2313 = vmatprep.subr.bf16.mxu1 %v8740_v26  ;;  %v1354_v46 = vmax.f32 %v1322_v17, 0.0  ;;  %v8768_v26 = vld [vmem:[#allocation13 + $0x108] ss:$40 sps:$4 sm:$0xff]   ;;  %v1271_v20 = vadd.f32 %v10881_v3, %v1270_v52 }
 0x332   : > { %v8501_v7 = vpop.f32.mrf.mxu0  ;;  %v1324_v57 = vadd.f32 %v1266_v32, %v17539_v21  ;;  %v17549_v32 = vmax.f32 %v10830_v63, 0.0  ;;  %v17551_v63 = vmax.f32 %v10824_v34, 0.0  ;;  %v8747_v34 = vld [vmem:[#allocation13 + $0x250] ss:$40 sps:$4 sm:$0xff]  }
 0x333   : > { %v11008_v38 = vpack.c.bf16 %v1354_v46, %v1353_v42  ;;  %v1282_v2 = vadd.f32 %v8501_v7, %v10881_v3  ;;  %v17550_v46 = vmax.f32 %v10817_v49, 0.0  ;;  %v17553_v49 = vmax.f32 %v10814_v56, 0.0  ;;  %v8755_v56 = vld [vmem:[#allocation13 + $0x204] ss:$40 sps:$4 sm:$0xff]  }
 0x334   : > { %2314 = vmatpush1.bf16.msra.mxu1 %v8738_v58  ;;  %v1273_v11 = vpop.f32.mrf.mxu0  ;;  %v1323_v58 = vadd.f32 %v1263_v25, %v17541_v0  ;;  %v1356_v33 = vmax.f32 %v1324_v57, 0.0  ;;  %v8753_v0 = vld [vmem:[#allocation13 + $0x200] ss:$40 sps:$4 sm:$0xff]  }
 0x335   : > { %2028 = vmatmul.mubr.bf16.gmra.mxu1 %v10981_v41  ;;  %2141 = vmatmul.mubr.bf16.vlgmr.msra.gmra.mxu0 %v10893_v8  ;;  %17540 = vst [vmem:[#allocation28_spill] sm:$0xff] %v11008_v38  ;;  %v1274_v36 = vadd.f32 %v10881_v3, %v1273_v11  ;;  %v1328_v40 = vadd.f32 %v1282_v2, %v17545_v30  ;;  %v1461_v2 = vld [vmem:[#allocation14] sm:$0xff] }
 0x336   : > { %2037 = vmatprep.mubr.bf16.mxu1 %v17475_v39  ;;  %2150 = vmatprep.mubr.bf16.mxu0 %v17475_v39  ;;  %v8504_v14 = vpop.f32.mrf.mxu0  ;;  %v1355_v15 = vmax.f32 %v1323_v58, 0.0  ;;  %v8761_v58 = vld [vmem:[#allocation13 + $0x1b4] ss:$40 sps:$4 sm:$0xff]  }
 0x337   : > { %2315 = vmatprep.subr.bf16.mxu1 %v8743_v37  ;;  %2495 = vmatpush1.bf16.msra.mxu0 %v8744_v16  ;;  %v17543_v16 = vmax.f32 %v10806_v28, 0.0  ;;  %v1295_v25 = vadd.f32 %v8504_v14, %v10881_v3  ;;  %v8782_v14 = vld [vmem:[#allocation13 + $0x114] ss:$40 sps:$4 sm:$0xff]  }
 0x338   : > { %2316 = vmatpush1.bf16.msra.mxu1 %v8741_v43  ;;  %2496 = vmatprep.subr.bf16.mxu0 %v8752_v29  ;;  %v11018_v37 = vpack.c.bf16 %v1356_v33, %v1355_v15  ;;  %v8774_v43 = vld [vmem:[#allocation13 + $0x68] ss:$40 sps:$4 sm:$0xff]   ;;  %v1286_v29 = vpop.f32.mrf.mxu0  ;;  %v8785_v15 = vld [vmem:[#allocation13 + $0xc4] ss:$40 sps:$4 sm:$0xff]  }
 0x339   : > { %2687 = vmatprep.subr.bf16.mxu1 %v8749_v48  ;;  %v1326_v6 = vadd.f32 %v1274_v36, %v17543_v16  ;;  %v1325_v48 = vadd.f32 %v1271_v20, %v17544_v45  ;;  %v1287_v35 = vadd.f32 %v10881_v3, %v1286_v29  ;;  %v8759_v33 = vld [vmem:[#allocation13 + $0x1b0] ss:$40 sps:$4 sm:$0xff]   ;;  %v8767_v36 = vld [vmem:[#allocation13 + $0x164] ss:$40 sps:$4 sm:$0xff]   ;;  %v8783_v20 = vld [vmem:[#allocation13 + $0xc0] ss:$40 sps:$4 sm:$0xff]  }
 0x33a   : > { %17542 = vst [vmem:[#allocation29_spill] sm:$0xff] %v11018_v37  ;;  %v8788_v16 = vld [vmem:[#allocation13 + $0x74] ss:$40 sps:$4 sm:$0xff]   ;;  %v8789_v29 = vld [vmem:[#allocation13 + $0x20] ss:$40 sps:$4 sm:$0xff]  }
 0x33b   : > { %2497 = vmatpush1.bf16.msra.mxu0 %v8750_v9  ;;  %v1358_v28 = vmax.f32 %v1326_v6, 0.0  ;;  %v8505_v9 = vpop.f32.mrf.mxu0  ;;  %v1357_v61 = vmax.f32 %v1325_v48, 0.0  ;;  %v8786_v6 = vld [vmem:[#allocation13 + $0x70] ss:$40 sps:$4 sm:$0xff]  }
 0x33c   : > { %2498 = vmatprep.subr.bf16.mxu0 %v8758_v60  ;;  %v1279_v60 = vadd.f32 %v10990_v18, %v10881_v3  ;;  %v1360_v18 = vmax.f32 %v1328_v40, 0.0  ;;  %v1298_v7 = vadd.f32 %v8505_v9, %v10881_v3 }
 0x33d   : > { %2038 = vmatmul.mubr.bf16.gmra.mxu1 %v10993_v51  ;;  %2151 = vmatmul.mubr.bf16.gmra.mxu0 %v10904_v4  ;;  %v11033_v10 = vpack.c.bf16 %v1358_v28, %v1357_v61  ;;  %v1289_v17 = vpop.f32.mrf.mxu0 }
 0x33e   : > { %2047 = vmatprep.mubr.bf16.mxu1 %v17475_v39  ;;  %2160 = vmatprep.mubr.bf16.mxu0 %v17475_v39  ;;  %v1332_v21 = vadd.f32 %v1298_v7, %v17551_v63 }
 0x33f   : > { %2499 = vmatpush1.bf16.msra.mxu0 %v8756_v47  ;;  %17546 = vst [vmem:[#allocation30_spill] sm:$0xff] %v11033_v10  ;;  %v17547_v47 = vmax.f32 %v10790_v53, 0.0 }
 0x340   : > { %2500 = vmatprep.subr.bf16.mxu0 %v8764_v19  ;;  %v1290_v19 = vadd.f32 %v10881_v3, %v1289_v17  ;;  %v1364_v11 = vmax.f32 %v1332_v21, 0.0 }
 0x341   : > { %v1327_v52 = vadd.f32 %v1279_v60, %v17547_v47 }
 0x342   : > { %v1330_v53 = vadd.f32 %v1290_v19, %v17549_v32 }
 0x343   : > { %2501 = vmatpush1.bf16.msra.mxu0 %v8762_v5  ;;  %v1359_v1 = vmax.f32 %v1327_v52, 0.0  ;;  %v1329_v5 = vadd.f32 %v1287_v35, %v17550_v46 }
 0x344   : > { %2502 = vmatprep.subr.bf16.mxu0 %v8770_v50  ;;  %v1362_v50 = vmax.f32 %v1330_v53, 0.0 }
 0x345   : > { %2048 = vmatmul.mubr.bf16.gmra.mxu1 %v11008_v38  ;;  %2161 = vmatmul.mubr.bf16.gmra.mxu0 %v10924_v13  ;;  %v11043_v23 = vpack.c.bf16 %v1360_v18, %v1359_v1  ;;  %v1361_v42 = vmax.f32 %v1329_v5, 0.0 }
 0x346   : > { %2057 = vmatprep.mubr.bf16.mxu1 %v17475_v39  ;;  %2170 = vmatprep.mubr.bf16.mxu0 %v17475_v39 }
 0x347   : > { %2503 = vmatpush1.bf16.msra.mxu0 %v8768_v26  ;;  %17548 = vst [vmem:[#allocation31_spill] sm:$0xff] %v11043_v23  ;;  %v11057_v57 = vpack.c.bf16 %v1362_v50, %v1361_v42  ;;  %v1331_v26 = vadd.f32 %v1295_v25, %v17553_v49 }
 0x348   : > { %2504 = vmatprep.subr.bf16.mxu0 %v8773_v55 }
 0x349   : > { %17552 = vst [vmem:[#allocation32_spill] sm:$0xff] %v11057_v57  ;;  %v1363_v55 = vmax.f32 %v1331_v26, 0.0 }
 0x34b   : > { %2505 = vmatpush1.bf16.msra.mxu0 %v8771_v62  ;;  %v11065_v3 = vpack.c.bf16 %v1364_v11, %v1363_v55  ;;  %v8765_v62 = vld [vmem:[#allocation13 + $0x160] ss:$40 sps:$4 sm:$0xff]  }
 0x34c   : > { %2506 = vmatprep.subr.bf16.mxu0 %v8776_v54  ;;  %v8780_v54 = vld [vmem:[#allocation13 + $0x110] ss:$40 sps:$4 sm:$0xff]  }
 0x34d   : > { %2058 = vmatmul.mubr.bf16.gmra.mxu1 %v11018_v37  ;;  %2171 = vmatmul.mubr.bf16.gmra.mxu0 %v10944_v22  ;;  %17554 = vst [vmem:[#allocation33_spill] sm:$0xff] %v11065_v3 }
 0x34e   : > { %2067 = vmatprep.mubr.bf16.mxu1 %v17475_v39  ;;  %2180 = vmatprep.mubr.bf16.mxu0 %v17475_v39 }
 0x34f   : > { %2507 = vmatpush1.bf16.msra.mxu0 %v8774_v43  ;;  %v8791_v43 = vld [vmem:[#allocation13 + $0x24] ss:$40 sps:$4 sm:$0xff]  }
 0x350   : > { %2508 = vmatprep.subr.bf16.mxu0 %v8779_v31  ;;  %v1465_v31 = vlaneseq }
 0x352   : > { %v11111_v45 = vshrl.u32 %v1465_v31, 7 }
 0x353   : > { %2509 = vmatpush1.bf16.msra.mxu0 %v8777_v27 }
 0x354   : > { %17555 = vst [vmem:[#allocation34_spill] sm:$0xff] %v11111_v45  ;;  %v17474_v48 = vsub.s32 0, %v11111_v45  ;;  %v17473_v28 = vsub.s32 1, %v11111_v45 }
 0x355   : > { %2068 = vmatmul.mubr.bf16.gmra.mxu1 %v11033_v10  ;;  %2181 = vmatmul.mubr.bf16.gmra.mxu0 %v10964_v24 }
 0x356   : > { %2077 = vmatprep.mubr.bf16.mxu1 %v17475_v39  ;;  %2190 = vmatprep.mubr.bf16.mxu0 %v17475_v39  ;;  %v11121_v27 = vrot.slane %v1461_v2, %v17474_v48  ;;  %v11125_v9 = vrot.slane %v1461_v2, %v17473_v28 }
 0x35d   : > { %2078 = vmatmul.mubr.bf16.gmra.mxu1 %v11043_v23  ;;  %2191 = vmatmul.mubr.bf16.gmra.mxu0 %v10919_v44 }
 0x35e   : > { %2087 = vmatprep.mubr.bf16.mxu1 %v17475_v39  ;;  %2200 = vmatprep.mubr.bf16.mxu0 %v17475_v39 }
 0x365   : > { %2088 = vmatmul.mubr.bf16.gmra.mxu1 %v11057_v57  ;;  %2201 = vmatmul.mubr.bf16.gmra.mxu0 %v10950_v12 }
 0x366   : > { %2097 = vmatprep.mubr.bf16.mxu1 %v17475_v39  ;;  %2210 = vmatprep.mubr.bf16.mxu0 %v17475_v39 }
 0x36d   : > { %2098 = vmatmul.mubr.bf16.gmra.mxu1 %v11065_v3  ;;  %2211 = vmatmul.mubr.bf16.gmra.mxu0 %v10966_v59 }
 0x36e   : > { %2220 = vmatprep.mubr.bf16.mxu0 %v17475_v39  ;;  %2333 = vmatprep.mubr.bf16.mxu1 %v17475_v39 }
 0x375   : > { %2221 = vmatmul.mubr.bf16.gmra.mxu0 %v10981_v41  ;;  %2334 = vmatmul.mubr.bf16.vlgmr.msra.gmra.mxu1 %v10893_v8 }
 0x376   : > { %2688 = vmatpush1.bf16.msra.mxu1 %v8747_v34  ;;  %2230 = vmatprep.mubr.bf16.mxu0 %v17475_v39 }
 0x377   : > { %2343 = vmatprep.mubr.bf16.mxu1 %v17475_v39  ;;  %2689 = vmatprep.subr.bf16.mxu1 %v8755_v56 }
 0x37a   : > { %2690 = vmatpush1.bf16.msra.mxu1 %v8753_v0 }
 0x37b   : > { %2691 = vmatprep.subr.bf16.mxu1 %v8761_v58 }
 0x37d   : > { %2231 = vmatmul.mubr.bf16.gmra.mxu0 %v10993_v51  ;;  %2344 = vmatmul.mubr.bf16.gmra.mxu1 %v10904_v4 }
 0x37e   : > { %2240 = vmatprep.mubr.bf16.mxu0 %v17475_v39  ;;  %2353 = vmatprep.mubr.bf16.mxu1 %v17475_v39 }
 0x37f   : > { %2692 = vmatpush1.bf16.msra.mxu1 %v8759_v33 }
 0x380   : > { %2693 = vmatprep.subr.bf16.mxu1 %v8767_v36 }
 0x383   : > { %2694 = vmatpush1.bf16.msra.mxu1 %v8765_v62 }
 0x384   : > { %2695 = vmatprep.subr.bf16.mxu1 %v8782_v14 }
 0x385   : > { %2241 = vmatmul.mubr.bf16.gmra.mxu0 %v11008_v38  ;;  %2354 = vmatmul.mubr.bf16.gmra.mxu1 %v10924_v13 }
 0x386   : > { %2250 = vmatprep.mubr.bf16.mxu0 %v17475_v39  ;;  %2363 = vmatprep.mubr.bf16.mxu1 %v17475_v39 }
 0x387   : > { %2696 = vmatpush1.bf16.msra.mxu1 %v8780_v54 }
 0x388   : > { %2697 = vmatprep.subr.bf16.mxu1 %v8785_v15 }
 0x38b   : > { %2698 = vmatpush1.bf16.msra.mxu1 %v8783_v20 }
 0x38c   : > { %2699 = vmatprep.subr.bf16.mxu1 %v8788_v16 }
 0x38d   : > { %2251 = vmatmul.mubr.bf16.gmra.mxu0 %v11018_v37  ;;  %2364 = vmatmul.mubr.bf16.gmra.mxu1 %v10944_v22 }
 0x38e   : > { %2260 = vmatprep.mubr.bf16.mxu0 %v17475_v39  ;;  %2373 = vmatprep.mubr.bf16.mxu1 %v17475_v39 }
 0x38f   : > { %2700 = vmatpush1.bf16.msra.mxu1 %v8786_v6 }
 0x390   : > { %2701 = vmatprep.subr.bf16.mxu1 %v8791_v43 }
 0x393   : > { %2702 = vmatpush1.bf16.msra.mxu1 %v8789_v29 }
 0x395   : > { %2261 = vmatmul.mubr.bf16.gmra.mxu0 %v11033_v10  ;;  %2374 = vmatmul.mubr.bf16.gmra.mxu1 %v10964_v24 }
 0x396   : > { %2270 = vmatprep.mubr.bf16.mxu0 %v17475_v39  ;;  %2383 = vmatprep.mubr.bf16.mxu1 %v17475_v39 }
 0x39d   : > { %2271 = vmatmul.mubr.bf16.gmra.mxu0 %v11043_v23  ;;  %2384 = vmatmul.mubr.bf16.gmra.mxu1 %v10919_v44 }
 0x39e   : > { %2280 = vmatprep.mubr.bf16.mxu0 %v17475_v39  ;;  %2393 = vmatprep.mubr.bf16.mxu1 %v17475_v39 }
 0x3a5   : > { %2281 = vmatmul.mubr.bf16.gmra.mxu0 %v11057_v57  ;;  %2394 = vmatmul.mubr.bf16.gmra.mxu1 %v10950_v12 }
 0x3a6   : > { %2290 = vmatprep.mubr.bf16.mxu0 %v17475_v39  ;;  %2403 = vmatprep.mubr.bf16.mxu1 %v17475_v39 }
 0x3ad   : > { %2291 = vmatmul.mubr.bf16.gmra.mxu0 %v11065_v3  ;;  %2404 = vmatmul.mubr.bf16.gmra.mxu1 %v10966_v59 }
 0x3ae   : > { %2413 = vmatprep.mubr.bf16.mxu1 %v17475_v39  ;;  %2526 = vmatprep.mubr.bf16.mxu0 %v17475_v39 }
 0x3b5   : > { %2414 = vmatmul.mubr.bf16.gmra.mxu1 %v10981_v41  ;;  %2527 = vmatmul.mubr.bf16.vlgmr.msra.gmra.mxu0 %v10893_v8 }
 0x3b6   : > { %2423 = vmatprep.mubr.bf16.mxu1 %v17475_v39  ;;  %2536 = vmatprep.mubr.bf16.mxu0 %v17475_v39 }
 0x3bd   : > { %2424 = vmatmul.mubr.bf16.gmra.mxu1 %v10993_v51  ;;  %2537 = vmatmul.mubr.bf16.gmra.mxu0 %v10904_v4 }
 0x3be   : > { %2433 = vmatprep.mubr.bf16.mxu1 %v17475_v39  ;;  %2546 = vmatprep.mubr.bf16.mxu0 %v17475_v39 }
 0x3c5   : > { %2434 = vmatmul.mubr.bf16.gmra.mxu1 %v11008_v38  ;;  %2547 = vmatmul.mubr.bf16.gmra.mxu0 %v10924_v13 }
 0x3c6   : > { %2443 = vmatprep.mubr.bf16.mxu1 %v17475_v39  ;;  %2556 = vmatprep.mubr.bf16.mxu0 %v17475_v39 }
 0x3cd   : > { %v1949_v60 = vpop.f32.mrf.mxu0  ;;  %2444 = vmatmul.mubr.bf16.gmra.mxu1 %v11018_v37  ;;  %2557 = vmatmul.mubr.bf16.gmra.mxu0 %v10944_v22 }
 0x3ce   : > { %v11130_v61 = vadd.f32 %v1949_v60, %v11121_v27  ;;  %2453 = vmatprep.mubr.bf16.mxu1 %v17475_v39  ;;  %2566 = vmatprep.mubr.bf16.mxu0 %v17475_v39 }
 0x3cf   : > { %v1951_v30 = vpop.f32.mrf.mxu0 }
 0x3d0   : > { %v3200_v40 = vand.u32 2147483647, %v11130_v61  ;;  %v11136_v17 = vadd.f32 %v1951_v30, %v11125_v9 }
 0x3d1   : > { %v1953_v47 = vpop.f32.mrf.mxu0 }
 0x3d2   : > { %v3520_v52 = vsub.f32 0.0, %v3200_v40  ;;  %v3201_v18 = vand.u32 2147483647, %v11136_v17  ;;  %v11140_v19 = vadd.f32 %v1953_v47, %v11121_v27 }
 0x3d3   : > { %v1955_v1 = vpop.f32.mrf.mxu0 }
 0x3d4   : > { %v3840_v35 = vmul.f32 1.442695, %v3520_v52  ;;  %v3521_v32 = vsub.f32 0.0, %v3201_v18  ;;  %v3210_v53 = vand.u32 2147483647, %v11140_v19  ;;  %v11144_v46 = vadd.f32 %v1955_v1, %v11125_v9 }
 0x3d5   : > { %v1959_v5 = vpop.f32.mrf.mxu0  ;;  %2454 = vmatmul.mubr.bf16.gmra.mxu1 %v11033_v10  ;;  %2567 = vmatmul.mubr.bf16.gmra.mxu0 %v10964_v24 }
 0x3d6   : > { %8792 = vpow2.f32 %v3840_v35  ;;  %v3842_v7 = vmul.f32 1.442695, %v3521_v32  ;;  %v3530_v50 = vsub.f32 0.0, %v3210_v53  ;;  %v11149_v25 = vadd.f32 %v1959_v5, %v11121_v27  ;;  %2463 = vmatprep.mubr.bf16.mxu1 %v17475_v39  ;;  %2576 = vmatprep.mubr.bf16.mxu0 %v17475_v39 }
 0x3d7   : > { %v3211_v42 = vand.u32 2147483647, %v11144_v46  ;;  %v1961_v63 = vpop.f32.mrf.mxu0 }
 0x3d8   : > { %8794 = vpow2.f32 %v3842_v7  ;;  %v3860_v21 = vmul.f32 1.442695, %v3530_v50  ;;  %v3220_v49 = vand.u32 2147483647, %v11149_v25  ;;  %v11156_v11 = vadd.f32 %v1961_v63, %v11125_v9 }
 0x3d9   : > { %v3531_v26 = vsub.f32 0.0, %v3211_v42  ;;  %v1963_v55 = vpop.f32.mrf.mxu0 }
 0x3da   : > { %8796 = vpow2.f32 %v3860_v21  ;;  %v3540_v34 = vsub.f32 0.0, %v3220_v49  ;;  %v11159_v56 = vadd.f32 %v1963_v55, %v11121_v27  ;;  %v3221_v58 = vand.u32 2147483647, %v11156_v11 }
 0x3db   : > { %v3862_v0 = vmul.f32 1.442695, %v3531_v26  ;;  %v1965_v33 = vpop.f32.mrf.mxu0  ;;  %v1999_v36 = vpop.f32.mrf.mxu1 }
 0x3dc   : > { %v3880_v62 = vmul.f32 1.442695, %v3540_v34  ;;  %v3230_v14 = vand.u32 2147483647, %v11159_v56  ;;  %v11164_v54 = vadd.f32 %v1965_v33, %v11125_v9  ;;  %v3541_v15 = vsub.f32 0.0, %v3221_v58 }
 0x3dd   : > { %8798 = vpow2.f32 %v3862_v0  ;;  %v11167_v20 = vadd.f32 %v1999_v36, %v11121_v27  ;;  %v1969_v16 = vpop.f32.mrf.mxu0  ;;  %v2001_v6 = vpop.f32.mrf.mxu1  ;;  %2464 = vmatmul.mubr.bf16.gmra.mxu1 %v11043_v23  ;;  %2577 = vmatmul.mubr.bf16.gmra.mxu0 %v10919_v44 }
 0x3de   : > { %8800 = vpow2.f32 %v3880_v62  ;;  %v3550_v43 = vsub.f32 0.0, %v3230_v14  ;;  %v3231_v29 = vand.u32 2147483647, %v11164_v54  ;;  %2473 = vmatprep.mubr.bf16.mxu1 %v17475_v39  ;;  %2586 = vmatprep.mubr.bf16.mxu0 %v17475_v39  ;;  %v3882_v31 = vmul.f32 1.442695, %v3541_v15 }
 0x3df   : > { %v3300_v2 = vand.u32 2147483647, %v11167_v20  ;;  %v11176_v60 = vadd.f32 %v1969_v16, %v11121_v27  ;;  %v1971_v30 = vpop.f32.mrf.mxu0  ;;  %v11178_v40 = vpop.f32.mrf.mxu1  ;;  %v11181_v18 = vadd.f32 %v2001_v6, %v11125_v9 }
 0x3e0   : > { %v3900_v47 = vmul.f32 1.442695, %v3550_v43  ;;  %v3551_v52 = vsub.f32 0.0, %v3231_v29  ;;  %8802 = vpow2.f32 %v3882_v31  ;;  %v11195_v26 = vadd.f32 %v1971_v30, %v11125_v9 }
 0x3e1   : > { %v3620_v1 = vsub.f32 0.0, %v3300_v2  ;;  %v3240_v35 = vand.u32 2147483647, %v11176_v60  ;;  %v11184_v32 = vpop.f32.mrf.mxu0  ;;  %v3301_v5 = vand.u32 2147483647, %v11181_v18  ;;  %v11189_v63 = vpop.f32.mrf.mxu1 }
 0x3e2   : > { %8804 = vpow2.f32 %v3900_v47  ;;  %v3902_v53 = vmul.f32 1.442695, %v3551_v52  ;;  %17556 = vst [vmem:[#allocation35_spill] sm:$0xff] %v11195_v26  ;;  %v3241_v52 = vand.u32 2147483647, %v11195_v26 }
 0x3e3   : > { %v11187_v7 = vpop.eup %8792  ;;  %v4040_v50 = vmul.f32 1.442695, %v3620_v1  ;;  %v3560_v42 = vsub.f32 0.0, %v3240_v35  ;;  %v11191_v21 = vpop.f32.mrf.mxu0  ;;  %v3621_v58 = vsub.f32 0.0, %v3301_v5 }
 0x3e4   : > { %v4480_v49 = vadd.f32 1.0, %v11187_v7  ;;  %8806 = vpow2.f32 %v3902_v53  ;;  %v4483_v62 = vmul.f32 -0.5, %v11187_v7  ;;  %v4486_v1 = vand.u32 2147483647, %v11187_v7 }
 0x3e5   : > { %v11197_v55 = vpop.eup %8794  ;;  %8808 = vpow2.f32 %v4040_v50  ;;  %v3920_v0 = vmul.f32 1.442695, %v3560_v42  ;;  %v11200_v33 = vpop.f32.mrf.mxu0  ;;  %2474 = vmatmul.mubr.bf16.gmra.mxu1 %v11057_v57  ;;  %2587 = vmatmul.mubr.bf16.gmra.mxu0 %v10950_v12  ;;  %v4042_v29 = vmul.f32 1.442695, %v3621_v58  ;;  %v3561_v58 = vsub.f32 0.0, %v3241_v52 }
 0x3e6   : > { %v11202_v36 = vpop.f32.mrf.mxu1  ;;  %8810 = vlog2.f32 %v4480_v49  ;;  %v4489_v15 = vadd.f32 1.0, %v11197_v55  ;;  %2483 = vmatprep.mubr.bf16.mxu1 %v17475_v39  ;;  %2596 = vmatprep.mubr.bf16.mxu0 %v17475_v39  ;;  %v4492_v30 = vmul.f32 -0.5, %v11197_v55  ;;  %v4484_v49 = vadd.f32 1.0, %v4483_v62 }
 0x3e7   : > { %v11211_v16 = vpop.eup %8796  ;;  %8812 = vpow2.f32 %v3920_v0  ;;  %v11215_v31 = vpop.f32.mrf.mxu0  ;;  %v4495_v28 = vand.u32 2147483647, %v11197_v55  ;;  %vm11245_vm2 = vcmp.lt.f32.partialorder %v4486_v1, 0.0004427343  ;;  %v11282_v44 = vmul.f32 1.442695, %v3561_v58 }
 0x3e8   : > { %v11217_v2 = vpop.f32.mrf.mxu1  ;;  %8814 = vlog2.f32 %v4489_v15  ;;  %v4570_v47 = vadd.f32 1.0, %v11211_v16  ;;  %v4573_v0 = vmul.f32 -0.5, %v11211_v16  ;;  %v4493_v62 = vadd.f32 1.0, %v4492_v30 }
 0x3e9   : > { %8816 = vpow2.f32 %v4042_v29  ;;  %v11225_v5 = vpop.f32.mrf.mxu0  ;;  %v4485_v52 = vmul.f32 %v11187_v7, %v4484_v49  ;;  %v4576_v57 = vand.u32 2147483647, %v11211_v16  ;;  %vm11266_vm3 = vcmp.lt.f32.partialorder %v4495_v28, 0.0004427343 }
 0x3ea   : > { %17557 = vst [vmem:[#allocation36_spill] sm:$0xff] %v11225_v5  ;;  %v11227_v50 = vpop.f32.mrf.mxu1  ;;  %v11229_v42 = vpop.eup %8798  ;;  %8818 = vlog2.f32 %v4570_v47  ;;  %v4574_v1 = vadd.f32 1.0, %v4573_v0  ;;  %v11273_v7 = vadd.f32 %v11178_v40, %v11121_v27 }
 0x3eb   : > { %17558 = vst [vmem:[#allocation37_spill] sm:$0xff] %v11227_v50  ;;  %v11233_v15 = vpop.eup %8800  ;;  %v4579_v48 = vadd.f32 1.0, %v11229_v42  ;;  %v4582_v29 = vmul.f32 -0.5, %v11229_v42  ;;  %v11239_v35 = vpop.f32.mrf.mxu0  ;;  %v4585_v28 = vand.u32 2147483647, %v11229_v42 }
 0x3ec   : > { %17559 = vst [vmem:[#allocation38_spill] sm:$0xff] %v11239_v35  ;;  %v11241_v43 = vpop.f32.mrf.mxu1  ;;  %v4660_v47 = vadd.f32 1.0, %v11233_v15  ;;  %v4663_v6 = vmul.f32 -0.5, %v11233_v15  ;;  %17568 = vst [vmem:[#allocation42_spill] sm:$0xff] %v11273_v7  ;;  %v4575_v58 = vmul.f32 %v11211_v16, %v4574_v1  ;;  %vm11300_vm4 = vcmp.lt.f32.partialorder %v4576_v57, 0.0004427343 }
 0x3ed   : > { %17560 = vst [vmem:[#allocation39_spill] sm:$0xff] %v11241_v43  ;;  %8820 = vlog2.f32 %v4579_v48  ;;  %v11251_v39 = vpop.f32.mrf.mxu0  ;;  %2484 = vmatmul.mubr.bf16.gmra.mxu1 %v11065_v3  ;;  %2597 = vmatmul.mubr.bf16.gmra.mxu0 %v10966_v59  ;;  %v11257_v30 = vpop.eup %8802  ;;  %v17565_v48 = vmov 0   ;;  %v4583_v3 = vadd.f32 1.0, %v4582_v29  ;;  %v4666_v29 = vand.u32 2147483647, %v11233_v15 }
 0x3ee   : > { %17563 = vst [vmem:[#allocation40_spill] sm:$0xff] %v11251_v39  ;;  %v11253_v12 = vpop.f32.mrf.mxu1  ;;  %8822 = vlog2.f32 %v4660_v47  ;;  %2606 = vmatprep.mubr.bf16.mxu0 %v17565_v48  ;;  %2719 = vmatprep.mubr.bf16.mxu1 %v17565_v48  ;;  %v4664_v59 = vadd.f32 1.0, %v4663_v6  ;;  %v4494_v47 = vmul.f32 %v11197_v55, %v4493_v62  ;;  %v4672_v40 = vmul.f32 -0.5, %v11257_v30 }
 0x3ef   : > { %17564 = vst [vmem:[#allocation41_spill] sm:$0xff] %v11253_v12  ;;  %v11263_v53 = vpop.eup %8804  ;;  %v4669_v12 = vadd.f32 1.0, %v11257_v30  ;;  %v11275_v49 = vpop.f32.mrf.mxu0  ;;  %v11306_v24 = vmul.f32 %v11229_v42, %v4583_v3  ;;  %v3310_v10 = vand.u32 2147483647, %v11273_v7  ;;  %vm11315_vm5 = vcmp.lt.f32.partialorder %v4585_v28, 0.0004427343 }
 0x3f0   : > { %17569 = vst [vmem:[#allocation43_spill] sm:$0xff] %v11275_v49  ;;  %v11277_v0 = vpop.f32.mrf.mxu1  ;;  %v4750_v39 = vadd.f32 1.0, %v11263_v53  ;;  %v4753_v23 = vmul.f32 -0.5, %v11263_v53  ;;  %vm11321_vm6 = vcmp.lt.f32.partialorder %v4666_v29, 0.0004427343  ;;  %v17592_v16 = vmax.f32 %v11144_v46, 0.0 }
 0x3f1   : > { %17570 = vst [vmem:[#allocation44_spill] sm:$0xff] %v11277_v0  ;;  %v11284_v6 = vpop.eup %8806  ;;  %8824 = vlog2.f32 %v4669_v12  ;;  %v11289_v49 = vpop.f32.mrf.mxu0  ;;  %v4756_v50 = vand.u32 2147483647, %v11263_v53  ;;  %v3630_v26 = vsub.f32 0.0, %v3310_v10 }
 0x3f2   : > { %17571 = vst [vmem:[#allocation45_spill] sm:$0xff] %v11289_v49  ;;  %v11291_v0 = vpop.f32.mrf.mxu1  ;;  %v11293_v55 = vpop.eup %8808  ;;  %8826 = vlog2.f32 %v4750_v39  ;;  %v4759_v12 = vadd.f32 1.0, %v11284_v6  ;;  %v4762_v49 = vmul.f32 -0.5, %v11284_v6  ;;  %v4675_v39 = vand.u32 2147483647, %v11257_v30 }
 0x3f3   : > { %17572 = vst [vmem:[#allocation46_spill] sm:$0xff] %v11291_v0  ;;  %v8811_v43 = vpop.eup %8810  ;;  %v11309_v0 = vmul.f32 %v11233_v15, %v4664_v59  ;;  %v5380_v3 = vadd.f32 1.0, %v11293_v55  ;;  %v4673_v15 = vadd.f32 1.0, %v4672_v40  ;;  %v4754_v1 = vadd.f32 1.0, %v4753_v23  ;;  %v11327_v28 = vpop.f32.mrf.mxu0 }
 0x3f4   : > { %v11313_v35 = vpop.eup %8812  ;;  %v4482_v57 = vmul.f32 0.6931472, %v8811_v43  ;;  %8828 = vlog2.f32 %v4759_v12  ;;  %v5383_v43 = vmul.f32 -0.5, %v11293_v55  ;;  %17579 = vst [vmem:[#allocation47_spill] sm:$0xff] %v11327_v28  ;;  %v11329_v7 = vpop.f32.mrf.mxu1  ;;  %v4763_v5 = vadd.f32 1.0, %v4762_v49 }
 0x3f5   : > { %v8815_v42 = vpop.eup %8814  ;;  %17580 = vst [vmem:[#allocation48_spill] sm:$0xff] %v11329_v7  ;;  %2607 = vmatmul.mubr.bf16.gmra.mxu0 %v10981_v41  ;;  %2720 = vmatmul.mubr.bf16.vlgmr.msra.gmra.mxu1 %v10893_v8  ;;  %8830 = vlog2.f32 %v5380_v3  ;;  %v4840_v23 = vadd.f32 1.0, %v11313_v35  ;;  %v17581_v7 = vmax.f32 %v11130_v61, 0.0  ;;  %v4765_v8 = vand.u32 2147483647, %v11284_v6 }
 0x3f6   : > { %v11333_v12 = vpop.eup %8816  ;;  %v4488_v29 = vsel %vm11245_vm2, %v4485_v52, %v4482_v57  ;;  %v4491_v40 = vmul.f32 0.6931472, %v8815_v42  ;;  %2616 = vmatprep.mubr.bf16.mxu0 %v17565_v48  ;;  %2729 = vmatprep.mubr.bf16.mxu1 %v17565_v48  ;;  %vm11345_vm7 = vcmp.lt.f32.partialorder %v4675_v39, 0.0004427343  ;;  %v5384_v3 = vadd.f32 1.0, %v5383_v43  ;;  %v11360_v39 = vpop.f32.mrf.mxu0 }
 0x3f7   : > { %v8819_v28 = vpop.eup %8818  ;;  %v7360_v41 = vadd.f32 %v4488_v29, %v17581_v7  ;;  %8832 = vlog2.f32 %v4840_v23  ;;  %v17584_v61 = vmax.f32 %v11136_v17, 0.0  ;;  %v4674_v10 = vmul.f32 %v11257_v30, %v4673_v15 }
 0x3f8   : > { %v4497_v14 = vsel %vm11266_vm3, %v4494_v47, %v4491_v40  ;;  %v4572_v52 = vmul.f32 0.6931472, %v8819_v28  ;;  %v5386_v34 = vand.u32 2147483647, %v11293_v55  ;;  %v5389_v49 = vadd.f32 1.0, %v11333_v12  ;;  %v11358_v47 = vpop.f32.mrf.mxu1 }
 0x3f9   : > { %7680 = vst [vmem:[%s11350_s2] sm:$0xff] %v7360_v41  ;;  %v7361_v7 = vadd.f32 %v4497_v14, %v17584_v61  ;;  %v4755_v41 = vmul.f32 %v11263_v53, %v4754_v1  ;;  %vm11365_vm8 = vcmp.lt.f32.partialorder %v4756_v50, 0.0004427343  ;;  %v4843_v30 = vmul.f32 -0.5, %v11313_v35 }
 0x3fa   : > { %v8821_v42 = vpop.eup %8820  ;;  %v4578_v43 = vsel %vm11300_vm4, %v4575_v58, %v4572_v52  ;;  %v17587_v28 = vmax.f32 %v11140_v19, 0.0  ;;  %vm11373_vm9 = vcmp.lt.f32.partialorder %v4765_v8, 0.0004427343  ;;  %8834 = vlog2.f32 %v5389_v49 }
 0x3fb   : > { %v8823_v15 = vpop.eup %8822  ;;  %7681 = vst [vmem:[%s11350_s2 + $0x8] sm:$0xff] %v7361_v7  ;;  %v4581_v40 = vmul.f32 0.6931472, %v8821_v42  ;;  %v4764_v53 = vmul.f32 %v11284_v6, %v4763_v5  ;;  %v11379_v50 = vmul.f32 %v11293_v55, %v5384_v3  ;;  %v4846_v62 = vand.u32 2147483647, %v11313_v35  ;;  %v11395_v6 = vpop.f32.mrf.mxu1 }
 0x3fc   : > { %v7370_v29 = vadd.f32 %v4578_v43, %v17587_v28  ;;  %v4662_v58 = vmul.f32 0.6931472, %v8823_v15  ;;  %vm11386_vm10 = vcmp.lt.f32.partialorder %v5386_v34, 0.0004427343  ;;  %8836 = vpow2.f32 %v11282_v44  ;;  %v11397_v55 = vpop.f32.mrf.mxu0 }
 0x3fd   : > { %v4587_v19 = vsel %vm11315_vm5, %v11306_v24, %v4581_v40  ;;  %v4060_v8 = vmul.f32 1.442695, %v3630_v26  ;;  %v11393_v5 = vadd.f32 %v11184_v32, %v11121_v27  ;;  %2617 = vmatmul.mubr.bf16.gmra.mxu0 %v10993_v51  ;;  %2730 = vmatmul.mubr.bf16.gmra.mxu1 %v10904_v4  ;;  %v4844_v32 = vadd.f32 1.0, %v4843_v30  ;;  %v11434_v30 = vpop.f32.mrf.mxu1 }
 0x3fe   : > { %7690 = vst [vmem:[%s11350_s2 + $0x50] sm:$0xff] %v7370_v29  ;;  %v8825_v24 = vpop.eup %8824  ;;  %v7371_v14 = vadd.f32 %v4587_v19, %v17592_v16  ;;  %v4668_v44 = vsel %vm11321_vm6, %v11309_v0, %v4662_v58  ;;  %v11408_v26 = vadd.f32 %v11189_v63, %v11125_v9  ;;  %2626 = vmatprep.mubr.bf16.mxu0 %v17565_v48  ;;  %v17593_v3 = vmax.f32 %v11149_v25, 0.0 }
 0x3ff   : > { %v8827_v52 = vpop.eup %8826  ;;  %v4671_v61 = vmul.f32 0.6931472, %v8825_v24  ;;  %v5392_v46 = vmul.f32 -0.5, %v11333_v12  ;;  %8838 = vpow2.f32 %v4060_v8  ;;  %2739 = vmatprep.mubr.bf16.mxu1 %v17565_v48  ;;  %v5395_v59 = vand.u32 2147483647, %v11333_v12 }
 0x400   : > { %v7380_v4 = vadd.f32 %v4668_v44, %v17593_v3  ;;  %7691 = vst [vmem:[%s11350_s2 + $0x58] sm:$0xff] %v7371_v14  ;;  %v4752_v0 = vmul.f32 0.6931472, %v8827_v52  ;;  %v3250_v7 = vand.u32 2147483647, %v11393_v5  ;;  %v11420_v63 = vadd.f32 %v11191_v21, %v11125_v9  ;;  %v11436_v21 = vpop.f32.mrf.mxu0 }
 0x401   : > { %v8829_v34 = vpop.eup %8828  ;;  %v4677_v25 = vsel %vm11345_vm7, %v4674_v10, %v4671_v61  ;;  %vm11425_vm11 = vcmp.lt.f32.partialorder %v4846_v62, 0.0004427343  ;;  %v3311_v42 = vand.u32 2147483647, %v11408_v26  ;;  %v11432_v43 = vadd.f32 %v11200_v33, %v11121_v27 }
 0x402   : > { %7700 = vst [vmem:[%s11350_s2 + $0xa0] sm:$0xff] %v7380_v4  ;;  %v17596_v15 = vmax.f32 %v11156_v11, 0.0  ;;  %v4758_v10 = vsel %vm11365_vm8, %v4755_v41, %v4752_v0  ;;  %v4761_v28 = vmul.f32 0.6931472, %v8829_v34  ;;  %v3570_v29 = vsub.f32 0.0, %v3250_v7  ;;  %v8831_v40 = vpop.eup %8830  ;;  %v11456_v4 = vpop.f32.mrf.mxu1 }
 0x403   : > { %v17597_v58 = vmax.f32 %v11159_v56, 0.0  ;;  %v5393_v19 = vadd.f32 1.0, %v5392_v46  ;;  %v3631_v33 = vsub.f32 0.0, %v3311_v42  ;;  %v3251_v8 = vand.u32 2147483647, %v11420_v63  ;;  %v11458_v23 = vpop.f32.mrf.mxu0 }
 0x404   : > { %v7381_v57 = vadd.f32 %v4677_v25, %v17596_v15  ;;  %v4767_v24 = vsel %vm11373_vm9, %v4764_v53, %v4761_v28  ;;  %v5382_v11 = vmul.f32 0.6931472, %v8831_v40  ;;  %v3940_v16 = vmul.f32 1.442695, %v3570_v29  ;;  %v8833_v41 = vpop.eup %8832  ;;  %v11482_v15 = vpop.f32.mrf.mxu1 }
 0x405   : > { %v7390_v62 = vadd.f32 %v4758_v10, %v17597_v58  ;;  %v11450_v17 = vadd.f32 %v11202_v36, %v11121_v27  ;;  %v17598_v56 = vmax.f32 %v11164_v54, 0.0  ;;  %v4062_v44 = vmul.f32 1.442695, %v3631_v33  ;;  %2627 = vmatmul.mubr.bf16.gmra.mxu0 %v11008_v38  ;;  %2740 = vmatmul.mubr.bf16.gmra.mxu1 %v10924_v13  ;;  %v11484_v49 = vpop.f32.mrf.mxu0  ;;  %v17617_v38 = vld [vmem:[#allocation23_spill] sm:$0xff] }
 0x406   : > { %7701 = vst [vmem:[%s11350_s2 + $0xa8] sm:$0xff] %v7381_v57  ;;  %v3571_v52 = vsub.f32 0.0, %v3251_v8  ;;  %v3260_v3 = vand.u32 2147483647, %v11432_v43  ;;  %v5388_v36 = vsel %vm11386_vm10, %v11379_v50, %v5382_v11  ;;  %v4842_v53 = vmul.f32 0.6931472, %v8833_v41  ;;  %2636 = vmatprep.mubr.bf16.mxu0 %v17565_v48  ;;  %2749 = vmatprep.mubr.bf16.mxu1 %v17565_v48  ;;  %v11500_v33 = vpop.f32.mrf.mxu1 }
 0x407   : > { %7710 = vst [vmem:[%s11350_s2 + $0xf0] sm:$0xff] %v7390_v62  ;;  %v7391_v14 = vadd.f32 %v4767_v24, %v17598_v56  ;;  %v4845_v54 = vmul.f32 %v11313_v35, %v4844_v32  ;;  %8840 = vpow2.f32 %v3940_v16  ;;  %v17599_v61 = vmax.f32 %v11167_v20, 0.0  ;;  %v8835_v7 = vpop.eup %8834  ;;  %v11502_v8 = vpop.f32.mrf.mxu0 }
 0x408   : > { %8842 = vpow2.f32 %v4062_v44  ;;  %v3942_v0 = vmul.f32 1.442695, %v3571_v52  ;;  %v3580_v13 = vsub.f32 0.0, %v3260_v3  ;;  %v5394_v1 = vmul.f32 %v11333_v12, %v5393_v19 }
 0x409   : > { %7711 = vst [vmem:[%s11350_s2 + $0xf8] sm:$0xff] %v7391_v14  ;;  %v7460_v46 = vadd.f32 %v5388_v36, %v17599_v61  ;;  %v4848_v50 = vsel %vm11425_vm11, %v4845_v54, %v4842_v53  ;;  %v3320_v35 = vand.u32 2147483647, %v11450_v17  ;;  %v11477_v32 = vadd.f32 %v11215_v31, %v11125_v9  ;;  %v11486_v57 = vpop.eup %8836  ;;  %v17602_v14 = vld [vmem:[#allocation36_spill] sm:$0xff]  ;;  %v17604_v36 = vld [vmem:[#allocation37_spill] sm:$0xff] }
 0x40a   : > { %v17600_v20 = vmax.f32 %v11176_v60, 0.0  ;;  %v5391_v25 = vmul.f32 0.6931472, %v8835_v7  ;;  %8844 = vpow2.f32 %v3942_v0  ;;  %v3960_v42 = vmul.f32 1.442695, %v3580_v13  ;;  %v17605_v0 = vld [vmem:[#allocation38_spill] sm:$0xff]  ;;  %v11529_v7 = vpop.f32.mrf.mxu1 }
 0x40b   : > { %7780 = vst [vmem:[%s11350_s2 + $0x320] sm:$0xff] %v7460_v46  ;;  %v2981_v12 = vmax.f32 %v11181_v18, 0.0  ;;  %vm5396_vm12 = vcmp.lt.f32.partialorder %v5395_v59, 0.0004427343  ;;  %v3640_v10 = vsub.f32 0.0, %v3320_v35  ;;  %v4849_v60 = vadd.f32 1.0, %v11486_v57 }
 0x40c   : > { %v7400_v34 = vadd.f32 %v4848_v50, %v17600_v20  ;;  %v3261_v31 = vand.u32 2147483647, %v11477_v32  ;;  %v5397_v28 = vsel %vm5396_vm12, %v5394_v1, %v5391_v25  ;;  %v11494_v29 = vadd.f32 %v11217_v2, %v11125_v9  ;;  %v11496_v40 = vpop.eup %8838  ;;  %v17601_v2 = vld [vmem:[#allocation35_spill] sm:$0xff]  ;;  %v11531_v50 = vpop.f32.mrf.mxu0 }
 0x40d   : > { %v7461_v58 = vadd.f32 %v5397_v28, %v2981_v12  ;;  %8846 = vpow2.f32 %v3960_v42  ;;  %v4080_v62 = vmul.f32 1.442695, %v3640_v10  ;;  %v5470_v18 = vadd.f32 1.0, %v11496_v40  ;;  %2637 = vmatmul.mubr.bf16.gmra.mxu0 %v11018_v37  ;;  %2750 = vmatmul.mubr.bf16.gmra.mxu1 %v10944_v22  ;;  %v17603_v22 = vld [vmem:[#allocation42_spill] sm:$0xff] }
 0x40e   : > { %7720 = vst [vmem:[%s11350_s2 + $0x140] sm:$0xff] %v7400_v34  ;;  %v3581_v19 = vsub.f32 0.0, %v3261_v31  ;;  %8848 = vlog2.f32 %v4849_v60  ;;  %2646 = vmatprep.mubr.bf16.mxu0 %v17565_v48  ;;  %2759 = vmatprep.mubr.bf16.mxu1 %v17565_v48  ;;  %v4852_v41 = vmul.f32 -0.5, %v11486_v57  ;;  %v3321_v56 = vand.u32 2147483647, %v11494_v29 }
 0x40f   : > { %7781 = vst [vmem:[%s11350_s2 + $0x328] sm:$0xff] %v7461_v58  ;;  %8850 = vpow2.f32 %v4080_v62  ;;  %v11515_v44 = vadd.f32 %v17602_v14, %v11121_v27  ;;  %v5473_v3 = vmul.f32 -0.5, %v11496_v40  ;;  %v11521_v53 = vadd.f32 %v17604_v36, %v11121_v27  ;;  %v11549_v14 = vpop.f32.mrf.mxu0  ;;  %v17606_v36 = vld [vmem:[#allocation30_spill] sm:$0xff] }
 0x410   : > { %v3962_v11 = vmul.f32 1.442695, %v3581_v19  ;;  %8852 = vlog2.f32 %v5470_v18  ;;  %v3641_v61 = vsub.f32 0.0, %v3321_v56  ;;  %v11527_v13 = vadd.f32 %v17605_v0, %v11125_v9 }
 0x411   : > { %v3270_v46 = vand.u32 2147483647, %v11515_v44  ;;  %v3330_v34 = vand.u32 2147483647, %v11521_v53  ;;  %v4853_v42 = vadd.f32 1.0, %v4852_v41  ;;  %v5474_v60 = vadd.f32 1.0, %v5473_v3  ;;  %v11547_v41 = vpop.f32.mrf.mxu1 }
 0x412   : > { %8854 = vpow2.f32 %v3962_v11  ;;  %v4855_v12 = vand.u32 2147483647, %v11486_v57  ;;  %v4082_v10 = vmul.f32 1.442695, %v3641_v61  ;;  %v5476_v58 = vand.u32 2147483647, %v11496_v40 }
 0x413   : > { %v3590_v31 = vsub.f32 0.0, %v3270_v46  ;;  %v3650_v11 = vsub.f32 0.0, %v3330_v34  ;;  %v3271_v56 = vand.u32 2147483647, %v11527_v13  ;;  %v17607_v61 = vld [vmem:[#allocation25_spill] sm:$0xff]  ;;  %v4854_v34 = vmul.f32 %v11486_v57, %v4853_v42  ;;  %v11574_v46 = vpop.f32.mrf.mxu1 }
 0x414   : > { %v11537_v25 = vpop.eup %8840  ;;  %8856 = vpow2.f32 %v4082_v10  ;;  %vm11560_vm13 = vcmp.lt.f32.partialorder %v4855_v12, 0.0004427343  ;;  %vm11566_vm14 = vcmp.lt.f32.partialorder %v5476_v58, 0.0004427343  ;;  %17612 = vst [vmem:[#allocation35_spill] sm:$0xff] %v11574_v46 }
 0x415   : > { %v11540_v28 = vpop.eup %8842  ;;  %v4930_v62 = vadd.f32 1.0, %v11537_v25  ;;  %2647 = vmatmul.mubr.bf16.gmra.mxu0 %v17606_v36  ;;  %2760 = vmatmul.mubr.bf16.gmra.mxu1 %v17607_v61  ;;  %v3980_v16 = vmul.f32 1.442695, %v3590_v31  ;;  %v4933_v57 = vmul.f32 -0.5, %v11537_v25  ;;  %v4100_v42 = vmul.f32 1.442695, %v3650_v11  ;;  %v11596_v37 = vpop.f32.mrf.mxu1 }
 0x416   : > { %v5479_v18 = vadd.f32 1.0, %v11540_v28  ;;  %2656 = vmatprep.mubr.bf16.mxu0 %v17565_v48  ;;  %2769 = vmatprep.mubr.bf16.mxu1 %v17565_v48  ;;  %v3591_v12 = vsub.f32 0.0, %v3271_v56  ;;  %v4936_v11 = vand.u32 2147483647, %v11537_v25 }
 0x417   : > { %v11553_v3 = vpop.eup %8844  ;;  %8858 = vlog2.f32 %v4930_v62  ;;  %v5475_v62 = vmul.f32 %v11496_v40, %v5474_v60  ;;  %v5482_v40 = vmul.f32 -0.5, %v11540_v28  ;;  %v4934_v36 = vadd.f32 1.0, %v4933_v57 }
 0x418   : > { %8860 = vlog2.f32 %v5479_v18  ;;  %v4939_v61 = vadd.f32 1.0, %v11553_v3  ;;  %v11576_v18 = vpop.f32.mrf.mxu0  ;;  %v4942_v56 = vmul.f32 -0.5, %v11553_v3  ;;  %v3982_v52 = vmul.f32 1.442695, %v3591_v12 }
 0x419   : > { %8862 = vpow2.f32 %v3980_v16  ;;  %17613 = vst [vmem:[#allocation36_spill] sm:$0xff] %v11576_v18  ;;  %v17614_v16 = vld [vmem:[#allocation39_spill] sm:$0xff]  ;;  %v17618_v12 = vmax.f32 %v17601_v2, 0.0  ;;  %v5483_v46 = vadd.f32 1.0, %v5482_v40  ;;  %v4945_v10 = vand.u32 2147483647, %v11553_v3 }
 0x41a   : > { %v11571_v0 = vpop.eup %8846  ;;  %8864 = vlog2.f32 %v4939_v61  ;;  %v11583_v31 = vadd.f32 %v17614_v16, %v11125_v9  ;;  %v17619_v2 = vmax.f32 %v17603_v22, 0.0  ;;  %vm11615_vm15 = vcmp.lt.f32.partialorder %v4936_v11, 0.0004427343 }
 0x41b   : > { %v8849_v19 = vpop.eup %8848  ;;  %v5020_v60 = vadd.f32 1.0, %v11571_v0  ;;  %8866 = vpow2.f32 %v4100_v42  ;;  %v5023_v1 = vmul.f32 -0.5, %v11571_v0  ;;  %v11598_v42 = vpop.f32.mrf.mxu0  ;;  %v5026_v57 = vand.u32 2147483647, %v11571_v0 }
 0x41c   : > { %v11585_v20 = vpop.eup %8850  ;;  %v4851_v61 = vmul.f32 0.6931472, %v8849_v19  ;;  %v5485_v19 = vand.u32 2147483647, %v11540_v28  ;;  %17615 = vst [vmem:[#allocation42_spill] sm:$0xff] %v11598_v42  ;;  %v17634_v42 = vld [vmem:[#allocation24_spill] sm:$0xff] }
 0x41d   : > { %v8853_v35 = vpop.eup %8852  ;;  %8868 = vlog2.f32 %v5020_v60  ;;  %v5560_v54 = vadd.f32 1.0, %v11585_v20  ;;  %v17616_v60 = vld [vmem:[#allocation31_spill] sm:$0xff]  ;;  %2770 = vmatmul.mubr.bf16.gmra.mxu1 %v17617_v38  ;;  %vm11633_vm1 = vcmp.lt.f32.partialorder %v4945_v10, 0.0004427343  ;;  %vm11639_vm2 = vcmp.lt.f32.partialorder %v5026_v57, 0.0004427343 }
 0x41e   : > { %v4857_v16 = vsel %vm11560_vm13, %v4854_v34, %v4851_v61  ;;  %v5472_v24 = vmul.f32 0.6931472, %v8853_v35  ;;  %2657 = vmatmul.mubr.bf16.gmra.mxu0 %v17616_v60  ;;  %2779 = vmatprep.mubr.bf16.mxu1 %v17565_v48  ;;  %v4943_v34 = vadd.f32 1.0, %v4942_v56  ;;  %v5024_v61 = vadd.f32 1.0, %v5023_v1 }
 0x41f   : > { %v11591_v58 = vpop.eup %8854  ;;  %v7401_v18 = vadd.f32 %v4857_v16, %v17618_v12  ;;  %8870 = vlog2.f32 %v5560_v54  ;;  %2666 = vmatprep.mubr.bf16.mxu0 %v17565_v48  ;;  %v5563_v54 = vmul.f32 -0.5, %v11585_v20  ;;  %vm11619_vm0 = vcmp.lt.f32.partialorder %v5485_v19, 0.0004427343 }
 0x420   : > { %v5478_v35 = vsel %vm11566_vm14, %v5475_v62, %v5472_v24  ;;  %v5029_v38 = vadd.f32 1.0, %v11591_v58  ;;  %8872 = vpow2.f32 %v3982_v52  ;;  %v5032_v24 = vmul.f32 -0.5, %v11591_v58  ;;  %v11624_v62 = vpop.f32.mrf.mxu1 }
 0x421   : > { %7721 = vst [vmem:[%s11350_s2 + $0x148] sm:$0xff] %v7401_v18  ;;  %v7470_v40 = vadd.f32 %v5478_v35, %v17619_v2  ;;  %17624 = vst [vmem:[#allocation37_spill] sm:$0xff] %v11624_v62  ;;  %v11626_v18 = vpop.f32.mrf.mxu0  ;;  %v11628_v22 = vpop.eup %8856  ;;  %v4935_v52 = vmul.f32 %v11537_v25, %v4934_v36  ;;  %v5484_v1 = vmul.f32 %v11540_v28, %v5483_v46  ;;  %v3331_v56 = vand.u32 2147483647, %v11583_v31  ;;  %v17630_v2 = vld [vmem:[#allocation40_spill] sm:$0xff] }
 0x422   : > { %8874 = vlog2.f32 %v5029_v38  ;;  %17625 = vst [vmem:[#allocation38_spill] sm:$0xff] %v11626_v18  ;;  %v4944_v12 = vmul.f32 %v11553_v3, %v4943_v34  ;;  %v5569_v38 = vadd.f32 1.0, %v11628_v22  ;;  %v11646_v25 = vadd.f32 %v17630_v2, %v11121_v27  ;;  %v11653_v18 = vpop.f32.mrf.mxu1  ;;  %v17633_v2 = vld [vmem:[#allocation32_spill] sm:$0xff] }
 0x423   : > { %7790 = vst [vmem:[%s11350_s2 + $0x370] sm:$0xff] %v7470_v40  ;;  %v5025_v46 = vmul.f32 %v11571_v0, %v5024_v61  ;;  %v5564_v10 = vadd.f32 1.0, %v5563_v54  ;;  %v5566_v40 = vand.u32 2147483647, %v11585_v20  ;;  %v5033_v34 = vadd.f32 1.0, %v5032_v24  ;;  %17631 = vst [vmem:[#allocation25_spill] sm:$0xff] %v11653_v18  ;;  %v11655_v62 = vpop.f32.mrf.mxu0 }
 0x424   : > { %v8859_v19 = vpop.eup %8858  ;;  %v5035_v57 = vand.u32 2147483647, %v11591_v58  ;;  %8876 = vlog2.f32 %v5569_v38  ;;  %17632 = vst [vmem:[#allocation39_spill] sm:$0xff] %v11655_v62  ;;  %v5572_v61 = vmul.f32 -0.5, %v11628_v22  ;;  %v3651_v24 = vsub.f32 0.0, %v3331_v56 }
 0x425   : > { %v8861_v28 = vpop.eup %8860  ;;  %v4932_v36 = vmul.f32 0.6931472, %v8859_v19  ;;  %2780 = vmatmul.mubr.bf16.gmra.mxu1 %v17634_v42  ;;  %v17635_v38 = vmax.f32 %v11393_v5, 0.0  ;;  %v3280_v16 = vand.u32 2147483647, %v11646_v25  ;;  %v5565_v56 = vmul.f32 %v11585_v20, %v5564_v10 }
 0x426   : > { %v11650_v60 = vpop.eup %8862  ;;  %v5481_v3 = vmul.f32 0.6931472, %v8861_v28  ;;  %2667 = vmatmul.mubr.bf16.gmra.mxu0 %v17633_v2  ;;  %2789 = vmatprep.mubr.bf16.mxu1 %v17565_v48  ;;  %vm11675_vm3 = vcmp.lt.f32.partialorder %v5566_v40, 0.0004427343  ;;  %v17640_v20 = vmax.f32 %v11420_v63, 0.0 }
 0x427   : > { %v8865_v19 = vpop.eup %8864  ;;  %v4938_v0 = vsel %vm11615_vm15, %v4935_v52, %v4932_v36  ;;  %v5110_v54 = vadd.f32 1.0, %v11650_v60  ;;  %2676 = vmatprep.mubr.bf16.mxu0 %v17565_v48  ;;  %v17636_v36 = vmax.f32 %v11408_v26, 0.0  ;;  %v17639_v26 = vld [vmem:[#allocation41_spill] sm:$0xff]  ;;  %vm11691_vm4 = vcmp.lt.f32.partialorder %v5035_v57, 0.0004427343 }
 0x428   : > { %v7410_v28 = vadd.f32 %v4938_v0, %v17635_v38  ;;  %v5487_v42 = vsel %vm11619_vm0, %v5484_v1, %v5481_v3  ;;  %v4941_v2 = vmul.f32 0.6931472, %v8865_v19  ;;  %v11670_v52 = vpop.eup %8866  ;;  %v5575_v1 = vand.u32 2147483647, %v11628_v22 }
 0x429   : > { %v7471_v62 = vadd.f32 %v5487_v42, %v17636_v36  ;;  %8878 = vlog2.f32 %v5110_v54  ;;  %v5650_v3 = vadd.f32 1.0, %v11670_v52  ;;  %v11686_v19 = vadd.f32 %v17639_v26, %v11121_v27  ;;  %v11695_v54 = vpop.f32.mrf.mxu1  ;;  %v11702_v42 = vpop.f32.mrf.mxu0 }
 0x42a   : > { %v8869_v5 = vpop.eup %8868  ;;  %7730 = vst [vmem:[%s11350_s2 + $0x190] sm:$0xff] %v7410_v28  ;;  %v4947_v59 = vsel %vm11633_vm1, %v4944_v12, %v4941_v2  ;;  %v4102_v11 = vmul.f32 1.442695, %v3651_v24  ;;  %v5034_v2 = vmul.f32 %v11591_v58, %v5033_v34  ;;  %v5573_v38 = vadd.f32 1.0, %v5572_v61 }
 0x42b   : > { %7791 = vst [vmem:[%s11350_s2 + $0x378] sm:$0xff] %v7471_v62  ;;  %v7411_v10 = vadd.f32 %v4947_v59, %v17640_v20  ;;  %v5022_v40 = vmul.f32 0.6931472, %v8869_v5  ;;  %8880 = vlog2.f32 %v5650_v3  ;;  %v3600_v28 = vsub.f32 0.0, %v3280_v16 }
 0x42c   : > { %v8871_v12 = vpop.eup %8870  ;;  %v5113_v57 = vmul.f32 -0.5, %v11650_v60  ;;  %8882 = vpow2.f32 %v4102_v11  ;;  %v17643_v36 = vmax.f32 %v11432_v43, 0.0  ;;  %vm11708_vm5 = vcmp.lt.f32.partialorder %v5575_v1, 0.0004427343  ;;  %v11718_v43 = vpop.f32.mrf.mxu1 }
 0x42d   : > { %7731 = vst [vmem:[%s11350_s2 + $0x198] sm:$0xff] %v7411_v10  ;;  %v5028_v62 = vsel %vm11639_vm2, %v5025_v46, %v5022_v40  ;;  %v5562_v63 = vmul.f32 0.6931472, %v8871_v12  ;;  %v11704_v24 = vpop.eup %8872  ;;  %v4000_v34 = vmul.f32 1.442695, %v3600_v28  ;;  %v5653_v59 = vmul.f32 -0.5, %v11670_v52  ;;  %v11728_v12 = vpop.f32.mrf.mxu0 }
 0x42e   : > { %v7420_v5 = vadd.f32 %v5028_v62, %v17643_v36  ;;  %v3340_v35 = vand.u32 2147483647, %v11686_v19  ;;  %v5116_v16 = vand.u32 2147483647, %v11650_v60  ;;  %v5119_v3 = vadd.f32 1.0, %v11704_v24  ;;  %17646 = vst [vmem:[#allocation23_spill] sm:$0xff] %v11718_v43 }
 0x42f   : > { %v8875_v46 = vpop.eup %8874  ;;  %v5568_v61 = vsel %vm11675_vm3, %v5565_v56, %v5562_v63  ;;  %v17647_v1 = vmax.f32 %v11450_v17, 0.0  ;;  %8884 = vpow2.f32 %v4000_v34  ;;  %v5574_v40 = vmul.f32 %v11628_v22, %v5573_v38  ;;  %v17648_v56 = vld [vmem:[#allocation43_spill] sm:$0xff]  ;;  %17649 = vst [vmem:[#allocation40_spill] sm:$0xff] %v11728_v12  ;;  %v17650_v62 = vld [vmem:[#allocation44_spill] sm:$0xff]  ;;  %v17651_v22 = vld [vmem:[#allocation45_spill] sm:$0xff] }
 0x430   : > { %7740 = vst [vmem:[%s11350_s2 + $0x1e0] sm:$0xff] %v7420_v5  ;;  %v5031_v20 = vmul.f32 0.6931472, %v8875_v46  ;;  %v3660_v10 = vsub.f32 0.0, %v3340_v35  ;;  %v5114_v18 = vadd.f32 1.0, %v5113_v57  ;;  %8886 = vlog2.f32 %v5119_v3  ;;  %v11749_v35 = vpop.f32.mrf.mxu1 }
 0x431   : > { %v7480_v26 = vadd.f32 %v5568_v61, %v17647_v1  ;;  %v11726_v11 = vadd.f32 %v17648_v56, %v11125_v9  ;;  %v11735_v63 = vadd.f32 %v17650_v62, %v11125_v9  ;;  %v11739_v38 = vadd.f32 %v17651_v22, %v11121_v27  ;;  %v8877_v57 = vpop.eup %8876  ;;  %17655 = vst [vmem:[#allocation24_spill] sm:$0xff] %v11749_v35  ;;  %v17658_v62 = vld [vmem:[#allocation47_spill] sm:$0xff] }
 0x432   : > { %v5037_v28 = vsel %vm11691_vm4, %v5034_v2, %v5031_v20  ;;  %v4120_v17 = vmul.f32 1.442695, %v3660_v10  ;;  %v17652_v36 = vmax.f32 %v11477_v32, 0.0  ;;  %vm11743_vm6 = vcmp.lt.f32.partialorder %v5116_v16, 0.0004427343  ;;  %v11759_v10 = vpop.f32.mrf.mxu0 }
 0x433   : > { %7800 = vst [vmem:[%s11350_s2 + $0x3c0] sm:$0xff] %v7480_v26  ;;  %v5656_v0 = vand.u32 2147483647, %v11670_v52  ;;  %v3281_v2 = vand.u32 2147483647, %v11726_v11  ;;  %v5654_v61 = vadd.f32 1.0, %v5653_v59  ;;  %v5115_v1 = vmul.f32 %v11650_v60, %v5114_v18 }
 0x434   : > { %v7421_v5 = vadd.f32 %v5037_v28, %v17652_v36  ;;  %v5571_v46 = vmul.f32 0.6931472, %v8877_v57  ;;  %8888 = vpow2.f32 %v4120_v17  ;;  %v3341_v3 = vand.u32 2147483647, %v11735_v63  ;;  %v17656_v26 = vld [vmem:[#allocation46_spill] sm:$0xff]  ;;  %17657 = vst [vmem:[#allocation41_spill] sm:$0xff] %v11759_v10 }
 0x435   : > { %v3601_v32 = vsub.f32 0.0, %v3281_v2  ;;  %v3290_v16 = vand.u32 2147483647, %v11739_v38  ;;  %v11757_v20 = vadd.f32 %v17656_v26, %v11121_v27  ;;  %v5122_v59 = vmul.f32 -0.5, %v11704_v24  ;;  %v11770_v2 = vpop.f32.mrf.mxu1  ;;  %v17661_v26 = vld [vmem:[#allocation26_spill] sm:$0xff] }
 0x436   : > { %7741 = vst [vmem:[%s11350_s2 + $0x1e8] sm:$0xff] %v7421_v5  ;;  %v8879_v56 = vpop.eup %8878  ;;  %v5577_v28 = vsel %vm11708_vm5, %v5574_v40, %v5571_v46  ;;  %v3661_v17 = vsub.f32 0.0, %v3341_v3  ;;  %v11766_v60 = vadd.f32 %v17658_v62, %v11125_v9  ;;  %v17659_v18 = vmax.f32 %v11494_v29, 0.0  ;;  %17660 = vst [vmem:[#allocation43_spill] sm:$0xff] %v11770_v2  ;;  %2790 = vmatmul.mubr.bf16.gmra.mxu1 %v17661_v26 }
 0x437   : > { %v5112_v57 = vmul.f32 0.6931472, %v8879_v56  ;;  %v4002_v36 = vmul.f32 1.442695, %v3601_v32  ;;  %v3610_v5 = vsub.f32 0.0, %v3290_v16  ;;  %v5655_v58 = vmul.f32 %v11670_v52, %v5654_v61  ;;  %2799 = vmatprep.mubr.bf16.mxu1 %v17565_v48  ;;  %v11784_v52 = vpop.f32.mrf.mxu0 }
 0x438   : > { %v7481_v22 = vadd.f32 %v5577_v28, %v17659_v18  ;;  %vm11774_vm7 = vcmp.lt.f32.partialorder %v5656_v0, 0.0004427343  ;;  %v4122_v46 = vmul.f32 1.442695, %v3661_v17  ;;  %v3350_v3 = vand.u32 2147483647, %v11757_v20  ;;  %v8881_v29 = vpop.eup %8880 }
 0x439   : > { %v5118_v32 = vsel %vm11743_vm6, %v5115_v1, %v5112_v57  ;;  %8890 = vpow2.f32 %v4002_v36  ;;  %v4020_v16 = vmul.f32 1.442695, %v3610_v5  ;;  %v3291_v56 = vand.u32 2147483647, %v11766_v60  ;;  %17664 = vst [vmem:[#allocation44_spill] sm:$0xff] %v11784_v52  ;;  %v17665_v0 = vld [vmem:[#allocation33_spill] sm:$0xff]  ;;  %v11787_v61 = vpop.eup %8882 }
 0x43a   : > { %7801 = vst [vmem:[%s11350_s2 + $0x3c8] sm:$0xff] %v7481_v22  ;;  %2677 = vmatmul.mubr.bf16.gmra.mxu0 %v17665_v0  ;;  %v17666_v28 = vmax.f32 %v11515_v44, 0.0  ;;  %v5652_v62 = vmul.f32 0.6931472, %v8881_v29  ;;  %8892 = vpow2.f32 %v4122_v46  ;;  %v3670_v18 = vsub.f32 0.0, %v3350_v3  ;;  %v17667_v1 = vld [vmem:[#allocation48_spill] sm:$0xff] }
 0x43b   : > { %v5123_v22 = vadd.f32 1.0, %v5122_v59  ;;  %v5659_v34 = vadd.f32 1.0, %v11787_v61  ;;  %8894 = vpow2.f32 %v4020_v16  ;;  %v11794_v57 = vadd.f32 %v17667_v1, %v11125_v9  ;;  %v10072_v3 = vld [vmem:[#allocation14] sm:$0xff] }
 0x43c   : > { %v7430_v17 = vadd.f32 %v5118_v32, %v17666_v28  ;;  %v5658_v36 = vsel %vm11774_vm7, %v5655_v58, %v5652_v62  ;;  %v5125_v5 = vand.u32 2147483647, %v11704_v24  ;;  %v4140_v44 = vmul.f32 1.442695, %v3670_v18  ;;  %v8885_v29 = vpop.eup %8884 }
 0x43d   : > { %v3611_v26 = vsub.f32 0.0, %v3291_v56  ;;  %v17668_v46 = vmax.f32 %v11521_v53, 0.0  ;;  %8896 = vlog2.f32 %v5659_v34  ;;  %v17669_v32 = vsub.s32 2, %v11111_v45  ;;  %v8887_v40 = vpop.eup %8886 }
 0x43e   : > { %7750 = vst [vmem:[%s11350_s2 + $0x230] sm:$0xff] %v7430_v17  ;;  %v17670_v28 = vsub.s32 3, %v11111_v45  ;;  %v2951_v58 = vmax.f32 %v11527_v13, 0.0  ;;  %v5662_v62 = vmul.f32 -0.5, %v11787_v61  ;;  %v5200_v56 = vadd.f32 1.0, %v8885_v29 }
 0x43f   : > { %v7490_v59 = vadd.f32 %v5658_v36, %v17668_v46  ;;  %v11804_v16 = vrot.slane %v10072_v3, %v17669_v32  ;;  %8898 = vpow2.f32 %v4140_v44  ;;  %v5121_v53 = vmul.f32 0.6931472, %v8887_v40 }
 0x440   : > { %v11808_v17 = vrot.slane %v10072_v3, %v17670_v28  ;;  %v5124_v18 = vmul.f32 %v11704_v24, %v5123_v22  ;;  %v4022_v34 = vmul.f32 1.442695, %v3611_v26  ;;  %v3351_v1 = vand.u32 2147483647, %v11794_v57 }
 0x441   : > { %7810 = vst [vmem:[%s11350_s2 + $0x410] sm:$0xff] %v7490_v59  ;;  %vm5126_vm8 = vcmp.lt.f32.partialorder %v5125_v5, 0.0004427343  ;;  %8900 = vlog2.f32 %v5200_v56  ;;  %v11818_v46 = vadd.f32 %v11358_v47, %v11121_v27  ;;  %v8889_v13 = vpop.eup %8888  ;;  %v5203_v24 = vmul.f32 -0.5, %v8885_v29 }
 0x442   : > { %v5127_v3 = vsel %vm5126_vm8, %v5124_v18, %v5121_v53  ;;  %8902 = vpow2.f32 %v4022_v34  ;;  %v3671_v59 = vsub.f32 0.0, %v3351_v1  ;;  %v5740_v26 = vadd.f32 1.0, %v8889_v13 }
 0x443   : > { %v7431_v32 = vadd.f32 %v5127_v3, %v2951_v58  ;;  %v5663_v5 = vadd.f32 1.0, %v5662_v62  ;;  %v5665_v28 = vand.u32 2147483647, %v11787_v61  ;;  %v5206_v47 = vand.u32 2147483647, %v8885_v29 }
 0x444   : > { %v4142_v56 = vmul.f32 1.442695, %v3671_v59  ;;  %8904 = vlog2.f32 %v5740_v26  ;;  %v3360_v53 = vand.u32 2147483647, %v11818_v46  ;;  %v11828_v18 = vadd.f32 %v11360_v39, %v11804_v16 }
 0x445   : > { %7751 = vst [vmem:[%s11350_s2 + $0x238] sm:$0xff] %v7431_v32  ;;  %v5743_v58 = vmul.f32 -0.5, %v8889_v13  ;;  %v5204_v3 = vadd.f32 1.0, %v5203_v24  ;;  %vm11836_vm9 = vcmp.lt.f32.partialorder %v5665_v28, 0.0004427343  ;;  %v11879_v22 = vadd.f32 %v11434_v30, %v11121_v27 }
 0x446   : > { %8906 = vpow2.f32 %v4142_v56  ;;  %v11832_v62 = vpop.eup %8890  ;;  %v3680_v26 = vsub.f32 0.0, %v3360_v53  ;;  %v5746_v39 = vand.u32 2147483647, %v8889_v13  ;;  %v5664_v56 = vmul.f32 %v11787_v61, %v5663_v5 }
 0x447   : > { %v8893_v40 = vpop.eup %8892  ;;  %v5209_v44 = vadd.f32 1.0, %v11832_v62  ;;  %vm11845_vm10 = vcmp.lt.f32.partialorder %v5206_v47, 0.0004427343  ;;  %v3202_v53 = vand.u32 2147483647, %v11828_v18  ;;  %v5744_v28 = vadd.f32 1.0, %v5743_v58 }
 0x448   : > { %v11842_v1 = vpop.eup %8894  ;;  %v5749_v32 = vadd.f32 1.0, %v8893_v40  ;;  %v4160_v36 = vmul.f32 1.442695, %v3680_v26  ;;  %v5205_v0 = vmul.f32 %v8885_v29, %v5204_v3  ;;  %v11854_v61 = vadd.f32 %v11395_v6, %v11125_v9 }
 0x449   : > { %8908 = vlog2.f32 %v5209_v44  ;;  %v5290_v59 = vadd.f32 1.0, %v11842_v1  ;;  %vm11858_vm11 = vcmp.lt.f32.partialorder %v5746_v39, 0.0004427343  ;;  %v5212_v44 = vmul.f32 -0.5, %v11832_v62 }
 0x44a   : > { %v8897_v45 = vpop.eup %8896  ;;  %8910 = vlog2.f32 %v5749_v32  ;;  %v5752_v58 = vmul.f32 -0.5, %v8893_v40  ;;  %v5215_v29 = vand.u32 2147483647, %v11832_v62  ;;  %v3522_v32 = vsub.f32 0.0, %v3202_v53 }
 0x44b   : > { %v5661_v47 = vmul.f32 0.6931472, %v8897_v45  ;;  %8912 = vlog2.f32 %v5290_v59  ;;  %v11867_v6 = vadd.f32 %v11397_v55, %v11808_v17  ;;  %v5745_v39 = vmul.f32 %v8889_v13, %v5744_v28  ;;  %v11889_v28 = vpop.f32.mrf.mxu1 }
 0x44c   : > { %v11856_v5 = vpop.eup %8898  ;;  %v5755_v34 = vand.u32 2147483647, %v8893_v40  ;;  %8914 = vpow2.f32 %v4160_v36  ;;  %v17677_v59 = vmax.f32 %v11583_v31, 0.0  ;;  %v5293_v53 = vmul.f32 -0.5, %v11842_v1 }
 0x44d   : > { %v5830_v3 = vadd.f32 1.0, %v11856_v5  ;;  %v5667_v45 = vsel %vm11836_vm9, %v5664_v56, %v5661_v47  ;;  %v5213_v12 = vadd.f32 1.0, %v5212_v44  ;;  %v5753_v43 = vadd.f32 1.0, %v5752_v58 }
 0x44e   : > { %v8901_v26 = vpop.eup %8900  ;;  %v7491_v10 = vadd.f32 %v5667_v45, %v17677_v59  ;;  %vm11884_vm12 = vcmp.lt.f32.partialorder %v5215_v29, 0.0004427343  ;;  %v3844_v13 = vmul.f32 1.442695, %v3522_v32  ;;  %v3361_v56 = vand.u32 2147483647, %v11854_v61 }
 0x44f   : > { %v11871_v2 = vpop.eup %8902  ;;  %v5202_v35 = vmul.f32 0.6931472, %v8901_v26  ;;  %8916 = vlog2.f32 %v5830_v3  ;;  %v17680_v44 = vmax.f32 %v11646_v25, 0.0  ;;  %vm11893_vm13 = vcmp.lt.f32.partialorder %v5755_v34, 0.0004427343 }
 0x450   : > { %v5299_v55 = vadd.f32 1.0, %v11871_v2  ;;  %7811 = vst [vmem:[%s11350_s2 + $0x418] sm:$0xff] %v7491_v10  ;;  %v5296_v10 = vand.u32 2147483647, %v11842_v1  ;;  %v5294_v24 = vadd.f32 1.0, %v5293_v53  ;;  %v3681_v29 = vsub.f32 0.0, %v3361_v56  ;;  %v11908_v53 = vpop.f32.mrf.mxu1 }
 0x451   : > { %v5208_v36 = vsel %vm11845_vm10, %v5205_v0, %v5202_v35  ;;  %v8905_v47 = vpop.eup %8904  ;;  %v5214_v3 = vmul.f32 %v11832_v62, %v5213_v12  ;;  %v5754_v32 = vmul.f32 %v8893_v40, %v5753_v43  ;;  %v5833_v25 = vmul.f32 -0.5, %v11856_v5 }
 0x452   : > { %v7440_v58 = vadd.f32 %v5208_v36, %v17680_v44  ;;  %8918 = vlog2.f32 %v5299_v55  ;;  %v5742_v0 = vmul.f32 0.6931472, %v8905_v47  ;;  %v5302_v45 = vmul.f32 -0.5, %v11871_v2 }
 0x453   : > { %v11898_v35 = vpop.eup %8906  ;;  %8920 = vpow2.f32 %v3844_v13  ;;  %v4162_v59 = vmul.f32 1.442695, %v3681_v29  ;;  %v3203_v55 = vand.u32 2147483647, %v11867_v6  ;;  %v17683_v36 = vmax.f32 %v11686_v19, 0.0 }
 0x454   : > { %7760 = vst [vmem:[%s11350_s2 + $0x280] sm:$0xff] %v7440_v58  ;;  %v5839_v34 = vadd.f32 1.0, %v11898_v35  ;;  %v5748_v26 = vsel %vm11858_vm11, %v5745_v39, %v5742_v0  ;;  %vm11912_vm14 = vcmp.lt.f32.partialorder %v5296_v10, 0.0004427343  ;;  %v5836_v12 = vand.u32 2147483647, %v11856_v5 }
 0x455   : > { %v7500_v13 = vadd.f32 %v5748_v26, %v17683_v36  ;;  %v5295_v40 = vmul.f32 %v11842_v1, %v5294_v24  ;;  %v3523_v62 = vsub.f32 0.0, %v3203_v55  ;;  %v3370_v39 = vand.u32 2147483647, %v11879_v22  ;;  %v11925_v1 = vpop.f32.mrf.mxu1 }
 0x456   : > { %8922 = vlog2.f32 %v5839_v34  ;;  %v8909_v52 = vpop.eup %8908  ;;  %v5834_v44 = vadd.f32 1.0, %v5833_v25  ;;  %v5305_v19 = vand.u32 2147483647, %v11871_v2  ;;  %v11923_v58 = vadd.f32 %v11436_v21, %v11804_v16 }
 0x457   : > { %8924 = vpow2.f32 %v4162_v59  ;;  %v8911_v56 = vpop.eup %8910  ;;  %7820 = vst [vmem:[%s11350_s2 + $0x460] sm:$0xff] %v7500_v13  ;;  %v5211_v47 = vmul.f32 0.6931472, %v8909_v52  ;;  %v5303_v29 = vadd.f32 1.0, %v5302_v45  ;;  %v3846_v34 = vmul.f32 1.442695, %v3523_v62 }
 0x458   : > { %v8913_v10 = vpop.eup %8912  ;;  %v5751_v0 = vmul.f32 0.6931472, %v8911_v56  ;;  %v3690_v26 = vsub.f32 0.0, %v3370_v39  ;;  %v3212_v25 = vand.u32 2147483647, %v11923_v58  ;;  %v11932_v55 = vadd.f32 %v11456_v4, %v11125_v9 }
 0x459   : > { %v5217_v24 = vsel %vm11884_vm12, %v5214_v3, %v5211_v47  ;;  %v5292_v59 = vmul.f32 0.6931472, %v8913_v10  ;;  %v11934_v21 = vpop.eup %8914  ;;  %v17686_v36 = vmax.f32 %v11726_v11, 0.0  ;;  %8926 = vpow2.f32 %v3846_v34  ;;  %v11950_v10 = vpop.f32.mrf.mxu1 }
 0x45a   : > { %v5757_v13 = vsel %vm11893_vm13, %v5754_v32, %v5751_v0  ;;  %v4180_v52 = vmul.f32 1.442695, %v3690_v26  ;;  %v17687_v3 = vmax.f32 %v11735_v63, 0.0  ;;  %v5842_v4 = vmul.f32 -0.5, %v11898_v35  ;;  %v17689_v63 = vld [vmem:[#allocation27_spill] sm:$0xff] }
 0x45b   : > { %v7441_v45 = vadd.f32 %v5217_v24, %v17686_v36  ;;  %v5298_v39 = vsel %vm11912_vm14, %v5295_v40, %v5292_v59  ;;  %v5920_v56 = vadd.f32 1.0, %v11934_v21  ;;  %v17688_v11 = vmax.f32 %v11739_v38, 0.0  ;;  %2800 = vmatmul.mubr.bf16.gmra.mxu1 %v17689_v63 }
 0x45c   : > { %v8917_v31 = vpop.eup %8916  ;;  %v7501_v62 = vadd.f32 %v5757_v13, %v17687_v3  ;;  %v5835_v32 = vmul.f32 %v11856_v5, %v5834_v44  ;;  %8928 = vpow2.f32 %v4180_v52  ;;  %vm5837_vm15 = vcmp.lt.f32.partialorder %v5836_v12, 0.0004427343  ;;  %2809 = vmatprep.mubr.bf16.mxu1 %v17565_v48 }
 0x45d   : > { %7761 = vst [vmem:[%s11350_s2 + $0x288] sm:$0xff] %v7441_v45  ;;  %v7450_v30 = vadd.f32 %v5298_v39, %v17688_v11  ;;  %v5832_v47 = vmul.f32 0.6931472, %v8917_v31  ;;  %8930 = vlog2.f32 %v5920_v56  ;;  %v3532_v43 = vsub.f32 0.0, %v3212_v25 }
 0x45e   : > { %7821 = vst [vmem:[%s11350_s2 + $0x468] sm:$0xff] %v7501_v62  ;;  %v11956_v40 = vadd.f32 %v11458_v23, %v11808_v17  ;;  %v5304_v5 = vmul.f32 %v11871_v2, %v5303_v29  ;;  %v2882_v44 = vmax.f32 %v11828_v18, 0.0  ;;  %v3371_v34 = vand.u32 2147483647, %v11932_v55 }
 0x45f   : > { %v8919_v38 = vpop.eup %8918  ;;  %7770 = vst [vmem:[%s11350_s2 + $0x2d0] sm:$0xff] %v7450_v30  ;;  %v5838_v0 = vsel %vm5837_vm15, %v5835_v32, %v5832_v47  ;;  %v17690_v12 = vmax.f32 %v11757_v20, 0.0  ;;  %v5843_v23 = vadd.f32 1.0, %v5842_v4  ;;  %v3864_v25 = vmul.f32 1.442695, %v3532_v43 }
 0x460   : > { %v11963_v26 = vpop.eup %8920  ;;  %v5301_v59 = vmul.f32 0.6931472, %v8919_v38  ;;  %vm5306_vm0 = vcmp.lt.f32.partialorder %v5305_v19, 0.0004427343  ;;  %v5845_v36 = vand.u32 2147483647, %v11898_v35  ;;  %v11973_v52 = vadd.f32 %v11482_v15, %v11121_v27 }
 0x461   : > { %v7510_v24 = vadd.f32 %v5838_v0, %v17690_v12  ;;  %v4498_v45 = vadd.f32 1.0, %v11963_v26  ;;  %v3691_v13 = vsub.f32 0.0, %v3371_v34  ;;  %8932 = vpow2.f32 %v3864_v25 }
 0x462   : > { %v5307_v2 = vsel %vm5306_vm0, %v5304_v5, %v5301_v59  ;;  %v3213_v29 = vand.u32 2147483647, %v11956_v40  ;;  %v17691_v31 = vmax.f32 %v11766_v60, 0.0  ;;  %v5923_v19 = vmul.f32 -0.5, %v11934_v21 }
 0x463   : > { %7830 = vst [vmem:[%s11350_s2 + $0x4b0] sm:$0xff] %v7510_v24  ;;  %v8923_v20 = vpop.eup %8922  ;;  %8934 = vlog2.f32 %v4498_v45  ;;  %v3041_v62 = vmax.f32 %v11854_v61, 0.0  ;;  %v5844_v56 = vmul.f32 %v11898_v35, %v5843_v23  ;;  %v4182_v11 = vmul.f32 1.442695, %v3691_v13 }
 0x464   : > { %v7451_v3 = vadd.f32 %v5307_v2, %v17691_v31  ;;  %v11979_v39 = vpop.eup %8924  ;;  %v5841_v4 = vmul.f32 0.6931472, %v8923_v20  ;;  %v3533_v30 = vsub.f32 0.0, %v3213_v29  ;;  %vm5846_vm1 = vcmp.lt.f32.partialorder %v5845_v36, 0.0004427343 }
 0x465   : > { %v5929_v15 = vadd.f32 1.0, %v11979_v39  ;;  %v2883_v60 = vmax.f32 %v11867_v6, 0.0  ;;  %v3050_v47 = vmax.f32 %v11879_v22, 0.0  ;;  %8936 = vpow2.f32 %v4182_v11 }
 0x466   : > { %7771 = vst [vmem:[%s11350_s2 + $0x2d8] sm:$0xff] %v7451_v3  ;;  %v5847_v32 = vsel %vm5846_vm1, %v5844_v56, %v5841_v4  ;;  %v3866_v63 = vmul.f32 1.442695, %v3533_v30  ;;  %v3380_v43 = vand.u32 2147483647, %v11973_v52  ;;  %v17692_v38 = vmax.f32 %v11794_v57, 0.0  ;;  %v11990_v34 = vpop.eup %8926 }
 0x467   : > { %v5924_v35 = vadd.f32 1.0, %v5923_v19  ;;  %v5926_v5 = vand.u32 2147483647, %v11934_v21  ;;  %8938 = vlog2.f32 %v5929_v15  ;;  %v4501_v12 = vmul.f32 -0.5, %v11963_v26 }
 0x468   : > { %v7511_v0 = vadd.f32 %v5847_v32, %v17692_v38  ;;  %8940 = vpow2.f32 %v3866_v63  ;;  %v3700_v24 = vsub.f32 0.0, %v3380_v43  ;;  %v11995_v59 = vadd.f32 %v11484_v49, %v11804_v16 }
 0x469   : > { %v4504_v23 = vand.u32 2147483647, %v11963_v26  ;;  %v4507_v57 = vadd.f32 1.0, %v11990_v34  ;;  %v2892_v25 = vmax.f32 %v11923_v58, 0.0  ;;  %v12003_v36 = vadd.f32 %v11500_v33, %v11125_v9  ;;  %v12005_v45 = vpop.eup %8928 }
 0x46a   : > { %7831 = vst [vmem:[%s11350_s2 + $0x4b8] sm:$0xff] %v7511_v0  ;;  %v5932_v13 = vmul.f32 -0.5, %v11979_v39  ;;  %v3051_v2 = vmax.f32 %v11932_v55, 0.0  ;;  %v4200_v29 = vmul.f32 1.442695, %v3700_v24  ;;  %v8931_v20 = vpop.eup %8930  ;;  %v6010_v3 = vadd.f32 1.0, %v12005_v45 }
 0x46b   : > { %v3222_v49 = vand.u32 2147483647, %v11995_v59  ;;  %vm12010_vm2 = vcmp.lt.f32.partialorder %v5926_v5, 0.0004427343  ;;  %8942 = vlog2.f32 %v4507_v57  ;;  %v2893_v33 = vmax.f32 %v11956_v40, 0.0 }
 0x46c   : > { %v5922_v19 = vmul.f32 0.6931472, %v8931_v20  ;;  %v5925_v4 = vmul.f32 %v11934_v21, %v5924_v35  ;;  %v4502_v56 = vadd.f32 1.0, %v4501_v12  ;;  %8944 = vpow2.f32 %v4200_v29 }
 0x46d   : > { %v5935_v11 = vand.u32 2147483647, %v11979_v39  ;;  %8946 = vlog2.f32 %v6010_v3  ;;  %v3542_v30 = vsub.f32 0.0, %v3222_v49  ;;  %v3381_v15 = vand.u32 2147483647, %v12003_v36 }
 0x46e   : > { %v5928_v32 = vsel %vm12010_vm2, %v5925_v4, %v5922_v19  ;;  %vm12021_vm3 = vcmp.lt.f32.partialorder %v4504_v23, 0.0004427343  ;;  %v5933_v43 = vadd.f32 1.0, %v5932_v13  ;;  %v12027_v21 = vadd.f32 %v11502_v8, %v11808_v17  ;;  %v12029_v38 = vpop.eup %8932 }
 0x46f   : > { %v17697_v0 = vmax.f32 %v11818_v46, 0.0  ;;  %v3884_v5 = vmul.f32 1.442695, %v3542_v30  ;;  %v3701_v12 = vsub.f32 0.0, %v3381_v15  ;;  %v12035_v24 = vadd.f32 %v11529_v7, %v11121_v27 }
 0x470   : > { %v8935_v23 = vpop.eup %8934  ;;  %v4503_v57 = vmul.f32 %v11963_v26, %v4502_v56  ;;  %v4510_v13 = vmul.f32 -0.5, %v11990_v34  ;;  %v4588_v29 = vadd.f32 1.0, %v12029_v38  ;;  %v3060_v8 = vmax.f32 %v11973_v52, 0.0 }
 0x471   : > { %v7520_v35 = vadd.f32 %v5928_v32, %v17697_v0  ;;  %v4500_v49 = vmul.f32 0.6931472, %v8935_v23  ;;  %vm12042_vm4 = vcmp.lt.f32.partialorder %v5935_v11, 0.0004427343  ;;  %8948 = vpow2.f32 %v3884_v5  ;;  %v12055_v11 = vpop.f32.mrf.mxu1 }
 0x472   : > { %v4202_v20 = vmul.f32 1.442695, %v3701_v12  ;;  %v5934_v7 = vmul.f32 %v11979_v39, %v5933_v43  ;;  %v6013_v31 = vmul.f32 -0.5, %v12005_v45  ;;  %8950 = vlog2.f32 %v4588_v29  ;;  %v12049_v3 = vpop.eup %8936 }
 0x473   : > { %7840 = vst [vmem:[%s11350_s2 + $0x500] sm:$0xff] %v7520_v35  ;;  %v3223_v26 = vand.u32 2147483647, %v12027_v21  ;;  %v4506_v19 = vsel %vm12021_vm3, %v4503_v57, %v4500_v49  ;;  %v4513_v4 = vand.u32 2147483647, %v11990_v34  ;;  %v4511_v15 = vadd.f32 1.0, %v4510_v13 }
 0x474   : > { %8952 = vpow2.f32 %v4202_v20  ;;  %v3390_v56 = vand.u32 2147483647, %v12035_v24  ;;  %v8939_v30 = vpop.eup %8938  ;;  %v7362_v39 = vadd.f32 %v4506_v19, %v2882_v44  ;;  %v6016_v32 = vand.u32 2147483647, %v12005_v45  ;;  %v12074_v20 = vpop.f32.mrf.mxu1 }
 0x475   : > { %v6019_v43 = vadd.f32 1.0, %v12049_v3  ;;  %v12061_v0 = vpop.eup %8940  ;;  %v5931_v63 = vmul.f32 0.6931472, %v8939_v30  ;;  %v2902_v35 = vmax.f32 %v11995_v59, 0.0  ;;  %v3543_v5 = vsub.f32 0.0, %v3223_v26 }
 0x476   : > { %v3710_v12 = vsub.f32 0.0, %v3390_v56  ;;  %7682 = vst [vmem:[%s11350_s2 + $0x10] sm:$0xff] %v7362_v39  ;;  %v6014_v23 = vadd.f32 1.0, %v6013_v31  ;;  %v4591_v57 = vmul.f32 -0.5, %v12029_v38  ;;  %v4597_v18 = vadd.f32 1.0, %v12061_v0 }
 0x477   : > { %8954 = vlog2.f32 %v6019_v43  ;;  %v5937_v44 = vsel %vm12042_vm4, %v5934_v7, %v5931_v63  ;;  %vm12069_vm5 = vcmp.lt.f32.partialorder %v4513_v4, 0.0004427343  ;;  %v3061_v29 = vmax.f32 %v12003_v36, 0.0 }
 0x478   : > { %v3886_v49 = vmul.f32 1.442695, %v3543_v5  ;;  %v8943_v26 = vpop.eup %8942  ;;  %v7521_v31 = vadd.f32 %v5937_v44, %v3041_v62  ;;  %v4512_v19 = vmul.f32 %v11990_v34, %v4511_v15  ;;  %vm12079_vm6 = vcmp.lt.f32.partialorder %v6016_v32, 0.0004427343  ;;  %v12096_v5 = vpop.f32.mrf.mxu1 }
 0x479   : > { %8956 = vlog2.f32 %v4597_v18  ;;  %v12083_v46 = vpop.eup %8944  ;;  %v4509_v7 = vmul.f32 0.6931472, %v8943_v26  ;;  %v4594_v4 = vand.u32 2147483647, %v12029_v38  ;;  %v4220_v30 = vmul.f32 1.442695, %v3710_v12 }
 0x47a   : > { %8958 = vpow2.f32 %v3886_v49  ;;  %v8947_v39 = vpop.eup %8946  ;;  %7841 = vst [vmem:[%s11350_s2 + $0x508] sm:$0xff] %v7521_v31  ;;  %v6015_v43 = vmul.f32 %v12005_v45, %v6014_v23  ;;  %v4592_v61 = vadd.f32 1.0, %v4591_v57  ;;  %v6022_v62 = vmul.f32 -0.5, %v12049_v3 }
 0x47b   : > { %v6100_v34 = vadd.f32 1.0, %v12083_v46  ;;  %v4515_v15 = vsel %vm12069_vm5, %v4512_v19, %v4509_v7  ;;  %v6012_v32 = vmul.f32 0.6931472, %v8947_v39  ;;  %8960 = vpow2.f32 %v4220_v30 }
 0x47c   : > { %v12094_v63 = vadd.f32 %v11531_v50, %v11804_v16  ;;  %v7363_v45 = vadd.f32 %v4515_v15, %v2883_v60  ;;  %v4600_v12 = vmul.f32 -0.5, %v12061_v0  ;;  %v2903_v23 = vmax.f32 %v12027_v21, 0.0 }
 0x47d   : > { %8962 = vlog2.f32 %v6100_v34  ;;  %v6018_v57 = vsel %vm12079_vm6, %v6015_v43, %v6012_v32  ;;  %vm12104_vm7 = vcmp.lt.f32.partialorder %v4594_v4, 0.0004427343  ;;  %v12111_v44 = vadd.f32 %v11547_v41, %v11125_v9  ;;  %v12123_v4 = vpop.f32.mrf.mxu1  ;;  %2810 = vmatmul.mubr.bf16.gmra.mxu1 %v10993_v51  ;;  %v17708_v32 = vld [vmem:[#allocation35_spill] sm:$0xff] }
 0x47e   : > { %v3232_v50 = vand.u32 2147483647, %v12094_v63  ;;  %v12113_v6 = vpop.eup %8948  ;;  %7683 = vst [vmem:[%s11350_s2 + $0x18] sm:$0xff] %v7363_v45  ;;  %v7530_v60 = vadd.f32 %v6018_v57, %v3050_v47  ;;  %v4593_v13 = vmul.f32 %v12029_v38, %v4592_v61  ;;  %v6025_v49 = vand.u32 2147483647, %v12049_v3  ;;  %2819 = vmatprep.mubr.bf16.mxu1 %v17565_v48 }
 0x47f   : > { %v3070_v26 = vmax.f32 %v12035_v24, 0.0  ;;  %v8951_v31 = vpop.eup %8950  ;;  %v6023_v19 = vadd.f32 1.0, %v6022_v62  ;;  %v4603_v56 = vand.u32 2147483647, %v12061_v0  ;;  %v4678_v7 = vadd.f32 1.0, %v12113_v6 }
 0x480   : > { %v3552_v41 = vsub.f32 0.0, %v3232_v50  ;;  %7850 = vst [vmem:[%s11350_s2 + $0x550] sm:$0xff] %v7530_v60  ;;  %v4590_v22 = vmul.f32 0.6931472, %v8951_v31  ;;  %v4601_v47 = vadd.f32 1.0, %v4600_v12  ;;  %v6103_v38 = vmul.f32 -0.5, %v12083_v46 }
 0x481   : > { %v12126_v30 = vpop.eup %8952  ;;  %v3391_v39 = vand.u32 2147483647, %v12111_v44  ;;  %v6106_v43 = vand.u32 2147483647, %v12083_v46  ;;  %8964 = vlog2.f32 %v4678_v7  ;;  %v12136_v51 = vadd.f32 %v11549_v14, %v11808_v17  ;;  %v17716_v7 = vld [vmem:[#allocation42_spill] sm:$0xff] }
 0x482   : > { %v6109_v61 = vadd.f32 1.0, %v12126_v30  ;;  %v4596_v62 = vsel %vm12104_vm7, %v4593_v13, %v4590_v22  ;;  %vm12140_vm8 = vcmp.lt.f32.partialorder %v6025_v49, 0.0004427343  ;;  %v3904_v15 = vmul.f32 1.442695, %v3552_v41 }
 0x483   : > { %v12146_v45 = vadd.f32 %v17708_v32, %v11121_v27  ;;  %v7372_v57 = vadd.f32 %v4596_v62, %v2892_v25  ;;  %v6024_v50 = vmul.f32 %v12049_v3, %v6023_v19  ;;  %v3711_v14 = vsub.f32 0.0, %v3391_v39  ;;  %v17713_v32 = vld [vmem:[#allocation36_spill] sm:$0xff] }
 0x484   : > { %v8955_v12 = vpop.eup %8954  ;;  %8966 = vlog2.f32 %v6109_v61  ;;  %vm12151_vm9 = vcmp.lt.f32.partialorder %v4603_v56, 0.0004427343  ;;  %v6104_v13 = vadd.f32 1.0, %v6103_v38  ;;  %v4602_v31 = vmul.f32 %v12061_v0, %v4601_v47 }
 0x485   : > { %v6021_v60 = vmul.f32 0.6931472, %v8955_v12  ;;  %8968 = vpow2.f32 %v3904_v15  ;;  %7692 = vst [vmem:[%s11350_s2 + $0x60] sm:$0xff] %v7372_v57  ;;  %vm12157_vm10 = vcmp.lt.f32.partialorder %v6106_v43, 0.0004427343  ;;  %v4681_v41 = vmul.f32 -0.5, %v12113_v6 }
 0x486   : > { %v8957_v49 = vpop.eup %8956  ;;  %v4222_v58 = vmul.f32 1.442695, %v3711_v14  ;;  %v3233_v25 = vand.u32 2147483647, %v12136_v51  ;;  %v3400_v22 = vand.u32 2147483647, %v12146_v45  ;;  %v12183_v12 = vadd.f32 %v17713_v32, %v11804_v16 }
 0x487   : > { %v12162_v3 = vpop.eup %8958  ;;  %v6027_v19 = vsel %vm12140_vm8, %v6024_v50, %v6021_v60  ;;  %v4599_v56 = vmul.f32 0.6931472, %v8957_v49  ;;  %v4684_v47 = vand.u32 2147483647, %v12113_v6  ;;  %v6112_v38 = vmul.f32 -0.5, %v12126_v30 }
 0x488   : > { %v7531_v0 = vadd.f32 %v6027_v19, %v3051_v2  ;;  %v4687_v39 = vadd.f32 1.0, %v12162_v3  ;;  %v12173_v43 = vpop.eup %8960  ;;  %8970 = vpow2.f32 %v4222_v58  ;;  %v3553_v62 = vsub.f32 0.0, %v3233_v25 }
 0x489   : > { %v4605_v61 = vsel %vm12151_vm9, %v4602_v31, %v4599_v56  ;;  %v3720_v34 = vsub.f32 0.0, %v3400_v22  ;;  %v2912_v2 = vmax.f32 %v12094_v63, 0.0  ;;  %v6105_v50 = vmul.f32 %v12083_v46, %v6104_v13  ;;  %v17717_v22 = vld [vmem:[#allocation37_spill] sm:$0xff] }
 0x48a   : > { %v8963_v15 = vpop.eup %8962  ;;  %7851 = vst [vmem:[%s11350_s2 + $0x558] sm:$0xff] %v7531_v0  ;;  %v7373_v55 = vadd.f32 %v4605_v61, %v2893_v33  ;;  %8972 = vlog2.f32 %v4687_v39  ;;  %v4682_v14 = vadd.f32 1.0, %v4681_v41  ;;  %v6190_v60 = vadd.f32 1.0, %v12173_v43 }
 0x48b   : > { %v6102_v57 = vmul.f32 0.6931472, %v8963_v15  ;;  %vm12188_vm11 = vcmp.lt.f32.partialorder %v4684_v47, 0.0004427343  ;;  %v3906_v40 = vmul.f32 1.442695, %v3553_v62  ;;  %v12200_v25 = vadd.f32 %v11596_v37, %v11125_v9  ;;  %v12221_v15 = vpop.f32.mrf.mxu1 }
 0x48c   : > { %7693 = vst [vmem:[%s11350_s2 + $0x68] sm:$0xff] %v7373_v55  ;;  %v4240_v33 = vmul.f32 1.442695, %v3720_v34  ;;  %v6113_v31 = vadd.f32 1.0, %v6112_v38  ;;  %v6115_v58 = vand.u32 2147483647, %v12126_v30  ;;  %8974 = vlog2.f32 %v6190_v60 }
 0x48d   : > { %v6108_v49 = vsel %vm12157_vm10, %v6105_v50, %v6102_v57  ;;  %8976 = vpow2.f32 %v3906_v40  ;;  %v3242_v13 = vand.u32 2147483647, %v12183_v12  ;;  %v4690_v56 = vmul.f32 -0.5, %v12162_v3 }
 0x48e   : > { %v7540_v46 = vadd.f32 %v6108_v49, %v3060_v8  ;;  %v8965_v19 = vpop.eup %8964  ;;  %8978 = vpow2.f32 %v4240_v33  ;;  %v12205_v41 = vadd.f32 %v17716_v7, %v11808_v17  ;;  %v12209_v0 = vadd.f32 %v17717_v22, %v11121_v27 }
 0x48f   : > { %v4680_v52 = vmul.f32 0.6931472, %v8965_v19  ;;  %v4683_v8 = vmul.f32 %v12113_v6, %v4682_v14  ;;  %v3562_v47 = vsub.f32 0.0, %v3242_v13  ;;  %v3401_v37 = vand.u32 2147483647, %v12200_v25 }
 0x490   : > { %7860 = vst [vmem:[%s11350_s2 + $0x5a0] sm:$0xff] %v7540_v46  ;;  %v6114_v39 = vmul.f32 %v12126_v30, %v6113_v31  ;;  %vm12215_vm12 = vcmp.lt.f32.partialorder %v6115_v58, 0.0004427343  ;;  %v3243_v62 = vand.u32 2147483647, %v12205_v41  ;;  %v4691_v14 = vadd.f32 1.0, %v4690_v56 }
 0x491   : > { %v8967_v38 = vpop.eup %8966  ;;  %v3410_v34 = vand.u32 2147483647, %v12209_v0  ;;  %v4686_v6 = vsel %vm12188_vm11, %v4683_v8, %v4680_v52  ;;  %v3924_v57 = vmul.f32 1.442695, %v3562_v47  ;;  %v3721_v50 = vsub.f32 0.0, %v3401_v37  ;;  %v17720_v56 = vld [vmem:[#allocation38_spill] sm:$0xff] }
 0x492   : > { %v12223_v55 = vpop.eup %8968  ;;  %v6111_v32 = vmul.f32 0.6931472, %v8967_v38  ;;  %v7382_v30 = vadd.f32 %v4686_v6, %v2902_v35  ;;  %v6193_v60 = vmul.f32 -0.5, %v12173_v43  ;;  %v3563_v31 = vsub.f32 0.0, %v3243_v62  ;;  %v12238_v35 = vpop.f32.mrf.mxu1 }
 0x493   : > { %v4768_v40 = vadd.f32 1.0, %v12223_v55  ;;  %8980 = vpow2.f32 %v3924_v57  ;;  %v4242_v49 = vmul.f32 1.442695, %v3721_v50  ;;  %v4693_v58 = vand.u32 2147483647, %v12162_v3 }
 0x494   : > { %v6117_v33 = vsel %vm12215_vm12, %v6114_v39, %v6111_v32  ;;  %7702 = vst [vmem:[%s11350_s2 + $0xb0] sm:$0xff] %v7382_v30  ;;  %v3071_v59 = vmax.f32 %v12111_v44, 0.0  ;;  %v3926_v13 = vmul.f32 1.442695, %v3563_v31  ;;  %v3730_v19 = vsub.f32 0.0, %v3410_v34  ;;  %v12253_v62 = vpop.f32.mrf.mxu1  ;;  %v17721_v31 = vld [vmem:[#allocation25_spill] sm:$0xff] }
 0x495   : > { %v7541_v18 = vadd.f32 %v6117_v33, %v3061_v29  ;;  %8982 = vlog2.f32 %v4768_v40  ;;  %v12240_v46 = vpop.eup %8970  ;;  %v12244_v7 = vadd.f32 %v17720_v56, %v11804_v16  ;;  %v6194_v36 = vadd.f32 1.0, %v6193_v60 }
 0x496   : > { %8984 = vpow2.f32 %v4242_v49  ;;  %v6196_v29 = vand.u32 2147483647, %v12173_v43  ;;  %v6199_v52 = vadd.f32 1.0, %v12240_v46  ;;  %v2913_v8 = vmax.f32 %v12136_v51, 0.0 }
 0x497   : > { %v8973_v22 = vpop.eup %8972  ;;  %7861 = vst [vmem:[%s11350_s2 + $0x5a8] sm:$0xff] %v7541_v18  ;;  %v4692_v37 = vmul.f32 %v12162_v3, %v4691_v14  ;;  %8986 = vpow2.f32 %v3926_v13  ;;  %v4260_v38 = vmul.f32 1.442695, %v3730_v19  ;;  %vm4694_vm13 = vcmp.lt.f32.partialorder %v4693_v58, 0.0004427343  ;;  %v12273_v13 = vpop.f32.mrf.mxu1  ;;  %v17722_v19 = vld [vmem:[#allocation28_spill] sm:$0xff] }
 0x498   : > { %v4689_v47 = vmul.f32 0.6931472, %v8973_v22  ;;  %v4771_v39 = vmul.f32 -0.5, %v12223_v55  ;;  %8988 = vlog2.f32 %v6199_v52  ;;  %v3252_v61 = vand.u32 2147483647, %v12244_v7  ;;  %2820 = vmatmul.mubr.bf16.gmra.mxu1 %v17722_v19 }
 0x499   : > { %v8975_v34 = vpop.eup %8974  ;;  %v6202_v32 = vmul.f32 -0.5, %v12240_v46  ;;  %v3080_v57 = vmax.f32 %v12146_v45, 0.0  ;;  %8990 = vpow2.f32 %v4260_v38  ;;  %v6195_v14 = vmul.f32 %v12173_v43, %v6194_v36  ;;  %2829 = vmatprep.mubr.bf16.mxu1 %v17565_v48 }
 0x49a   : > { %v4695_v6 = vsel %vm4694_vm13, %v4692_v37, %v4689_v47  ;;  %v12257_v50 = vpop.eup %8976  ;;  %v6192_v30 = vmul.f32 0.6931472, %v8975_v34  ;;  %v3572_v60 = vsub.f32 0.0, %v3252_v61  ;;  %vm6197_vm14 = vcmp.lt.f32.partialorder %v6196_v29, 0.0004427343  ;;  %v17723_v47 = vld [vmem:[#allocation39_spill] sm:$0xff] }
 0x49b   : > { %v7383_v3 = vadd.f32 %v4695_v6, %v2903_v23  ;;  %v12262_v40 = vpop.eup %8978  ;;  %v4774_v33 = vand.u32 2147483647, %v12223_v55  ;;  %v4777_v49 = vadd.f32 1.0, %v12257_v50  ;;  %v12268_v18 = vadd.f32 %v17721_v31, %v11125_v9 }
 0x49c   : > { %v6198_v58 = vsel %vm6197_vm14, %v6195_v14, %v6192_v30  ;;  %v4772_v21 = vadd.f32 1.0, %v4771_v39  ;;  %v6280_v23 = vadd.f32 1.0, %v12262_v40  ;;  %v2922_v43 = vmax.f32 %v12183_v12, 0.0 }
 0x49d   : > { %7703 = vst [vmem:[%s11350_s2 + $0xb8] sm:$0xff] %v7383_v3  ;;  %v7550_v56 = vadd.f32 %v6198_v58, %v3070_v26  ;;  %v6203_v22 = vadd.f32 1.0, %v6202_v32  ;;  %v6205_v36 = vand.u32 2147483647, %v12240_v46  ;;  %8992 = vlog2.f32 %v4777_v49 }
 0x49e   : > { %8994 = vlog2.f32 %v6280_v23  ;;  %v3944_v52 = vmul.f32 1.442695, %v3572_v60  ;;  %v12283_v37 = vadd.f32 %v17723_v47, %v11808_v17  ;;  %vm12286_vm15 = vcmp.lt.f32.partialorder %v4774_v33, 0.0004427343 }
 0x49f   : > { %7870 = vst [vmem:[%s11350_s2 + $0x5f0] sm:$0xff] %v7550_v56  ;;  %v3411_v39 = vand.u32 2147483647, %v12268_v18  ;;  %v4780_v34 = vmul.f32 -0.5, %v12257_v50  ;;  %v4783_v6 = vand.u32 2147483647, %v12257_v50  ;;  %v4773_v30 = vmul.f32 %v12223_v55, %v4772_v21 }
 0x4a0   : > { %v8981_v61 = vpop.eup %8980  ;;  %v6283_v32 = vmul.f32 -0.5, %v12262_v40  ;;  %8996 = vpow2.f32 %v3944_v52  ;;  %v6204_v14 = vmul.f32 %v12240_v46, %v6203_v22  ;;  %vm12298_vm0 = vcmp.lt.f32.partialorder %v6205_v36, 0.0004427343 }
 0x4a1   : > { %v4858_v33 = vadd.f32 1.0, %v8981_v61  ;;  %v4861_v58 = vmul.f32 -0.5, %v8981_v61  ;;  %v3731_v23 = vsub.f32 0.0, %v3411_v39  ;;  %v3253_v19 = vand.u32 2147483647, %v12283_v37 }
 0x4a2   : > { %v8983_v3 = vpop.eup %8982  ;;  %v6286_v56 = vand.u32 2147483647, %v12262_v40  ;;  %v12309_v55 = vadd.f32 %v11695_v54, %v11121_v27  ;;  %v4781_v22 = vadd.f32 1.0, %v4780_v34  ;;  %vm12315_vm1 = vcmp.lt.f32.partialorder %v4783_v6, 0.0004427343 }
 0x4a3   : > { %v12302_v49 = vpop.eup %8984  ;;  %v4770_v31 = vmul.f32 0.6931472, %v8983_v3  ;;  %8998 = vlog2.f32 %v4858_v33  ;;  %v6284_v47 = vadd.f32 1.0, %v6283_v32  ;;  %v4864_v33 = vand.u32 2147483647, %v8981_v61 }
 0x4a4   : > { %v6289_v52 = vadd.f32 1.0, %v12302_v49  ;;  %v12311_v46 = vpop.eup %8986  ;;  %v4862_v29 = vadd.f32 1.0, %v4861_v58  ;;  %v4262_v38 = vmul.f32 1.442695, %v3731_v23  ;;  %v6292_v34 = vmul.f32 -0.5, %v12302_v49 }
 0x4a5   : > { %v4776_v21 = vsel %vm12286_vm15, %v4773_v30, %v4770_v31  ;;  %v8989_v39 = vpop.eup %8988  ;;  %v4867_v54 = vadd.f32 1.0, %v12311_v46  ;;  %v3573_v30 = vsub.f32 0.0, %v3253_v19  ;;  %v3420_v63 = vand.u32 2147483647, %v12309_v55 }
 0x4a6   : > { %v7392_v3 = vadd.f32 %v4776_v21, %v2912_v2  ;;  %9000 = vlog2.f32 %v6289_v52  ;;  %v12322_v26 = vpop.eup %8990  ;;  %v6201_v24 = vmul.f32 0.6931472, %v8989_v39  ;;  %vm12330_vm2 = vcmp.lt.f32.partialorder %v6286_v56, 0.0004427343 }
 0x4a7   : > { %9002 = vlog2.f32 %v4867_v54  ;;  %v6370_v6 = vadd.f32 1.0, %v12322_v26  ;;  %v6295_v31 = vand.u32 2147483647, %v12302_v49  ;;  %v12337_v58 = vadd.f32 %v11702_v42, %v11804_v16 }
 0x4a8   : > { %7712 = vst [vmem:[%s11350_s2 + $0x100] sm:$0xff] %v7392_v3  ;;  %v6207_v2 = vsel %vm12298_vm0, %v6204_v14, %v6201_v24  ;;  %v4782_v19 = vmul.f32 %v12257_v50, %v4781_v22  ;;  %v6285_v52 = vmul.f32 %v12262_v40, %v6284_v47  ;;  %v4863_v24 = vmul.f32 %v8981_v61, %v4862_v29  ;;  %v17736_v29 = vld [vmem:[#allocation23_spill] sm:$0xff] }
 0x4a9   : > { %v7551_v23 = vadd.f32 %v6207_v2, %v3071_v59  ;;  %9004 = vlog2.f32 %v6370_v6  ;;  %vm12343_vm3 = vcmp.lt.f32.partialorder %v4864_v33, 0.0004427343  ;;  %v3946_v56 = vmul.f32 1.442695, %v3573_v30 }
 0x4aa   : > { %v8993_v60 = vpop.eup %8992  ;;  %9006 = vpow2.f32 %v4262_v38  ;;  %v6293_v39 = vadd.f32 1.0, %v6292_v34  ;;  %v4870_v44 = vmul.f32 -0.5, %v12311_v46  ;;  %v3740_v59 = vsub.f32 0.0, %v3420_v63  ;;  %v17737_v63 = vld [vmem:[#allocation40_spill] sm:$0xff] }
 0x4ab   : > { %v8995_v21 = vpop.eup %8994  ;;  %7871 = vst [vmem:[%s11350_s2 + $0x5f8] sm:$0xff] %v7551_v23  ;;  %v4779_v42 = vmul.f32 0.6931472, %v8993_v60  ;;  %vm12349_vm4 = vcmp.lt.f32.partialorder %v6295_v31, 0.0004427343  ;;  %9008 = vpow2.f32 %v3946_v56  ;;  %v12356_v61 = vadd.f32 %v17736_v29, %v11125_v9 }
 0x4ac   : > { %v6282_v3 = vmul.f32 0.6931472, %v8995_v21  ;;  %v3262_v40 = vand.u32 2147483647, %v12337_v58  ;;  %v4873_v33 = vand.u32 2147483647, %v12311_v46  ;;  %v12371_v2 = vadd.f32 %v17737_v63, %v11808_v17 }
 0x4ad   : > { %v12358_v22 = vpop.eup %8996  ;;  %v4785_v47 = vsel %vm12315_vm1, %v4782_v19, %v4779_v42  ;;  %v6373_v54 = vmul.f32 -0.5, %v12322_v26  ;;  %v4280_v38 = vmul.f32 1.442695, %v3740_v59  ;;  %v4871_v31 = vadd.f32 1.0, %v4870_v44  ;;  %v12375_v19 = vpop.f32.mrf.mxu1  ;;  %v17739_v21 = vld [vmem:[#allocation41_spill] sm:$0xff] }
 0x4ae   : > { %v7393_v30 = vadd.f32 %v4785_v47, %v2913_v8  ;;  %v6288_v34 = vsel %vm12330_vm2, %v6285_v52, %v6282_v3  ;;  %v4948_v6 = vadd.f32 1.0, %v12358_v22  ;;  %v3582_v23 = vsub.f32 0.0, %v3262_v40  ;;  %v17738_v52 = vld [vmem:[#allocation24_spill] sm:$0xff] }
 0x4af   : > { %v7560_v36 = vadd.f32 %v6288_v34, %v3080_v57  ;;  %9010 = vpow2.f32 %v4280_v38  ;;  %v6294_v8 = vmul.f32 %v12302_v49, %v6293_v39  ;;  %v3421_v32 = vand.u32 2147483647, %v12356_v61  ;;  %v12398_v38 = vpop.f32.mrf.mxu1 }
 0x4b0   : > { %v8999_v51 = vpop.eup %8998  ;;  %7713 = vst [vmem:[%s11350_s2 + $0x108] sm:$0xff] %v7393_v30  ;;  %9012 = vlog2.f32 %v4948_v6  ;;  %v12382_v60 = vadd.f32 %v17738_v52, %v11121_v27  ;;  %v6376_v45 = vand.u32 2147483647, %v12322_v26  ;;  %v3964_v57 = vmul.f32 1.442695, %v3582_v23 }
 0x4b1   : > { %7880 = vst [vmem:[%s11350_s2 + $0x640] sm:$0xff] %v7560_v36  ;;  %v4860_v56 = vmul.f32 0.6931472, %v8999_v51  ;;  %v12388_v42 = vadd.f32 %v17739_v21, %v11804_v16  ;;  %vm12390_vm5 = vcmp.lt.f32.partialorder %v4873_v33, 0.0004427343  ;;  %v6374_v49 = vadd.f32 1.0, %v6373_v54 }
 0x4b2   : > { %v3741_v39 = vsub.f32 0.0, %v3421_v32  ;;  %v3263_v3 = vand.u32 2147483647, %v12371_v2  ;;  %v4872_v47 = vmul.f32 %v12311_v46, %v4871_v31  ;;  %9014 = vpow2.f32 %v3964_v57 }
 0x4b3   : > { %v9001_v44 = vpop.eup %9000  ;;  %v4866_v40 = vsel %vm12343_vm3, %v4863_v24, %v4860_v56  ;;  %v3430_v54 = vand.u32 2147483647, %v12382_v60  ;;  %v4951_v24 = vmul.f32 -0.5, %v12358_v22  ;;  %v3272_v46 = vand.u32 2147483647, %v12388_v42  ;;  %v12415_v56 = vpop.f32.mrf.mxu1 }
 0x4b4   : > { %v6291_v29 = vmul.f32 0.6931472, %v9001_v44  ;;  %v9003_v30 = vpop.eup %9002  ;;  %v7402_v33 = vadd.f32 %v4866_v40, %v2922_v43  ;;  %v4282_v34 = vmul.f32 1.442695, %v3741_v39  ;;  %v3583_v6 = vsub.f32 0.0, %v3263_v3  ;;  %v17744_v44 = vld [vmem:[#allocation43_spill] sm:$0xff] }
 0x4b5   : > { %v4869_v14 = vmul.f32 0.6931472, %v9003_v30  ;;  %v17742_v31 = vmax.f32 %v12200_v25, 0.0  ;;  %v3750_v43 = vsub.f32 0.0, %v3430_v54  ;;  %v6375_v32 = vmul.f32 %v12322_v26, %v6374_v49 }
 0x4b6   : > { %v6297_v63 = vsel %vm12349_vm4, %v6294_v8, %v6291_v29  ;;  %v9005_v36 = vpop.eup %9004  ;;  %7722 = vst [vmem:[%s11350_s2 + $0x150] sm:$0xff] %v7402_v33  ;;  %9016 = vpow2.f32 %v4282_v34  ;;  %v3966_v12 = vmul.f32 1.442695, %v3583_v6  ;;  %v3592_v52 = vsub.f32 0.0, %v3272_v46  ;;  %v12434_v34 = vpop.f32.mrf.mxu1  ;;  %v17746_v6 = vld [vmem:[#allocation29_spill] sm:$0xff] }
 0x4b7   : > { %v7561_v23 = vadd.f32 %v6297_v63, %v17742_v31  ;;  %v12410_v51 = vpop.eup %9006  ;;  %v4875_v50 = vsel %vm12390_vm5, %v4872_v47, %v4869_v14  ;;  %v6372_v8 = vmul.f32 0.6931472, %v9005_v36  ;;  %v17743_v57 = vmax.f32 %v12205_v41, 0.0  ;;  %2830 = vmatmul.mubr.bf16.gmra.mxu1 %v17746_v6 }
 0x4b8   : > { %vm6377_vm6 = vcmp.lt.f32.partialorder %v6376_v45, 0.0004427343  ;;  %v6379_v21 = vadd.f32 1.0, %v12410_v51  ;;  %v12423_v39 = vadd.f32 %v17744_v44, %v11125_v9  ;;  %v12425_v59 = vpop.eup %9008  ;;  %9018 = vpow2.f32 %v3966_v12  ;;  %2839 = vmatprep.mubr.bf16.mxu1 %v17565_v48 }
 0x4b9   : > { %7881 = vst [vmem:[%s11350_s2 + $0x648] sm:$0xff] %v7561_v23  ;;  %v7403_v25 = vadd.f32 %v4875_v50, %v17743_v57  ;;  %v6378_v3 = vsel %vm6377_vm6, %v6375_v32, %v6372_v8  ;;  %v4300_v26 = vmul.f32 1.442695, %v3750_v43  ;;  %v3984_v49 = vmul.f32 1.442695, %v3592_v52  ;;  %v17747_v8 = vld [vmem:[#allocation44_spill] sm:$0xff] }
 0x4ba   : > { %v17745_v40 = vmax.f32 %v12209_v0, 0.0  ;;  %v2932_v41 = vmax.f32 %v12244_v7, 0.0  ;;  %v4952_v45 = vadd.f32 1.0, %v4951_v24  ;;  %9020 = vlog2.f32 %v6379_v21 }
 0x4bb   : > { %7723 = vst [vmem:[%s11350_s2 + $0x158] sm:$0xff] %v7403_v25  ;;  %v4954_v47 = vand.u32 2147483647, %v12358_v22  ;;  %v3091_v30 = vmax.f32 %v12268_v18, 0.0  ;;  %v4957_v33 = vadd.f32 1.0, %v12425_v59  ;;  %9022 = vpow2.f32 %v4300_v26 }
 0x4bc   : > { %v7570_v29 = vadd.f32 %v6378_v3, %v17745_v40  ;;  %v9011_v54 = vpop.eup %9010  ;;  %v2933_v0 = vmax.f32 %v12283_v37, 0.0  ;;  %v3100_v63 = vmax.f32 %v12309_v55, 0.0  ;;  %9024 = vpow2.f32 %v3984_v49 }
 0x4bd   : > { %v3431_v7 = vand.u32 2147483647, %v12423_v39  ;;  %v9013_v14 = vpop.eup %9012  ;;  %v6382_v24 = vmul.f32 -0.5, %v12410_v51  ;;  %9026 = vlog2.f32 %v4957_v33  ;;  %v6460_v46 = vadd.f32 1.0, %v9011_v54 }
 0x4be   : > { %7890 = vst [vmem:[%s11350_s2 + $0x690] sm:$0xff] %v7570_v29  ;;  %v4950_v31 = vmul.f32 0.6931472, %v9013_v14  ;;  %v4953_v23 = vmul.f32 %v12358_v22, %v4952_v45  ;;  %vm4955_vm7 = vcmp.lt.f32.partialorder %v4954_v47, 0.0004427343  ;;  %v4960_v50 = vmul.f32 -0.5, %v12425_v59 }
 0x4bf   : > { %v3751_v43 = vsub.f32 0.0, %v3431_v7  ;;  %9028 = vlog2.f32 %v6460_v46  ;;  %v12449_v32 = vadd.f32 %v17747_v8, %v11808_v17  ;;  %v9015_v52 = vpop.eup %9014  ;;  %v6385_v25 = vand.u32 2147483647, %v12410_v51 }
 0x4c0   : > { %v4956_v57 = vsel %vm4955_vm7, %v4953_v23, %v4950_v31  ;;  %v6463_v21 = vmul.f32 -0.5, %v9011_v54  ;;  %v6383_v22 = vadd.f32 1.0, %v6382_v24  ;;  %v5038_v26 = vadd.f32 1.0, %v9015_v52 }
 0x4c1   : > { %v4302_v44 = vmul.f32 1.442695, %v3751_v43  ;;  %v7412_v3 = vadd.f32 %v4956_v57, %v2932_v41  ;;  %v12454_v49 = vadd.f32 %v11889_v28, %v11121_v27  ;;  %v4963_v40 = vand.u32 2147483647, %v12425_v59 }
 0x4c2   : > { %v3273_v45 = vand.u32 2147483647, %v12449_v32  ;;  %v4961_v33 = vadd.f32 1.0, %v4960_v50  ;;  %v6466_v6 = vand.u32 2147483647, %v9011_v54  ;;  %v6464_v7 = vadd.f32 1.0, %v6463_v21 }
 0x4c3   : > { %9030 = vpow2.f32 %v4302_v44  ;;  %v9017_v47 = vpop.eup %9016  ;;  %7732 = vst [vmem:[%s11350_s2 + $0x1a0] sm:$0xff] %v7412_v3  ;;  %v5041_v14 = vmul.f32 -0.5, %v9015_v52  ;;  %v6384_v28 = vmul.f32 %v12410_v51, %v6383_v22  ;;  %vm12462_vm8 = vcmp.lt.f32.partialorder %v6385_v25, 0.0004427343 }
 0x4c4   : > { %9032 = vlog2.f32 %v5038_v26  ;;  %v6469_v24 = vadd.f32 1.0, %v9017_v47  ;;  %v3593_v46 = vsub.f32 0.0, %v3273_v45  ;;  %v3440_v43 = vand.u32 2147483647, %v12454_v49  ;;  %v2182_v26 = vpop.f32.mrf.mxu0 }
 0x4c5   : > { %v12468_v8 = vpop.eup %9018  ;;  %vm12470_vm9 = vcmp.lt.f32.partialorder %v4963_v40, 0.0004427343  ;;  %v6472_v57 = vmul.f32 -0.5, %v9017_v47  ;;  %v4962_v51 = vmul.f32 %v12425_v59, %v4961_v33  ;;  %vm12475_vm10 = vcmp.lt.f32.partialorder %v6466_v6, 0.0004427343 }
 0x4c6   : > { %9034 = vlog2.f32 %v6469_v24  ;;  %v3986_v21 = vmul.f32 1.442695, %v3593_v46  ;;  %v5044_v3 = vand.u32 2147483647, %v9015_v52  ;;  %v5047_v22 = vadd.f32 1.0, %v12468_v8  ;;  %v2184_v50 = vpop.f32.mrf.mxu0 }
 0x4c7   : > { %v9021_v44 = vpop.eup %9020  ;;  %v6465_v23 = vmul.f32 %v9011_v54, %v6464_v7  ;;  %v5042_v41 = vadd.f32 1.0, %v5041_v14  ;;  %v6475_v46 = vand.u32 2147483647, %v9017_v47  ;;  %v3760_v33 = vsub.f32 0.0, %v3440_v43 }
 0x4c8   : > { %v12480_v45 = vpop.eup %9022  ;;  %v6381_v40 = vmul.f32 0.6931472, %v9021_v44  ;;  %9036 = vpow2.f32 %v3986_v21  ;;  %v6473_v12 = vadd.f32 1.0, %v6472_v57  ;;  %v12489_v44 = vadd.f32 %v2182_v26, %v11804_v16  ;;  %v2186_v43 = vpop.f32.mrf.mxu0 }
 0x4c9   : > { %v12482_v24 = vpop.eup %9024  ;;  %9038 = vlog2.f32 %v5047_v22  ;;  %v6550_v59 = vadd.f32 1.0, %v12480_v45  ;;  %v5050_v14 = vmul.f32 -0.5, %v12468_v8  ;;  %v5043_v22 = vmul.f32 %v9015_v52, %v5042_v41 }
 0x4ca   : > { %v9027_v6 = vpop.eup %9026  ;;  %v6387_v29 = vsel %vm12462_vm8, %v6384_v28, %v6381_v40  ;;  %v5128_v36 = vadd.f32 1.0, %v12482_v24  ;;  %vm12494_vm11 = vcmp.lt.f32.partialorder %v5044_v3, 0.0004427343  ;;  %v5053_v28 = vand.u32 2147483647, %v12468_v8 }
 0x4cb   : > { %v7571_v54 = vadd.f32 %v6387_v29, %v3091_v30  ;;  %v4959_v7 = vmul.f32 0.6931472, %v9027_v6  ;;  %9040 = vlog2.f32 %v6550_v59  ;;  %v4320_v30 = vmul.f32 1.442695, %v3760_v33 }
 0x4cc   : > { %v9029_v21 = vpop.eup %9028  ;;  %9042 = vlog2.f32 %v5128_v36  ;;  %v12504_v29 = vadd.f32 %v11908_v53, %v11125_v9  ;;  %vm12508_vm12 = vcmp.lt.f32.partialorder %v6475_v46, 0.0004427343  ;;  %v6553_v36 = vmul.f32 -0.5, %v12480_v45 }
 0x4cd   : > { %7891 = vst [vmem:[%s11350_s2 + $0x698] sm:$0xff] %v7571_v54  ;;  %v4965_v31 = vsel %vm12470_vm9, %v4962_v51, %v4959_v7  ;;  %v6462_v18 = vmul.f32 0.6931472, %v9029_v21  ;;  %v3282_v57 = vand.u32 2147483647, %v12489_v44  ;;  %v6474_v53 = vmul.f32 %v9017_v47, %v6473_v12 }
 0x4ce   : > { %v7413_v52 = vadd.f32 %v4965_v31, %v2933_v0  ;;  %v5051_v26 = vadd.f32 1.0, %v5050_v14  ;;  %9044 = vpow2.f32 %v4320_v30  ;;  %vm12521_vm13 = vcmp.lt.f32.partialorder %v5053_v28, 0.0004427343  ;;  %v12541_v28 = vpop.f32.mrf.mxu1 }
 0x4cf   : > { %v6468_v3 = vsel %vm12475_vm10, %v6465_v23, %v6462_v18  ;;  %v5131_v46 = vmul.f32 -0.5, %v12482_v24  ;;  %v6556_v25 = vand.u32 2147483647, %v12480_v45  ;;  %v3602_v23 = vsub.f32 0.0, %v3282_v57 }
 0x4d0   : > { %v12514_v51 = vpop.eup %9030  ;;  %7733 = vst [vmem:[%s11350_s2 + $0x1a8] sm:$0xff] %v7413_v52  ;;  %v7580_v0 = vadd.f32 %v6468_v3, %v3100_v63  ;;  %v12529_v12 = vadd.f32 %v2184_v50, %v11808_v17  ;;  %v6554_v47 = vadd.f32 1.0, %v6553_v36  ;;  %v3441_v55 = vand.u32 2147483647, %v12504_v29 }
 0x4d1   : > { %v9033_v37 = vpop.eup %9032  ;;  %v6559_v59 = vadd.f32 1.0, %v12514_v51  ;;  %v12535_v63 = vadd.f32 %v11925_v1, %v11121_v27  ;;  %v5052_v7 = vmul.f32 %v12468_v8, %v5051_v26  ;;  %v5134_v14 = vand.u32 2147483647, %v12482_v24 }
 0x4d2   : > { %v5040_v33 = vmul.f32 0.6931472, %v9033_v37  ;;  %7900 = vst [vmem:[%s11350_s2 + $0x6e0] sm:$0xff] %v7580_v0  ;;  %v4004_v21 = vmul.f32 1.442695, %v3602_v23  ;;  %v17760_v31 = vmax.f32 %v12337_v58, 0.0  ;;  %v6555_v3 = vmul.f32 %v12480_v45, %v6554_v47  ;;  %v12561_v23 = vpop.f32.mrf.mxu1 }
 0x4d3   : > { %9046 = vlog2.f32 %v6559_v59  ;;  %v9035_v6 = vpop.eup %9034  ;;  %v5132_v52 = vadd.f32 1.0, %v5131_v46  ;;  %v3761_v36 = vsub.f32 0.0, %v3441_v55  ;;  %vm12547_vm14 = vcmp.lt.f32.partialorder %v6556_v25, 0.0004427343 }
 0x4d4   : > { %v5046_v54 = vsel %vm12494_vm11, %v5043_v22, %v5040_v33  ;;  %v6471_v30 = vmul.f32 0.6931472, %v9035_v6  ;;  %9048 = vpow2.f32 %v4004_v21  ;;  %v3283_v8 = vand.u32 2147483647, %v12529_v12  ;;  %v2188_v21 = vpop.f32.mrf.mxu0 }
 0x4d5   : > { %v7422_v18 = vadd.f32 %v5046_v54, %v17760_v31  ;;  %v12545_v1 = vpop.eup %9036  ;;  %v3450_v22 = vand.u32 2147483647, %v12535_v63  ;;  %v6562_v26 = vmul.f32 -0.5, %v12514_v51  ;;  %v17763_v0 = vmax.f32 %v12356_v61, 0.0 }
 0x4d6   : > { %v9039_v50 = vpop.eup %9038  ;;  %v6477_v58 = vsel %vm12508_vm12, %v6474_v53, %v6471_v30  ;;  %v5137_v37 = vadd.f32 1.0, %v12545_v1  ;;  %v4322_v33 = vmul.f32 1.442695, %v3761_v36  ;;  %v3603_v25 = vsub.f32 0.0, %v3283_v8 }
 0x4d7   : > { %7742 = vst [vmem:[%s11350_s2 + $0x1f0] sm:$0xff] %v7422_v18  ;;  %v7581_v46 = vadd.f32 %v6477_v58, %v17763_v0  ;;  %v5049_v59 = vmul.f32 0.6931472, %v9039_v50  ;;  %v5133_v6 = vmul.f32 %v12482_v24, %v5132_v52  ;;  %vm12564_vm15 = vcmp.lt.f32.partialorder %v5134_v14, 0.0004427343 }
 0x4d8   : > { %v9041_v55 = vpop.eup %9040  ;;  %9050 = vlog2.f32 %v5137_v37  ;;  %v3770_v45 = vsub.f32 0.0, %v3450_v22  ;;  %v4006_v54 = vmul.f32 1.442695, %v3603_v25  ;;  %v17766_v31 = vmax.f32 %v12371_v2, 0.0 }
 0x4d9   : > { %v9043_v53 = vpop.eup %9042  ;;  %7901 = vst [vmem:[%s11350_s2 + $0x6e8] sm:$0xff] %v7581_v46  ;;  %v5055_v61 = vsel %vm12521_vm13, %v5052_v7, %v5049_v59  ;;  %v6552_v47 = vmul.f32 0.6931472, %v9041_v55  ;;  %9052 = vpow2.f32 %v4322_v33  ;;  %v6563_v14 = vadd.f32 1.0, %v6562_v26  ;;  %v12582_v7 = vpop.f32.mrf.mxu1  ;;  %v17769_v33 = vld [vmem:[#allocation30_spill] sm:$0xff] }
 0x4da   : > { %v7423_v18 = vadd.f32 %v5055_v61, %v17766_v31  ;;  %v5130_v24 = vmul.f32 0.6931472, %v9043_v53  ;;  %v4340_v30 = vmul.f32 1.442695, %v3770_v45  ;;  %9054 = vpow2.f32 %v4006_v54  ;;  %v2192_v46 = vpop.f32.mrf.mxu0 }
 0x4db   : > { %v6558_v52 = vsel %vm12547_vm14, %v6555_v3, %v6552_v47  ;;  %v12576_v36 = vadd.f32 %v2186_v43, %v11804_v16  ;;  %v12580_v40 = vadd.f32 %v11950_v10, %v11125_v9  ;;  %v12584_v8 = vpop.eup %9044  ;;  %v17767_v2 = vmax.f32 %v12382_v60, 0.0  ;;  %v12603_v59 = vpop.f32.mrf.mxu1  ;;  %2840 = vmatmul.mubr.bf16.gmra.mxu1 %v17769_v33 }
 0x4dc   : > { %7743 = vst [vmem:[%s11350_s2 + $0x1f8] sm:$0xff] %v7423_v18  ;;  %v5136_v57 = vsel %vm12564_vm15, %v5133_v6, %v5130_v24  ;;  %9056 = vpow2.f32 %v4340_v30  ;;  %v12592_v43 = vadd.f32 %v2188_v21, %v11808_v17  ;;  %v17768_v50 = vmax.f32 %v12388_v42, 0.0  ;;  %2849 = vmatprep.mubr.bf16.mxu1 %v17565_v48 }
 0x4dd   : > { %v7590_v22 = vadd.f32 %v6558_v52, %v17767_v2  ;;  %v6565_v58 = vand.u32 2147483647, %v12514_v51  ;;  %v5140_v3 = vmul.f32 -0.5, %v12545_v1  ;;  %v6640_v26 = vadd.f32 1.0, %v12584_v8 }
 0x4de   : > { %v7432_v10 = vadd.f32 %v5136_v57, %v17768_v50  ;;  %v3111_v60 = vmax.f32 %v12423_v39, 0.0  ;;  %v3292_v37 = vand.u32 2147483647, %v12576_v36  ;;  %v3451_v0 = vand.u32 2147483647, %v12580_v40 }
 0x4df   : > { %7910 = vst [vmem:[%s11350_s2 + $0x730] sm:$0xff] %v7590_v22  ;;  %v6564_v25 = vmul.f32 %v12514_v51, %v6563_v14  ;;  %v2953_v55 = vmax.f32 %v12449_v32, 0.0  ;;  %v3120_v6 = vmax.f32 %v12454_v49, 0.0  ;;  %9058 = vlog2.f32 %v6640_v26 }
 0x4e0   : > { %v9047_v42 = vpop.eup %9046  ;;  %7752 = vst [vmem:[%s11350_s2 + $0x240] sm:$0xff] %v7432_v10  ;;  %v3612_v41 = vsub.f32 0.0, %v3292_v37  ;;  %v3771_v45 = vsub.f32 0.0, %v3451_v0  ;;  %v3293_v53 = vand.u32 2147483647, %v12592_v43  ;;  %v5141_v61 = vadd.f32 1.0, %v5140_v3 }
 0x4e1   : > { %v6561_v39 = vmul.f32 0.6931472, %v9047_v42  ;;  %vm6566_vm0 = vcmp.lt.f32.partialorder %v6565_v58, 0.0004427343  ;;  %v12614_v47 = vadd.f32 %v12055_v11, %v11121_v27  ;;  %v12617_v51 = vadd.f32 %v2192_v46, %v11804_v16  ;;  %v12619_v32 = vpop.eup %9048 }
 0x4e2   : > { %v4024_v21 = vmul.f32 1.442695, %v3612_v41  ;;  %v4342_v31 = vmul.f32 1.442695, %v3771_v45  ;;  %v3613_v18 = vsub.f32 0.0, %v3293_v53  ;;  %v2962_v30 = vmax.f32 %v12489_v44, 0.0 }
 0x4e3   : > { %v6567_v54 = vsel %vm6566_vm0, %v6564_v25, %v6561_v39  ;;  %v5143_v14 = vand.u32 2147483647, %v12545_v1  ;;  %v5218_v52 = vadd.f32 1.0, %v12619_v32  ;;  %v3121_v11 = vmax.f32 %v12504_v29, 0.0 }
 0x4e4   : > { %v7591_v24 = vadd.f32 %v6567_v54, %v3111_v60  ;;  %9060 = vpow2.f32 %v4024_v21  ;;  %v4026_v2 = vmul.f32 1.442695, %v3613_v18  ;;  %v3460_v22 = vand.u32 2147483647, %v12614_v47 }
 0x4e5   : > { %v9051_v57 = vpop.eup %9050  ;;  %v5142_v50 = vmul.f32 %v12545_v1, %v5141_v61  ;;  %v6643_v10 = vmul.f32 -0.5, %v12584_v8  ;;  %9062 = vlog2.f32 %v5218_v52  ;;  %v2963_v58 = vmax.f32 %v12529_v12, 0.0 }
 0x4e6   : > { %7911 = vst [vmem:[%s11350_s2 + $0x738] sm:$0xff] %v7591_v24  ;;  %v12630_v3 = vpop.eup %9052  ;;  %v5139_v26 = vmul.f32 0.6931472, %v9051_v57  ;;  %9064 = vpow2.f32 %v4342_v31  ;;  %v3780_v60 = vsub.f32 0.0, %v3460_v22  ;;  %v3302_v37 = vand.u32 2147483647, %v12617_v51 }
 0x4e7   : > { %vm5144_vm1 = vcmp.lt.f32.partialorder %v5143_v14, 0.0004427343  ;;  %v6646_v0 = vand.u32 2147483647, %v12584_v8  ;;  %v6649_v46 = vadd.f32 1.0, %v12630_v3  ;;  %v3130_v1 = vmax.f32 %v12535_v63, 0.0  ;;  %v12636_v33 = vpop.eup %9054 }
 0x4e8   : > { %v5145_v42 = vsel %vm5144_vm1, %v5142_v50, %v5139_v26  ;;  %9066 = vpow2.f32 %v4026_v2  ;;  %v4360_v25 = vmul.f32 1.442695, %v3780_v60  ;;  %v3622_v39 = vsub.f32 0.0, %v3302_v37  ;;  %v2194_v50 = vpop.f32.mrf.mxu0 }
 0x4e9   : > { %v12638_v41 = vpop.eup %9056  ;;  %v7433_v45 = vadd.f32 %v5145_v42, %v2953_v55  ;;  %v6644_v53 = vadd.f32 1.0, %v6643_v10  ;;  %v5221_v61 = vmul.f32 -0.5, %v12619_v32  ;;  %9068 = vlog2.f32 %v6649_v46 }
 0x4ea   : > { %v5224_v54 = vand.u32 2147483647, %v12619_v32  ;;  %v5227_v21 = vadd.f32 1.0, %v12636_v33  ;;  %v6730_v31 = vadd.f32 1.0, %v12638_v41  ;;  %v12646_v18 = vadd.f32 %v12074_v20, %v11125_v9 }
 0x4eb   : > { %7753 = vst [vmem:[%s11350_s2 + $0x248] sm:$0xff] %v7433_v45  ;;  %vm12649_vm2 = vcmp.lt.f32.partialorder %v6646_v0, 0.0004427343  ;;  %v2972_v55 = vmax.f32 %v12576_v36, 0.0  ;;  %v3131_v14 = vmax.f32 %v12580_v40, 0.0  ;;  %9070 = vpow2.f32 %v4360_v25 }
 0x4ec   : > { %v9059_v52 = vpop.eup %9058  ;;  %v6652_v2 = vmul.f32 -0.5, %v12630_v3  ;;  %9072 = vlog2.f32 %v5227_v21  ;;  %v4044_v57 = vmul.f32 1.442695, %v3622_v39  ;;  %v6645_v10 = vmul.f32 %v12584_v8, %v6644_v53 }
 0x4ed   : > { %v6642_v20 = vmul.f32 0.6931472, %v9059_v52  ;;  %v5222_v26 = vadd.f32 1.0, %v5221_v61  ;;  %9074 = vlog2.f32 %v6730_v31  ;;  %vm12658_vm3 = vcmp.lt.f32.partialorder %v5224_v54, 0.0004427343 }
 0x4ee   : > { %v6655_v37 = vand.u32 2147483647, %v12630_v3  ;;  %9076 = vpow2.f32 %v4044_v57  ;;  %v3461_v0 = vand.u32 2147483647, %v12646_v18  ;;  %v5230_v42 = vmul.f32 -0.5, %v12636_v33 }
 0x4ef   : > { %v6648_v46 = vsel %vm12649_vm2, %v6645_v10, %v6642_v20  ;;  %v6733_v25 = vmul.f32 -0.5, %v12638_v41  ;;  %v12669_v8 = vadd.f32 %v2194_v50, %v11808_v17  ;;  %v6653_v45 = vadd.f32 1.0, %v6652_v2  ;;  %v12690_v50 = vpop.f32.mrf.mxu1 }
 0x4f0   : > { %v7600_v39 = vadd.f32 %v6648_v46, %v3120_v6  ;;  %v3781_v53 = vsub.f32 0.0, %v3461_v0  ;;  %v12675_v61 = vadd.f32 %v12096_v5, %v11121_v27  ;;  %v5233_v21 = vand.u32 2147483647, %v12636_v33 }
 0x4f1   : > { %v12677_v54 = vpop.eup %9060  ;;  %v6736_v31 = vand.u32 2147483647, %v12638_v41  ;;  %v5223_v49 = vmul.f32 %v12619_v32, %v5222_v26  ;;  %vm12685_vm4 = vcmp.lt.f32.partialorder %v6655_v37, 0.0004427343  ;;  %v5231_v0 = vadd.f32 1.0, %v5230_v42 }
 0x4f2   : > { %v9063_v57 = vpop.eup %9062  ;;  %7920 = vst [vmem:[%s11350_s2 + $0x780] sm:$0xff] %v7600_v39  ;;  %v5308_v5 = vadd.f32 1.0, %v12677_v54  ;;  %v4362_v2 = vmul.f32 1.442695, %v3781_v53  ;;  %v6734_v46 = vadd.f32 1.0, %v6733_v25  ;;  %v6654_v39 = vmul.f32 %v12630_v3, %v6653_v45  ;;  %v2196_v3 = vpop.f32.mrf.mxu0 }
 0x4f3   : > { %v12692_v20 = vpop.eup %9064  ;;  %v5220_v10 = vmul.f32 0.6931472, %v9063_v57  ;;  %v3303_v52 = vand.u32 2147483647, %v12669_v8  ;;  %v3470_v26 = vand.u32 2147483647, %v12675_v61 }
 0x4f4   : > { %9078 = vlog2.f32 %v5308_v5  ;;  %v6739_v32 = vadd.f32 1.0, %v12692_v20  ;;  %vm12702_vm5 = vcmp.lt.f32.partialorder %v5233_v21, 0.0004427343  ;;  %vm12706_vm6 = vcmp.lt.f32.partialorder %v6736_v31, 0.0004427343 }
 0x4f5   : > { %v12698_v37 = vpop.eup %9066  ;;  %v5226_v53 = vsel %vm12658_vm3, %v5223_v49, %v5220_v10  ;;  %9080 = vpow2.f32 %v4362_v2  ;;  %v5311_v57 = vmul.f32 -0.5, %v12677_v54  ;;  %v12714_v49 = vpop.f32.mrf.mxu1  ;;  %v5232_v5 = vmul.f32 %v12636_v33, %v5231_v0 }
 0x4f6   : > { %v9069_v25 = vpop.eup %9068  ;;  %v7442_v45 = vadd.f32 %v5226_v53, %v2962_v30  ;;  %9082 = vlog2.f32 %v6739_v32  ;;  %v5317_v60 = vadd.f32 1.0, %v12698_v37  ;;  %v6735_v31 = vmul.f32 %v12638_v41, %v6734_v46 }
 0x4f7   : > { %v6651_v21 = vmul.f32 0.6931472, %v9069_v25  ;;  %v3623_v10 = vsub.f32 0.0, %v3303_v52  ;;  %v6742_v2 = vmul.f32 -0.5, %v12692_v20  ;;  %v3790_v44 = vsub.f32 0.0, %v3470_v26 }
 0x4f8   : > { %v12718_v22 = vpop.eup %9070  ;;  %7762 = vst [vmem:[%s11350_s2 + $0x290] sm:$0xff] %v7442_v45  ;;  %9084 = vlog2.f32 %v5317_v60  ;;  %v12723_v30 = vadd.f32 %v2196_v3, %v11804_v16  ;;  %v5320_v33 = vmul.f32 -0.5, %v12698_v37  ;;  %v12731_v52 = vadd.f32 %v12123_v4, %v11125_v9  ;;  %v12736_v45 = vpop.f32.mrf.mxu1 }
 0x4f9   : > { %v9073_v32 = vpop.eup %9072  ;;  %v6657_v53 = vsel %vm12685_vm4, %v6654_v39, %v6651_v21  ;;  %v6820_v41 = vadd.f32 1.0, %v12718_v22  ;;  %v5312_v3 = vadd.f32 1.0, %v5311_v57  ;;  %v5314_v25 = vand.u32 2147483647, %v12677_v54 }
 0x4fa   : > { %v9075_v0 = vpop.eup %9074  ;;  %v7601_v46 = vadd.f32 %v6657_v53, %v3121_v11  ;;  %v5229_v26 = vmul.f32 0.6931472, %v9073_v32  ;;  %v6745_v60 = vand.u32 2147483647, %v12692_v20  ;;  %v4046_v21 = vmul.f32 1.442695, %v3623_v10  ;;  %v2198_v10 = vpop.f32.mrf.mxu0 }
 0x4fb   : > { %v12738_v6 = vpop.eup %9076  ;;  %v6732_v39 = vmul.f32 0.6931472, %v9075_v0  ;;  %9086 = vlog2.f32 %v6820_v41  ;;  %v6743_v29 = vadd.f32 1.0, %v6742_v2  ;;  %v4380_v57 = vmul.f32 1.442695, %v3790_v44  ;;  %v12757_v12 = vpop.f32.mrf.mxu1 }
 0x4fc   : > { %7921 = vst [vmem:[%s11350_s2 + $0x788] sm:$0xff] %v7601_v46  ;;  %v5235_v4 = vsel %vm12702_vm5, %v5232_v5, %v5229_v26  ;;  %v5398_v11 = vadd.f32 1.0, %v12738_v6  ;;  %v5321_v0 = vadd.f32 1.0, %v5320_v33  ;;  %v5323_v41 = vand.u32 2147483647, %v12698_v37 }
 0x4fd   : > { %v7443_v32 = vadd.f32 %v5235_v4, %v2963_v58  ;;  %v6738_v53 = vsel %vm12706_vm6, %v6735_v31, %v6732_v39  ;;  %vm12752_vm7 = vcmp.lt.f32.partialorder %v5314_v25, 0.0004427343  ;;  %v6823_v2 = vmul.f32 -0.5, %v12718_v22  ;;  %v17782_v58 = vld [vmem:[#allocation31_spill] sm:$0xff] }
 0x4fe   : > { %v7610_v24 = vadd.f32 %v6738_v53, %v3130_v1  ;;  %9088 = vlog2.f32 %v5398_v11  ;;  %2850 = vmatmul.mubr.bf16.gmra.mxu1 %v17782_v58  ;;  %v5313_v42 = vmul.f32 %v12677_v54, %v5312_v3  ;;  %vm12762_vm8 = vcmp.lt.f32.partialorder %v6745_v60, 0.0004427343 }
 0x4ff   : > { %7763 = vst [vmem:[%s11350_s2 + $0x298] sm:$0xff] %v7443_v32  ;;  %9090 = vpow2.f32 %v4046_v21  ;;  %v3312_v63 = vand.u32 2147483647, %v12723_v30  ;;  %2859 = vmatprep.mubr.bf16.mxu1 %v17565_v48  ;;  %v6744_v1 = vmul.f32 %v12692_v20, %v6743_v29  ;;  %v3471_v44 = vand.u32 2147483647, %v12731_v52  ;;  %v2202_v29 = vpop.f32.mrf.mxu0 }
 0x500   : > { %7930 = vst [vmem:[%s11350_s2 + $0x7d0] sm:$0xff] %v7610_v24  ;;  %9092 = vpow2.f32 %v4380_v57  ;;  %v12772_v33 = vadd.f32 %v2198_v10, %v11808_v17  ;;  %v5322_v54 = vmul.f32 %v12698_v37, %v5321_v0  ;;  %vm12775_vm9 = vcmp.lt.f32.partialorder %v5323_v41, 0.0004427343 }
 0x501   : > { %v9079_v46 = vpop.eup %9078  ;;  %v6826_v3 = vand.u32 2147483647, %v12718_v22  ;;  %v3632_v25 = vsub.f32 0.0, %v3312_v63  ;;  %v6824_v20 = vadd.f32 1.0, %v6823_v2  ;;  %v3791_v21 = vsub.f32 0.0, %v3471_v44 }
 0x502   : > { %v12780_v39 = vpop.eup %9080  ;;  %v5310_v60 = vmul.f32 0.6931472, %v9079_v46  ;;  %v3313_v4 = vand.u32 2147483647, %v12772_v33  ;;  %v5401_v57 = vmul.f32 -0.5, %v12738_v6  ;;  %v12787_v53 = vadd.f32 %v12221_v15, %v11121_v27 }
 0x503   : > { %v9083_v11 = vpop.eup %9082  ;;  %v6829_v37 = vadd.f32 1.0, %v12780_v39  ;;  %v4064_v32 = vmul.f32 1.442695, %v3632_v25  ;;  %v4382_v10 = vmul.f32 1.442695, %v3791_v21  ;;  %v12794_v63 = vadd.f32 %v2202_v29, %v11804_v16 }
 0x504   : > { %v5316_v0 = vsel %vm12752_vm7, %v5313_v42, %v5310_v60  ;;  %v6741_v41 = vmul.f32 0.6931472, %v9083_v11  ;;  %v3633_v24 = vsub.f32 0.0, %v3313_v4  ;;  %v12798_v44 = vadd.f32 %v12238_v35, %v11125_v9  ;;  %v2204_v11 = vpop.f32.mrf.mxu0 }
 0x505   : > { %v9085_v2 = vpop.eup %9084  ;;  %v7452_v58 = vadd.f32 %v5316_v0, %v2972_v55  ;;  %9094 = vlog2.f32 %v6829_v37  ;;  %v5402_v55 = vadd.f32 1.0, %v5401_v57  ;;  %v5404_v46 = vand.u32 2147483647, %v12738_v6 }
 0x506   : > { %v6747_v15 = vsel %vm12762_vm8, %v6744_v1, %v6741_v41  ;;  %v5319_v5 = vmul.f32 0.6931472, %v9085_v2  ;;  %9096 = vpow2.f32 %v4064_v32  ;;  %v4066_v42 = vmul.f32 1.442695, %v3633_v24 }
 0x507   : > { %7772 = vst [vmem:[%s11350_s2 + $0x2e0] sm:$0xff] %v7452_v58  ;;  %v7611_v36 = vadd.f32 %v6747_v15, %v3131_v14  ;;  %9098 = vpow2.f32 %v4382_v10  ;;  %v6825_v60 = vmul.f32 %v12718_v22, %v6824_v20  ;;  %v3480_v31 = vand.u32 2147483647, %v12787_v53 }
 0x508   : > { %v9087_v25 = vpop.eup %9086  ;;  %v5325_v35 = vsel %vm12775_vm9, %v5322_v54, %v5319_v5  ;;  %9100 = vpow2.f32 %v4066_v42  ;;  %v17787_v1 = vmax.f32 %v12592_v43, 0.0  ;;  %v6832_v14 = vmul.f32 -0.5, %v12780_v39 }
 0x509   : > { %7931 = vst [vmem:[%s11350_s2 + $0x7d8] sm:$0xff] %v7611_v36  ;;  %v6822_v40 = vmul.f32 0.6931472, %v9087_v25  ;;  %v3322_v4 = vand.u32 2147483647, %v12794_v63  ;;  %v3141_v29 = vmax.f32 %v12646_v18, 0.0  ;;  %v5403_v57 = vmul.f32 %v12738_v6, %v5402_v55 }
 0x50a   : > { %v7453_v21 = vadd.f32 %v5325_v35, %v17787_v1  ;;  %vm6827_vm10 = vcmp.lt.f32.partialorder %v6826_v3, 0.0004427343  ;;  %v3800_v26 = vsub.f32 0.0, %v3480_v31  ;;  %v3481_v54 = vand.u32 2147483647, %v12798_v44 }
 0x50b   : > { %v9089_v22 = vpop.eup %9088  ;;  %v6828_v20 = vsel %vm6827_vm10, %v6825_v60, %v6822_v40  ;;  %vm12819_vm11 = vcmp.lt.f32.partialorder %v5404_v46, 0.0004427343  ;;  %v3642_v37 = vsub.f32 0.0, %v3322_v4  ;;  %v17790_v3 = vmax.f32 %v12614_v47, 0.0 }
 0x50c   : > { %7773 = vst [vmem:[%s11350_s2 + $0x2e8] sm:$0xff] %v7453_v21  ;;  %v12823_v32 = vpop.eup %9090  ;;  %v5400_v0 = vmul.f32 0.6931472, %v9089_v22  ;;  %v6835_v41 = vand.u32 2147483647, %v12780_v39  ;;  %v3801_v10 = vsub.f32 0.0, %v3481_v54  ;;  %v12832_v15 = vadd.f32 %v2204_v11, %v11808_v17  ;;  %v2206_v54 = vpop.f32.mrf.mxu0 }
 0x50d   : > { %v7620_v18 = vadd.f32 %v6828_v20, %v17790_v3  ;;  %v12828_v24 = vpop.eup %9092  ;;  %v6833_v2 = vadd.f32 1.0, %v6832_v14  ;;  %v5407_v58 = vadd.f32 1.0, %v12823_v32  ;;  %v4400_v6 = vmul.f32 1.442695, %v3800_v26  ;;  %v12858_v11 = vpop.f32.mrf.mxu1 }
 0x50e   : > { %v5406_v5 = vsel %vm12819_vm11, %v5403_v57, %v5400_v0  ;;  %v6910_v47 = vadd.f32 1.0, %v12828_v24  ;;  %v4084_v42 = vmul.f32 1.442695, %v3642_v37  ;;  %v12840_v36 = vadd.f32 %v12253_v62, %v11121_v27 }
 0x50f   : > { %7940 = vst [vmem:[%s11350_s2 + $0x820] sm:$0xff] %v7620_v18  ;;  %v17791_v55 = vmax.f32 %v12617_v51, 0.0  ;;  %v2983_v25 = vmax.f32 %v12669_v8, 0.0  ;;  %9102 = vlog2.f32 %v5407_v58  ;;  %v3150_v35 = vmax.f32 %v12675_v61, 0.0 }
 0x510   : > { %9104 = vlog2.f32 %v6910_v47  ;;  %v2992_v60 = vmax.f32 %v12723_v30, 0.0  ;;  %v3151_v31 = vmax.f32 %v12731_v52, 0.0  ;;  %v4402_v1 = vmul.f32 1.442695, %v3801_v10 }
 0x511   : > { %v7462_v46 = vadd.f32 %v5406_v5, %v17791_v55  ;;  %vm12849_vm12 = vcmp.lt.f32.partialorder %v6835_v41, 0.0004427343  ;;  %9106 = vpow2.f32 %v4400_v6  ;;  %v3323_v51 = vand.u32 2147483647, %v12832_v15  ;;  %v12882_v55 = vpop.f32.mrf.mxu1 }
 0x512   : > { %v9095_v40 = vpop.eup %9094  ;;  %v6834_v14 = vmul.f32 %v12780_v39, %v6833_v2  ;;  %9108 = vpow2.f32 %v4084_v42  ;;  %v3490_v26 = vand.u32 2147483647, %v12840_v36  ;;  %v5410_v57 = vmul.f32 -0.5, %v12823_v32 }
 0x513   : > { %7782 = vst [vmem:[%s11350_s2 + $0x330] sm:$0xff] %v7462_v46  ;;  %v12860_v22 = vpop.eup %9096  ;;  %v6831_v20 = vmul.f32 0.6931472, %v9095_v40  ;;  %9110 = vpow2.f32 %v4402_v1  ;;  %v6913_v39 = vmul.f32 -0.5, %v12828_v24  ;;  %v3643_v0 = vsub.f32 0.0, %v3323_v51 }
 0x514   : > { %v12864_v37 = vpop.eup %9098  ;;  %v5488_v3 = vadd.f32 1.0, %v12860_v22  ;;  %v3810_v58 = vsub.f32 0.0, %v3490_v26  ;;  %v12875_v6 = vadd.f32 %v2206_v54, %v11804_v16  ;;  %v5413_v47 = vand.u32 2147483647, %v12823_v32 }
 0x515   : > { %v12869_v41 = vpop.eup %9100  ;;  %v6837_v10 = vsel %vm12849_vm12, %v6834_v14, %v6831_v20  ;;  %v6919_v2 = vadd.f32 1.0, %v12864_v37  ;;  %v12880_v42 = vadd.f32 %v12273_v13, %v11125_v9  ;;  %v5411_v46 = vadd.f32 1.0, %v5410_v57 }
 0x516   : > { %v7621_v5 = vadd.f32 %v6837_v10, %v3141_v29  ;;  %9112 = vlog2.f32 %v5488_v3  ;;  %v6916_v1 = vand.u32 2147483647, %v12828_v24  ;;  %v5497_v21 = vadd.f32 1.0, %v12869_v41 }
 0x517   : > { %9114 = vlog2.f32 %v6919_v2  ;;  %v6914_v51 = vadd.f32 1.0, %v6913_v39  ;;  %v5491_v40 = vmul.f32 -0.5, %v12860_v22  ;;  %v5494_v29 = vand.u32 2147483647, %v12860_v22  ;;  %v12897_v39 = vpop.f32.mrf.mxu1 }
 0x518   : > { %7941 = vst [vmem:[%s11350_s2 + $0x828] sm:$0xff] %v7621_v5  ;;  %v4086_v14 = vmul.f32 1.442695, %v3643_v0  ;;  %v6922_v26 = vmul.f32 -0.5, %v12864_v37  ;;  %9116 = vlog2.f32 %v5497_v21  ;;  %v4420_v13 = vmul.f32 1.442695, %v3810_v58  ;;  %v2208_v58 = vpop.f32.mrf.mxu0 }
 0x519   : > { %v3332_v54 = vand.u32 2147483647, %v12875_v6  ;;  %vm12891_vm13 = vcmp.lt.f32.partialorder %v5413_v47, 0.0004427343  ;;  %v6925_v57 = vand.u32 2147483647, %v12864_v37  ;;  %v5412_v10 = vmul.f32 %v12823_v32, %v5411_v46 }
 0x51a   : > { %v5500_v3 = vmul.f32 -0.5, %v12869_v41  ;;  %9118 = vpow2.f32 %v4086_v14  ;;  %vm12900_vm14 = vcmp.lt.f32.partialorder %v6916_v1, 0.0004427343  ;;  %v6915_v47 = vmul.f32 %v12828_v24, %v6914_v51  ;;  %v2212_v18 = vpop.f32.mrf.mxu0 }
 0x51b   : > { %9120 = vpow2.f32 %v4420_v13  ;;  %v3652_v2 = vsub.f32 0.0, %v3332_v54  ;;  %v5492_v21 = vadd.f32 1.0, %v5491_v40  ;;  %vm12907_vm15 = vcmp.lt.f32.partialorder %v5494_v29, 0.0004427343  ;;  %v12922_v29 = vpop.f32.mrf.mxu1 }
 0x51c   : > { %v9103_v5 = vpop.eup %9102  ;;  %v6923_v32 = vadd.f32 1.0, %v6922_v26  ;;  %vm12914_vm0 = vcmp.lt.f32.partialorder %v6925_v57, 0.0004427343  ;;  %v5501_v24 = vadd.f32 1.0, %v5500_v3  ;;  %v5503_v51 = vand.u32 2147483647, %v12869_v41 }
 0x51d   : > { %v9105_v14 = vpop.eup %9104  ;;  %v5409_v4 = vmul.f32 0.6931472, %v9103_v5  ;;  %v12920_v40 = vadd.f32 %v2208_v58, %v11808_v17  ;;  %v17802_v5 = vld [vmem:[#allocation32_spill] sm:$0xff]  ;;  %v4104_v46 = vmul.f32 1.442695, %v3652_v2  ;;  %v5493_v20 = vmul.f32 %v12860_v22, %v5492_v21 }
 0x51e   : > { %v12912_v1 = vpop.eup %9106  ;;  %v6912_v13 = vmul.f32 0.6931472, %v9105_v14  ;;  %2860 = vmatmul.mubr.bf16.gmra.mxu1 %v17802_v5  ;;  %v3491_v3 = vand.u32 2147483647, %v12880_v42  ;;  %v6924_v2 = vmul.f32 %v12864_v37, %v6923_v32  ;;  %vm12950_vm1 = vcmp.lt.f32.partialorder %v5503_v51, 0.0004427343 }
 0x51f   : > { %v12925_v26 = vpop.eup %9108  ;;  %v5415_v14 = vsel %vm12891_vm13, %v5412_v10, %v5409_v4  ;;  %v7000_v57 = vadd.f32 1.0, %v12912_v1  ;;  %2869 = vmatprep.mubr.bf16.mxu1 %v17565_v48  ;;  %v7003_v48 = vmul.f32 -0.5, %v12912_v1  ;;  %v3333_v0 = vand.u32 2147483647, %v12920_v40 }
 0x520   : > { %v12932_v43 = vpop.eup %9110  ;;  %v7463_v58 = vadd.f32 %v5415_v14, %v2983_v25  ;;  %v6918_v5 = vsel %vm12900_vm14, %v6915_v47, %v6912_v13  ;;  %v5578_v4 = vadd.f32 1.0, %v12925_v26  ;;  %v5581_v8 = vmul.f32 -0.5, %v12925_v26 }
 0x521   : > { %v7630_v10 = vadd.f32 %v6918_v5, %v3150_v35  ;;  %9122 = vlog2.f32 %v7000_v57  ;;  %v7009_v25 = vadd.f32 1.0, %v12932_v43  ;;  %v5502_v47 = vmul.f32 %v12869_v41, %v5501_v24 }
 0x522   : > { %7783 = vst [vmem:[%s11350_s2 + $0x338] sm:$0xff] %v7463_v58  ;;  %9124 = vlog2.f32 %v5578_v4  ;;  %v3811_v35 = vsub.f32 0.0, %v3491_v3  ;;  %v12956_v32 = vadd.f32 %v12375_v19, %v11121_v27  ;;  %v12959_v13 = vadd.f32 %v2212_v18, %v11804_v16 }
 0x523   : > { %v9113_v22 = vpop.eup %9112  ;;  %7950 = vst [vmem:[%s11350_s2 + $0x870] sm:$0xff] %v7630_v10  ;;  %9126 = vpow2.f32 %v4104_v46  ;;  %v7004_v57 = vadd.f32 1.0, %v7003_v48  ;;  %v7006_v41 = vand.u32 2147483647, %v12912_v1  ;;  %v12964_v24 = vadd.f32 %v12398_v38, %v11125_v9 }
 0x524   : > { %v9115_v37 = vpop.eup %9114  ;;  %v5490_v21 = vmul.f32 0.6931472, %v9113_v22  ;;  %9128 = vlog2.f32 %v7009_v25  ;;  %v5582_v3 = vadd.f32 1.0, %v5581_v8  ;;  %v7012_v19 = vmul.f32 -0.5, %v12932_v43 }
 0x525   : > { %v6921_v14 = vmul.f32 0.6931472, %v9115_v37  ;;  %v9117_v46 = vpop.eup %9116  ;;  %v3653_v58 = vsub.f32 0.0, %v3333_v0  ;;  %v4422_v10 = vmul.f32 1.442695, %v3811_v35  ;;  %v17805_v52 = vmax.f32 %v12772_v33, 0.0  ;;  %v2214_v35 = vpop.f32.mrf.mxu0 }
 0x526   : > { %v5496_v51 = vsel %vm12907_vm15, %v5493_v20, %v5490_v21  ;;  %v5499_v38 = vmul.f32 0.6931472, %v9117_v46  ;;  %v3500_v8 = vand.u32 2147483647, %v12956_v32  ;;  %v3342_v25 = vand.u32 2147483647, %v12959_v13 }
 0x527   : > { %v12969_v18 = vpop.eup %9118  ;;  %v7472_v5 = vadd.f32 %v5496_v51, %v2992_v60  ;;  %v6927_v4 = vsel %vm12914_vm0, %v6924_v2, %v6921_v14  ;;  %v5584_v60 = vand.u32 2147483647, %v12925_v26  ;;  %v7015_v54 = vand.u32 2147483647, %v12932_v43 }
 0x528   : > { %v12975_v48 = vpop.eup %9120  ;;  %v7631_v62 = vadd.f32 %v6927_v4, %v3151_v31  ;;  %v5587_v20 = vadd.f32 1.0, %v12969_v18  ;;  %v5505_v30 = vsel %vm12950_vm1, %v5502_v47, %v5499_v38  ;;  %v7013_v0 = vadd.f32 1.0, %v7012_v19 }
 0x529   : > { %7792 = vst [vmem:[%s11350_s2 + $0x380] sm:$0xff] %v7472_v5  ;;  %v7090_v2 = vadd.f32 1.0, %v12975_v48  ;;  %v7473_v31 = vadd.f32 %v5505_v30, %v17805_v52  ;;  %v3171_v22 = vmax.f32 %v12880_v42, 0.0  ;;  %v7005_v37 = vmul.f32 %v12912_v1, %v7004_v57 }
 0x52a   : > { %7951 = vst [vmem:[%s11350_s2 + $0x878] sm:$0xff] %v7631_v62  ;;  %9130 = vlog2.f32 %v5587_v20  ;;  %vm12993_vm2 = vcmp.lt.f32.partialorder %v7006_v41, 0.0004427343  ;;  %v4106_v47 = vmul.f32 1.442695, %v3653_v58  ;;  %v5583_v21 = vmul.f32 %v12925_v26, %v5582_v3  ;;  %v2216_v3 = vpop.f32.mrf.mxu0 }
 0x52b   : > { %9132 = vlog2.f32 %v7090_v2  ;;  %7793 = vst [vmem:[%s11350_s2 + $0x388] sm:$0xff] %v7473_v31  ;;  %v3820_v14 = vsub.f32 0.0, %v3500_v8  ;;  %v3662_v33 = vsub.f32 0.0, %v3342_v25  ;;  %vm12999_vm3 = vcmp.lt.f32.partialorder %v5584_v60, 0.0004427343 }
 0x52c   : > { %9134 = vpow2.f32 %v4422_v10  ;;  %vm13003_vm4 = vcmp.lt.f32.partialorder %v7015_v54, 0.0004427343  ;;  %v3501_v1 = vand.u32 2147483647, %v12964_v24  ;;  %v7014_v41 = vmul.f32 %v12932_v43, %v7013_v0 }
 0x52d   : > { %9136 = vpow2.f32 %v4106_v47  ;;  %v4440_v19 = vmul.f32 1.442695, %v3820_v14  ;;  %v4124_v58 = vmul.f32 1.442695, %v3662_v33  ;;  %v13010_v26 = vadd.f32 %v2214_v35, %v11808_v17 }
 0x52e   : > { %v9123_v57 = vpop.eup %9122  ;;  %v5590_v38 = vmul.f32 -0.5, %v12969_v18  ;;  %v5593_v10 = vand.u32 2147483647, %v12969_v18  ;;  %v7093_v62 = vmul.f32 -0.5, %v12975_v48  ;;  %v3821_v25 = vsub.f32 0.0, %v3501_v1 }
 0x52f   : > { %v9125_v5 = vpop.eup %9124  ;;  %v7002_v4 = vmul.f32 0.6931472, %v9123_v57  ;;  %9138 = vpow2.f32 %v4440_v19  ;;  %v3343_v43 = vand.u32 2147483647, %v13010_v26  ;;  %v13023_v2 = vadd.f32 %v12415_v56, %v11121_v27  ;;  %v13039_v56 = vpop.f32.mrf.mxu1 }
 0x530   : > { %v13015_v20 = vpop.eup %9126  ;;  %v5580_v8 = vmul.f32 0.6931472, %v9125_v5  ;;  %v13026_v52 = vadd.f32 %v2216_v3, %v11804_v16  ;;  %v17812_v31 = vmax.f32 %v12787_v53, 0.0  ;;  %9140 = vpow2.f32 %v4124_v58 }
 0x531   : > { %v9129_v30 = vpop.eup %9128  ;;  %v7008_v60 = vsel %vm12993_vm2, %v7005_v37, %v7002_v4  ;;  %v5668_v54 = vadd.f32 1.0, %v13015_v20  ;;  %v17813_v37 = vmax.f32 %v12794_v63, 0.0  ;;  %v7096_v14 = vand.u32 2147483647, %v12975_v48 }
 0x532   : > { %v7640_v0 = vadd.f32 %v7008_v60, %v17812_v31  ;;  %v5586_v35 = vsel %vm12999_vm3, %v5583_v21, %v5580_v8  ;;  %v7011_v47 = vmul.f32 0.6931472, %v9129_v30  ;;  %v13037_v27 = vadd.f32 %v12434_v34, %v11125_v9 }
 0x533   : > { %v7482_v61 = vadd.f32 %v5586_v35, %v17813_v37  ;;  %9142 = vlog2.f32 %v5668_v54  ;;  %v5591_v21 = vadd.f32 1.0, %v5590_v38  ;;  %v4442_v33 = vmul.f32 1.442695, %v3821_v25  ;;  %v13058_v38 = vpop.f32.mrf.mxu1 }
 0x534   : > { %7960 = vst [vmem:[%s11350_s2 + $0x8c0] sm:$0xff] %v7640_v0  ;;  %v7017_v53 = vsel %vm13003_vm4, %v7014_v41, %v7011_v47  ;;  %v3663_v46 = vsub.f32 0.0, %v3343_v43  ;;  %v17814_v63 = vmax.f32 %v12798_v44, 0.0  ;;  %v7094_v57 = vadd.f32 1.0, %v7093_v62 }
 0x535   : > { %7802 = vst [vmem:[%s11350_s2 + $0x3d0] sm:$0xff] %v7482_v61  ;;  %v3013_v19 = vmax.f32 %v12920_v40, 0.0  ;;  %v3510_v9 = vand.u32 2147483647, %v13023_v2  ;;  %v5671_v34 = vmul.f32 -0.5, %v13015_v20  ;;  %9144 = vpow2.f32 %v4442_v33  ;;  %v2218_v61 = vpop.f32.mrf.mxu0 }
 0x536   : > { %v7641_v1 = vadd.f32 %v7017_v53, %v17814_v63  ;;  %v4126_v58 = vmul.f32 1.442695, %v3663_v46  ;;  %v3352_v3 = vand.u32 2147483647, %v13026_v52  ;;  %vm13052_vm5 = vcmp.lt.f32.partialorder %v5593_v10, 0.0004427343  ;;  %v13079_v46 = vpop.f32.mrf.mxu1 }
 0x537   : > { %v9131_v51 = vpop.eup %9130  ;;  %v3180_v44 = vmax.f32 %v12956_v32, 0.0  ;;  %v3830_v5 = vsub.f32 0.0, %v3510_v9  ;;  %v3511_v4 = vand.u32 2147483647, %v13037_v27  ;;  %v5592_v25 = vmul.f32 %v12969_v18, %v5591_v21 }
 0x538   : > { %7961 = vst [vmem:[%s11350_s2 + $0x8c8] sm:$0xff] %v7641_v1  ;;  %v9133_v62 = vpop.eup %9132  ;;  %v5589_v8 = vmul.f32 0.6931472, %v9131_v51  ;;  %vm13061_vm6 = vcmp.lt.f32.partialorder %v7096_v14, 0.0004427343  ;;  %9146 = vpow2.f32 %v4126_v58  ;;  %v7095_v60 = vmul.f32 %v12975_v48, %v7094_v57 }
 0x539   : > { %v13065_v10 = vpop.eup %9134  ;;  %v7092_v30 = vmul.f32 0.6931472, %v9133_v62  ;;  %v5674_v54 = vand.u32 2147483647, %v13015_v20  ;;  %v3672_v31 = vsub.f32 0.0, %v3352_v3  ;;  %v5672_v18 = vadd.f32 1.0, %v5671_v34 }
 0x53a   : > { %v13069_v0 = vpop.eup %9136  ;;  %v5595_v35 = vsel %vm13052_vm5, %v5592_v25, %v5589_v8  ;;  %v7099_v47 = vadd.f32 1.0, %v13065_v10  ;;  %v4460_v37 = vmul.f32 1.442695, %v3830_v5  ;;  %v17819_v14 = vmax.f32 %v12832_v15, 0.0 }
 0x53b   : > { %v7098_v48 = vsel %vm13061_vm6, %v7095_v60, %v7092_v30  ;;  %v5677_v21 = vadd.f32 1.0, %v13069_v0  ;;  %v3831_v33 = vsub.f32 0.0, %v3511_v4  ;;  %v17820_v63 = vmax.f32 %v12840_v36, 0.0  ;;  %v2222_v4 = vpop.f32.mrf.mxu0  ;;  %v13104_v30 = vpop.f32.mrf.mxu1  ;;  %v17823_v60 = vld [vmem:[#allocation33_spill] sm:$0xff] }
 0x53c   : > { %v7483_v53 = vadd.f32 %v5595_v35, %v17819_v14  ;;  %9148 = vlog2.f32 %v7099_v47  ;;  %v3022_v57 = vmax.f32 %v12959_v13, 0.0  ;;  %v3181_v9 = vmax.f32 %v12964_v24, 0.0  ;;  %v13085_v34 = vpop.eup %9138  ;;  %2870 = vmatmul.mubr.bf16.gmra.mxu1 %v17823_v60 }
 0x53d   : > { %v7650_v1 = vadd.f32 %v7098_v48, %v17820_v63  ;;  %vm13088_vm7 = vcmp.lt.f32.partialorder %v5674_v54, 0.0004427343  ;;  %9150 = vlog2.f32 %v5677_v21  ;;  %v4144_v3 = vmul.f32 1.442695, %v3672_v31  ;;  %v13100_v62 = vpop.eup %9140 }
 0x53e   : > { %7803 = vst [vmem:[%s11350_s2 + $0x3d8] sm:$0xff] %v7483_v53  ;;  %v5673_v36 = vmul.f32 %v13015_v20, %v5672_v18  ;;  %v7180_v51 = vadd.f32 1.0, %v13085_v34  ;;  %v13098_v5 = vadd.f32 %v2218_v61, %v11808_v17  ;;  %v7102_v8 = vmul.f32 -0.5, %v13065_v10 }
 0x53f   : > { %7970 = vst [vmem:[%s11350_s2 + $0x910] sm:$0xff] %v7650_v1  ;;  %9152 = vpow2.f32 %v4460_v37  ;;  %v4462_v43 = vmul.f32 1.442695, %v3831_v33  ;;  %v5680_v54 = vmul.f32 -0.5, %v13069_v0  ;;  %v5758_v31 = vadd.f32 1.0, %v13100_v62  ;;  %v17824_v37 = vld [vmem:[#allocation34_spill] sm:$0xff] }
 0x540   : > { %v9143_v20 = vpop.eup %9142  ;;  %9154 = vlog2.f32 %v7180_v51  ;;  %v13111_v47 = vadd.f32 %v2222_v4, %v11804_v16  ;;  %v1483_v61 = vsub.s32 4, %v17824_v37  ;;  %v7105_v14 = vand.u32 2147483647, %v13065_v10 }
 0x541   : > { %v5670_v18 = vmul.f32 0.6931472, %v9143_v20  ;;  %9156 = vpow2.f32 %v4144_v3  ;;  %v3353_v48 = vand.u32 2147483647, %v13098_v5  ;;  %v7103_v63 = vadd.f32 1.0, %v7102_v8 }
 0x542   : > { %9158 = vlog2.f32 %v5758_v31  ;;  %v13117_v21 = vpop.eup %9144  ;;  %v7183_v1 = vmul.f32 -0.5, %v13085_v34  ;;  %v17825_v3 = vmax.f32 %v12875_v6, 0.0  ;;  %v5681_v4 = vadd.f32 1.0, %v5680_v54 }
 0x543   : > { %v5676_v33 = vsel %vm13088_vm7, %v5673_v36, %v5670_v18  ;;  %9160 = vpow2.f32 %v4462_v43  ;;  %v5683_v60 = vand.u32 2147483647, %v13069_v0  ;;  %v7189_v20 = vadd.f32 1.0, %v13117_v21  ;;  %v13130_v36 = vld [vmem:[#allocation14] sm:$0xff] }
 0x544   : > { %v7492_v51 = vadd.f32 %v5676_v33, %v17825_v3  ;;  %v7186_v53 = vand.u32 2147483647, %v13085_v34  ;;  %v3673_v35 = vsub.f32 0.0, %v3353_v48  ;;  %v3362_v15 = vand.u32 2147483647, %v13111_v47 }
 0x545   : > { %v13126_v31 = vpop.eup %9146  ;;  %v13133_v8 = vrot.slane %v13130_v36, %v1483_v61  ;;  %vm13136_vm8 = vcmp.lt.f32.partialorder %v7105_v14, 0.0004427343  ;;  %v5761_v43 = vmul.f32 -0.5, %v13100_v62  ;;  %9162 = vlog2.f32 %v7189_v20  ;;  %v2224_v20 = vpop.f32.mrf.mxu0 }
 0x546   : > { %7812 = vst [vmem:[%s11350_s2 + $0x420] sm:$0xff] %v7492_v51  ;;  %v5767_v54 = vadd.f32 1.0, %v13126_v31  ;;  %v7184_v18 = vadd.f32 1.0, %v7183_v1  ;;  %v5764_v48 = vand.u32 2147483647, %v13100_v62  ;;  %v3682_v3 = vsub.f32 0.0, %v3362_v15 }
 0x547   : > { %v4146_v33 = vmul.f32 1.442695, %v3673_v35  ;;  %v7104_v25 = vmul.f32 %v13065_v10, %v7103_v63  ;;  %v5682_v61 = vmul.f32 %v13069_v0, %v5681_v4  ;;  %v13147_v14 = vadd.f32 %v12541_v28, %v13133_v8  ;;  %v2226_v58 = vpop.f32.mrf.mxu0 }
 0x548   : > { %9164 = vlog2.f32 %v5767_v54  ;;  %vm13149_vm9 = vcmp.lt.f32.partialorder %v5683_v60, 0.0004427343  ;;  %vm13153_vm10 = vcmp.lt.f32.partialorder %v7186_v53, 0.0004427343  ;;  %v4164_v35 = vmul.f32 1.442695, %v3682_v3 }
 0x549   : > { %v9149_v51 = vpop.eup %9148  ;;  %9166 = vpow2.f32 %v4146_v33  ;;  %v5762_v0 = vadd.f32 1.0, %v5761_v43  ;;  %v7192_v4 = vmul.f32 -0.5, %v13117_v21  ;;  %v3204_v28 = vand.u32 2147483647, %v13147_v14 }
 0x54a   : > { %v9151_v10 = vpop.eup %9150  ;;  %v7101_v63 = vmul.f32 0.6931472, %v9149_v51  ;;  %v7185_v60 = vmul.f32 %v13085_v34, %v7184_v18  ;;  %vm13160_vm11 = vcmp.lt.f32.partialorder %v5764_v48, 0.0004427343  ;;  %9168 = vpow2.f32 %v4164_v35 }
 0x54b   : > { %v5679_v15 = vmul.f32 0.6931472, %v9151_v10  ;;  %v5770_v43 = vmul.f32 -0.5, %v13126_v31  ;;  %v3524_v3 = vsub.f32 0.0, %v3204_v28  ;;  %v13170_v51 = vadd.f32 %v2224_v20, %v11808_v17 }
 0x54c   : > { %v13164_v53 = vpop.eup %9152  ;;  %v7107_v33 = vsel %vm13136_vm8, %v7104_v25, %v7101_v63  ;;  %v7195_v48 = vand.u32 2147483647, %v13117_v21  ;;  %v5763_v20 = vmul.f32 %v13100_v62, %v5762_v0  ;;  %v7193_v28 = vadd.f32 1.0, %v7192_v4 }
 0x54d   : > { %v9155_v10 = vpop.eup %9154  ;;  %v7651_v34 = vadd.f32 %v7107_v33, %v3171_v22  ;;  %v5685_v18 = vsel %vm13149_vm9, %v5682_v61, %v5679_v15  ;;  %v7270_v6 = vadd.f32 1.0, %v13164_v53  ;;  %v5773_v22 = vand.u32 2147483647, %v13126_v31 }
 0x54e   : > { %v13178_v25 = vpop.eup %9156  ;;  %v7493_v35 = vadd.f32 %v5685_v18, %v3013_v19  ;;  %v7182_v63 = vmul.f32 0.6931472, %v9155_v10  ;;  %v3848_v61 = vmul.f32 1.442695, %v3524_v3  ;;  %v5771_v33 = vadd.f32 1.0, %v5770_v43 }
 0x54f   : > { %v9159_v42 = vpop.eup %9158  ;;  %7971 = vst [vmem:[%s11350_s2 + $0x918] sm:$0xff] %v7651_v34  ;;  %9170 = vlog2.f32 %v7270_v6  ;;  %v5848_v41 = vadd.f32 1.0, %v13178_v25  ;;  %v3363_v62 = vand.u32 2147483647, %v13170_v51  ;;  %v1487_v4 = vsub.s32 5, %v17824_v37 }
 0x550   : > { %v13186_v15 = vpop.eup %9160  ;;  %7813 = vst [vmem:[%s11350_s2 + $0x428] sm:$0xff] %v7493_v35  ;;  %v7188_v40 = vsel %vm13153_vm10, %v7185_v60, %v7182_v63  ;;  %v5760_v19 = vmul.f32 0.6931472, %v9159_v42  ;;  %v13196_v10 = vadd.f32 %v2226_v58, %v11804_v16  ;;  %v7194_v1 = vmul.f32 %v13117_v21, %v7193_v28 }
 0x551   : > { %v7660_v0 = vadd.f32 %v7188_v40, %v3180_v44  ;;  %9172 = vlog2.f32 %v5848_v41  ;;  %vm13201_vm12 = vcmp.lt.f32.partialorder %v7195_v48, 0.0004427343  ;;  %v7279_v43 = vadd.f32 1.0, %v13186_v15 }
 0x552   : > { %v5766_v3 = vsel %vm13160_vm11, %v5763_v20, %v5760_v19  ;;  %v9163_v32 = vpop.eup %9162  ;;  %vm13209_vm13 = vcmp.lt.f32.partialorder %v5773_v22, 0.0004427343  ;;  %v7273_v54 = vmul.f32 -0.5, %v13164_v53  ;;  %9174 = vpow2.f32 %v3848_v61 }
 0x553   : > { %7980 = vst [vmem:[%s11350_s2 + $0x960] sm:$0xff] %v7660_v0  ;;  %v7502_v44 = vadd.f32 %v5766_v3, %v3022_v57  ;;  %v7191_v34 = vmul.f32 0.6931472, %v9163_v32  ;;  %v5772_v21 = vmul.f32 %v13126_v31, %v5771_v33  ;;  %9176 = vlog2.f32 %v7279_v43  ;;  %v2228_v3 = vpop.f32.mrf.mxu0 }
 0x554   : > { %v3683_v18 = vsub.f32 0.0, %v3363_v62  ;;  %v7276_v6 = vand.u32 2147483647, %v13164_v53  ;;  %v5851_v35 = vmul.f32 -0.5, %v13178_v25  ;;  %v13219_v13 = vrot.slane %v13130_v36, %v1487_v4 }
 0x555   : > { %v9165_v48 = vpop.eup %9164  ;;  %7822 = vst [vmem:[%s11350_s2 + $0x470] sm:$0xff] %v7502_v44  ;;  %v3372_v57 = vand.u32 2147483647, %v13196_v10  ;;  %v7197_v20 = vsel %vm13201_vm12, %v7194_v1, %v7191_v34  ;;  %v7282_v28 = vmul.f32 -0.5, %v13186_v15  ;;  %v7274_v41 = vadd.f32 1.0, %v7273_v54 }
 0x556   : > { %v13222_v63 = vpop.eup %9166  ;;  %v5769_v31 = vmul.f32 0.6931472, %v9165_v48  ;;  %v4166_v42 = vmul.f32 1.442695, %v3683_v18  ;;  %v7661_v22 = vadd.f32 %v7197_v20, %v3181_v9  ;;  %v5854_v61 = vand.u32 2147483647, %v13178_v25 }
 0x557   : > { %v5857_v36 = vadd.f32 1.0, %v13222_v63  ;;  %v13231_v40 = vpop.eup %9168  ;;  %v13237_v33 = vadd.f32 %v12561_v23, %v13219_v13  ;;  %v3692_v62 = vsub.f32 0.0, %v3372_v57  ;;  %v17838_v24 = vmax.f32 %v13010_v26, 0.0 }
 0x558   : > { %v5775_v19 = vsel %vm13209_vm13, %v5772_v21, %v5769_v31  ;;  %9178 = vpow2.f32 %v4166_v42  ;;  %7981 = vst [vmem:[%s11350_s2 + $0x968] sm:$0xff] %v7661_v22  ;;  %v5852_v0 = vadd.f32 1.0, %v5851_v35  ;;  %v3042_v4 = vmax.f32 %v13111_v47, 0.0 }
 0x559   : > { %v7503_v9 = vadd.f32 %v5775_v19, %v17838_v24  ;;  %9180 = vlog2.f32 %v5857_v36  ;;  %v7283_v1 = vadd.f32 1.0, %v7282_v28  ;;  %v7285_v60 = vand.u32 2147483647, %v13186_v15  ;;  %v2232_v24 = vpop.f32.mrf.mxu0 }
 0x55a   : > { %v5938_v43 = vadd.f32 1.0, %v13231_v40  ;;  %v2884_v32 = vmax.f32 %v13147_v14, 0.0  ;;  %vm13247_vm14 = vcmp.lt.f32.partialorder %v7276_v6, 0.0004427343  ;;  %v3205_v26 = vand.u32 2147483647, %v13237_v33 }
 0x55b   : > { %7823 = vst [vmem:[%s11350_s2 + $0x478] sm:$0xff] %v7503_v9  ;;  %v4184_v44 = vmul.f32 1.442695, %v3692_v62  ;;  %v13254_v58 = vadd.f32 %v12582_v7, %v13133_v8  ;;  %v7275_v34 = vmul.f32 %v13164_v53, %v7274_v41  ;;  %vm13257_vm15 = vcmp.lt.f32.partialorder %v5854_v61, 0.0004427343 }
 0x55c   : > { %v9171_v54 = vpop.eup %9170  ;;  %9182 = vlog2.f32 %v5938_v43  ;;  %v13262_v18 = vadd.f32 %v2228_v3, %v11808_v17  ;;  %v5853_v6 = vmul.f32 %v13178_v25, %v5852_v0  ;;  %v3525_v35 = vsub.f32 0.0, %v3205_v26 }
 0x55d   : > { %v7272_v48 = vmul.f32 0.6931472, %v9171_v54  ;;  %9184 = vpow2.f32 %v4184_v44  ;;  %v7284_v7 = vmul.f32 %v13186_v15, %v7283_v1  ;;  %vm13266_vm0 = vcmp.lt.f32.partialorder %v7285_v60, 0.0004427343 }
 0x55e   : > { %v9173_v57 = vpop.eup %9172  ;;  %v3214_v53 = vand.u32 2147483647, %v13254_v58  ;;  %v3373_v31 = vand.u32 2147483647, %v13262_v18  ;;  %v5860_v25 = vmul.f32 -0.5, %v13222_v63  ;;  %v17845_v15 = vmax.f32 %v13023_v2, 0.0 }
 0x55f   : > { %v7278_v28 = vsel %vm13247_vm14, %v7275_v34, %v7272_v48  ;;  %v5850_v42 = vmul.f32 0.6931472, %v9173_v57  ;;  %v3850_v22 = vmul.f32 1.442695, %v3525_v35  ;;  %v13275_v41 = vpop.eup %9174  ;;  %v13281_v62 = vadd.f32 %v12603_v59, %v13219_v13 }
 0x560   : > { %v7670_v61 = vadd.f32 %v7278_v28, %v17845_v15  ;;  %v3534_v36 = vsub.f32 0.0, %v3214_v53  ;;  %v3693_v19 = vsub.f32 0.0, %v3373_v31  ;;  %v9177_v9 = vpop.eup %9176  ;;  %v5863_v3 = vand.u32 2147483647, %v13222_v63  ;;  %v2234_v31 = vpop.f32.mrf.mxu0 }
 0x561   : > { %v5856_v0 = vsel %vm13257_vm15, %v5853_v6, %v5850_v42  ;;  %v5941_v1 = vmul.f32 -0.5, %v13231_v40  ;;  %v4516_v60 = vadd.f32 1.0, %v13275_v41  ;;  %v17846_v2 = vmax.f32 %v13026_v52, 0.0 }
 0x562   : > { %7990 = vst [vmem:[%s11350_s2 + $0x9b0] sm:$0xff] %v7670_v61  ;;  %v7281_v23 = vmul.f32 0.6931472, %v9177_v9  ;;  %9186 = vpow2.f32 %v3850_v22  ;;  %v3868_v59 = vmul.f32 1.442695, %v3534_v36  ;;  %v5861_v26 = vadd.f32 1.0, %v5860_v25 }
 0x563   : > { %v7512_v43 = vadd.f32 %v5856_v0, %v17846_v2  ;;  %9188 = vlog2.f32 %v4516_v60  ;;  %v4186_v44 = vmul.f32 1.442695, %v3693_v19  ;;  %v13292_v54 = vadd.f32 %v2232_v24, %v11804_v16 }
 0x564   : > { %v7287_v34 = vsel %vm13266_vm0, %v7284_v7, %v7281_v23  ;;  %v5944_v21 = vand.u32 2147483647, %v13231_v40  ;;  %9190 = vpow2.f32 %v3868_v59  ;;  %v3215_v52 = vand.u32 2147483647, %v13281_v62 }
 0x565   : > { %7832 = vst [vmem:[%s11350_s2 + $0x4c0] sm:$0xff] %v7512_v43  ;;  %v13299_v48 = vpop.eup %9178  ;;  %v17847_v6 = vmax.f32 %v13037_v27, 0.0  ;;  %v3043_v57 = vmax.f32 %v13170_v51, 0.0  ;;  %v3052_v53 = vmax.f32 %v13196_v10, 0.0  ;;  %9192 = vpow2.f32 %v4186_v44 }
 0x566   : > { %v9181_v28 = vpop.eup %9180  ;;  %vm13305_vm1 = vcmp.lt.f32.partialorder %v5863_v3, 0.0004427343  ;;  %v5942_v7 = vadd.f32 1.0, %v5941_v1  ;;  %v5947_v42 = vadd.f32 1.0, %v13299_v48  ;;  %v3535_v25 = vsub.f32 0.0, %v3215_v52 }
 0x567   : > { %v7671_v35 = vadd.f32 %v7287_v34, %v17847_v6  ;;  %v5859_v22 = vmul.f32 0.6931472, %v9181_v28  ;;  %v5862_v27 = vmul.f32 %v13222_v63, %v5861_v26  ;;  %v3382_v15 = vand.u32 2147483647, %v13292_v54 }
 0x568   : > { %v13315_v61 = vadd.f32 %v12690_v50, %v13133_v8  ;;  %vm13317_vm2 = vcmp.lt.f32.partialorder %v5944_v21, 0.0004427343  ;;  %9194 = vlog2.f32 %v5947_v42  ;;  %v3870_v19 = vmul.f32 1.442695, %v3535_v25 }
 0x569   : > { %7991 = vst [vmem:[%s11350_s2 + $0x9b8] sm:$0xff] %v7671_v35  ;;  %v13322_v24 = vadd.f32 %v2234_v31, %v11808_v17  ;;  %v9183_v9 = vpop.eup %9182  ;;  %v5865_v63 = vsel %vm13305_vm1, %v5862_v27, %v5859_v22  ;;  %v4519_v0 = vmul.f32 -0.5, %v13275_v41  ;;  %v3702_v3 = vsub.f32 0.0, %v3382_v15 }
 0x56a   : > { %v3224_v50 = vand.u32 2147483647, %v13315_v61  ;;  %v13328_v1 = vpop.eup %9184  ;;  %v17852_v60 = vmax.f32 %v13098_v5, 0.0  ;;  %v5940_v43 = vmul.f32 0.6931472, %v9183_v9  ;;  %v5943_v23 = vmul.f32 %v13231_v40, %v5942_v7  ;;  %v2236_v9 = vpop.f32.mrf.mxu0 }
 0x56b   : > { %9196 = vpow2.f32 %v3870_v19  ;;  %v4522_v59 = vand.u32 2147483647, %v13275_v41  ;;  %v2885_v26 = vmax.f32 %v13237_v33, 0.0  ;;  %v6028_v44 = vadd.f32 1.0, %v13328_v1 }
 0x56c   : > { %v7513_v2 = vadd.f32 %v5865_v63, %v17852_v60  ;;  %v4204_v34 = vmul.f32 1.442695, %v3702_v3  ;;  %v5946_v21 = vsel %vm13317_vm2, %v5943_v23, %v5940_v43  ;;  %v5950_v52 = vmul.f32 -0.5, %v13299_v48 }
 0x56d   : > { %v3544_v5 = vsub.f32 0.0, %v3224_v50  ;;  %v3383_v6 = vand.u32 2147483647, %v13322_v24  ;;  %v7522_v40 = vadd.f32 %v5946_v21, %v3042_v4  ;;  %v4520_v35 = vadd.f32 1.0, %v4519_v0 }
 0x56e   : > { %7833 = vst [vmem:[%s11350_s2 + $0x4c8] sm:$0xff] %v7513_v2  ;;  %v5953_v31 = vand.u32 2147483647, %v13299_v48  ;;  %9198 = vlog2.f32 %v6028_v44  ;;  %v2894_v28 = vmax.f32 %v13254_v58, 0.0  ;;  %vm13348_vm3 = vcmp.lt.f32.partialorder %v4522_v59, 0.0004427343 }
 0x56f   : > { %9200 = vpow2.f32 %v4204_v34  ;;  %v3888_v20 = vmul.f32 1.442695, %v3544_v5  ;;  %v3703_v7 = vsub.f32 0.0, %v3383_v6  ;;  %v13345_v42 = vpop.eup %9186  ;;  %7842 = vst [vmem:[%s11350_s2 + $0x510] sm:$0xff] %v7522_v40  ;;  %v6031_v22 = vmul.f32 -0.5, %v13328_v1 }
 0x570   : > { %v3053_v47 = vmax.f32 %v13262_v18, 0.0  ;;  %v2895_v4 = vmax.f32 %v13281_v62, 0.0  ;;  %v9189_v27 = vpop.eup %9188  ;;  %v5951_v15 = vadd.f32 1.0, %v5950_v52  ;;  %v4525_v36 = vadd.f32 1.0, %v13345_v42 }
 0x571   : > { %v3062_v19 = vmax.f32 %v13292_v54, 0.0  ;;  %9202 = vpow2.f32 %v3888_v20  ;;  %v13357_v63 = vpop.eup %9190  ;;  %v4518_v0 = vmul.f32 0.6931472, %v9189_v27  ;;  %v4521_v3 = vmul.f32 %v13275_v41, %v4520_v35 }
 0x572   : > { %vm13360_vm4 = vcmp.lt.f32.partialorder %v5953_v31, 0.0004427343  ;;  %v6034_v60 = vand.u32 2147483647, %v13328_v1  ;;  %v13365_v2 = vpop.eup %9192  ;;  %9204 = vlog2.f32 %v4525_v36  ;;  %v4606_v43 = vadd.f32 1.0, %v13357_v63 }
 0x573   : > { %v4206_v23 = vmul.f32 1.442695, %v3703_v7  ;;  %v13370_v59 = vadd.f32 %v12714_v49, %v13219_v13  ;;  %v4524_v41 = vsel %vm13348_vm3, %v4521_v3, %v4518_v0  ;;  %v6032_v44 = vadd.f32 1.0, %v6031_v22  ;;  %v2238_v0 = vpop.f32.mrf.mxu0 }
 0x574   : > { %v6037_v34 = vadd.f32 1.0, %v13365_v2  ;;  %v13376_v21 = vadd.f32 %v2236_v9, %v11804_v16  ;;  %v7364_v52 = vadd.f32 %v4524_v41, %v2884_v32  ;;  %v5952_v5 = vmul.f32 %v13299_v48, %v5951_v15 }
 0x575   : > { %9206 = vlog2.f32 %v4606_v43  ;;  %v2904_v6 = vmax.f32 %v13315_v61, 0.0  ;;  %v9195_v40 = vpop.eup %9194  ;;  %vm13382_vm5 = vcmp.lt.f32.partialorder %v6034_v60, 0.0004427343  ;;  %v3063_v35 = vmax.f32 %v13322_v24, 0.0 }
 0x576   : > { %9208 = vlog2.f32 %v6037_v34  ;;  %v13389_v31 = vadd.f32 %v12736_v45, %v13133_v8  ;;  %7684 = vst [vmem:[%s11350_s2 + $0x20] sm:$0xff] %v7364_v52  ;;  %v5949_v14 = vmul.f32 0.6931472, %v9195_v40  ;;  %v4528_v32 = vmul.f32 -0.5, %v13345_v42 }
 0x577   : > { %9210 = vpow2.f32 %v4206_v23  ;;  %v3225_v48 = vand.u32 2147483647, %v13370_v59  ;;  %v4531_v7 = vand.u32 2147483647, %v13345_v42  ;;  %v6033_v25 = vmul.f32 %v13328_v1, %v6032_v44 }
 0x578   : > { %v13394_v20 = vpop.eup %9196  ;;  %v2905_v22 = vmax.f32 %v13370_v59, 0.0  ;;  %v3392_v27 = vand.u32 2147483647, %v13376_v21  ;;  %v5955_v45 = vsel %vm13360_vm4, %v5952_v5, %v5949_v14  ;;  %v4609_v15 = vmul.f32 -0.5, %v13357_v63 }
 0x579   : > { %v6040_v36 = vmul.f32 -0.5, %v13365_v2  ;;  %v4615_v9 = vadd.f32 1.0, %v13394_v20  ;;  %v7523_v3 = vadd.f32 %v5955_v45, %v3043_v57  ;;  %v3545_v60 = vsub.f32 0.0, %v3225_v48 }
 0x57a   : > { %v3072_v1 = vmax.f32 %v13376_v21, 0.0  ;;  %v3712_v43 = vsub.f32 0.0, %v3392_v27  ;;  %v4529_v41 = vadd.f32 1.0, %v4528_v32  ;;  %v4612_v50 = vand.u32 2147483647, %v13357_v63 }
 0x57b   : > { %v9199_v23 = vpop.eup %9198  ;;  %9212 = vlog2.f32 %v4615_v9  ;;  %v3234_v44 = vand.u32 2147483647, %v13389_v31  ;;  %7843 = vst [vmem:[%s11350_s2 + $0x518] sm:$0xff] %v7523_v3  ;;  %vm13413_vm6 = vcmp.lt.f32.partialorder %v4531_v7, 0.0004427343  ;;  %v13418_v5 = vadd.f32 %v2238_v0, %v11808_v17 }
 0x57c   : > { %v13410_v34 = vpop.eup %9200  ;;  %v6030_v51 = vmul.f32 0.6931472, %v9199_v23  ;;  %v3890_v57 = vmul.f32 1.442695, %v3545_v60  ;;  %v4610_v40 = vadd.f32 1.0, %v4609_v15  ;;  %v6041_v14 = vadd.f32 1.0, %v6040_v36 }
 0x57d   : > { %v6043_v32 = vand.u32 2147483647, %v13365_v2  ;;  %v6118_v48 = vadd.f32 1.0, %v13410_v34  ;;  %v4224_v45 = vmul.f32 1.442695, %v3712_v43  ;;  %v3554_v9 = vsub.f32 0.0, %v3234_v44 }
 0x57e   : > { %v13422_v27 = vpop.eup %9202  ;;  %v6036_v7 = vsel %vm13382_vm5, %v6033_v25, %v6030_v51  ;;  %9214 = vpow2.f32 %v3890_v57  ;;  %v4530_v3 = vmul.f32 %v13345_v42, %v4529_v41  ;;  %vm13429_vm7 = vcmp.lt.f32.partialorder %v4612_v50, 0.0004427343 }
 0x57f   : > { %v7532_v0 = vadd.f32 %v6036_v7, %v3052_v53  ;;  %9216 = vlog2.f32 %v6118_v48  ;;  %v9205_v36 = vpop.eup %9204  ;;  %v4618_v60 = vmul.f32 -0.5, %v13394_v20  ;;  %v4696_v23 = vadd.f32 1.0, %v13422_v27 }
 0x580   : > { %9218 = vpow2.f32 %v4224_v45  ;;  %v13437_v49 = vadd.f32 %v12757_v12, %v13219_v13  ;;  %v4527_v25 = vmul.f32 0.6931472, %v9205_v36  ;;  %v4611_v10 = vmul.f32 %v13357_v63, %v4610_v40  ;;  %v2242_v12 = vpop.f32.mrf.mxu0 }
 0x581   : > { %7852 = vst [vmem:[%s11350_s2 + $0x560] sm:$0xff] %v7532_v0  ;;  %v3908_v53 = vmul.f32 1.442695, %v3554_v9  ;;  %v3393_v42 = vand.u32 2147483647, %v13418_v5  ;;  %v6042_v41 = vmul.f32 %v13365_v2, %v6041_v14  ;;  %9220 = vlog2.f32 %v4696_v23 }
 0x582   : > { %v9207_v43 = vpop.eup %9206  ;;  %vm13443_vm8 = vcmp.lt.f32.partialorder %v6043_v32, 0.0004427343  ;;  %v4621_v44 = vand.u32 2147483647, %v13394_v20  ;;  %v4533_v57 = vsel %vm13413_vm6, %v4530_v3, %v4527_v25  ;;  %v4619_v32 = vadd.f32 1.0, %v4618_v60  ;;  %v2244_v60 = vpop.f32.mrf.mxu0 }
 0x583   : > { %v9209_v51 = vpop.eup %9208  ;;  %v4608_v63 = vmul.f32 0.6931472, %v9207_v43  ;;  %9222 = vpow2.f32 %v3908_v53  ;;  %v3713_v40 = vsub.f32 0.0, %v3393_v42  ;;  %v7365_v2 = vadd.f32 %v4533_v57, %v2885_v26 }
 0x584   : > { %v13450_v48 = vpop.eup %9210  ;;  %v6039_v14 = vmul.f32 0.6931472, %v9209_v51  ;;  %v3235_v7 = vand.u32 2147483647, %v13437_v49  ;;  %v6121_v9 = vmul.f32 -0.5, %v13410_v34  ;;  %v4699_v52 = vmul.f32 -0.5, %v13422_v27 }
 0x585   : > { %v4614_v45 = vsel %vm13429_vm7, %v4611_v10, %v4608_v63  ;;  %v6127_v3 = vadd.f32 1.0, %v13450_v48  ;;  %7685 = vst [vmem:[%s11350_s2 + $0x28] sm:$0xff] %v7365_v2  ;;  %v4226_v0 = vmul.f32 1.442695, %v3713_v40  ;;  %v6124_v23 = vand.u32 2147483647, %v13410_v34 }
 0x586   : > { %v7374_v33 = vadd.f32 %v4614_v45, %v2894_v28  ;;  %v6045_v26 = vsel %vm13443_vm8, %v6042_v41, %v6039_v14  ;;  %v3555_v36 = vsub.f32 0.0, %v3235_v7  ;;  %v2914_v25 = vmax.f32 %v13389_v31, 0.0 }
 0x587   : > { %v7533_v15 = vadd.f32 %v6045_v26, %v3053_v47  ;;  %9224 = vlog2.f32 %v6127_v3  ;;  %v13471_v28 = vadd.f32 %v2242_v12, %v11804_v16  ;;  %v13475_v53 = vadd.f32 %v12858_v11, %v13133_v8 }
 0x588   : > { %v9213_v10 = vpop.eup %9212  ;;  %7694 = vst [vmem:[%s11350_s2 + $0x70] sm:$0xff] %v7374_v33  ;;  %9226 = vpow2.f32 %v4226_v0  ;;  %v3910_v58 = vmul.f32 1.442695, %v3555_v36  ;;  %v4620_v18 = vmul.f32 %v13394_v20, %v4619_v32  ;;  %v6122_v47 = vadd.f32 1.0, %v6121_v9 }
 0x589   : > { %7853 = vst [vmem:[%s11350_s2 + $0x568] sm:$0xff] %v7533_v15  ;;  %v4617_v42 = vmul.f32 0.6931472, %v9213_v10  ;;  %v13480_v43 = vadd.f32 %v2244_v60, %v11808_v17  ;;  %vm4622_vm9 = vcmp.lt.f32.partialorder %v4621_v44, 0.0004427343  ;;  %v4700_v41 = vadd.f32 1.0, %v4699_v52 }
 0x58a   : > { %9228 = vpow2.f32 %v3910_v58  ;;  %v3402_v50 = vand.u32 2147483647, %v13471_v28  ;;  %v6130_v11 = vmul.f32 -0.5, %v13450_v48  ;;  %v3073_v57 = vmax.f32 %v13418_v5, 0.0 }
 0x58b   : > { %v13483_v12 = vpop.eup %9214  ;;  %v4623_v51 = vsel %vm4622_vm9, %v4620_v18, %v4617_v42  ;;  %v3244_v63 = vand.u32 2147483647, %v13475_v53  ;;  %vm13490_vm10 = vcmp.lt.f32.partialorder %v6124_v23, 0.0004427343  ;;  %v3403_v14 = vand.u32 2147483647, %v13480_v43 }
 0x58c   : > { %v9217_v20 = vpop.eup %9216  ;;  %v7375_v40 = vadd.f32 %v4623_v51, %v2895_v4  ;;  %v4705_v2 = vadd.f32 1.0, %v13483_v12  ;;  %v6123_v45 = vmul.f32 %v13410_v34, %v6122_v47  ;;  %v4702_v9 = vand.u32 2147483647, %v13422_v27 }
 0x58d   : > { %v13496_v32 = vpop.eup %9218  ;;  %v6120_v7 = vmul.f32 0.6931472, %v9217_v20  ;;  %v3722_v52 = vsub.f32 0.0, %v3402_v50  ;;  %v4701_v62 = vmul.f32 %v13422_v27, %v4700_v41  ;;  %v3564_v3 = vsub.f32 0.0, %v3244_v63 }
 0x58e   : > { %7695 = vst [vmem:[%s11350_s2 + $0x78] sm:$0xff] %v7375_v40  ;;  %9230 = vlog2.f32 %v4705_v2  ;;  %v6208_v4 = vadd.f32 1.0, %v13496_v32  ;;  %v9221_v33 = vpop.eup %9220  ;;  %v6131_v0 = vadd.f32 1.0, %v6130_v11  ;;  %v6133_v36 = vand.u32 2147483647, %v13450_v48 }
 0x58f   : > { %v6126_v26 = vsel %vm13490_vm10, %v6123_v45, %v6120_v7  ;;  %v4244_v60 = vmul.f32 1.442695, %v3722_v52  ;;  %v4698_v23 = vmul.f32 0.6931472, %v9221_v33  ;;  %v3723_v27 = vsub.f32 0.0, %v3403_v14 }
 0x590   : > { %v13506_v34 = vpop.eup %9222  ;;  %v7542_v15 = vadd.f32 %v6126_v26, %v3062_v19  ;;  %9232 = vlog2.f32 %v6208_v4  ;;  %vm4703_vm11 = vcmp.lt.f32.partialorder %v4702_v9, 0.0004427343  ;;  %v2915_v58 = vmax.f32 %v13437_v49, 0.0  ;;  %v2246_v19 = vpop.f32.mrf.mxu0 }
 0x591   : > { %v4786_v10 = vadd.f32 1.0, %v13506_v34  ;;  %v13514_v42 = vadd.f32 %v12882_v55, %v13219_v13  ;;  %v4704_v18 = vsel %vm4703_vm11, %v4701_v62, %v4698_v23  ;;  %v4708_v47 = vmul.f32 -0.5, %v13483_v12 }
 0x592   : > { %7862 = vst [vmem:[%s11350_s2 + $0x5b0] sm:$0xff] %v7542_v15  ;;  %9234 = vpow2.f32 %v4244_v60  ;;  %v3928_v54 = vmul.f32 1.442695, %v3564_v3  ;;  %v7384_v41 = vadd.f32 %v4704_v18, %v2904_v6  ;;  %v6132_v50 = vmul.f32 %v13450_v48, %v6131_v0  ;;  %v2248_v3 = vpop.f32.mrf.mxu0 }
 0x593   : > { %vm13521_vm12 = vcmp.lt.f32.partialorder %v6133_v36, 0.0004427343  ;;  %9236 = vlog2.f32 %v4786_v10  ;;  %v4711_v11 = vand.u32 2147483647, %v13483_v12  ;;  %v3082_v63 = vmax.f32 %v13471_v28, 0.0 }
 0x594   : > { %v9225_v55 = vpop.eup %9224  ;;  %9238 = vpow2.f32 %v3928_v54  ;;  %v4246_v20 = vmul.f32 1.442695, %v3723_v27  ;;  %7704 = vst [vmem:[%s11350_s2 + $0xc0] sm:$0xff] %v7384_v41  ;;  %v6211_v61 = vmul.f32 -0.5, %v13496_v32  ;;  %v3245_v6 = vand.u32 2147483647, %v13514_v42 }
 0x595   : > { %v13527_v40 = vpop.eup %9226  ;;  %v6129_v44 = vmul.f32 0.6931472, %v9225_v55  ;;  %v13533_v48 = vadd.f32 %v2246_v19, %v11804_v16  ;;  %v4709_v2 = vadd.f32 1.0, %v4708_v47  ;;  %v6214_v14 = vand.u32 2147483647, %v13496_v32 }
 0x596   : > { %v6217_v7 = vadd.f32 1.0, %v13527_v40  ;;  %9240 = vpow2.f32 %v4246_v20  ;;  %v4789_v52 = vmul.f32 -0.5, %v13506_v34  ;;  %v3565_v62 = vsub.f32 0.0, %v3245_v6 }
 0x597   : > { %v13537_v45 = vpop.eup %9228  ;;  %v6135_v9 = vsel %vm13521_vm12, %v6132_v50, %v6129_v44  ;;  %v3412_v4 = vand.u32 2147483647, %v13533_v48  ;;  %v4792_v26 = vand.u32 2147483647, %v13506_v34  ;;  %v2924_v0 = vmax.f32 %v13475_v53, 0.0 }
 0x598   : > { %v7543_v33 = vadd.f32 %v6135_v9, %v3063_v35  ;;  %9242 = vlog2.f32 %v6217_v7  ;;  %v6212_v36 = vadd.f32 1.0, %v6211_v61  ;;  %v4795_v60 = vadd.f32 1.0, %v13537_v45 }
 0x599   : > { %v3083_v15 = vmax.f32 %v13480_v43, 0.0  ;;  %v3930_v23 = vmul.f32 1.442695, %v3565_v62  ;;  %vm13550_vm13 = vcmp.lt.f32.partialorder %v4711_v11, 0.0004427343  ;;  %v3732_v10 = vsub.f32 0.0, %v3412_v4 }
 0x59a   : > { %7863 = vst [vmem:[%s11350_s2 + $0x5b8] sm:$0xff] %v7543_v33  ;;  %v13556_v24 = vadd.f32 %v12897_v39, %v13133_v8  ;;  %v13559_v35 = vadd.f32 %v2248_v3, %v11808_v17  ;;  %v4710_v47 = vmul.f32 %v13483_v12, %v4709_v2  ;;  %vm13562_vm14 = vcmp.lt.f32.partialorder %v6214_v14, 0.0004427343 }
 0x59b   : > { %v9231_v18 = vpop.eup %9230  ;;  %v4790_v19 = vadd.f32 1.0, %v4789_v52  ;;  %9244 = vlog2.f32 %v4795_v60  ;;  %vm13566_vm15 = vcmp.lt.f32.partialorder %v4792_v26, 0.0004427343  ;;  %v4264_v39 = vmul.f32 1.442695, %v3732_v10 }
 0x59c   : > { %v4707_v41 = vmul.f32 0.6931472, %v9231_v18  ;;  %9246 = vpow2.f32 %v3930_v23  ;;  %v6213_v55 = vmul.f32 %v13496_v32, %v6212_v36  ;;  %v6220_v11 = vmul.f32 -0.5, %v13527_v40 }
 0x59d   : > { %v9233_v51 = vpop.eup %9232  ;;  %v3254_v12 = vand.u32 2147483647, %v13556_v24  ;;  %v3413_v20 = vand.u32 2147483647, %v13559_v35  ;;  %9248 = vpow2.f32 %v4264_v39  ;;  %v13578_v6 = vadd.f32 %v12922_v29, %v13219_v13 }
 0x59e   : > { %v4713_v44 = vsel %vm13550_vm13, %v4710_v47, %v4707_v41  ;;  %v6210_v61 = vmul.f32 0.6931472, %v9233_v51  ;;  %v4798_v14 = vmul.f32 -0.5, %v13537_v45  ;;  %v4791_v4 = vmul.f32 %v13506_v34, %v4790_v19 }
 0x59f   : > { %v13580_v2 = vpop.eup %9234  ;;  %v7385_v32 = vadd.f32 %v4713_v44, %v2905_v22  ;;  %v3574_v7 = vsub.f32 0.0, %v3254_v12  ;;  %v3733_v9 = vsub.f32 0.0, %v3413_v20  ;;  %v6223_v3 = vand.u32 2147483647, %v13527_v40 }
 0x5a0   : > { %v9237_v52 = vpop.eup %9236  ;;  %v6216_v62 = vsel %vm13562_vm14, %v6213_v55, %v6210_v61  ;;  %v6298_v29 = vadd.f32 1.0, %v13580_v2  ;;  %v6221_v26 = vadd.f32 1.0, %v6220_v11  ;;  %v4801_v60 = vand.u32 2147483647, %v13537_v45 }
 0x5a1   : > { %v13590_v33 = vpop.eup %9238  ;;  %7705 = vst [vmem:[%s11350_s2 + $0xc8] sm:$0xff] %v7385_v32  ;;  %v7552_v59 = vadd.f32 %v6216_v62, %v3072_v1  ;;  %v4788_v22 = vmul.f32 0.6931472, %v9237_v52  ;;  %v3948_v36 = vmul.f32 1.442695, %v3574_v7  ;;  %v4799_v18 = vadd.f32 1.0, %v4798_v14  ;;  %v2252_v1 = vpop.f32.mrf.mxu0 }
 0x5a2   : > { %9250 = vlog2.f32 %v6298_v29  ;;  %v4876_v23 = vadd.f32 1.0, %v13590_v33  ;;  %v3255_v34 = vand.u32 2147483647, %v13578_v6  ;;  %v4266_v21 = vmul.f32 1.442695, %v3733_v9 }
 0x5a3   : > { %v13598_v27 = vpop.eup %9240  ;;  %7872 = vst [vmem:[%s11350_s2 + $0x600] sm:$0xff] %v7552_v59  ;;  %v4794_v10 = vsel %vm13566_vm15, %v4791_v4, %v4788_v22  ;;  %9252 = vpow2.f32 %v3948_v36  ;;  %v2925_v19 = vmax.f32 %v13514_v42, 0.0  ;;  %v6222_v39 = vmul.f32 %v13527_v40, %v6221_v26 }
 0x5a4   : > { %v7394_v47 = vadd.f32 %v4794_v10, %v2914_v25  ;;  %9254 = vlog2.f32 %v4876_v23  ;;  %v6307_v54 = vadd.f32 1.0, %v13598_v27  ;;  %v6301_v51 = vmul.f32 -0.5, %v13580_v2 }
 0x5a5   : > { %v9243_v41 = vpop.eup %9242  ;;  %v4879_v50 = vmul.f32 -0.5, %v13590_v33  ;;  %v3092_v55 = vmax.f32 %v13533_v48, 0.0  ;;  %v3575_v12 = vsub.f32 0.0, %v3255_v34  ;;  %v13613_v31 = vadd.f32 %v2252_v1, %v11804_v16 }
 0x5a6   : > { %7714 = vst [vmem:[%s11350_s2 + $0x110] sm:$0xff] %v7394_v47  ;;  %v6219_v11 = vmul.f32 0.6931472, %v9243_v41  ;;  %9256 = vlog2.f32 %v6307_v54  ;;  %vm6224_vm0 = vcmp.lt.f32.partialorder %v6223_v3, 0.0004427343  ;;  %v4800_v25 = vmul.f32 %v13537_v45, %v4799_v18 }
 0x5a7   : > { %vm13616_vm1 = vcmp.lt.f32.partialorder %v4801_v60, 0.0004427343  ;;  %9258 = vpow2.f32 %v4266_v21  ;;  %v6304_v61 = vand.u32 2147483647, %v13580_v2  ;;  %v3950_v32 = vmul.f32 1.442695, %v3575_v12 }
 0x5a8   : > { %v9245_v40 = vpop.eup %9244  ;;  %v6225_v44 = vsel %vm6224_vm0, %v6222_v39, %v6219_v11  ;;  %v3422_v14 = vand.u32 2147483647, %v13613_v31  ;;  %v6302_v45 = vadd.f32 1.0, %v6301_v51  ;;  %v13628_v62 = vadd.f32 %v13039_v56, %v13133_v8  ;;  %v2254_v56 = vpop.f32.mrf.mxu0 }
 0x5a9   : > { %v13622_v7 = vpop.eup %9246  ;;  %v7553_v9 = vadd.f32 %v6225_v44, %v3073_v57  ;;  %v4797_v52 = vmul.f32 0.6931472, %v9245_v40  ;;  %v4880_v4 = vadd.f32 1.0, %v4879_v50  ;;  %v4882_v3 = vand.u32 2147483647, %v13590_v33 }
 0x5aa   : > { %v4885_v29 = vadd.f32 1.0, %v13622_v7  ;;  %9260 = vpow2.f32 %v3950_v32  ;;  %v13632_v59 = vpop.eup %9248  ;;  %v6310_v57 = vmul.f32 -0.5, %v13598_v27  ;;  %v3742_v22 = vsub.f32 0.0, %v3422_v14 }
 0x5ab   : > { %7873 = vst [vmem:[%s11350_s2 + $0x608] sm:$0xff] %v7553_v9  ;;  %v4803_v5 = vsel %vm13616_vm1, %v4800_v25, %v4797_v52  ;;  %v3264_v26 = vand.u32 2147483647, %v13628_v62  ;;  %v6313_v60 = vand.u32 2147483647, %v13598_v27  ;;  %v2934_v23 = vmax.f32 %v13556_v24, 0.0  ;;  %v2256_v9 = vpop.f32.mrf.mxu0 }
 0x5ac   : > { %v7395_v36 = vadd.f32 %v4803_v5, %v2915_v58  ;;  %9262 = vlog2.f32 %v4885_v29  ;;  %v6388_v34 = vadd.f32 1.0, %v13632_v59  ;;  %v3093_v10 = vmax.f32 %v13559_v35, 0.0 }
 0x5ad   : > { %v2935_v18 = vmax.f32 %v13578_v6, 0.0  ;;  %v4284_v21 = vmul.f32 1.442695, %v3742_v22  ;;  %v6303_v1 = vmul.f32 %v13580_v2, %v6302_v45  ;;  %vm13648_vm2 = vcmp.lt.f32.partialorder %v6304_v61, 0.0004427343 }
 0x5ae   : > { %7715 = vst [vmem:[%s11350_s2 + $0x118] sm:$0xff] %v7395_v36  ;;  %v3584_v49 = vsub.f32 0.0, %v3264_v26  ;;  %v13653_v58 = vadd.f32 %v2254_v56, %v11808_v17  ;;  %v4881_v41 = vmul.f32 %v13590_v33, %v4880_v4  ;;  %vm13656_vm3 = vcmp.lt.f32.partialorder %v4882_v3, 0.0004427343 }
 0x5af   : > { %v9251_v54 = vpop.eup %9250  ;;  %v6311_v51 = vadd.f32 1.0, %v6310_v57  ;;  %9264 = vlog2.f32 %v6388_v34  ;;  %vm13662_vm4 = vcmp.lt.f32.partialorder %v6313_v60, 0.0004427343  ;;  %v4888_v20 = vmul.f32 -0.5, %v13622_v7 }
 0x5b0   : > { %v13660_v50 = vpop.eup %9252  ;;  %v6300_v2 = vmul.f32 0.6931472, %v9251_v54  ;;  %9266 = vpow2.f32 %v4284_v21  ;;  %v3968_v12 = vmul.f32 1.442695, %v3584_v49  ;;  %v3102_v40 = vmax.f32 %v13613_v31, 0.0 }
 0x5b1   : > { %v9255_v25 = vpop.eup %9254  ;;  %v4966_v33 = vadd.f32 1.0, %v13660_v50  ;;  %v13671_v44 = vadd.f32 %v13058_v38, %v13219_v13  ;;  %v3423_v14 = vand.u32 2147483647, %v13653_v58  ;;  %v6312_v4 = vmul.f32 %v13598_v27, %v6311_v51 }
 0x5b2   : > { %v6306_v61 = vsel %vm13648_vm2, %v6303_v1, %v6300_v2  ;;  %v4878_v32 = vmul.f32 0.6931472, %v9255_v25  ;;  %9268 = vpow2.f32 %v3968_v12  ;;  %v6391_v3 = vmul.f32 -0.5, %v13632_v59  ;;  %v2258_v25 = vpop.f32.mrf.mxu0 }
 0x5b3   : > { %v9257_v52 = vpop.eup %9256  ;;  %v7562_v45 = vadd.f32 %v6306_v61, %v3082_v63  ;;  %9270 = vlog2.f32 %v4966_v33  ;;  %v4891_v57 = vand.u32 2147483647, %v13622_v7  ;;  %v3743_v22 = vsub.f32 0.0, %v3423_v14 }
 0x5b4   : > { %v13680_v38 = vpop.eup %9258  ;;  %v4884_v29 = vsel %vm13656_vm3, %v4881_v41, %v4878_v32  ;;  %v6309_v5 = vmul.f32 0.6931472, %v9257_v52  ;;  %v4889_v63 = vadd.f32 1.0, %v4888_v20  ;;  %v13690_v26 = vadd.f32 %v2256_v9, %v11804_v16 }
 0x5b5   : > { %7882 = vst [vmem:[%s11350_s2 + $0x650] sm:$0xff] %v7562_v45  ;;  %v7404_v28 = vadd.f32 %v4884_v29, %v2924_v0  ;;  %v6397_v27 = vadd.f32 1.0, %v13680_v38  ;;  %v6394_v36 = vand.u32 2147483647, %v13632_v59  ;;  %v4286_v60 = vmul.f32 1.442695, %v3743_v22 }
 0x5b6   : > { %v6315_v56 = vsel %vm13662_vm4, %v6312_v4, %v6309_v5  ;;  %v3265_v34 = vand.u32 2147483647, %v13671_v44  ;;  %v6392_v0 = vadd.f32 1.0, %v6391_v3  ;;  %v2944_v1 = vmax.f32 %v13628_v62, 0.0 }
 0x5b7   : > { %v13696_v21 = vpop.eup %9260  ;;  %7724 = vst [vmem:[%s11350_s2 + $0x160] sm:$0xff] %v7404_v28  ;;  %v7563_v53 = vadd.f32 %v6315_v56, %v3083_v15  ;;  %9272 = vlog2.f32 %v6397_v27  ;;  %vm13702_vm5 = vcmp.lt.f32.partialorder %v4891_v57, 0.0004427343  ;;  %v4969_v49 = vmul.f32 -0.5, %v13660_v50  ;;  %v2262_v28 = vpop.f32.mrf.mxu0 }
 0x5b8   : > { %v4972_v54 = vand.u32 2147483647, %v13660_v50  ;;  %v4975_v41 = vadd.f32 1.0, %v13696_v21  ;;  %v4890_v51 = vmul.f32 %v13622_v7, %v4889_v63  ;;  %9274 = vpow2.f32 %v4286_v60 }
 0x5b9   : > { %v9263_v39 = vpop.eup %9262  ;;  %7883 = vst [vmem:[%s11350_s2 + $0x658] sm:$0xff] %v7563_v53  ;;  %v3585_v43 = vsub.f32 0.0, %v3265_v34  ;;  %v3432_v15 = vand.u32 2147483647, %v13690_v26  ;;  %vm13712_vm6 = vcmp.lt.f32.partialorder %v6394_v36, 0.0004427343  ;;  %v6393_v20 = vmul.f32 %v13632_v59, %v6392_v0 }
 0x5ba   : > { %v4887_v2 = vmul.f32 0.6931472, %v9263_v39  ;;  %9276 = vlog2.f32 %v4975_v41  ;;  %v3103_v12 = vmax.f32 %v13653_v58, 0.0  ;;  %v13720_v7 = vadd.f32 %v13079_v46, %v13133_v8 }
 0x5bb   : > { %v3970_v33 = vmul.f32 1.442695, %v3585_v43  ;;  %v3752_v61 = vsub.f32 0.0, %v3432_v15  ;;  %v4970_v9 = vadd.f32 1.0, %v4969_v49  ;;  %vm13724_vm7 = vcmp.lt.f32.partialorder %v4972_v54, 0.0004427343 }
 0x5bc   : > { %v9265_v32 = vpop.eup %9264  ;;  %v4893_v14 = vsel %vm13702_vm5, %v4890_v51, %v4887_v2  ;;  %v6400_v45 = vmul.f32 -0.5, %v13680_v38  ;;  %v6403_v29 = vand.u32 2147483647, %v13680_v38  ;;  %v2945_v57 = vmax.f32 %v13671_v44, 0.0  ;;  %v2375_v51 = vpop.f32.mrf.mxu1 }
 0x5bd   : > { %v13729_v4 = vpop.eup %9266  ;;  %v7405_v59 = vadd.f32 %v4893_v14, %v2925_v19  ;;  %v6390_v3 = vmul.f32 0.6931472, %v9265_v32  ;;  %9278 = vpow2.f32 %v3970_v33  ;;  %v4304_v46 = vmul.f32 1.442695, %v3752_v61 }
 0x5be   : > { %v6478_v5 = vadd.f32 1.0, %v13729_v4  ;;  %v13737_v22 = vadd.f32 %v2258_v25, %v11808_v17  ;;  %v4978_v19 = vmul.f32 -0.5, %v13696_v21  ;;  %v3274_v27 = vand.u32 2147483647, %v13720_v7 }
 0x5bf   : > { %v13739_v63 = vpop.eup %9268  ;;  %7725 = vst [vmem:[%s11350_s2 + $0x168] sm:$0xff] %v7405_v59  ;;  %v6396_v42 = vsel %vm13712_vm6, %v6393_v20, %v6390_v3  ;;  %9280 = vpow2.f32 %v4304_v46  ;;  %v4971_v60 = vmul.f32 %v13660_v50, %v4970_v9  ;;  %v13751_v34 = vadd.f32 %v13104_v30, %v13219_v13 }
 0x5c0   : > { %v9271_v56 = vpop.eup %9270  ;;  %v7572_v36 = vadd.f32 %v6396_v42, %v3092_v55  ;;  %9282 = vlog2.f32 %v6478_v5  ;;  %v6401_v0 = vadd.f32 1.0, %v6400_v45  ;;  %v5056_v47 = vadd.f32 1.0, %v13739_v63 }
 0x5c1   : > { %v4968_v53 = vmul.f32 0.6931472, %v9271_v56  ;;  %v13755_v49 = vadd.f32 %v2262_v28, %v11804_v16  ;;  %vm13758_vm8 = vcmp.lt.f32.partialorder %v6403_v29, 0.0004427343  ;;  %v3112_v48 = vmax.f32 %v13690_v26, 0.0 }
 0x5c2   : > { %7892 = vst [vmem:[%s11350_s2 + $0x6a0] sm:$0xff] %v7572_v36  ;;  %v3594_v55 = vsub.f32 0.0, %v3274_v27  ;;  %v3433_v50 = vand.u32 2147483647, %v13737_v22  ;;  %v4979_v41 = vadd.f32 1.0, %v4978_v19  ;;  %9284 = vlog2.f32 %v5056_v47  ;;  %v2264_v19 = vpop.f32.mrf.mxu0 }
 0x5c3   : > { %v4974_v30 = vsel %vm13724_vm7, %v4971_v60, %v4968_v53  ;;  %v4981_v39 = vand.u32 2147483647, %v13696_v21  ;;  %v3275_v25 = vand.u32 2147483647, %v13751_v34  ;;  %v6402_v33 = vmul.f32 %v13680_v38, %v6401_v0 }
 0x5c4   : > { %v9273_v43 = vpop.eup %9272  ;;  %v7414_v15 = vadd.f32 %v4974_v30, %v2934_v23  ;;  %v3988_v2 = vmul.f32 1.442695, %v3594_v55  ;;  %v3753_v11 = vsub.f32 0.0, %v3433_v50  ;;  %v6481_v61 = vmul.f32 -0.5, %v13729_v4 }
 0x5c5   : > { %v6399_v20 = vmul.f32 0.6931472, %v9273_v43  ;;  %v3442_v32 = vand.u32 2147483647, %v13755_v49  ;;  %v13773_v14 = vpop.eup %9274  ;;  %v3595_v52 = vsub.f32 0.0, %v3275_v25  ;;  %v13777_v24 = vadd.f32 %v2375_v51, %v13133_v8  ;;  %v2377_v25 = vpop.f32.mrf.mxu1 }
 0x5c6   : > { %7734 = vst [vmem:[%s11350_s2 + $0x1b0] sm:$0xff] %v7414_v15  ;;  %9286 = vpow2.f32 %v3988_v2  ;;  %v4306_v9 = vmul.f32 1.442695, %v3753_v11  ;;  %v4980_v38 = vmul.f32 %v13696_v21, %v4979_v41  ;;  %v5059_v59 = vmul.f32 -0.5, %v13739_v63 }
 0x5c7   : > { %v9277_v23 = vpop.eup %9276  ;;  %v6405_v45 = vsel %vm13758_vm8, %v6402_v33, %v6399_v20  ;;  %v6487_v3 = vadd.f32 1.0, %v13773_v14  ;;  %v3990_v5 = vmul.f32 1.442695, %v3595_v52  ;;  %vm4982_vm9 = vcmp.lt.f32.partialorder %v4981_v39, 0.0004427343 }
 0x5c8   : > { %v7573_v46 = vadd.f32 %v6405_v45, %v3093_v10  ;;  %v4977_v29 = vmul.f32 0.6931472, %v9277_v23  ;;  %9288 = vpow2.f32 %v4306_v9  ;;  %v6484_v28 = vand.u32 2147483647, %v13729_v4 }
 0x5c9   : > { %9290 = vlog2.f32 %v6487_v3  ;;  %v3762_v42 = vsub.f32 0.0, %v3442_v32  ;;  %v6482_v56 = vadd.f32 1.0, %v6481_v61  ;;  %v3284_v36 = vand.u32 2147483647, %v13777_v24 }
 0x5ca   : > { %v13787_v27 = vpop.eup %9278  ;;  %7893 = vst [vmem:[%s11350_s2 + $0x6a8] sm:$0xff] %v7573_v46  ;;  %v4983_v21 = vsel %vm4982_vm9, %v4980_v38, %v4977_v29  ;;  %9292 = vpow2.f32 %v3990_v5  ;;  %v5060_v10 = vadd.f32 1.0, %v5059_v59  ;;  %v2954_v53 = vmax.f32 %v13720_v7, 0.0  ;;  %v2266_v29 = vpop.f32.mrf.mxu0 }
 0x5cb   : > { %v7415_v35 = vadd.f32 %v4983_v21, %v2935_v18  ;;  %v5065_v60 = vadd.f32 1.0, %v13787_v27  ;;  %v6490_v47 = vmul.f32 -0.5, %v13773_v14  ;;  %v4324_v54 = vmul.f32 1.442695, %v3762_v42  ;;  %v2379_v21 = vpop.f32.mrf.mxu1 }
 0x5cc   : > { %v13795_v0 = vpop.eup %9280  ;;  %v3604_v55 = vsub.f32 0.0, %v3284_v36  ;;  %v13799_v50 = vadd.f32 %v2264_v19, %v11808_v17  ;;  %vm13802_vm10 = vcmp.lt.f32.partialorder %v6484_v28, 0.0004427343  ;;  %v3113_v18 = vmax.f32 %v13737_v22, 0.0 }
 0x5cd   : > { %v9283_v30 = vpop.eup %9282  ;;  %7735 = vst [vmem:[%s11350_s2 + $0x1b8] sm:$0xff] %v7415_v35  ;;  %9294 = vlog2.f32 %v5065_v60  ;;  %v6568_v6 = vadd.f32 1.0, %v13795_v0  ;;  %v6483_v51 = vmul.f32 %v13729_v4, %v6482_v56  ;;  %v5062_v43 = vand.u32 2147483647, %v13739_v63 }
 0x5ce   : > { %v6480_v39 = vmul.f32 0.6931472, %v9283_v30  ;;  %9296 = vpow2.f32 %v4324_v54  ;;  %v5061_v15 = vmul.f32 %v13739_v63, %v5060_v10  ;;  %v5068_v2 = vmul.f32 -0.5, %v13787_v27 }
 0x5cf   : > { %9298 = vlog2.f32 %v6568_v6  ;;  %v4008_v11 = vmul.f32 1.442695, %v3604_v55  ;;  %v9285_v20 = vpop.eup %9284  ;;  %v6491_v61 = vadd.f32 1.0, %v6490_v47  ;;  %v6493_v32 = vand.u32 2147483647, %v13773_v14  ;;  %v2268_v6 = vpop.f32.mrf.mxu0 }
 0x5d0   : > { %v6486_v33 = vsel %vm13802_vm10, %v6483_v51, %v6480_v39  ;;  %v3443_v4 = vand.u32 2147483647, %v13799_v50  ;;  %v5058_v52 = vmul.f32 0.6931472, %v9285_v20  ;;  %v6571_v63 = vmul.f32 -0.5, %v13795_v0 }
 0x5d1   : > { %v7582_v9 = vadd.f32 %v6486_v33, %v3102_v40  ;;  %9300 = vpow2.f32 %v4008_v11  ;;  %vm5063_vm11 = vcmp.lt.f32.partialorder %v5062_v43, 0.0004427343  ;;  %v5071_v23 = vand.u32 2147483647, %v13787_v27 }
 0x5d2   : > { %v3763_v45 = vsub.f32 0.0, %v3443_v4  ;;  %v13821_v38 = vadd.f32 %v2377_v25, %v13219_v13  ;;  %v5064_v3 = vsel %vm5063_vm11, %v5061_v15, %v5058_v52  ;;  %v5069_v46 = vadd.f32 1.0, %v5068_v2  ;;  %v2381_v15 = vpop.f32.mrf.mxu1 }
 0x5d3   : > { %v13823_v59 = vpop.eup %9286  ;;  %7902 = vst [vmem:[%s11350_s2 + $0x6f0] sm:$0xff] %v7582_v9  ;;  %v2955_v31 = vmax.f32 %v13751_v34, 0.0  ;;  %v3122_v40 = vmax.f32 %v13755_v49, 0.0  ;;  %v7424_v5 = vadd.f32 %v5064_v3, %v2944_v1  ;;  %vm13830_vm12 = vcmp.lt.f32.partialorder %v6493_v32, 0.0004427343 }
 0x5d4   : > { %v6574_v42 = vand.u32 2147483647, %v13795_v0  ;;  %v5146_v19 = vadd.f32 1.0, %v13823_v59  ;;  %v6492_v36 = vmul.f32 %v13773_v14, %v6491_v61  ;;  %v6572_v35 = vadd.f32 1.0, %v6571_v63 }
 0x5d5   : > { %v13836_v56 = vpop.eup %9288  ;;  %v2964_v10 = vmax.f32 %v13777_v24, 0.0  ;;  %v4326_v60 = vmul.f32 1.442695, %v3763_v45  ;;  %7744 = vst [vmem:[%s11350_s2 + $0x200] sm:$0xff] %v7424_v5  ;;  %vm13841_vm13 = vcmp.lt.f32.partialorder %v5071_v23, 0.0004427343  ;;  %v5070_v14 = vmul.f32 %v13787_v27, %v5069_v46  ;;  %v2272_v23 = vpop.f32.mrf.mxu0 }
 0x5d6   : > { %v9291_v47 = vpop.eup %9290  ;;  %9302 = vlog2.f32 %v5146_v19  ;;  %v6577_v1 = vadd.f32 1.0, %v13836_v56  ;;  %v3285_v54 = vand.u32 2147483647, %v13821_v38  ;;  %v13851_v41 = vadd.f32 %v2266_v29, %v11804_v16 }
 0x5d7   : > { %v13847_v55 = vpop.eup %9292  ;;  %v6489_v30 = vmul.f32 0.6931472, %v9291_v47  ;;  %9304 = vpow2.f32 %v4326_v60  ;;  %vm13853_vm14 = vcmp.lt.f32.partialorder %v6574_v42, 0.0004427343  ;;  %v5149_v51 = vmul.f32 -0.5, %v13823_v59 }
 0x5d8   : > { %9306 = vlog2.f32 %v6577_v1  ;;  %v5155_v43 = vadd.f32 1.0, %v13847_v55  ;;  %v6573_v27 = vmul.f32 %v13795_v0, %v6572_v35  ;;  %v3123_v11 = vmax.f32 %v13799_v50, 0.0 }
 0x5d9   : > { %v6495_v2 = vsel %vm13830_vm12, %v6492_v36, %v6489_v30  ;;  %v13864_v25 = vadd.f32 %v2379_v21, %v13133_v8  ;;  %v3605_v61 = vsub.f32 0.0, %v3285_v54  ;;  %v13869_v32 = vadd.f32 %v2268_v6, %v11808_v17 }
 0x5da   : > { %v9295_v20 = vpop.eup %9294  ;;  %v7583_v33 = vadd.f32 %v6495_v2, %v3103_v12  ;;  %9308 = vlog2.f32 %v5155_v43  ;;  %v6580_v52 = vmul.f32 -0.5, %v13836_v56  ;;  %v3452_v0 = vand.u32 2147483647, %v13851_v41 }
 0x5db   : > { %v13871_v4 = vpop.eup %9296  ;;  %v5067_v9 = vmul.f32 0.6931472, %v9295_v20  ;;  %v13876_v63 = vadd.f32 %v2381_v15, %v13219_v13  ;;  %v5150_v58 = vadd.f32 1.0, %v5149_v51  ;;  %v5152_v12 = vand.u32 2147483647, %v13823_v59 }
 0x5dc   : > { %v9299_v45 = vpop.eup %9298  ;;  %7903 = vst [vmem:[%s11350_s2 + $0x6f8] sm:$0xff] %v7583_v33  ;;  %v5158_v3 = vmul.f32 -0.5, %v13847_v55  ;;  %v6658_v46 = vadd.f32 1.0, %v13871_v4  ;;  %v4010_v28 = vmul.f32 1.442695, %v3605_v61  ;;  %v3772_v42 = vsub.f32 0.0, %v3452_v0 }
 0x5dd   : > { %v5073_v29 = vsel %vm13841_vm13, %v5070_v14, %v5067_v9  ;;  %v6570_v5 = vmul.f32 0.6931472, %v9299_v45  ;;  %v6583_v36 = vand.u32 2147483647, %v13836_v56  ;;  %v13890_v35 = vadd.f32 %v2272_v23, %v11804_v16 }
 0x5de   : > { %v13884_v19 = vpop.eup %9300  ;;  %v7425_v21 = vadd.f32 %v5073_v29, %v2945_v57  ;;  %9310 = vlog2.f32 %v6658_v46  ;;  %v6581_v47 = vadd.f32 1.0, %v6580_v52  ;;  %v5161_v62 = vand.u32 2147483647, %v13847_v55  ;;  %v2385_v52 = vpop.f32.mrf.mxu1 }
 0x5df   : > { %v6576_v60 = vsel %vm13853_vm14, %v6573_v27, %v6570_v5  ;;  %v5236_v1 = vadd.f32 1.0, %v13884_v19  ;;  %v5159_v57 = vadd.f32 1.0, %v5158_v3  ;;  %9312 = vpow2.f32 %v4010_v28 }
 0x5e0   : > { %7745 = vst [vmem:[%s11350_s2 + $0x208] sm:$0xff] %v7425_v21  ;;  %v7592_v44 = vadd.f32 %v6576_v60, %v3112_v48  ;;  %v4344_v54 = vmul.f32 1.442695, %v3772_v42  ;;  %v5151_v30 = vmul.f32 %v13823_v59, %v5150_v58  ;;  %vm13900_vm15 = vcmp.lt.f32.partialorder %v5152_v12, 0.0004427343  ;;  %v2274_v21 = vpop.f32.mrf.mxu0 }
 0x5e1   : > { %9314 = vlog2.f32 %v5236_v1  ;;  %v2965_v6 = vmax.f32 %v13821_v38, 0.0  ;;  %vm13906_vm0 = vcmp.lt.f32.partialorder %v6583_v36, 0.0004427343  ;;  %v3294_v26 = vand.u32 2147483647, %v13864_v25 }
 0x5e2   : > { %7912 = vst [vmem:[%s11350_s2 + $0x740] sm:$0xff] %v7592_v44  ;;  %9316 = vpow2.f32 %v4344_v54  ;;  %v3453_v48 = vand.u32 2147483647, %v13869_v32  ;;  %v6582_v59 = vmul.f32 %v13836_v56, %v6581_v47  ;;  %vm13913_vm1 = vcmp.lt.f32.partialorder %v5161_v62, 0.0004427343  ;;  %v2387_v62 = vpop.f32.mrf.mxu1 }
 0x5e3   : > { %v9303_v51 = vpop.eup %9302  ;;  %v6661_v15 = vmul.f32 -0.5, %v13871_v4  ;;  %v3295_v2 = vand.u32 2147483647, %v13876_v63  ;;  %v5160_v33 = vmul.f32 %v13847_v55, %v5159_v57  ;;  %v3614_v61 = vsub.f32 0.0, %v3294_v26 }
 0x5e4   : > { %v13919_v27 = vpop.eup %9304  ;;  %v5148_v20 = vmul.f32 0.6931472, %v9303_v51  ;;  %v3773_v9 = vsub.f32 0.0, %v3453_v48  ;;  %v5239_v23 = vmul.f32 -0.5, %v13884_v19  ;;  %v3462_v58 = vand.u32 2147483647, %v13890_v35 }
 0x5e5   : > { %v9307_v0 = vpop.eup %9306  ;;  %v6667_v56 = vadd.f32 1.0, %v13919_v27  ;;  %v3615_v45 = vsub.f32 0.0, %v3295_v2  ;;  %v4028_v46 = vmul.f32 1.442695, %v3614_v61  ;;  %v6662_v28 = vadd.f32 1.0, %v6661_v15  ;;  %v2276_v61 = vpop.f32.mrf.mxu0 }
 0x5e6   : > { %v5154_v12 = vsel %vm13900_vm15, %v5151_v30, %v5148_v20  ;;  %v6579_v3 = vmul.f32 0.6931472, %v9307_v0  ;;  %v4346_v29 = vmul.f32 1.442695, %v3773_v9  ;;  %v6664_v42 = vand.u32 2147483647, %v13871_v4 }
 0x5e7   : > { %v9309_v5 = vpop.eup %9308  ;;  %v7434_v55 = vadd.f32 %v5154_v12, %v2954_v53  ;;  %9318 = vlog2.f32 %v6667_v56  ;;  %v4030_v47 = vmul.f32 1.442695, %v3615_v45  ;;  %v5240_v44 = vadd.f32 1.0, %v5239_v23 }
 0x5e8   : > { %v6585_v36 = vsel %vm13906_vm0, %v6582_v59, %v6579_v3  ;;  %v5157_v60 = vmul.f32 0.6931472, %v9309_v5  ;;  %9320 = vpow2.f32 %v4028_v46  ;;  %v3782_v7 = vsub.f32 0.0, %v3462_v58 }
 0x5e9   : > { %7754 = vst [vmem:[%s11350_s2 + $0x250] sm:$0xff] %v7434_v55  ;;  %v7593_v1 = vadd.f32 %v6585_v36, %v3113_v18  ;;  %9322 = vpow2.f32 %v4346_v29  ;;  %v13938_v57 = vadd.f32 %v2385_v52, %v13133_v8  ;;  %v13941_v54 = vadd.f32 %v2274_v21, %v11808_v17 }
 0x5ea   : > { %v5163_v53 = vsel %vm13913_vm1, %v5160_v33, %v5157_v60  ;;  %9324 = vpow2.f32 %v4030_v47  ;;  %v3132_v18 = vmax.f32 %v13851_v41, 0.0  ;;  %v4364_v14 = vmul.f32 1.442695, %v3782_v7 }
 0x5eb   : > { %v9311_v30 = vpop.eup %9310  ;;  %7913 = vst [vmem:[%s11350_s2 + $0x748] sm:$0xff] %v7593_v1  ;;  %v7435_v22 = vadd.f32 %v5163_v53, %v2955_v31  ;;  %v13948_v39 = vadd.f32 %v2387_v62, %v13219_v13  ;;  %v6663_v48 = vmul.f32 %v13871_v4, %v6662_v28  ;;  %v5242_v51 = vand.u32 2147483647, %v13884_v19 }
 0x5ec   : > { %v6660_v26 = vmul.f32 0.6931472, %v9311_v30  ;;  %v3304_v59 = vand.u32 2147483647, %v13938_v57  ;;  %v13953_v43 = vpop.eup %9312  ;;  %vm6665_vm2 = vcmp.lt.f32.partialorder %v6664_v42, 0.0004427343  ;;  %9326 = vpow2.f32 %v4364_v14 }
 0x5ed   : > { %7755 = vst [vmem:[%s11350_s2 + $0x258] sm:$0xff] %v7435_v22  ;;  %v6670_v34 = vmul.f32 -0.5, %v13919_v27  ;;  %v3463_v31 = vand.u32 2147483647, %v13941_v54  ;;  %v5241_v20 = vmul.f32 %v13884_v19, %v5240_v44  ;;  %v5245_v4 = vadd.f32 1.0, %v13953_v43  ;;  %v2389_v22 = vpop.f32.mrf.mxu1 }
 0x5ee   : > { %v9315_v15 = vpop.eup %9314  ;;  %v6666_v2 = vsel %vm6665_vm2, %v6663_v48, %v6660_v26  ;;  %v3305_v33 = vand.u32 2147483647, %v13948_v39  ;;  %v3624_v23 = vsub.f32 0.0, %v3304_v59  ;;  %vm5243_vm3 = vcmp.lt.f32.partialorder %v5242_v51, 0.0004427343 }
 0x5ef   : > { %v13961_v9 = vpop.eup %9316  ;;  %v7602_v52 = vadd.f32 %v6666_v2, %v3122_v40  ;;  %v5238_v0 = vmul.f32 0.6931472, %v9315_v15  ;;  %v3783_v56 = vsub.f32 0.0, %v3463_v31  ;;  %v6673_v45 = vand.u32 2147483647, %v13919_v27 }
 0x5f0   : > { %9328 = vlog2.f32 %v5245_v4  ;;  %v6748_v19 = vadd.f32 1.0, %v13961_v9  ;;  %v6671_v12 = vadd.f32 1.0, %v6670_v34  ;;  %v4048_v3 = vmul.f32 1.442695, %v3624_v23 }
 0x5f1   : > { %7922 = vst [vmem:[%s11350_s2 + $0x790] sm:$0xff] %v7602_v52  ;;  %v5244_v58 = vsel %vm5243_vm3, %v5241_v20, %v5238_v0  ;;  %v13969_v46 = vadd.f32 %v2276_v61, %v11804_v16  ;;  %v2974_v40 = vmax.f32 %v13864_v25, 0.0  ;;  %v4366_v29 = vmul.f32 1.442695, %v3783_v56  ;;  %v2278_v61 = vpop.f32.mrf.mxu0 }
 0x5f2   : > { %v7444_v49 = vadd.f32 %v5244_v58, %v2964_v10  ;;  %9330 = vlog2.f32 %v6748_v19  ;;  %v5248_v5 = vmul.f32 -0.5, %v13953_v43  ;;  %v3133_v55 = vmax.f32 %v13869_v32, 0.0 }
 0x5f3   : > { %9332 = vpow2.f32 %v4048_v3  ;;  %v3625_v28 = vsub.f32 0.0, %v3305_v33  ;;  %v6751_v21 = vmul.f32 -0.5, %v13961_v9  ;;  %v2975_v36 = vmax.f32 %v13876_v63, 0.0 }
 0x5f4   : > { %v9319_v42 = vpop.eup %9318  ;;  %7764 = vst [vmem:[%s11350_s2 + $0x2a0] sm:$0xff] %v7444_v49  ;;  %v3142_v60 = vmax.f32 %v13890_v35, 0.0  ;;  %9334 = vpow2.f32 %v4366_v29  ;;  %v6672_v47 = vmul.f32 %v13919_v27, %v6671_v12  ;;  %vm6674_vm4 = vcmp.lt.f32.partialorder %v6673_v45, 0.0004427343 }
 0x5f5   : > { %v13980_v24 = vpop.eup %9320  ;;  %v6669_v10 = vmul.f32 0.6931472, %v9319_v42  ;;  %v3472_v62 = vand.u32 2147483647, %v13969_v46  ;;  %v5251_v44 = vand.u32 2147483647, %v13953_v43  ;;  %v13998_v20 = vadd.f32 %v2389_v22, %v13133_v8  ;;  %v2391_v42 = vpop.f32.mrf.mxu1 }
 0x5f6   : > { %v13984_v1 = vpop.eup %9322  ;;  %v5326_v7 = vadd.f32 1.0, %v13980_v24  ;;  %v2984_v53 = vmax.f32 %v13938_v57, 0.0  ;;  %v4050_v30 = vmul.f32 1.442695, %v3625_v28  ;;  %v5249_v48 = vadd.f32 1.0, %v5248_v5 }
 0x5f7   : > { %v13989_v14 = vpop.eup %9324  ;;  %v6675_v26 = vsel %vm6674_vm4, %v6672_v47, %v6669_v10  ;;  %v6757_v27 = vadd.f32 1.0, %v13984_v1  ;;  %v3143_v51 = vmax.f32 %v13941_v54, 0.0  ;;  %v6752_v34 = vadd.f32 1.0, %v6751_v21 }
 0x5f8   : > { %v7603_v59 = vadd.f32 %v6675_v26, %v3123_v11  ;;  %v6754_v31 = vand.u32 2147483647, %v13961_v9  ;;  %9336 = vlog2.f32 %v5326_v7  ;;  %v5335_v15 = vadd.f32 1.0, %v13989_v14 }
 0x5f9   : > { %9338 = vlog2.f32 %v6757_v27  ;;  %v3792_v2 = vsub.f32 0.0, %v3472_v62  ;;  %v14000_v4 = vpop.eup %9326  ;;  %vm14003_vm5 = vcmp.lt.f32.partialorder %v5251_v44, 0.0004427343  ;;  %v5329_v50 = vmul.f32 -0.5, %v13980_v24 }
 0x5fa   : > { %7923 = vst [vmem:[%s11350_s2 + $0x798] sm:$0xff] %v7603_v59  ;;  %v2985_v11 = vmax.f32 %v13948_v39, 0.0  ;;  %9340 = vpow2.f32 %v4050_v30  ;;  %v5332_v52 = vand.u32 2147483647, %v13980_v24  ;;  %v6760_v0 = vmul.f32 -0.5, %v13984_v1 }
 0x5fb   : > { %9342 = vlog2.f32 %v5335_v15  ;;  %v6838_v23 = vadd.f32 1.0, %v14000_v4  ;;  %v5250_v56 = vmul.f32 %v13953_v43, %v5249_v48  ;;  %v6753_v45 = vmul.f32 %v13961_v9, %v6752_v34 }
 0x5fc   : > { %vm14014_vm6 = vcmp.lt.f32.partialorder %v6754_v31, 0.0004427343  ;;  %v3152_v58 = vmax.f32 %v13969_v46, 0.0  ;;  %v4384_v3 = vmul.f32 1.442695, %v3792_v2  ;;  %v14021_v29 = vadd.f32 %v2278_v61, %v11808_v17 }
 0x5fd   : > { %v9329_v12 = vpop.eup %9328  ;;  %9344 = vlog2.f32 %v6838_v23  ;;  %v3314_v49 = vand.u32 2147483647, %v13998_v20  ;;  %v5330_v28 = vadd.f32 1.0, %v5329_v50  ;;  %v6763_v43 = vand.u32 2147483647, %v13984_v1 }
 0x5fe   : > { %v5247_v5 = vmul.f32 0.6931472, %v9329_v12  ;;  %v5338_v9 = vmul.f32 -0.5, %v13989_v14  ;;  %vm14025_vm7 = vcmp.lt.f32.partialorder %v5332_v52, 0.0004427343  ;;  %v6761_v47 = vadd.f32 1.0, %v6760_v0  ;;  %v2282_v52 = vpop.f32.mrf.mxu0  ;;  %v2395_v12 = vpop.f32.mrf.mxu1 }
 0x5ff   : > { %v9331_v21 = vpop.eup %9330  ;;  %v5341_v62 = vand.u32 2147483647, %v13989_v14  ;;  %9346 = vpow2.f32 %v4384_v3  ;;  %v6841_v22 = vmul.f32 -0.5, %v14000_v4  ;;  %v3634_v26 = vsub.f32 0.0, %v3314_v49 }
 0x600   : > { %v14030_v44 = vpop.eup %9332  ;;  %v5253_v7 = vsel %vm14003_vm5, %v5250_v56, %v5247_v5  ;;  %v6750_v30 = vmul.f32 0.6931472, %v9331_v21  ;;  %v3473_v34 = vand.u32 2147483647, %v14021_v29  ;;  %v14042_v31 = vadd.f32 %v2391_v42, %v13219_v13 }
 0x601   : > { %v14035_v48 = vpop.eup %9334  ;;  %v7445_v27 = vadd.f32 %v5253_v7, %v2965_v6  ;;  %v5416_v59 = vadd.f32 1.0, %v14030_v44  ;;  %vm14046_vm8 = vcmp.lt.f32.partialorder %v6763_v43, 0.0004427343  ;;  %v5339_v33 = vadd.f32 1.0, %v5338_v9 }
 0x602   : > { %v6756_v15 = vsel %vm14014_vm6, %v6753_v45, %v6750_v30  ;;  %v6847_v50 = vadd.f32 1.0, %v14035_v48  ;;  %v5331_v6 = vmul.f32 %v13980_v24, %v5330_v28  ;;  %v6762_v61 = vmul.f32 %v13984_v1, %v6761_v47 }
 0x603   : > { %7765 = vst [vmem:[%s11350_s2 + $0x2a8] sm:$0xff] %v7445_v27  ;;  %v7612_v38 = vadd.f32 %v6756_v15, %v3132_v18  ;;  %9348 = vlog2.f32 %v5416_v59  ;;  %vm14056_vm9 = vcmp.lt.f32.partialorder %v5341_v62, 0.0004427343  ;;  %v6844_v23 = vand.u32 2147483647, %v14000_v4 }
 0x604   : > { %9350 = vlog2.f32 %v6847_v50  ;;  %v4068_v56 = vmul.f32 1.442695, %v3634_v26  ;;  %v6842_v19 = vadd.f32 1.0, %v6841_v22  ;;  %v2994_v41 = vmax.f32 %v13998_v20, 0.0  ;;  %v2284_v50 = vpop.f32.mrf.mxu0 }
 0x605   : > { %v9337_v45 = vpop.eup %9336  ;;  %7932 = vst [vmem:[%s11350_s2 + $0x7e0] sm:$0xff] %v7612_v38  ;;  %v3793_v18 = vsub.f32 0.0, %v3473_v34  ;;  %v3315_v24 = vand.u32 2147483647, %v14042_v31  ;;  %v5340_v49 = vmul.f32 %v13989_v14, %v5339_v33  ;;  %v14066_v5 = vadd.f32 %v2282_v52, %v11804_v16 }
 0x606   : > { %v9339_v1 = vpop.eup %9338  ;;  %v5328_v3 = vmul.f32 0.6931472, %v9337_v45  ;;  %9352 = vpow2.f32 %v4068_v56  ;;  %v5419_v9 = vmul.f32 -0.5, %v14030_v44  ;;  %v6850_v7 = vmul.f32 -0.5, %v14035_v48  ;;  %v2397_v56 = vpop.f32.mrf.mxu1 }
 0x607   : > { %v14068_v28 = vpop.eup %9340  ;;  %v6759_v43 = vmul.f32 0.6931472, %v9339_v1  ;;  %v4386_v42 = vmul.f32 1.442695, %v3793_v18  ;;  %v3635_v21 = vsub.f32 0.0, %v3315_v24  ;;  %v14076_v30 = vadd.f32 %v2395_v12, %v13133_v8  ;;  %v2286_v24 = vpop.f32.mrf.mxu0 }
 0x608   : > { %v9343_v47 = vpop.eup %9342  ;;  %v5334_v62 = vsel %vm14025_vm7, %v5331_v6, %v5328_v3  ;;  %v5425_v14 = vadd.f32 1.0, %v14068_v28  ;;  %v6843_v34 = vmul.f32 %v14000_v4, %v6842_v19  ;;  %v5422_v15 = vand.u32 2147483647, %v14030_v44 }
 0x609   : > { %v7454_v22 = vadd.f32 %v5334_v62, %v2974_v40  ;;  %v6765_v26 = vsel %vm14046_vm8, %v6762_v61, %v6759_v43  ;;  %v5337_v27 = vmul.f32 0.6931472, %v9343_v47  ;;  %9354 = vpow2.f32 %v4386_v42 }
 0x60a   : > { %v9345_v59 = vpop.eup %9344  ;;  %v7613_v10 = vadd.f32 %v6765_v26, %v3133_v55  ;;  %9356 = vlog2.f32 %v5425_v14  ;;  %v4070_v2 = vmul.f32 1.442695, %v3635_v21  ;;  %v3482_v33 = vand.u32 2147483647, %v14066_v5 }
 0x60b   : > { %7774 = vst [vmem:[%s11350_s2 + $0x2f0] sm:$0xff] %v7454_v22  ;;  %v5343_v25 = vsel %vm14056_vm9, %v5340_v49, %v5337_v27  ;;  %v6840_v40 = vmul.f32 0.6931472, %v9345_v59  ;;  %vm6845_vm10 = vcmp.lt.f32.partialorder %v6844_v23, 0.0004427343  ;;  %v5420_v61 = vadd.f32 1.0, %v5419_v9  ;;  %v2399_v27 = vpop.f32.mrf.mxu1 }
 0x60c   : > { %v14090_v38 = vpop.eup %9346  ;;  %7933 = vst [vmem:[%s11350_s2 + $0x7e8] sm:$0xff] %v7613_v10  ;;  %v7455_v32 = vadd.f32 %v5343_v25, %v2975_v36  ;;  %v6853_v55 = vand.u32 2147483647, %v14035_v48  ;;  %v3324_v4 = vand.u32 2147483647, %v14076_v30  ;;  %v6851_v52 = vadd.f32 1.0, %v6850_v7 }
 0x60d   : > { %v6846_v6 = vsel %vm6845_vm10, %v6843_v34, %v6840_v40  ;;  %v6928_v0 = vadd.f32 1.0, %v14090_v38  ;;  %9358 = vpow2.f32 %v4070_v2  ;;  %v3802_v19 = vsub.f32 0.0, %v3482_v33 }
 0x60e   : > { %7775 = vst [vmem:[%s11350_s2 + $0x2f8] sm:$0xff] %v7455_v32  ;;  %v7622_v45 = vadd.f32 %v6846_v6, %v3142_v60  ;;  %v3644_v63 = vsub.f32 0.0, %v3324_v4  ;;  %vm14101_vm11 = vcmp.lt.f32.partialorder %v5422_v15, 0.0004427343  ;;  %v5428_v23 = vmul.f32 -0.5, %v14068_v28 }
 0x60f   : > { %9360 = vlog2.f32 %v6928_v0  ;;  %v14107_v18 = vadd.f32 %v2284_v50, %v11808_v17  ;;  %vm14110_vm12 = vcmp.lt.f32.partialorder %v6853_v55, 0.0004427343  ;;  %v4404_v35 = vmul.f32 1.442695, %v3802_v19  ;;  %v2288_v0 = vpop.f32.mrf.mxu0 }
 0x610   : > { %v9349_v12 = vpop.eup %9348  ;;  %7942 = vst [vmem:[%s11350_s2 + $0x830] sm:$0xff] %v7622_v45  ;;  %v4088_v60 = vmul.f32 1.442695, %v3644_v63  ;;  %v14115_v3 = vadd.f32 %v2397_v56, %v13219_v13  ;;  %v5421_v9 = vmul.f32 %v14030_v44, %v5420_v61  ;;  %v6852_v42 = vmul.f32 %v14035_v48, %v6851_v52 }
 0x611   : > { %v9351_v49 = vpop.eup %9350  ;;  %v5418_v43 = vmul.f32 0.6931472, %v9349_v12  ;;  %v3483_v21 = vand.u32 2147483647, %v14107_v18  ;;  %9362 = vpow2.f32 %v4404_v35  ;;  %v14122_v7 = vadd.f32 %v2286_v24, %v11804_v16 }
 0x612   : > { %v6849_v47 = vmul.f32 0.6931472, %v9351_v49  ;;  %v3325_v62 = vand.u32 2147483647, %v14115_v3  ;;  %v5429_v26 = vadd.f32 1.0, %v5428_v23  ;;  %9364 = vpow2.f32 %v4088_v60 }
 0x613   : > { %v14124_v14 = vpop.eup %9352  ;;  %v5424_v22 = vsel %vm14101_vm11, %v5421_v9, %v5418_v43  ;;  %v3803_v44 = vsub.f32 0.0, %v3483_v21  ;;  %v6931_v10 = vmul.f32 -0.5, %v14090_v38  ;;  %v5431_v25 = vand.u32 2147483647, %v14068_v28  ;;  %v2401_v21 = vpop.f32.mrf.mxu1 }
 0x614   : > { %v7464_v48 = vadd.f32 %v5424_v22, %v2984_v53  ;;  %v6855_v59 = vsel %vm14110_vm12, %v6852_v42, %v6849_v47  ;;  %v5506_v34 = vadd.f32 1.0, %v14124_v14  ;;  %v3645_v2 = vsub.f32 0.0, %v3325_v62  ;;  %v2292_v22 = vpop.f32.mrf.mxu0 }
 0x615   : > { %v7623_v15 = vadd.f32 %v6855_v59, %v3143_v51  ;;  %v4406_v40 = vmul.f32 1.442695, %v3803_v44  ;;  %v3153_v57 = vmax.f32 %v14021_v29, 0.0  ;;  %v3492_v53 = vand.u32 2147483647, %v14122_v7 }
 0x616   : > { %v14137_v33 = vpop.eup %9354  ;;  %7784 = vst [vmem:[%s11350_s2 + $0x340] sm:$0xff] %v7464_v48  ;;  %9366 = vlog2.f32 %v5506_v34  ;;  %v14143_v50 = vadd.f32 %v2399_v27, %v13133_v8  ;;  %v5430_v54 = vmul.f32 %v14068_v28, %v5429_v26  ;;  %v6934_v51 = vand.u32 2147483647, %v14090_v38 }
 0x617   : > { %v9357_v32 = vpop.eup %9356  ;;  %7943 = vst [vmem:[%s11350_s2 + $0x838] sm:$0xff] %v7623_v15  ;;  %v6937_v55 = vadd.f32 1.0, %v14137_v33  ;;  %v2995_v4 = vmax.f32 %v14042_v31, 0.0  ;;  %v6932_v61 = vadd.f32 1.0, %v6931_v10  ;;  %9368 = vpow2.f32 %v4406_v40 }
 0x618   : > { %v5427_v6 = vmul.f32 0.6931472, %v9357_v32  ;;  %v4090_v52 = vmul.f32 1.442695, %v3645_v2  ;;  %vm5432_vm13 = vcmp.lt.f32.partialorder %v5431_v25, 0.0004427343  ;;  %v14159_v1 = vadd.f32 %v2288_v0, %v11808_v17 }
 0x619   : > { %9370 = vlog2.f32 %v6937_v55  ;;  %v3162_v56 = vmax.f32 %v14066_v5, 0.0  ;;  %v3812_v45 = vsub.f32 0.0, %v3492_v53  ;;  %v3004_v28 = vmax.f32 %v14076_v30, 0.0 }
 0x61a   : > { %v5433_v19 = vsel %vm5432_vm13, %v5430_v54, %v5427_v6  ;;  %9372 = vpow2.f32 %v4090_v52  ;;  %v3334_v63 = vand.u32 2147483647, %v14143_v50  ;;  %v14153_v36 = vpop.eup %9358  ;;  %v5509_v24 = vmul.f32 -0.5, %v14124_v14 }
 0x61b   : > { %v7465_v23 = vadd.f32 %v5433_v19, %v2985_v11  ;;  %v4424_v12 = vmul.f32 1.442695, %v3812_v45  ;;  %v6933_v60 = vmul.f32 %v14090_v38, %v6932_v61  ;;  %vm14162_vm14 = vcmp.lt.f32.partialorder %v6934_v51, 0.0004427343 }
 0x61c   : > { %v9361_v35 = vpop.eup %9360  ;;  %v5515_v43 = vadd.f32 1.0, %v14153_v36  ;;  %v3654_v9 = vsub.f32 0.0, %v3334_v63  ;;  %v6940_v39 = vmul.f32 -0.5, %v14137_v33  ;;  %v3493_v11 = vand.u32 2147483647, %v14159_v1 }
 0x61d   : > { %7785 = vst [vmem:[%s11350_s2 + $0x348] sm:$0xff] %v7465_v23  ;;  %v6930_v42 = vmul.f32 0.6931472, %v9361_v35  ;;  %9374 = vpow2.f32 %v4424_v12  ;;  %v5512_v47 = vand.u32 2147483647, %v14124_v14  ;;  %v3163_v38 = vmax.f32 %v14107_v18, 0.0 }
 0x61e   : > { %9376 = vlog2.f32 %v5515_v43  ;;  %v3005_v62 = vmax.f32 %v14115_v3, 0.0  ;;  %v14173_v26 = vpop.eup %9362  ;;  %v5510_v27 = vadd.f32 1.0, %v5509_v24  ;;  %v6943_v48 = vand.u32 2147483647, %v14137_v33 }
 0x61f   : > { %v6936_v44 = vsel %vm14162_vm14, %v6933_v60, %v6930_v42  ;;  %v3813_v59 = vsub.f32 0.0, %v3493_v11  ;;  %v14178_v10 = vpop.eup %9364  ;;  %v7018_v15 = vadd.f32 1.0, %v14173_v26  ;;  %v4108_v25 = vmul.f32 1.442695, %v3654_v9 }
 0x620   : > { %v7632_v34 = vadd.f32 %v6936_v44, %v3152_v58  ;;  %v14184_v40 = vadd.f32 %v2401_v21, %v13219_v13  ;;  %v6941_v2 = vadd.f32 1.0, %v6940_v39  ;;  %v5518_v53 = vmul.f32 -0.5, %v14153_v36 }
 0x621   : > { %v5596_v32 = vadd.f32 1.0, %v14178_v10  ;;  %v14189_v54 = vadd.f32 %v2292_v22, %v11804_v16  ;;  %vm14192_vm15 = vcmp.lt.f32.partialorder %v5512_v47, 0.0004427343  ;;  %9378 = vlog2.f32 %v7018_v15 }
 0x622   : > { %7952 = vst [vmem:[%s11350_s2 + $0x880] sm:$0xff] %v7632_v34  ;;  %v3172_v46 = vmax.f32 %v14122_v7, 0.0  ;;  %v4426_v58 = vmul.f32 1.442695, %v3813_v59  ;;  %v5511_v6 = vmul.f32 %v14124_v14, %v5510_v27  ;;  %vm14198_vm0 = vcmp.lt.f32.partialorder %v6943_v48, 0.0004427343  ;;  %v2405_v48 = vpop.f32.mrf.mxu1 }
 0x623   : > { %v9367_v55 = vpop.eup %9366  ;;  %9380 = vlog2.f32 %v5596_v32  ;;  %v3014_v52 = vmax.f32 %v14143_v50, 0.0  ;;  %v5521_v45 = vand.u32 2147483647, %v14153_v36  ;;  %v3335_v19 = vand.u32 2147483647, %v14184_v40 }
 0x624   : > { %v5508_v0 = vmul.f32 0.6931472, %v9367_v55  ;;  %9382 = vpow2.f32 %v4108_v25  ;;  %v14205_v63 = vpop.eup %9368  ;;  %v6942_v23 = vmul.f32 %v14137_v33, %v6941_v2  ;;  %v5519_v24 = vadd.f32 1.0, %v5518_v53  ;;  %v2294_v55 = vpop.f32.mrf.mxu0 }
 0x625   : > { %9384 = vpow2.f32 %v4426_v58  ;;  %v3502_v14 = vand.u32 2147483647, %v14189_v54  ;;  %v7021_v60 = vmul.f32 -0.5, %v14173_v26  ;;  %v5599_v49 = vmul.f32 -0.5, %v14178_v10 }
 0x626   : > { %v9371_v12 = vpop.eup %9370  ;;  %v5514_v35 = vsel %vm14192_vm15, %v5511_v6, %v5508_v0  ;;  %v7027_v43 = vadd.f32 1.0, %v14205_v63  ;;  %v3655_v39 = vsub.f32 0.0, %v3335_v19  ;;  %vm14218_vm1 = vcmp.lt.f32.partialorder %v5521_v45, 0.0004427343 }
 0x627   : > { %v14214_v9 = vpop.eup %9372  ;;  %v7474_v33 = vadd.f32 %v5514_v35, %v2994_v41  ;;  %v6939_v42 = vmul.f32 0.6931472, %v9371_v12  ;;  %v3822_v11 = vsub.f32 0.0, %v3502_v14  ;;  %v3173_v22 = vmax.f32 %v14159_v1, 0.0 }
 0x628   : > { %9386 = vlog2.f32 %v7027_v43  ;;  %v5605_v47 = vadd.f32 1.0, %v14214_v9  ;;  %v7024_v20 = vand.u32 2147483647, %v14173_v26  ;;  %v5602_v41 = vand.u32 2147483647, %v14178_v10 }
 0x629   : > { %7794 = vst [vmem:[%s11350_s2 + $0x390] sm:$0xff] %v7474_v33  ;;  %v6945_v44 = vsel %vm14198_vm0, %v6942_v23, %v6939_v42  ;;  %v4110_v27 = vmul.f32 1.442695, %v3655_v39  ;;  %v5520_v15 = vmul.f32 %v14153_v36, %v5519_v24  ;;  %v4444_v25 = vmul.f32 1.442695, %v3822_v11  ;;  %v2407_v11 = vpop.f32.mrf.mxu1 }
 0x62a   : > { %v14229_v59 = vpop.eup %9374  ;;  %v7633_v34 = vadd.f32 %v6945_v44, %v3153_v57  ;;  %9388 = vlog2.f32 %v5605_v47  ;;  %v7022_v53 = vadd.f32 1.0, %v7021_v60  ;;  %v5600_v32 = vadd.f32 1.0, %v5599_v49 }
 0x62b   : > { %v9377_v2 = vpop.eup %9376  ;;  %v7108_v51 = vadd.f32 1.0, %v14229_v59  ;;  %v3015_v58 = vmax.f32 %v14184_v40, 0.0  ;;  %v7030_v61 = vmul.f32 -0.5, %v14205_v63  ;;  %9390 = vpow2.f32 %v4110_v27 }
 0x62c   : > { %7953 = vst [vmem:[%s11350_s2 + $0x888] sm:$0xff] %v7633_v34  ;;  %v5517_v6 = vmul.f32 0.6931472, %v9377_v2  ;;  %v14239_v29 = vadd.f32 %v2405_v48, %v13133_v8  ;;  %vm14241_vm2 = vcmp.lt.f32.partialorder %v7024_v20, 0.0004427343  ;;  %v5608_v0 = vmul.f32 -0.5, %v14214_v9  ;;  %v2296_v2 = vpop.f32.mrf.mxu0 }
 0x62d   : > { %vm14245_vm3 = vcmp.lt.f32.partialorder %v5602_v41, 0.0004427343  ;;  %9392 = vlog2.f32 %v7108_v51  ;;  %v7111_v19 = vmul.f32 -0.5, %v14229_v59  ;;  %v14254_v23 = vadd.f32 %v2294_v55, %v11808_v17 }
 0x62e   : > { %v5523_v45 = vsel %vm14218_vm1, %v5520_v15, %v5517_v6  ;;  %9394 = vpow2.f32 %v4444_v25  ;;  %v9379_v24 = vpop.eup %9378  ;;  %v7023_v12 = vmul.f32 %v14173_v26, %v7022_v53  ;;  %v7033_v35 = vand.u32 2147483647, %v14205_v63 }
 0x62f   : > { %v7475_v14 = vadd.f32 %v5523_v45, %v2995_v4  ;;  %v3344_v60 = vand.u32 2147483647, %v14239_v29  ;;  %v7020_v43 = vmul.f32 0.6931472, %v9379_v24  ;;  %v5601_v33 = vmul.f32 %v14178_v10, %v5600_v32 }
 0x630   : > { %v9381_v49 = vpop.eup %9380  ;;  %v7031_v42 = vadd.f32 1.0, %v7030_v61  ;;  %v5611_v39 = vand.u32 2147483647, %v14214_v9  ;;  %v5609_v31 = vadd.f32 1.0, %v5608_v0  ;;  %v7114_v4 = vand.u32 2147483647, %v14229_v59  ;;  %v2409_v61 = vpop.f32.mrf.mxu1 }
 0x631   : > { %v14263_v21 = vpop.eup %9382  ;;  %7795 = vst [vmem:[%s11350_s2 + $0x398] sm:$0xff] %v7475_v14  ;;  %v5598_v47 = vmul.f32 0.6931472, %v9381_v49  ;;  %v3664_v26 = vsub.f32 0.0, %v3344_v60  ;;  %v7026_v20 = vsel %vm14241_vm2, %v7023_v12, %v7020_v43  ;;  %v7112_v41 = vadd.f32 1.0, %v7111_v19  ;;  %v2298_v43 = vpop.f32.mrf.mxu0 }
 0x632   : > { %v14267_v44 = vpop.eup %9384  ;;  %v5686_v10 = vadd.f32 1.0, %v14263_v21  ;;  %v3503_v27 = vand.u32 2147483647, %v14254_v23  ;;  %v7642_v48 = vadd.f32 %v7026_v20, %v3162_v56  ;;  %v14279_v25 = vadd.f32 %v2407_v11, %v13219_v13 }
 0x633   : > { %v5604_v34 = vsel %vm14245_vm3, %v5601_v33, %v5598_v47  ;;  %v7117_v15 = vadd.f32 1.0, %v14267_v44  ;;  %vm14283_vm4 = vcmp.lt.f32.partialorder %v7033_v35, 0.0004427343  ;;  %v3182_v5 = vmax.f32 %v14189_v54, 0.0  ;;  %v2411_v33 = vpop.f32.mrf.mxu1 }
 0x634   : > { %v7484_v53 = vadd.f32 %v5604_v34, %v3004_v28  ;;  %9396 = vlog2.f32 %v5686_v10  ;;  %7962 = vst [vmem:[%s11350_s2 + $0x8d0] sm:$0xff] %v7642_v48  ;;  %v7032_v51 = vmul.f32 %v14205_v63, %v7031_v42  ;;  %vm14290_vm5 = vcmp.lt.f32.partialorder %v5611_v39, 0.0004427343 }
 0x635   : > { %v9387_v56 = vpop.eup %9386  ;;  %9398 = vlog2.f32 %v7117_v15  ;;  %v4128_v6 = vmul.f32 1.442695, %v3664_v26  ;;  %v5610_v28 = vmul.f32 %v14214_v9, %v5609_v31  ;;  %v3823_v57 = vsub.f32 0.0, %v3503_v27 }
 0x636   : > { %7804 = vst [vmem:[%s11350_s2 + $0x3e0] sm:$0xff] %v7484_v53  ;;  %v7029_v30 = vmul.f32 0.6931472, %v9387_v56  ;;  %v14297_v36 = vadd.f32 %v2296_v2, %v11804_v16  ;;  %v7113_v45 = vmul.f32 %v14229_v59, %v7112_v41  ;;  %vm14300_vm6 = vcmp.lt.f32.partialorder %v7114_v4, 0.0004427343 }
 0x637   : > { %v9389_v0 = vpop.eup %9388  ;;  %9400 = vpow2.f32 %v4128_v6  ;;  %v3345_v19 = vand.u32 2147483647, %v14279_v25  ;;  %v4446_v9 = vmul.f32 1.442695, %v3823_v57  ;;  %v14308_v12 = vadd.f32 %v2409_v61, %v13133_v8 }
 0x638   : > { %v7035_v24 = vsel %vm14283_vm4, %v7032_v51, %v7029_v30  ;;  %v5607_v14 = vmul.f32 0.6931472, %v9389_v0  ;;  %v14310_v16 = vpop.eup %9390  ;;  %v5689_v35 = vmul.f32 -0.5, %v14263_v21  ;;  %v5692_v60 = vand.u32 2147483647, %v14263_v21 }
 0x639   : > { %v7643_v59 = vadd.f32 %v7035_v24, %v3163_v38  ;;  %v3665_v49 = vsub.f32 0.0, %v3345_v19  ;;  %v7120_v11 = vmul.f32 -0.5, %v14267_v44  ;;  %v5695_v47 = vadd.f32 1.0, %v14310_v16 }
 0x63a   : > { %v9393_v42 = vpop.eup %9392  ;;  %v5613_v39 = vsel %vm14290_vm5, %v5610_v28, %v5607_v14  ;;  %v3512_v31 = vand.u32 2147483647, %v14297_v36  ;;  %9402 = vpow2.f32 %v4446_v9  ;;  %v3024_v41 = vmax.f32 %v14239_v29, 0.0 }
 0x63b   : > { %v14321_v18 = vpop.eup %9394  ;;  %7963 = vst [vmem:[%s11350_s2 + $0x8d8] sm:$0xff] %v7643_v59  ;;  %v7485_v38 = vadd.f32 %v5613_v39, %v3005_v62  ;;  %v7110_v4 = vmul.f32 0.6931472, %v9393_v42  ;;  %v4130_v26 = vmul.f32 1.442695, %v3665_v49  ;;  %9404 = vlog2.f32 %v5695_v47  ;;  %v2415_v62 = vpop.f32.mrf.mxu1  ;;  %v10074_v39 = vld [vmem:[#allocation14] sm:$0xff] }
 0x63c   : > { %v7198_v20 = vadd.f32 1.0, %v14321_v18  ;;  %v14329_v10 = vadd.f32 %v2298_v43, %v11808_v17  ;;  %v5690_v48 = vadd.f32 1.0, %v5689_v35  ;;  %v7123_v3 = vand.u32 2147483647, %v14267_v44 }
 0x63d   : > { %7805 = vst [vmem:[%s11350_s2 + $0x3e8] sm:$0xff] %v7485_v38  ;;  %v7116_v27 = vsel %vm14300_vm6, %v7113_v45, %v7110_v4  ;;  %9406 = vpow2.f32 %v4130_v26  ;;  %v5698_v15 = vmul.f32 -0.5, %v14310_v16  ;;  %v3832_v2 = vsub.f32 0.0, %v3512_v31  ;;  %v2528_v4 = vpop.f32.mrf.mxu0 }
 0x63e   : > { %v7652_v34 = vadd.f32 %v7116_v27, %v3172_v46  ;;  %9408 = vlog2.f32 %v7198_v20  ;;  %vm14338_vm7 = vcmp.lt.f32.partialorder %v5692_v60, 0.0004427343  ;;  %v7121_v17 = vadd.f32 1.0, %v7120_v11 }
 0x63f   : > { %v3183_v32 = vmax.f32 %v14254_v23, 0.0  ;;  %v3354_v56 = vand.u32 2147483647, %v14308_v12  ;;  %v4464_v51 = vmul.f32 1.442695, %v3832_v2  ;;  %v14347_v7 = vadd.f32 %v2411_v33, %v13219_v13 }
 0x640   : > { %7972 = vst [vmem:[%s11350_s2 + $0x920] sm:$0xff] %v7652_v34  ;;  %v3513_v55 = vand.u32 2147483647, %v14329_v10  ;;  %v14350_v46 = vadd.f32 %v2415_v62, %v13133_v8  ;;  %v5691_v61 = vmul.f32 %v14263_v21, %v5690_v48  ;;  %vm14353_vm8 = vcmp.lt.f32.partialorder %v7123_v3, 0.0004427343 }
 0x641   : > { %v9397_v6 = vpop.eup %9396  ;;  %v3674_v28 = vsub.f32 0.0, %v3354_v56  ;;  %v1491_v57 = vsub.s32 6, %v17824_v37  ;;  %v5699_v63 = vadd.f32 1.0, %v5698_v15  ;;  %9410 = vpow2.f32 %v4464_v51 }
 0x642   : > { %v9399_v0 = vpop.eup %9398  ;;  %v5688_v45 = vmul.f32 0.6931472, %v9397_v6  ;;  %v3833_v19 = vsub.f32 0.0, %v3513_v55  ;;  %v7122_v14 = vmul.f32 %v14267_v44, %v7121_v17  ;;  %v3355_v59 = vand.u32 2147483647, %v14347_v7 }
 0x643   : > { %v7119_v24 = vmul.f32 0.6931472, %v9399_v0  ;;  %v4148_v9 = vmul.f32 1.442695, %v3674_v28  ;;  %v7201_v60 = vmul.f32 -0.5, %v14321_v18  ;;  %v14371_v11 = vrot.slane %v10074_v39, %v1491_v57 }
 0x644   : > { %v14360_v21 = vpop.eup %9400  ;;  %v5694_v35 = vsel %vm14338_vm7, %v5691_v61, %v5688_v45  ;;  %v4466_v49 = vmul.f32 1.442695, %v3833_v19  ;;  %v3364_v43 = vand.u32 2147483647, %v14350_v46  ;;  %v3025_v31 = vmax.f32 %v14279_v25, 0.0 }
 0x645   : > { %v7494_v33 = vadd.f32 %v5694_v35, %v3014_v52  ;;  %v7125_v44 = vsel %vm14353_vm8, %v7122_v14, %v7119_v24  ;;  %v5776_v42 = vadd.f32 1.0, %v14360_v21  ;;  %9412 = vpow2.f32 %v4148_v9 }
 0x646   : > { %v7653_v47 = vadd.f32 %v7125_v44, %v3173_v22  ;;  %v3675_v38 = vsub.f32 0.0, %v3355_v59  ;;  %v5701_v50 = vand.u32 2147483647, %v14310_v16  ;;  %v3192_v52 = vmax.f32 %v14297_v36, 0.0  ;;  %v2417_v22 = vpop.f32.mrf.mxu1 }
 0x647   : > { %7814 = vst [vmem:[%s11350_s2 + $0x430] sm:$0xff] %v7494_v33  ;;  %9414 = vlog2.f32 %v5776_v42  ;;  %v3684_v26 = vsub.f32 0.0, %v3364_v43  ;;  %v14379_v20 = vpop.eup %9402  ;;  %v7202_v27 = vadd.f32 1.0, %v7201_v60  ;;  %v7204_v48 = vand.u32 2147483647, %v14321_v18  ;;  %v2530_v43 = vpop.f32.mrf.mxu0 }
 0x648   : > { %7973 = vst [vmem:[%s11350_s2 + $0x928] sm:$0xff] %v7653_v47  ;;  %9416 = vpow2.f32 %v4466_v49  ;;  %v4150_v1 = vmul.f32 1.442695, %v3675_v38  ;;  %v9405_v3 = vpop.eup %9404  ;;  %v5700_v62 = vmul.f32 %v14310_v16, %v5699_v63  ;;  %v7207_v34 = vadd.f32 1.0, %v14379_v20 }
 0x649   : > { %v3034_v15 = vmax.f32 %v14308_v12, 0.0  ;;  %v14387_v2 = vadd.f32 %v2528_v4, %v14371_v11  ;;  %v5697_v17 = vmul.f32 0.6931472, %v9405_v3  ;;  %v5779_v56 = vmul.f32 -0.5, %v14360_v21 }
 0x64a   : > { %v14389_v53 = vpop.eup %9406  ;;  %9418 = vpow2.f32 %v4150_v1  ;;  %v4168_v51 = vmul.f32 1.442695, %v3684_v26  ;;  %vm5702_vm9 = vcmp.lt.f32.partialorder %v5701_v50, 0.0004427343  ;;  %v14394_v6 = vadd.f32 %v2417_v22, %v13219_v13 }
 0x64b   : > { %v9409_v55 = vpop.eup %9408  ;;  %9420 = vlog2.f32 %v7207_v34  ;;  %v5785_v16 = vadd.f32 1.0, %v14389_v53  ;;  %v5703_v61 = vsel %vm5702_vm9, %v5700_v62, %v5697_v17  ;;  %v7203_v28 = vmul.f32 %v14321_v18, %v7202_v27 }
 0x64c   : > { %v7200_v30 = vmul.f32 0.6931472, %v9409_v55  ;;  %vm7205_vm10 = vcmp.lt.f32.partialorder %v7204_v48, 0.0004427343  ;;  %v7495_v57 = vadd.f32 %v5703_v61, %v3015_v58  ;;  %v3193_v0 = vmax.f32 %v14329_v10, 0.0 }
 0x64d   : > { %9422 = vlog2.f32 %v5785_v16  ;;  %v3206_v45 = vand.u32 2147483647, %v14387_v2  ;;  %v5780_v19 = vadd.f32 1.0, %v5779_v56  ;;  %v5782_v24 = vand.u32 2147483647, %v14360_v21 }
 0x64e   : > { %v7206_v63 = vsel %vm7205_vm10, %v7203_v28, %v7200_v30  ;;  %9424 = vpow2.f32 %v4168_v51  ;;  %v14402_v14 = vpop.eup %9410  ;;  %7815 = vst [vmem:[%s11350_s2 + $0x438] sm:$0xff] %v7495_v57  ;;  %v3365_v40 = vand.u32 2147483647, %v14394_v6  ;;  %v1495_v58 = vsub.s32 7, %v17824_v37 }
 0x64f   : > { %v7662_v18 = vadd.f32 %v7206_v63, %v3182_v5  ;;  %v3526_v9 = vsub.f32 0.0, %v3206_v45  ;;  %v7210_v59 = vmul.f32 -0.5, %v14379_v20  ;;  %v5788_v35 = vmul.f32 -0.5, %v14389_v53 }
 0x650   : > { %v7288_v60 = vadd.f32 1.0, %v14402_v14  ;;  %v3035_v49 = vmax.f32 %v14347_v7, 0.0  ;;  %v3044_v33 = vmax.f32 %v14350_v46, 0.0  ;;  %v3685_v54 = vsub.f32 0.0, %v3365_v40 }
 0x651   : > { %7982 = vst [vmem:[%s11350_s2 + $0x970] sm:$0xff] %v7662_v18  ;;  %v3852_v44 = vmul.f32 1.442695, %v3526_v9  ;;  %v14415_v5 = vrot.slane %v10074_v39, %v1495_v58  ;;  %v5781_v42 = vmul.f32 %v14360_v21, %v5780_v19  ;;  %vm14418_vm11 = vcmp.lt.f32.partialorder %v5782_v24, 0.0004427343  ;;  %v2419_v39 = vpop.f32.mrf.mxu1  ;;  %v2532_v9 = vpop.f32.mrf.mxu0 }
 0x652   : > { %9426 = vlog2.f32 %v7288_v60  ;;  %v3045_v38 = vmax.f32 %v14394_v6, 0.0  ;;  %v14423_v4 = vpop.eup %9412  ;;  %v7213_v50 = vand.u32 2147483647, %v14379_v20  ;;  %v4170_v26 = vmul.f32 1.442695, %v3685_v54 }
 0x653   : > { %9428 = vpow2.f32 %v3852_v44  ;;  %v14427_v27 = vadd.f32 %v2530_v43, %v14415_v5  ;;  %v7211_v1 = vadd.f32 1.0, %v7210_v59  ;;  %v5789_v21 = vadd.f32 1.0, %v5788_v35 }
 0x654   : > { %v9415_v48 = vpop.eup %9414  ;;  %v5791_v22 = vand.u32 2147483647, %v14389_v53  ;;  %v5866_v3 = vadd.f32 1.0, %v14423_v4  ;;  %v7291_v17 = vmul.f32 -0.5, %v14402_v14  ;;  %9430 = vpow2.f32 %v4170_v26 }
 0x655   : > { %v14431_v62 = vpop.eup %9416  ;;  %v5778_v34 = vmul.f32 0.6931472, %v9415_v48  ;;  %v3207_v56 = vand.u32 2147483647, %v14427_v27  ;;  %v2886_v55 = vmax.f32 %v14387_v2, 0.0  ;;  %v14438_v16 = vadd.f32 %v2419_v39, %v13133_v8  ;;  %v2421_v48 = vpop.f32.mrf.mxu1 }
 0x656   : > { %9432 = vlog2.f32 %v5866_v3  ;;  %v7297_v51 = vadd.f32 1.0, %v14431_v62  ;;  %vm14444_vm12 = vcmp.lt.f32.partialorder %v7213_v50, 0.0004427343  ;;  %v7294_v57 = vand.u32 2147483647, %v14402_v14 }
 0x657   : > { %v14440_v61 = vpop.eup %9418  ;;  %v5784_v30 = vsel %vm14418_vm11, %v5781_v42, %v5778_v34  ;;  %v3527_v45 = vsub.f32 0.0, %v3207_v56  ;;  %v7212_v24 = vmul.f32 %v14379_v20, %v7211_v1  ;;  %v5790_v58 = vmul.f32 %v14389_v53, %v5789_v21  ;;  %v2425_v54 = vpop.f32.mrf.mxu1 }
 0x658   : > { %v9421_v63 = vpop.eup %9420  ;;  %v7504_v19 = vadd.f32 %v5784_v30, %v3024_v41  ;;  %9434 = vlog2.f32 %v7297_v51  ;;  %v5875_v18 = vadd.f32 1.0, %v14440_v61  ;;  %vm14454_vm13 = vcmp.lt.f32.partialorder %v5791_v22, 0.0004427343 }
 0x659   : > { %v7209_v40 = vmul.f32 0.6931472, %v9421_v63  ;;  %v7292_v35 = vadd.f32 1.0, %v7291_v17  ;;  %v5869_v43 = vmul.f32 -0.5, %v14423_v4  ;;  %v3854_v29 = vmul.f32 1.442695, %v3527_v45 }
 0x65a   : > { %v9423_v60 = vpop.eup %9422  ;;  %7824 = vst [vmem:[%s11350_s2 + $0x480] sm:$0xff] %v7504_v19  ;;  %9436 = vlog2.f32 %v5875_v18  ;;  %v3374_v41 = vand.u32 2147483647, %v14438_v16  ;;  %vm14465_vm14 = vcmp.lt.f32.partialorder %v7294_v57, 0.0004427343  ;;  %v14470_v42 = vadd.f32 %v2532_v9, %v14371_v11  ;;  %v2534_v9 = vpop.f32.mrf.mxu0 }
 0x65b   : > { %v14461_v20 = vpop.eup %9424  ;;  %v7215_v44 = vsel %vm14444_vm12, %v7212_v24, %v7209_v40  ;;  %v5787_v53 = vmul.f32 0.6931472, %v9423_v60  ;;  %v5872_v50 = vand.u32 2147483647, %v14423_v4  ;;  %v3054_v39 = vmax.f32 %v14438_v16, 0.0 }
 0x65c   : > { %v7663_v47 = vadd.f32 %v7215_v44, %v3183_v32  ;;  %v5956_v26 = vadd.f32 1.0, %v14461_v20  ;;  %v7300_v21 = vmul.f32 -0.5, %v14431_v62  ;;  %v5878_v22 = vmul.f32 -0.5, %v14440_v61 }
 0x65d   : > { %v5793_v1 = vsel %vm14454_vm13, %v5790_v58, %v5787_v53  ;;  %9438 = vpow2.f32 %v3854_v29  ;;  %v5870_v32 = vadd.f32 1.0, %v5869_v43  ;;  %v3694_v3 = vsub.f32 0.0, %v3374_v41 }
 0x65e   : > { %7983 = vst [vmem:[%s11350_s2 + $0x978] sm:$0xff] %v7663_v47  ;;  %v7505_v23 = vadd.f32 %v5793_v1, %v3025_v31  ;;  %9440 = vlog2.f32 %v5956_v26  ;;  %v7303_v17 = vand.u32 2147483647, %v14431_v62  ;;  %v2887_v56 = vmax.f32 %v14427_v27, 0.0 }
 0x65f   : > { %v9427_v34 = vpop.eup %9426  ;;  %v3216_v51 = vand.u32 2147483647, %v14470_v42  ;;  %v14488_v30 = vadd.f32 %v2421_v48, %v13219_v13  ;;  %v7293_v25 = vmul.f32 %v14402_v14, %v7292_v35  ;;  %vm14494_vm15 = vcmp.lt.f32.partialorder %v5872_v50, 0.0004427343 }
 0x660   : > { %v14490_v28 = vpop.eup %9428  ;;  %7825 = vst [vmem:[%s11350_s2 + $0x488] sm:$0xff] %v7505_v23  ;;  %v7290_v57 = vmul.f32 0.6931472, %v9427_v34  ;;  %v4188_v45 = vmul.f32 1.442695, %v3694_v3  ;;  %v7301_v63 = vadd.f32 1.0, %v7300_v21  ;;  %v5871_v59 = vmul.f32 %v14423_v4, %v5870_v32 }
 0x661   : > { %v5879_v19 = vadd.f32 1.0, %v5878_v22  ;;  %v4534_v24 = vadd.f32 1.0, %v14490_v28  ;;  %v3536_v18 = vsub.f32 0.0, %v3216_v51  ;;  %v14499_v40 = vpop.eup %9430  ;;  %v3375_v14 = vand.u32 2147483647, %v14488_v30 }
 0x662   : > { %v7296_v58 = vsel %vm14465_vm14, %v7293_v25, %v7290_v57  ;;  %9442 = vpow2.f32 %v4188_v45  ;;  %vm14507_vm0 = vcmp.lt.f32.partialorder %v7303_v17, 0.0004427343  ;;  %v5959_v29 = vmul.f32 -0.5, %v14461_v20  ;;  %v2427_v57 = vpop.f32.mrf.mxu1 }
 0x663   : > { %v9433_v35 = vpop.eup %9432  ;;  %v7672_v60 = vadd.f32 %v7296_v58, %v3192_v52  ;;  %9444 = vlog2.f32 %v4534_v24  ;;  %v5881_v44 = vand.u32 2147483647, %v14440_v61  ;;  %v5965_v53 = vadd.f32 1.0, %v14499_v40 }
 0x664   : > { %v5868_v41 = vmul.f32 0.6931472, %v9433_v35  ;;  %v14515_v4 = vadd.f32 %v2534_v9, %v14415_v5  ;;  %v7302_v36 = vmul.f32 %v14431_v62, %v7301_v63  ;;  %v5880_v52 = vmul.f32 %v14440_v61, %v5879_v19  ;;  %v2538_v62 = vpop.f32.mrf.mxu0 }
 0x665   : > { %v9435_v47 = vpop.eup %9434  ;;  %7992 = vst [vmem:[%s11350_s2 + $0x9c0] sm:$0xff] %v7672_v60  ;;  %v3872_v50 = vmul.f32 1.442695, %v3536_v18  ;;  %v3695_v26 = vsub.f32 0.0, %v3375_v14  ;;  %v5962_v21 = vand.u32 2147483647, %v14461_v20  ;;  %9446 = vlog2.f32 %v5965_v53 }
 0x666   : > { %v5874_v48 = vsel %vm14494_vm15, %v5871_v59, %v5868_v41  ;;  %v7299_v1 = vmul.f32 0.6931472, %v9435_v47  ;;  %v5960_v32 = vadd.f32 1.0, %v5959_v29  ;;  %v4537_v17 = vmul.f32 -0.5, %v14490_v28  ;;  %v2540_v60 = vpop.f32.mrf.mxu0 }
 0x667   : > { %v9437_v22 = vpop.eup %9436  ;;  %v7514_v23 = vadd.f32 %v5874_v48, %v3034_v15  ;;  %9448 = vpow2.f32 %v3872_v50  ;;  %v4190_v3 = vmul.f32 1.442695, %v3695_v26  ;;  %v3217_v51 = vand.u32 2147483647, %v14515_v4 }
 0x668   : > { %v7305_v61 = vsel %vm14507_vm0, %v7302_v36, %v7299_v1  ;;  %v5877_v34 = vmul.f32 0.6931472, %v9437_v22  ;;  %vm5882_vm1 = vcmp.lt.f32.partialorder %v5881_v44, 0.0004427343  ;;  %v14533_v12 = vadd.f32 %v2425_v54, %v13133_v8 }
 0x669   : > { %7834 = vst [vmem:[%s11350_s2 + $0x4d0] sm:$0xff] %v7514_v23  ;;  %v7673_v25 = vadd.f32 %v7305_v61, %v3193_v0  ;;  %9450 = vpow2.f32 %v4190_v3  ;;  %vm14537_vm2 = vcmp.lt.f32.partialorder %v5962_v21, 0.0004427343  ;;  %v3537_v63 = vsub.f32 0.0, %v3217_v51 }
 0x66a   : > { %v14535_v15 = vpop.eup %9438  ;;  %v5883_v31 = vsel %vm5882_vm1, %v5880_v52, %v5877_v34  ;;  %v14542_v19 = vadd.f32 %v2538_v62, %v14371_v11  ;;  %v5961_v0 = vmul.f32 %v14461_v20, %v5960_v32  ;;  %v14550_v9 = vadd.f32 %v2427_v57, %v13219_v13  ;;  %v2429_v34 = vpop.f32.mrf.mxu1 }
 0x66b   : > { %v9441_v24 = vpop.eup %9440  ;;  %7993 = vst [vmem:[%s11350_s2 + $0x9c8] sm:$0xff] %v7673_v25  ;;  %v7515_v10 = vadd.f32 %v5883_v31, %v3035_v49  ;;  %v4543_v18 = vadd.f32 1.0, %v14535_v15  ;;  %v4538_v59 = vadd.f32 1.0, %v4537_v17  ;;  %v5968_v14 = vmul.f32 -0.5, %v14499_v40  ;;  %v2542_v17 = vpop.f32.mrf.mxu0 }
 0x66c   : > { %v5958_v58 = vmul.f32 0.6931472, %v9441_v24  ;;  %v3874_v35 = vmul.f32 1.442695, %v3537_v63  ;;  %v4540_v43 = vand.u32 2147483647, %v14490_v28  ;;  %v14567_v36 = vadd.f32 %v2540_v60, %v14415_v5 }
 0x66d   : > { %7835 = vst [vmem:[%s11350_s2 + $0x4d8] sm:$0xff] %v7515_v10  ;;  %9452 = vlog2.f32 %v4543_v18  ;;  %v2896_v7 = vmax.f32 %v14470_v42, 0.0  ;;  %v3384_v49 = vand.u32 2147483647, %v14533_v12  ;;  %v5971_v29 = vand.u32 2147483647, %v14499_v40 }
 0x66e   : > { %v5964_v20 = vsel %vm14537_vm2, %v5961_v0, %v5958_v58  ;;  %9454 = vpow2.f32 %v3874_v35  ;;  %v3226_v41 = vand.u32 2147483647, %v14542_v19  ;;  %v3385_v47 = vand.u32 2147483647, %v14550_v9 }
 0x66f   : > { %v14561_v44 = vpop.eup %9442  ;;  %v7524_v53 = vadd.f32 %v5964_v20, %v3044_v33  ;;  %v3704_v54 = vsub.f32 0.0, %v3384_v49  ;;  %v4539_v50 = vmul.f32 %v14490_v28, %v4538_v59  ;;  %v5969_v26 = vadd.f32 1.0, %v5968_v14 }
 0x670   : > { %v9445_v52 = vpop.eup %9444  ;;  %v6046_v48 = vadd.f32 1.0, %v14561_v44  ;;  %v3546_v1 = vsub.f32 0.0, %v3226_v41  ;;  %v4546_v22 = vmul.f32 -0.5, %v14535_v15  ;;  %v3705_v46 = vsub.f32 0.0, %v3385_v47 }
 0x671   : > { %7844 = vst [vmem:[%s11350_s2 + $0x520] sm:$0xff] %v7524_v53  ;;  %v4536_v21 = vmul.f32 0.6931472, %v9445_v52  ;;  %v4208_v23 = vmul.f32 1.442695, %v3704_v54  ;;  %v5970_v31 = vmul.f32 %v14499_v40, %v5969_v26  ;;  %v14591_v2 = vadd.f32 %v2429_v34, %v13133_v8 }
 0x672   : > { %vm4541_vm3 = vcmp.lt.f32.partialorder %v4540_v43, 0.0004427343  ;;  %vm14573_vm4 = vcmp.lt.f32.partialorder %v5971_v29, 0.0004427343  ;;  %9456 = vlog2.f32 %v6046_v48  ;;  %v3892_v32 = vmul.f32 1.442695, %v3546_v1  ;;  %v9447_v3 = vpop.eup %9446  ;;  %v2431_v48 = vpop.f32.mrf.mxu1 }
 0x673   : > { %v4542_v62 = vsel %vm4541_vm3, %v4539_v50, %v4536_v21  ;;  %9458 = vpow2.f32 %v4208_v23  ;;  %v4210_v28 = vmul.f32 1.442695, %v3705_v46  ;;  %v3227_v61 = vand.u32 2147483647, %v14567_v36 }
 0x674   : > { %v14578_v51 = vpop.eup %9448  ;;  %v7366_v57 = vadd.f32 %v4542_v62, %v2886_v55  ;;  %v5967_v25 = vmul.f32 0.6931472, %v9447_v3  ;;  %9460 = vpow2.f32 %v3892_v32  ;;  %v4547_v45 = vadd.f32 1.0, %v4546_v22 }
 0x675   : > { %v4549_v63 = vand.u32 2147483647, %v14535_v15  ;;  %v4624_v24 = vadd.f32 1.0, %v14578_v51  ;;  %9462 = vpow2.f32 %v4210_v28  ;;  %v3547_v18 = vsub.f32 0.0, %v3227_v61 }
 0x676   : > { %v14585_v10 = vpop.eup %9450  ;;  %7686 = vst [vmem:[%s11350_s2 + $0x30] sm:$0xff] %v7366_v57  ;;  %v5973_v0 = vsel %vm14573_vm4, %v5970_v31, %v5967_v25  ;;  %v14594_v55 = vadd.f32 %v2542_v17, %v14371_v11  ;;  %v3055_v58 = vmax.f32 %v14488_v30, 0.0  ;;  %v2897_v59 = vmax.f32 %v14515_v4, 0.0 }
 0x677   : > { %v7525_v40 = vadd.f32 %v5973_v0, %v3045_v38  ;;  %9464 = vlog2.f32 %v4624_v24  ;;  %v6049_v14 = vmul.f32 -0.5, %v14561_v44  ;;  %v4627_v35 = vmul.f32 -0.5, %v14578_v51 }
 0x678   : > { %v6055_v60 = vadd.f32 1.0, %v14585_v10  ;;  %v3894_v43 = vmul.f32 1.442695, %v3547_v18  ;;  %vm14604_vm5 = vcmp.lt.f32.partialorder %v4549_v63, 0.0004427343  ;;  %v3064_v6 = vmax.f32 %v14533_v12, 0.0  ;;  %v2544_v63 = vpop.f32.mrf.mxu0 }
 0x679   : > { %7845 = vst [vmem:[%s11350_s2 + $0x528] sm:$0xff] %v7525_v40  ;;  %v2906_v38 = vmax.f32 %v14542_v19, 0.0  ;;  %v3394_v20 = vand.u32 2147483647, %v14591_v2  ;;  %v4548_v41 = vmul.f32 %v14535_v15, %v4547_v45  ;;  %v3065_v53 = vmax.f32 %v14550_v9, 0.0 }
 0x67a   : > { %v9453_v29 = vpop.eup %9452  ;;  %9466 = vlog2.f32 %v6055_v60  ;;  %v3236_v54 = vand.u32 2147483647, %v14594_v55  ;;  %v6052_v50 = vand.u32 2147483647, %v14561_v44  ;;  %v6050_v1 = vadd.f32 1.0, %v6049_v14 }
 0x67b   : > { %v14614_v47 = vpop.eup %9454  ;;  %v4545_v52 = vmul.f32 0.6931472, %v9453_v29  ;;  %9468 = vpow2.f32 %v3894_v43  ;;  %v3714_v26 = vsub.f32 0.0, %v3394_v20  ;;  %v4628_v21 = vadd.f32 1.0, %v4627_v35  ;;  %v2435_v29 = vpop.f32.mrf.mxu1 }
 0x67c   : > { %v4630_v22 = vand.u32 2147483647, %v14578_v51  ;;  %v4633_v15 = vadd.f32 1.0, %v14614_v47  ;;  %v6058_v46 = vmul.f32 -0.5, %v14585_v10  ;;  %v3556_v32 = vsub.f32 0.0, %v3236_v54 }
 0x67d   : > { %v4551_v23 = vsel %vm14604_vm5, %v4548_v41, %v4545_v52  ;;  %v4228_v33 = vmul.f32 1.442695, %v3714_v26  ;;  %v2907_v62 = vmax.f32 %v14567_v36, 0.0  ;;  %v14626_v28 = vadd.f32 %v2431_v48, %v13219_v13  ;;  %v2437_v16 = vpop.f32.mrf.mxu1 }
 0x67e   : > { %v7367_v3 = vadd.f32 %v4551_v23, %v2887_v56  ;;  %9470 = vlog2.f32 %v4633_v15  ;;  %vm14628_vm6 = vcmp.lt.f32.partialorder %v6052_v50, 0.0004427343  ;;  %v4636_v17 = vmul.f32 -0.5, %v14614_v47  ;;  %v2548_v15 = vpop.f32.mrf.mxu0 }
 0x67f   : > { %v9457_v61 = vpop.eup %9456  ;;  %9472 = vpow2.f32 %v4228_v33  ;;  %v3912_v57 = vmul.f32 1.442695, %v3556_v32  ;;  %v6051_v56 = vmul.f32 %v14561_v44, %v6050_v1  ;;  %vm14637_vm7 = vcmp.lt.f32.partialorder %v4630_v22, 0.0004427343 }
 0x680   : > { %v14633_v25 = vpop.eup %9458  ;;  %7687 = vst [vmem:[%s11350_s2 + $0x38] sm:$0xff] %v7367_v3  ;;  %v6048_v27 = vmul.f32 0.6931472, %v9457_v61  ;;  %v6061_v45 = vand.u32 2147483647, %v14585_v10  ;;  %v4629_v0 = vmul.f32 %v14578_v51, %v4628_v21  ;;  %v6059_v18 = vadd.f32 1.0, %v6058_v46 }
 0x681   : > { %v14642_v24 = vpop.eup %9460  ;;  %v6136_v40 = vadd.f32 1.0, %v14633_v25  ;;  %9474 = vpow2.f32 %v3912_v57  ;;  %v4639_v35 = vand.u32 2147483647, %v14614_v47  ;;  %v3395_v43 = vand.u32 2147483647, %v14626_v28 }
 0x682   : > { %v14646_v14 = vpop.eup %9462  ;;  %v6054_v44 = vsel %vm14628_vm6, %v6051_v56, %v6048_v27  ;;  %v4714_v60 = vadd.f32 1.0, %v14642_v24  ;;  %v4637_v51 = vadd.f32 1.0, %v4636_v17  ;;  %v14656_v20 = vadd.f32 %v2544_v63, %v14415_v5 }
 0x683   : > { %v7534_v49 = vadd.f32 %v6054_v44, %v3054_v39  ;;  %9476 = vlog2.f32 %v6136_v40  ;;  %v6145_v54 = vadd.f32 1.0, %v14646_v14  ;;  %v3074_v52 = vmax.f32 %v14591_v2, 0.0 }
 0x684   : > { %v9465_v41 = vpop.eup %9464  ;;  %9478 = vlog2.f32 %v4714_v60  ;;  %v2916_v50 = vmax.f32 %v14594_v55, 0.0  ;;  %v6060_v48 = vmul.f32 %v14585_v10, %v6059_v18  ;;  %vm14663_vm8 = vcmp.lt.f32.partialorder %v6061_v45, 0.0004427343 }
 0x685   : > { %7854 = vst [vmem:[%s11350_s2 + $0x570] sm:$0xff] %v7534_v49  ;;  %v4626_v26 = vmul.f32 0.6931472, %v9465_v41  ;;  %v3075_v39 = vmax.f32 %v14626_v28, 0.0  ;;  %vm14668_vm9 = vcmp.lt.f32.partialorder %v4639_v35, 0.0004427343  ;;  %9480 = vlog2.f32 %v6145_v54 }
 0x686   : > { %v3715_v21 = vsub.f32 0.0, %v3395_v43  ;;  %v14673_v22 = vadd.f32 %v2435_v29, %v13133_v8  ;;  %v4638_v46 = vmul.f32 %v14614_v47, %v4637_v51  ;;  %v6139_v33 = vmul.f32 -0.5, %v14633_v25 }
 0x687   : > { %v9467_v23 = vpop.eup %9466  ;;  %v4632_v10 = vsel %vm14637_vm7, %v4629_v0, %v4626_v26  ;;  %v3237_v32 = vand.u32 2147483647, %v14656_v20  ;;  %v4717_v17 = vmul.f32 -0.5, %v14642_v24  ;;  %v6142_v27 = vand.u32 2147483647, %v14633_v25 }
 0x688   : > { %v14680_v3 = vpop.eup %9468  ;;  %v7376_v61 = vadd.f32 %v4632_v10, %v2896_v7  ;;  %v6057_v34 = vmul.f32 0.6931472, %v9467_v23  ;;  %v4230_v57 = vmul.f32 1.442695, %v3715_v21  ;;  %v6148_v56 = vmul.f32 -0.5, %v14646_v14 }
 0x689   : > { %v4723_v31 = vadd.f32 1.0, %v14680_v3  ;;  %v14689_v47 = vadd.f32 %v2548_v15, %v14371_v11  ;;  %v3557_v42 = vsub.f32 0.0, %v3237_v32  ;;  %v3404_v7 = vand.u32 2147483647, %v14673_v22 }
 0x68a   : > { %7696 = vst [vmem:[%s11350_s2 + $0x80] sm:$0xff] %v7376_v61  ;;  %v6063_v45 = vsel %vm14663_vm8, %v6060_v48, %v6057_v34  ;;  %9482 = vpow2.f32 %v4230_v57  ;;  %v6140_v18 = vadd.f32 1.0, %v6139_v33  ;;  %v4720_v40 = vand.u32 2147483647, %v14642_v24 }
 0x68b   : > { %v9471_v63 = vpop.eup %9470  ;;  %v7535_v0 = vadd.f32 %v6063_v45, %v3055_v58  ;;  %9484 = vlog2.f32 %v4723_v31  ;;  %v4718_v60 = vadd.f32 1.0, %v4717_v17  ;;  %v3914_v43 = vmul.f32 1.442695, %v3557_v42  ;;  %v2550_v17 = vpop.f32.mrf.mxu0 }
 0x68c   : > { %v14698_v44 = vpop.eup %9472  ;;  %v4635_v35 = vmul.f32 0.6931472, %v9471_v63  ;;  %v3724_v49 = vsub.f32 0.0, %v3404_v7  ;;  %vm14701_vm10 = vcmp.lt.f32.partialorder %v6142_v27, 0.0004427343  ;;  %v6149_v29 = vadd.f32 1.0, %v6148_v56  ;;  %v2439_v7 = vpop.f32.mrf.mxu1 }
 0x68d   : > { %7855 = vst [vmem:[%s11350_s2 + $0x578] sm:$0xff] %v7535_v0  ;;  %v6151_v41 = vand.u32 2147483647, %v14646_v14  ;;  %v6226_v30 = vadd.f32 1.0, %v14698_v44  ;;  %9486 = vpow2.f32 %v3914_v43  ;;  %v3246_v48 = vand.u32 2147483647, %v14689_v47  ;;  %v2552_v43 = vpop.f32.mrf.mxu0 }
 0x68e   : > { %v14707_v58 = vpop.eup %9474  ;;  %v4641_v54 = vsel %vm14668_vm9, %v4638_v46, %v4635_v35  ;;  %v4248_v26 = vmul.f32 1.442695, %v3724_v49  ;;  %vm14714_vm11 = vcmp.lt.f32.partialorder %v4720_v40, 0.0004427343  ;;  %v4726_v23 = vmul.f32 -0.5, %v14680_v3 }
 0x68f   : > { %v7377_v21 = vadd.f32 %v4641_v54, %v2897_v59  ;;  %9488 = vlog2.f32 %v6226_v30  ;;  %v6141_v1 = vmul.f32 %v14633_v25, %v6140_v18  ;;  %v4719_v46 = vmul.f32 %v14642_v24, %v4718_v60 }
 0x690   : > { %v9477_v10 = vpop.eup %9476  ;;  %v4804_v33 = vadd.f32 1.0, %v14707_v58  ;;  %9490 = vpow2.f32 %v4248_v26  ;;  %v2917_v4 = vmax.f32 %v14656_v20, 0.0  ;;  %v3566_v59 = vsub.f32 0.0, %v3246_v48 }
 0x691   : > { %v9479_v32 = vpop.eup %9478  ;;  %7697 = vst [vmem:[%s11350_s2 + $0x88] sm:$0xff] %v7377_v21  ;;  %v6138_v61 = vmul.f32 0.6931472, %v9477_v10  ;;  %v14725_v34 = vadd.f32 %v2437_v16, %v13219_v13  ;;  %v6150_v27 = vmul.f32 %v14646_v14, %v6149_v29  ;;  %vm14728_vm12 = vcmp.lt.f32.partialorder %v6151_v41, 0.0004427343 }
 0x692   : > { %v4716_v57 = vmul.f32 0.6931472, %v9479_v32  ;;  %9492 = vlog2.f32 %v4804_v33  ;;  %v9481_v24 = vpop.eup %9480  ;;  %v4727_v31 = vadd.f32 1.0, %v4726_v23  ;;  %v3932_v45 = vmul.f32 1.442695, %v3566_v59 }
 0x693   : > { %v6144_v56 = vsel %vm14701_vm10, %v6141_v1, %v6138_v61  ;;  %v3405_v42 = vand.u32 2147483647, %v14725_v34  ;;  %v6147_v0 = vmul.f32 0.6931472, %v9481_v24  ;;  %v6229_v18 = vmul.f32 -0.5, %v14698_v44  ;;  %v2441_v61 = vpop.f32.mrf.mxu1 }
 0x694   : > { %v7544_v63 = vadd.f32 %v6144_v56, %v3064_v6  ;;  %v4722_v14 = vsel %vm14714_vm11, %v4719_v46, %v4716_v57  ;;  %9494 = vpow2.f32 %v3932_v45  ;;  %v14743_v60 = vadd.f32 %v2550_v17, %v14415_v5 }
 0x695   : > { %v7386_v40 = vadd.f32 %v4722_v14, %v2906_v38  ;;  %v3725_v35 = vsub.f32 0.0, %v3405_v42  ;;  %v6153_v12 = vsel %vm14728_vm12, %v6150_v27, %v6147_v0  ;;  %v4729_v6 = vand.u32 2147483647, %v14680_v3  ;;  %v2554_v14 = vpop.f32.mrf.mxu0  ;;  %v2445_v0 = vpop.f32.mrf.mxu1 }
 0x696   : > { %7864 = vst [vmem:[%s11350_s2 + $0x5c0] sm:$0xff] %v7544_v63  ;;  %v3084_v49 = vmax.f32 %v14673_v22, 0.0  ;;  %v14751_v51 = vadd.f32 %v2439_v7, %v13133_v8  ;;  %v7545_v38 = vadd.f32 %v6153_v12, %v3065_v53  ;;  %v4728_v29 = vmul.f32 %v14680_v3, %v4727_v31 }
 0x697   : > { %v14753_v19 = vpop.eup %9482  ;;  %7706 = vst [vmem:[%s11350_s2 + $0xd0] sm:$0xff] %v7386_v40  ;;  %v4250_v41 = vmul.f32 1.442695, %v3725_v35  ;;  %v3247_v30 = vand.u32 2147483647, %v14743_v60  ;;  %v6230_v26 = vadd.f32 1.0, %v6229_v18  ;;  %v14763_v21 = vadd.f32 %v2552_v43, %v14371_v11 }
 0x698   : > { %v9485_v54 = vpop.eup %9484  ;;  %v4807_v48 = vmul.f32 -0.5, %v14707_v58  ;;  %v6235_v16 = vadd.f32 1.0, %v14753_v19  ;;  %7865 = vst [vmem:[%s11350_s2 + $0x5c8] sm:$0xff] %v7545_v38  ;;  %v3414_v9 = vand.u32 2147483647, %v14751_v51  ;;  %v2926_v3 = vmax.f32 %v14689_v47, 0.0 }
 0x699   : > { %v4725_v15 = vmul.f32 0.6931472, %v9485_v54  ;;  %9496 = vpow2.f32 %v4250_v41  ;;  %v3567_v23 = vsub.f32 0.0, %v3247_v30  ;;  %vm4730_vm13 = vcmp.lt.f32.partialorder %v4729_v6, 0.0004427343 }
 0x69a   : > { %v6232_v53 = vand.u32 2147483647, %v14698_v44  ;;  %9498 = vlog2.f32 %v6235_v16  ;;  %v14769_v10 = vpop.eup %9486  ;;  %v4810_v46 = vand.u32 2147483647, %v14707_v58  ;;  %v3734_v32 = vsub.f32 0.0, %v3414_v9 }
 0x69b   : > { %v4731_v1 = vsel %vm4730_vm13, %v4728_v29, %v4725_v15  ;;  %v3934_v33 = vmul.f32 1.442695, %v3567_v23  ;;  %v6231_v57 = vmul.f32 %v14698_v44, %v6230_v26  ;;  %v4808_v27 = vadd.f32 1.0, %v4807_v48 }
 0x69c   : > { %v9489_v59 = vpop.eup %9488  ;;  %v7387_v17 = vadd.f32 %v4731_v1, %v2907_v62  ;;  %v4813_v25 = vadd.f32 1.0, %v14769_v10  ;;  %v4268_v31 = vmul.f32 1.442695, %v3734_v32  ;;  %v3256_v45 = vand.u32 2147483647, %v14763_v21 }
 0x69d   : > { %v14776_v24 = vpop.eup %9490  ;;  %v6228_v56 = vmul.f32 0.6931472, %v9489_v59  ;;  %9500 = vpow2.f32 %v3934_v33  ;;  %vm6233_vm14 = vcmp.lt.f32.partialorder %v6232_v53, 0.0004427343  ;;  %v14782_v36 = vadd.f32 %v2441_v61, %v13219_v13 }
 0x69e   : > { %7707 = vst [vmem:[%s11350_s2 + $0xd8] sm:$0xff] %v7387_v17  ;;  %9502 = vlog2.f32 %v4813_v25  ;;  %v6316_v42 = vadd.f32 1.0, %v14776_v24  ;;  %vm14784_vm15 = vcmp.lt.f32.partialorder %v4810_v46, 0.0004427343  ;;  %v6238_v63 = vmul.f32 -0.5, %v14753_v19 }
 0x69f   : > { %v9493_v62 = vpop.eup %9492  ;;  %v6234_v44 = vsel %vm6233_vm14, %v6231_v57, %v6228_v56  ;;  %9504 = vpow2.f32 %v4268_v31  ;;  %v4809_v35 = vmul.f32 %v14707_v58, %v4808_v27  ;;  %v6241_v43 = vand.u32 2147483647, %v14753_v19 }
 0x6a0   : > { %v7554_v18 = vadd.f32 %v6234_v44, %v3074_v52  ;;  %v4806_v40 = vmul.f32 0.6931472, %v9493_v62  ;;  %9506 = vlog2.f32 %v6316_v42  ;;  %v4816_v12 = vmul.f32 -0.5, %v14769_v10  ;;  %v2558_v62 = vpop.f32.mrf.mxu0 }
 0x6a1   : > { %v3085_v6 = vmax.f32 %v14725_v34, 0.0  ;;  %v3576_v38 = vsub.f32 0.0, %v3256_v45  ;;  %v14795_v29 = vpop.eup %9494  ;;  %v3415_v2 = vand.u32 2147483647, %v14782_v36  ;;  %v14802_v52 = vadd.f32 %v2554_v14, %v14415_v5 }
 0x6a2   : > { %7874 = vst [vmem:[%s11350_s2 + $0x610] sm:$0xff] %v7554_v18  ;;  %v4812_v41 = vsel %vm14784_vm15, %v4809_v35, %v4806_v40  ;;  %v14805_v58 = vadd.f32 %v2445_v0, %v13133_v8  ;;  %v6239_v54 = vadd.f32 1.0, %v6238_v63  ;;  %v6319_v26 = vmul.f32 -0.5, %v14776_v24  ;;  %v2447_v0 = vpop.f32.mrf.mxu1 }
 0x6a3   : > { %v7396_v30 = vadd.f32 %v4812_v41, %v2916_v50  ;;  %v4894_v48 = vadd.f32 1.0, %v14795_v29  ;;  %v2927_v16 = vmax.f32 %v14743_v60, 0.0  ;;  %v3094_v15 = vmax.f32 %v14751_v51, 0.0 }
 0x6a4   : > { %v3952_v23 = vmul.f32 1.442695, %v3576_v38  ;;  %v3735_v9 = vsub.f32 0.0, %v3415_v2  ;;  %v4817_v53 = vadd.f32 1.0, %v4816_v12  ;;  %v4819_v1 = vand.u32 2147483647, %v14769_v10 }
 0x6a5   : > { %7716 = vst [vmem:[%s11350_s2 + $0x120] sm:$0xff] %v7396_v30  ;;  %9508 = vlog2.f32 %v4894_v48  ;;  %v3257_v46 = vand.u32 2147483647, %v14802_v52  ;;  %v6322_v50 = vand.u32 2147483647, %v14776_v24  ;;  %v6240_v59 = vmul.f32 %v14753_v19, %v6239_v54 }
 0x6a6   : > { %v14816_v55 = vpop.eup %9496  ;;  %9510 = vpow2.f32 %v3952_v23  ;;  %v4270_v33 = vmul.f32 1.442695, %v3735_v9  ;;  %v3424_v32 = vand.u32 2147483647, %v14805_v58  ;;  %vm14821_vm0 = vcmp.lt.f32.partialorder %v6241_v43, 0.0004427343 }
 0x6a7   : > { %v9499_v61 = vpop.eup %9498  ;;  %v6320_v57 = vadd.f32 1.0, %v6319_v26  ;;  %v6325_v27 = vadd.f32 1.0, %v14816_v55  ;;  %v3577_v56 = vsub.f32 0.0, %v3257_v46  ;;  %v4818_v45 = vmul.f32 %v14769_v10, %v4817_v53 }
 0x6a8   : > { %v6237_v25 = vmul.f32 0.6931472, %v9499_v61  ;;  %9512 = vpow2.f32 %v4270_v33  ;;  %v3744_v31 = vsub.f32 0.0, %v3424_v32  ;;  %vm14827_vm1 = vcmp.lt.f32.partialorder %v4819_v1, 0.0004427343 }
 0x6a9   : > { %9514 = vlog2.f32 %v6325_v27  ;;  %v2936_v19 = vmax.f32 %v14763_v21, 0.0  ;;  %vm14836_vm2 = vcmp.lt.f32.partialorder %v6322_v50, 0.0004427343  ;;  %v3095_v10 = vmax.f32 %v14782_v36, 0.0  ;;  %v2560_v50 = vpop.f32.mrf.mxu0 }
 0x6aa   : > { %v14832_v44 = vpop.eup %9500  ;;  %v6243_v7 = vsel %vm14821_vm0, %v6240_v59, %v6237_v25  ;;  %v3954_v14 = vmul.f32 1.442695, %v3577_v56  ;;  %v6321_v35 = vmul.f32 %v14776_v24, %v6320_v57  ;;  %v4897_v43 = vmul.f32 -0.5, %v14795_v29 }
 0x6ab   : > { %v9503_v18 = vpop.eup %9502  ;;  %v7555_v40 = vadd.f32 %v6243_v7, %v3075_v39  ;;  %v4903_v12 = vadd.f32 1.0, %v14832_v44  ;;  %v4288_v2 = vmul.f32 1.442695, %v3744_v31  ;;  %v14849_v30 = vadd.f32 %v2558_v62, %v14371_v11 }
 0x6ac   : > { %v14846_v38 = vpop.eup %9504  ;;  %v4815_v41 = vmul.f32 0.6931472, %v9503_v18  ;;  %9516 = vpow2.f32 %v3954_v14  ;;  %v6328_v26 = vmul.f32 -0.5, %v14816_v55  ;;  %v14855_v39 = vadd.f32 %v2447_v0, %v13219_v13 }
 0x6ad   : > { %v9507_v54 = vpop.eup %9506  ;;  %7875 = vst [vmem:[%s11350_s2 + $0x618] sm:$0xff] %v7555_v40  ;;  %9518 = vlog2.f32 %v4903_v12  ;;  %v6406_v28 = vadd.f32 1.0, %v14846_v38  ;;  %v4900_v23 = vand.u32 2147483647, %v14795_v29  ;;  %v2937_v9 = vmax.f32 %v14802_v52, 0.0 }
 0x6ae   : > { %v4821_v24 = vsel %vm14827_vm1, %v4818_v45, %v4815_v41  ;;  %v6318_v48 = vmul.f32 0.6931472, %v9507_v54  ;;  %v4898_v1 = vadd.f32 1.0, %v4897_v43  ;;  %v6331_v46 = vand.u32 2147483647, %v14816_v55  ;;  %v2449_v43 = vpop.f32.mrf.mxu1 }
 0x6af   : > { %v7397_v53 = vadd.f32 %v4821_v24, %v2917_v4  ;;  %9520 = vlog2.f32 %v6406_v28  ;;  %v4906_v32 = vmul.f32 -0.5, %v14832_v44  ;;  %v3266_v61 = vand.u32 2147483647, %v14849_v30 }
 0x6b0   : > { %v6324_v33 = vsel %vm14836_vm2, %v6321_v35, %v6318_v48  ;;  %9522 = vpow2.f32 %v4288_v2  ;;  %v6329_v20 = vadd.f32 1.0, %v6328_v26  ;;  %v3104_v4 = vmax.f32 %v14805_v58, 0.0  ;;  %v2562_v48 = vpop.f32.mrf.mxu0 }
 0x6b1   : > { %7717 = vst [vmem:[%s11350_s2 + $0x128] sm:$0xff] %v7397_v53  ;;  %v7564_v59 = vadd.f32 %v6324_v33, %v3084_v49  ;;  %v3425_v17 = vand.u32 2147483647, %v14855_v39  ;;  %v4909_v27 = vand.u32 2147483647, %v14832_v44  ;;  %v6409_v25 = vmul.f32 -0.5, %v14846_v38  ;;  %v2451_v33 = vpop.f32.mrf.mxu1 }
 0x6b2   : > { %v9509_v57 = vpop.eup %9508  ;;  %v3586_v56 = vsub.f32 0.0, %v3266_v61  ;;  %v14876_v31 = vadd.f32 %v2560_v50, %v14415_v5  ;;  %v4899_v22 = vmul.f32 %v14795_v29, %v4898_v1  ;;  %vm4901_vm3 = vcmp.lt.f32.partialorder %v4900_v23, 0.0004427343 }
 0x6b3   : > { %v14878_v45 = vpop.eup %9510  ;;  %7884 = vst [vmem:[%s11350_s2 + $0x660] sm:$0xff] %v7564_v59  ;;  %v4896_v42 = vmul.f32 0.6931472, %v9509_v57  ;;  %v3745_v49 = vsub.f32 0.0, %v3425_v17  ;;  %vm14882_vm4 = vcmp.lt.f32.partialorder %v6331_v46, 0.0004427343  ;;  %v6330_v40 = vmul.f32 %v14816_v55, %v6329_v20 }
 0x6b4   : > { %v4907_v7 = vadd.f32 1.0, %v4906_v32  ;;  %v4984_v63 = vadd.f32 1.0, %v14878_v45  ;;  %v3972_v14 = vmul.f32 1.442695, %v3586_v56  ;;  %v6412_v35 = vand.u32 2147483647, %v14846_v38 }
 0x6b5   : > { %v14887_v0 = vpop.eup %9512  ;;  %v4902_v18 = vsel %vm4901_vm3, %v4899_v22, %v4896_v42  ;;  %v3267_v29 = vand.u32 2147483647, %v14876_v31  ;;  %vm14894_vm5 = vcmp.lt.f32.partialorder %v4909_v27, 0.0004427343  ;;  %v6410_v54 = vadd.f32 1.0, %v6409_v25  ;;  %v2564_v25 = vpop.f32.mrf.mxu0 }
 0x6b6   : > { %v9515_v12 = vpop.eup %9514  ;;  %v7406_v41 = vadd.f32 %v4902_v18, %v2926_v3  ;;  %9524 = vlog2.f32 %v4984_v63  ;;  %v6415_v28 = vadd.f32 1.0, %v14887_v0  ;;  %v2946_v55 = vmax.f32 %v14849_v30, 0.0 }
 0x6b7   : > { %v6327_v26 = vmul.f32 0.6931472, %v9515_v12  ;;  %v4290_v24 = vmul.f32 1.442695, %v3745_v49  ;;  %v4908_v23 = vmul.f32 %v14832_v44, %v4907_v7  ;;  %9526 = vpow2.f32 %v3972_v14  ;;  %v2455_v12 = vpop.f32.mrf.mxu1  ;;  %v2568_v46 = vpop.f32.mrf.mxu0 }
 0x6b8   : > { %7726 = vst [vmem:[%s11350_s2 + $0x170] sm:$0xff] %v7406_v41  ;;  %v3587_v53 = vsub.f32 0.0, %v3267_v29  ;;  %v14903_v47 = vadd.f32 %v2449_v43, %v13133_v8  ;;  %vm14909_vm6 = vcmp.lt.f32.partialorder %v6412_v35, 0.0004427343  ;;  %v4987_v50 = vmul.f32 -0.5, %v14878_v45 }
 0x6b9   : > { %v14905_v3 = vpop.eup %9516  ;;  %v6333_v1 = vsel %vm14882_vm4, %v6330_v40, %v6327_v26  ;;  %9528 = vlog2.f32 %v6415_v28  ;;  %v6411_v61 = vmul.f32 %v14846_v38, %v6410_v54  ;;  %v3105_v20 = vmax.f32 %v14855_v39, 0.0 }
 0x6ba   : > { %v9519_v44 = vpop.eup %9518  ;;  %v7565_v32 = vadd.f32 %v6333_v1, %v3085_v6  ;;  %v4993_v59 = vadd.f32 1.0, %v14905_v3  ;;  %9530 = vpow2.f32 %v4290_v24  ;;  %v3974_v57 = vmul.f32 1.442695, %v3587_v53 }
 0x6bb   : > { %v4905_v17 = vmul.f32 0.6931472, %v9519_v44  ;;  %v14920_v27 = vadd.f32 %v2562_v48, %v14371_v11  ;;  %v4990_v42 = vand.u32 2147483647, %v14878_v45  ;;  %v3434_v34 = vand.u32 2147483647, %v14903_v47 }
 0x6bc   : > { %v9521_v56 = vpop.eup %9520  ;;  %7885 = vst [vmem:[%s11350_s2 + $0x668] sm:$0xff] %v7565_v32  ;;  %9532 = vlog2.f32 %v4993_v59  ;;  %v14926_v6 = vadd.f32 %v2451_v33, %v13219_v13  ;;  %v4988_v62 = vadd.f32 1.0, %v4987_v50  ;;  %v6418_v63 = vmul.f32 -0.5, %v14887_v0 }
 0x6bd   : > { %v14928_v38 = vpop.eup %9522  ;;  %v4911_v22 = vsel %vm14894_vm5, %v4908_v23, %v4905_v17  ;;  %v6408_v49 = vmul.f32 0.6931472, %v9521_v56  ;;  %9534 = vpow2.f32 %v3974_v57  ;;  %v14937_v18 = vadd.f32 %v2564_v25, %v14415_v5 }
 0x6be   : > { %v7407_v7 = vadd.f32 %v4911_v22, %v2927_v16  ;;  %v6496_v14 = vadd.f32 1.0, %v14928_v38  ;;  %v2947_v35 = vmax.f32 %v14876_v31, 0.0  ;;  %v3754_v29 = vsub.f32 0.0, %v3434_v34 }
 0x6bf   : > { %v6414_v40 = vsel %vm14909_vm6, %v6411_v61, %v6408_v49  ;;  %v3276_v43 = vand.u32 2147483647, %v14920_v27  ;;  %vm14946_vm7 = vcmp.lt.f32.partialorder %v4990_v42, 0.0004427343  ;;  %v4996_v41 = vmul.f32 -0.5, %v14905_v3 }
 0x6c0   : > { %7727 = vst [vmem:[%s11350_s2 + $0x178] sm:$0xff] %v7407_v7  ;;  %v7574_v60 = vadd.f32 %v6414_v40, %v3094_v15  ;;  %9536 = vlog2.f32 %v6496_v14  ;;  %v4989_v2 = vmul.f32 %v14878_v45, %v4988_v62  ;;  %v6421_v54 = vand.u32 2147483647, %v14887_v0 }
 0x6c1   : > { %v4308_v26 = vmul.f32 1.442695, %v3754_v29  ;;  %v3596_v28 = vsub.f32 0.0, %v3276_v43  ;;  %v6419_v24 = vadd.f32 1.0, %v6418_v63  ;;  %v3435_v48 = vand.u32 2147483647, %v14926_v6  ;;  %v2457_v43 = vpop.f32.mrf.mxu1 }
 0x6c2   : > { %7894 = vst [vmem:[%s11350_s2 + $0x6b0] sm:$0xff] %v7574_v60  ;;  %v3277_v51 = vand.u32 2147483647, %v14937_v18  ;;  %v14957_v15 = vadd.f32 %v2455_v12, %v13133_v8  ;;  %v4999_v53 = vand.u32 2147483647, %v14905_v3  ;;  %v3114_v1 = vmax.f32 %v14903_v47, 0.0 }
 0x6c3   : > { %v9525_v23 = vpop.eup %9524  ;;  %9538 = vpow2.f32 %v4308_v26  ;;  %v3992_v45 = vmul.f32 1.442695, %v3596_v28  ;;  %v4997_v33 = vadd.f32 1.0, %v4996_v41  ;;  %v3755_v44 = vsub.f32 0.0, %v3435_v48 }
 0x6c4   : > { %v4986_v50 = vmul.f32 0.6931472, %v9525_v23  ;;  %v3597_v32 = vsub.f32 0.0, %v3277_v51  ;;  %v14961_v61 = vpop.eup %9526  ;;  %vm14963_vm8 = vcmp.lt.f32.partialorder %v6421_v54, 0.0004427343  ;;  %v6499_v17 = vmul.f32 -0.5, %v14928_v38  ;;  %v2570_v51 = vpop.f32.mrf.mxu0 }
 0x6c5   : > { %9540 = vpow2.f32 %v3992_v45  ;;  %v3444_v57 = vand.u32 2147483647, %v14957_v15  ;;  %v6420_v42 = vmul.f32 %v14887_v0, %v6419_v24  ;;  %v5074_v34 = vadd.f32 1.0, %v14961_v61 }
 0x6c6   : > { %v9529_v25 = vpop.eup %9528  ;;  %v4992_v56 = vsel %vm14946_vm7, %v4989_v2, %v4986_v50  ;;  %v14974_v22 = vadd.f32 %v2568_v46, %v14371_v11  ;;  %vm14978_vm9 = vcmp.lt.f32.partialorder %v4999_v53, 0.0004427343  ;;  %v4310_v63 = vmul.f32 1.442695, %v3755_v44 }
 0x6c7   : > { %v7416_v49 = vadd.f32 %v4992_v56, %v2936_v19  ;;  %v6417_v62 = vmul.f32 0.6931472, %v9529_v25  ;;  %v14982_v14 = vpop.eup %9530  ;;  %v4998_v40 = vmul.f32 %v14905_v3, %v4997_v33  ;;  %v6502_v0 = vand.u32 2147483647, %v14928_v38 }
 0x6c8   : > { %9542 = vlog2.f32 %v5074_v34  ;;  %v3994_v29 = vmul.f32 1.442695, %v3597_v32  ;;  %v6500_v19 = vadd.f32 1.0, %v6499_v17  ;;  %v6505_v60 = vadd.f32 1.0, %v14982_v14 }
 0x6c9   : > { %v9533_v12 = vpop.eup %9532  ;;  %7736 = vst [vmem:[%s11350_s2 + $0x1c0] sm:$0xff] %v7416_v49  ;;  %v6423_v21 = vsel %vm14963_vm8, %v6420_v42, %v6417_v62  ;;  %v3764_v16 = vsub.f32 0.0, %v3444_v57  ;;  %9544 = vpow2.f32 %v4310_v63  ;;  %v3286_v54 = vand.u32 2147483647, %v14974_v22 }
 0x6ca   : > { %v14990_v41 = vpop.eup %9534  ;;  %v7575_v3 = vadd.f32 %v6423_v21, %v3095_v10  ;;  %v4995_v2 = vmul.f32 0.6931472, %v9533_v12  ;;  %9546 = vlog2.f32 %v6505_v60  ;;  %v2956_v28 = vmax.f32 %v14920_v27, 0.0 }
 0x6cb   : > { %v5083_v26 = vadd.f32 1.0, %v14990_v41  ;;  %v14998_v24 = vadd.f32 %v2457_v43, %v13219_v13  ;;  %v5077_v36 = vmul.f32 -0.5, %v14961_v61  ;;  %v3115_v10 = vmax.f32 %v14926_v6, 0.0 }
 0x6cc   : > { %7895 = vst [vmem:[%s11350_s2 + $0x6b8] sm:$0xff] %v7575_v3  ;;  %v5001_v48 = vsel %vm14978_vm9, %v4998_v40, %v4995_v2  ;;  %9548 = vpow2.f32 %v3994_v29  ;;  %vm15007_vm10 = vcmp.lt.f32.partialorder %v6502_v0, 0.0004427343  ;;  %v4328_v46 = vmul.f32 1.442695, %v3764_v16 }
 0x6cd   : > { %v9537_v23 = vpop.eup %9536  ;;  %v7417_v53 = vadd.f32 %v5001_v48, %v2937_v9  ;;  %9550 = vlog2.f32 %v5083_v26  ;;  %v6501_v33 = vmul.f32 %v14928_v38, %v6500_v19  ;;  %v2957_v44 = vmax.f32 %v14937_v18, 0.0  ;;  %v2459_v9 = vpop.f32.mrf.mxu1 }
 0x6ce   : > { %v6498_v50 = vmul.f32 0.6931472, %v9537_v23  ;;  %v3606_v32 = vsub.f32 0.0, %v3286_v54  ;;  %v6508_v59 = vmul.f32 -0.5, %v14982_v14  ;;  %9552 = vpow2.f32 %v4328_v46 }
 0x6cf   : > { %7737 = vst [vmem:[%s11350_s2 + $0x1c8] sm:$0xff] %v7417_v53  ;;  %v3445_v17 = vand.u32 2147483647, %v14998_v24  ;;  %v15017_v52 = vadd.f32 %v2570_v51, %v14415_v5  ;;  %v5078_v38 = vadd.f32 1.0, %v5077_v36  ;;  %v5080_v56 = vand.u32 2147483647, %v14961_v61 }
 0x6d0   : > { %v15019_v57 = vpop.eup %9538  ;;  %v6504_v25 = vsel %vm15007_vm10, %v6501_v33, %v6498_v50  ;;  %v4012_v42 = vmul.f32 1.442695, %v3606_v32  ;;  %v6511_v49 = vand.u32 2147483647, %v14982_v14  ;;  %v5086_v62 = vmul.f32 -0.5, %v14990_v41 }
 0x6d1   : > { %v7584_v34 = vadd.f32 %v6504_v25, %v3104_v4  ;;  %v6586_v7 = vadd.f32 1.0, %v15019_v57  ;;  %v3765_v40 = vsub.f32 0.0, %v3445_v17  ;;  %v3287_v0 = vand.u32 2147483647, %v15017_v52  ;;  %v2572_v17 = vpop.f32.mrf.mxu0 }
 0x6d2   : > { %v15029_v63 = vpop.eup %9540  ;;  %9554 = vpow2.f32 %v4012_v42  ;;  %v15033_v29 = vadd.f32 %v2459_v9, %v13133_v8  ;;  %v6509_v43 = vadd.f32 1.0, %v6508_v59  ;;  %v5089_v58 = vand.u32 2147483647, %v14990_v41 }
 0x6d3   : > { %7904 = vst [vmem:[%s11350_s2 + $0x700] sm:$0xff] %v7584_v34  ;;  %9556 = vlog2.f32 %v6586_v7  ;;  %v5164_v4 = vadd.f32 1.0, %v15029_v63  ;;  %v3124_v12 = vmax.f32 %v14957_v15, 0.0  ;;  %v2966_v21 = vmax.f32 %v14974_v22, 0.0 }
 0x6d4   : > { %v4330_v19 = vmul.f32 1.442695, %v3765_v40  ;;  %v3607_v60 = vsub.f32 0.0, %v3287_v0  ;;  %v5079_v3 = vmul.f32 %v14961_v61, %v5078_v38  ;;  %vm15041_vm11 = vcmp.lt.f32.partialorder %v5080_v56, 0.0004427343 }
 0x6d5   : > { %v9543_v16 = vpop.eup %9542  ;;  %vm15045_vm12 = vcmp.lt.f32.partialorder %v6511_v49, 0.0004427343  ;;  %9558 = vlog2.f32 %v5164_v4  ;;  %v5087_v48 = vadd.f32 1.0, %v5086_v62  ;;  %v3454_v36 = vand.u32 2147483647, %v15033_v29 }
 0x6d6   : > { %v5076_v26 = vmul.f32 0.6931472, %v9543_v16  ;;  %9560 = vpow2.f32 %v4330_v19  ;;  %v15050_v51 = vpop.eup %9544  ;;  %v6510_v23 = vmul.f32 %v14982_v14, %v6509_v43  ;;  %vm15053_vm13 = vcmp.lt.f32.partialorder %v5089_v58, 0.0004427343  ;;  %v2461_v58 = vpop.f32.mrf.mxu1 }
 0x6d7   : > { %v6589_v53 = vmul.f32 -0.5, %v15019_v57  ;;  %v4014_v45 = vmul.f32 1.442695, %v3607_v60  ;;  %v9547_v46 = vpop.eup %9546  ;;  %v5167_v33 = vmul.f32 -0.5, %v15029_v63  ;;  %v6595_v32 = vadd.f32 1.0, %v15050_v51 }
 0x6d8   : > { %v5082_v50 = vsel %vm15041_vm11, %v5079_v3, %v5076_v26  ;;  %v3125_v59 = vmax.f32 %v14998_v24, 0.0  ;;  %v6507_v25 = vmul.f32 0.6931472, %v9547_v46  ;;  %v6592_v38 = vand.u32 2147483647, %v15019_v57 }
 0x6d9   : > { %v15063_v14 = vpop.eup %9548  ;;  %v7426_v9 = vadd.f32 %v5082_v50, %v2946_v55  ;;  %9562 = vpow2.f32 %v4014_v45  ;;  %v5088_v42 = vmul.f32 %v14990_v41, %v5087_v48  ;;  %v3774_v49 = vsub.f32 0.0, %v3454_v36 }
 0x6da   : > { %v9551_v56 = vpop.eup %9550  ;;  %9564 = vlog2.f32 %v6595_v32  ;;  %v5173_v34 = vadd.f32 1.0, %v15063_v14  ;;  %v6513_v62 = vsel %vm15045_vm12, %v6510_v23, %v6507_v25  ;;  %v6590_v40 = vadd.f32 1.0, %v6589_v53 }
 0x6db   : > { %7746 = vst [vmem:[%s11350_s2 + $0x210] sm:$0xff] %v7426_v9  ;;  %v5085_v7 = vmul.f32 0.6931472, %v9551_v56  ;;  %v15074_v30 = vadd.f32 %v2572_v17, %v14371_v11  ;;  %v15076_v55 = vpop.eup %9552  ;;  %v7585_v0 = vadd.f32 %v6513_v62, %v3105_v20  ;;  %v5168_v41 = vadd.f32 1.0, %v5167_v33 }
 0x6dc   : > { %v5170_v43 = vand.u32 2147483647, %v15029_v63  ;;  %9566 = vlog2.f32 %v5173_v34  ;;  %vm15083_vm14 = vcmp.lt.f32.partialorder %v6592_v38, 0.0004427343  ;;  %v6676_v60 = vadd.f32 1.0, %v15076_v55 }
 0x6dd   : > { %v5091_v4 = vsel %vm15053_vm13, %v5088_v42, %v5085_v7  ;;  %v2967_v16 = vmax.f32 %v15017_v52, 0.0  ;;  %7905 = vst [vmem:[%s11350_s2 + $0x708] sm:$0xff] %v7585_v0  ;;  %v6598_v20 = vmul.f32 -0.5, %v15050_v51  ;;  %v5176_v3 = vmul.f32 -0.5, %v15063_v14  ;;  %v2574_v42 = vpop.f32.mrf.mxu0 }
 0x6de   : > { %v7427_v39 = vadd.f32 %v5091_v4, %v2947_v35  ;;  %v4348_v2 = vmul.f32 1.442695, %v3774_v49  ;;  %v6591_v26 = vmul.f32 %v15019_v57, %v6590_v40  ;;  %9568 = vlog2.f32 %v6676_v60 }
 0x6df   : > { %v15094_v54 = vpop.eup %9554  ;;  %v3296_v48 = vand.u32 2147483647, %v15074_v30  ;;  %v15099_v36 = vadd.f32 %v2461_v58, %v13219_v13  ;;  %v5169_v31 = vmul.f32 %v15029_v63, %v5168_v41  ;;  %vm15103_vm15 = vcmp.lt.f32.partialorder %v5170_v43, 0.0004427343  ;;  %v2465_v43 = vpop.f32.mrf.mxu1 }
 0x6e0   : > { %v9557_v23 = vpop.eup %9556  ;;  %7747 = vst [vmem:[%s11350_s2 + $0x218] sm:$0xff] %v7427_v39  ;;  %v5254_v61 = vadd.f32 1.0, %v15094_v54  ;;  %v3134_v53 = vmax.f32 %v15033_v29, 0.0  ;;  %v6601_v57 = vand.u32 2147483647, %v15050_v51  ;;  %9570 = vpow2.f32 %v4348_v2 }
 0x6e1   : > { %v6588_v45 = vmul.f32 0.6931472, %v9557_v23  ;;  %v3616_v46 = vsub.f32 0.0, %v3296_v48  ;;  %v6599_v33 = vadd.f32 1.0, %v6598_v20  ;;  %v5177_v32 = vadd.f32 1.0, %v5176_v3  ;;  %v2578_v48 = vpop.f32.mrf.mxu0  ;;  %v2467_v35 = vpop.f32.mrf.mxu1 }
 0x6e2   : > { %v9559_v50 = vpop.eup %9558  ;;  %v5179_v17 = vand.u32 2147483647, %v15063_v14  ;;  %9572 = vlog2.f32 %v5254_v61  ;;  %v3455_v56 = vand.u32 2147483647, %v15099_v36  ;;  %v6679_v49 = vmul.f32 -0.5, %v15076_v55 }
 0x6e3   : > { %v15111_v63 = vpop.eup %9560  ;;  %v6594_v9 = vsel %vm15083_vm14, %v6591_v26, %v6588_v45  ;;  %v5166_v25 = vmul.f32 0.6931472, %v9559_v50  ;;  %v4032_v38 = vmul.f32 1.442695, %v3616_v46  ;;  %v6682_v62 = vand.u32 2147483647, %v15076_v55  ;;  %v2469_v15 = vpop.f32.mrf.mxu1 }
 0x6e4   : > { %v7594_v34 = vadd.f32 %v6594_v9, %v3114_v1  ;;  %v6685_v7 = vadd.f32 1.0, %v15111_v63  ;;  %v5257_v0 = vmul.f32 -0.5, %v15094_v54  ;;  %v3775_v41 = vsub.f32 0.0, %v3455_v56 }
 0x6e5   : > { %v5172_v40 = vsel %vm15103_vm15, %v5169_v31, %v5166_v25  ;;  %9574 = vpow2.f32 %v4032_v38  ;;  %vm15129_vm0 = vcmp.lt.f32.partialorder %v6601_v57, 0.0004427343  ;;  %v15134_v4 = vadd.f32 %v2574_v42, %v14415_v5 }
 0x6e6   : > { %v15124_v58 = vpop.eup %9562  ;;  %7914 = vst [vmem:[%s11350_s2 + $0x750] sm:$0xff] %v7594_v34  ;;  %v7436_v47 = vadd.f32 %v5172_v40, %v2956_v28  ;;  %9576 = vlog2.f32 %v6685_v7  ;;  %v6600_v60 = vmul.f32 %v15050_v51, %v6599_v33  ;;  %v5178_v39 = vmul.f32 %v15063_v14, %v5177_v32 }
 0x6e7   : > { %v9565_v19 = vpop.eup %9564  ;;  %vm15138_vm1 = vcmp.lt.f32.partialorder %v5179_v17, 0.0004427343  ;;  %v5263_v27 = vadd.f32 1.0, %v15124_v58  ;;  %v6680_v3 = vadd.f32 1.0, %v6679_v49  ;;  %v2976_v2 = vmax.f32 %v15074_v30, 0.0 }
 0x6e8   : > { %7756 = vst [vmem:[%s11350_s2 + $0x260] sm:$0xff] %v7436_v47  ;;  %v6597_v28 = vmul.f32 0.6931472, %v9565_v19  ;;  %v4350_v26 = vmul.f32 1.442695, %v3775_v41  ;;  %v5258_v51 = vadd.f32 1.0, %v5257_v0  ;;  %v15153_v57 = vadd.f32 %v2465_v43, %v13133_v8  ;;  %v2580_v47 = vpop.f32.mrf.mxu0 }
 0x6e9   : > { %v9567_v23 = vpop.eup %9566  ;;  %vm15145_vm2 = vcmp.lt.f32.partialorder %v6682_v62, 0.0004427343  ;;  %9578 = vlog2.f32 %v5263_v27  ;;  %v3297_v14 = vand.u32 2147483647, %v15134_v4  ;;  %v6688_v50 = vmul.f32 -0.5, %v15111_v63 }
 0x6ea   : > { %v6603_v61 = vsel %vm15129_vm0, %v6600_v60, %v6597_v28  ;;  %v5175_v45 = vmul.f32 0.6931472, %v9567_v23  ;;  %9580 = vpow2.f32 %v4350_v26  ;;  %v15159_v32 = vadd.f32 %v2578_v48, %v14371_v11 }
 0x6eb   : > { %v7595_v46 = vadd.f32 %v6603_v61, %v3115_v10  ;;  %v3617_v33 = vsub.f32 0.0, %v3297_v14  ;;  %v9569_v17 = vpop.eup %9568  ;;  %v5260_v25 = vand.u32 2147483647, %v15094_v54  ;;  %v3464_v38 = vand.u32 2147483647, %v15153_v57 }
 0x6ec   : > { %v5181_v9 = vsel %vm15138_vm1, %v5178_v39, %v5175_v45  ;;  %v15166_v56 = vadd.f32 %v2467_v35, %v13219_v13  ;;  %v6678_v10 = vmul.f32 0.6931472, %v9569_v17  ;;  %v6681_v42 = vmul.f32 %v15076_v55, %v6680_v3  ;;  %v2582_v17 = vpop.f32.mrf.mxu0 }
 0x6ed   : > { %7915 = vst [vmem:[%s11350_s2 + $0x758] sm:$0xff] %v7595_v46  ;;  %v7437_v6 = vadd.f32 %v5181_v9, %v2957_v44  ;;  %v4034_v34 = vmul.f32 1.442695, %v3617_v33  ;;  %v15172_v49 = vpop.eup %9570  ;;  %v5259_v62 = vmul.f32 %v15094_v54, %v5258_v51  ;;  %v3784_v7 = vsub.f32 0.0, %v3464_v38 }
 0x6ee   : > { %v3306_v40 = vand.u32 2147483647, %v15159_v32  ;;  %v3465_v0 = vand.u32 2147483647, %v15166_v56  ;;  %v6684_v18 = vsel %vm15145_vm2, %v6681_v42, %v6678_v10  ;;  %v6689_v44 = vadd.f32 1.0, %v6688_v50 }
 0x6ef   : > { %v9573_v41 = vpop.eup %9572  ;;  %7757 = vst [vmem:[%s11350_s2 + $0x268] sm:$0xff] %v7437_v6  ;;  %v5266_v43 = vmul.f32 -0.5, %v15124_v58  ;;  %v6766_v55 = vadd.f32 1.0, %v15172_v49  ;;  %v7604_v54 = vadd.f32 %v6684_v18, %v3124_v12  ;;  %9582 = vpow2.f32 %v4034_v34 }
 0x6f0   : > { %v5256_v1 = vmul.f32 0.6931472, %v9573_v41  ;;  %v4368_v19 = vmul.f32 1.442695, %v3784_v7  ;;  %vm5261_vm3 = vcmp.lt.f32.partialorder %v5260_v25, 0.0004427343  ;;  %v15189_v3 = vadd.f32 %v2580_v47, %v14415_v5 }
 0x6f1   : > { %v6691_v60 = vand.u32 2147483647, %v15111_v63  ;;  %9584 = vlog2.f32 %v6766_v55  ;;  %v3626_v39 = vsub.f32 0.0, %v3306_v40  ;;  %7924 = vst [vmem:[%s11350_s2 + $0x7a0] sm:$0xff] %v7604_v54  ;;  %v3785_v28 = vsub.f32 0.0, %v3465_v0 }
 0x6f2   : > { %v15185_v20 = vpop.eup %9574  ;;  %v5262_v27 = vsel %vm5261_vm3, %v5259_v62, %v5256_v1  ;;  %9586 = vpow2.f32 %v4368_v19  ;;  %v5267_v48 = vadd.f32 1.0, %v5266_v43  ;;  %v3135_v31 = vmax.f32 %v15099_v36, 0.0 }
 0x6f3   : > { %v9577_v12 = vpop.eup %9576  ;;  %v7446_v26 = vadd.f32 %v5262_v27, %v2966_v21  ;;  %v5344_v23 = vadd.f32 1.0, %v15185_v20  ;;  %v6690_v14 = vmul.f32 %v15111_v63, %v6689_v44  ;;  %v5269_v35 = vand.u32 2147483647, %v15124_v58 }
 0x6f4   : > { %v6687_v51 = vmul.f32 0.6931472, %v9577_v12  ;;  %v4052_v61 = vmul.f32 1.442695, %v3626_v39  ;;  %vm6692_vm4 = vcmp.lt.f32.partialorder %v6691_v60, 0.0004427343  ;;  %v15199_v46 = vadd.f32 %v2469_v15, %v13133_v8 }
 0x6f5   : > { %7766 = vst [vmem:[%s11350_s2 + $0x2b0] sm:$0xff] %v7446_v26  ;;  %9588 = vlog2.f32 %v5344_v23  ;;  %v4370_v45 = vmul.f32 1.442695, %v3785_v28  ;;  %v6769_v50 = vmul.f32 -0.5, %v15172_v49  ;;  %v3307_v33 = vand.u32 2147483647, %v15189_v3 }
 0x6f6   : > { %v9579_v22 = vpop.eup %9578  ;;  %v6693_v21 = vsel %vm6692_vm4, %v6690_v14, %v6687_v51  ;;  %9590 = vpow2.f32 %v4052_v61  ;;  %v5268_v38 = vmul.f32 %v15124_v58, %v5267_v48  ;;  %vm5270_vm5 = vcmp.lt.f32.partialorder %v5269_v35, 0.0004427343  ;;  %v2584_v14 = vpop.f32.mrf.mxu0 }
 0x6f7   : > { %v15203_v63 = vpop.eup %9580  ;;  %v7605_v9 = vadd.f32 %v6693_v21, %v3125_v59  ;;  %v5265_v25 = vmul.f32 0.6931472, %v9579_v22  ;;  %9592 = vpow2.f32 %v4370_v45  ;;  %v2977_v10 = vmax.f32 %v15134_v4, 0.0  ;;  %v2471_v59 = vpop.f32.mrf.mxu1 }
 0x6f8   : > { %v6775_v6 = vadd.f32 1.0, %v15203_v63  ;;  %v3627_v42 = vsub.f32 0.0, %v3307_v33  ;;  %v6772_v62 = vand.u32 2147483647, %v15172_v49  ;;  %v3474_v7 = vand.u32 2147483647, %v15199_v46 }
 0x6f9   : > { %7925 = vst [vmem:[%s11350_s2 + $0x7a8] sm:$0xff] %v7605_v9  ;;  %v5271_v34 = vsel %vm5270_vm5, %v5268_v38, %v5265_v25  ;;  %v15214_v24 = vadd.f32 %v2582_v17, %v14371_v11  ;;  %v6770_v40 = vadd.f32 1.0, %v6769_v50  ;;  %v5347_v0 = vmul.f32 -0.5, %v15185_v20  ;;  %v2475_v25 = vpop.f32.mrf.mxu1 }
 0x6fa   : > { %v7447_v58 = vadd.f32 %v5271_v34, %v2967_v16  ;;  %9594 = vlog2.f32 %v6775_v6  ;;  %v3144_v41 = vmax.f32 %v15153_v57, 0.0  ;;  %v4054_v18 = vmul.f32 1.442695, %v3627_v42 }
 0x6fb   : > { %v3794_v44 = vsub.f32 0.0, %v3474_v7  ;;  %v3316_v43 = vand.u32 2147483647, %v15214_v24  ;;  %v5350_v55 = vand.u32 2147483647, %v15185_v20  ;;  %v2986_v47 = vmax.f32 %v15159_v32, 0.0  ;;  %v2588_v7 = vpop.f32.mrf.mxu0 }
 0x6fc   : > { %7767 = vst [vmem:[%s11350_s2 + $0x2b8] sm:$0xff] %v7447_v58  ;;  %v3145_v54 = vmax.f32 %v15166_v56, 0.0  ;;  %v15226_v52 = vadd.f32 %v2471_v59, %v13219_v13  ;;  %v15228_v16 = vpop.eup %9582  ;;  %v6778_v1 = vmul.f32 -0.5, %v15203_v63  ;;  %9596 = vpow2.f32 %v4054_v18 }
 0x6fd   : > { %v4388_v19 = vmul.f32 1.442695, %v3794_v44  ;;  %v3636_v60 = vsub.f32 0.0, %v3316_v43  ;;  %v6771_v27 = vmul.f32 %v15172_v49, %v6770_v40  ;;  %vm15232_vm6 = vcmp.lt.f32.partialorder %v6772_v62, 0.0004427343 }
 0x6fe   : > { %v9585_v39 = vpop.eup %9584  ;;  %v5348_v15 = vadd.f32 1.0, %v5347_v0  ;;  %v5353_v12 = vadd.f32 1.0, %v15228_v16  ;;  %v3475_v51 = vand.u32 2147483647, %v15226_v52  ;;  %v6781_v35 = vand.u32 2147483647, %v15203_v63 }
 0x6ff   : > { %v15237_v26 = vpop.eup %9586  ;;  %v6768_v48 = vmul.f32 0.6931472, %v9585_v39  ;;  %9598 = vpow2.f32 %v4388_v19  ;;  %v4072_v23 = vmul.f32 1.442695, %v3636_v60  ;;  %v2987_v61 = vmax.f32 %v15189_v3, 0.0 }
 0x700   : > { %9600 = vlog2.f32 %v5353_v12  ;;  %v6856_v49 = vadd.f32 1.0, %v15237_v26  ;;  %vm15245_vm7 = vcmp.lt.f32.partialorder %v5350_v55, 0.0004427343  ;;  %v6779_v21 = vadd.f32 1.0, %v6778_v1 }
 0x701   : > { %v6774_v45 = vsel %vm15232_vm6, %v6771_v27, %v6768_v48  ;;  %9602 = vpow2.f32 %v4072_v23  ;;  %v5349_v17 = vmul.f32 %v15185_v20, %v5348_v15  ;;  %v3795_v9 = vsub.f32 0.0, %v3475_v51 }
 0x702   : > { %v9589_v50 = vpop.eup %9588  ;;  %v7614_v33 = vadd.f32 %v6774_v45, %v3134_v53  ;;  %9604 = vlog2.f32 %v6856_v49  ;;  %v5356_v42 = vmul.f32 -0.5, %v15228_v16  ;;  %v3154_v34 = vmax.f32 %v15199_v46, 0.0 }
 0x703   : > { %v15252_v38 = vpop.eup %9590  ;;  %v5346_v6 = vmul.f32 0.6931472, %v9589_v50  ;;  %v15257_v62 = vadd.f32 %v2584_v14, %v14415_v5  ;;  %vm15262_vm8 = vcmp.lt.f32.partialorder %v6781_v35, 0.0004427343  ;;  %v6859_v53 = vmul.f32 -0.5, %v15237_v26 }
 0x704   : > { %v15259_v59 = vpop.eup %9592  ;;  %7934 = vst [vmem:[%s11350_s2 + $0x7f0] sm:$0xff] %v7614_v33  ;;  %v5434_v20 = vadd.f32 1.0, %v15252_v38  ;;  %v4390_v58 = vmul.f32 1.442695, %v3795_v9  ;;  %v6780_v0 = vmul.f32 %v15203_v63, %v6779_v21  ;;  %v15273_v44 = vadd.f32 %v2475_v25, %v13133_v8 }
 0x705   : > { %v5352_v40 = vsel %vm15245_vm7, %v5349_v17, %v5346_v6  ;;  %v6865_v18 = vadd.f32 1.0, %v15259_v59  ;;  %v5359_v55 = vand.u32 2147483647, %v15228_v16  ;;  %v15279_v1 = vadd.f32 %v2588_v7, %v14371_v11 }
 0x706   : > { %v7456_v43 = vadd.f32 %v5352_v40, %v2976_v2  ;;  %9606 = vlog2.f32 %v5434_v20  ;;  %v5357_v60 = vadd.f32 1.0, %v5356_v42  ;;  %v6862_v39 = vand.u32 2147483647, %v15237_v26  ;;  %v2477_v42 = vpop.f32.mrf.mxu1 }
 0x707   : > { %v9595_v19 = vpop.eup %9594  ;;  %9608 = vlog2.f32 %v6865_v18  ;;  %v3317_v63 = vand.u32 2147483647, %v15257_v62  ;;  %v6860_v28 = vadd.f32 1.0, %v6859_v53  ;;  %v5437_v15 = vmul.f32 -0.5, %v15252_v38 }
 0x708   : > { %7776 = vst [vmem:[%s11350_s2 + $0x300] sm:$0xff] %v7456_v43  ;;  %v6777_v27 = vmul.f32 0.6931472, %v9595_v19  ;;  %9610 = vpow2.f32 %v4390_v58  ;;  %v6868_v30 = vmul.f32 -0.5, %v15259_v59  ;;  %v2996_v2 = vmax.f32 %v15214_v24, 0.0  ;;  %v2590_v43 = vpop.f32.mrf.mxu0 }
 0x709   : > { %v3155_v12 = vmax.f32 %v15226_v52, 0.0  ;;  %v3637_v48 = vsub.f32 0.0, %v3317_v63  ;;  %v15288_v23 = vpop.eup %9596  ;;  %vm15292_vm9 = vcmp.lt.f32.partialorder %v5359_v55, 0.0004427343  ;;  %v3484_v35 = vand.u32 2147483647, %v15273_v44 }
 0x70a   : > { %v6783_v51 = vsel %vm15262_vm8, %v6780_v0, %v6777_v27  ;;  %v3326_v49 = vand.u32 2147483647, %v15279_v1  ;;  %v5358_v22 = vmul.f32 %v15228_v16, %v5357_v60  ;;  %vm15301_vm10 = vcmp.lt.f32.partialorder %v6862_v39, 0.0004427343 }
 0x70b   : > { %v7615_v45 = vadd.f32 %v6783_v51, %v3135_v31  ;;  %v5443_v50 = vadd.f32 1.0, %v15288_v23  ;;  %v6861_v17 = vmul.f32 %v15237_v26, %v6860_v28  ;;  %v5438_v9 = vadd.f32 1.0, %v5437_v15  ;;  %v2479_v51 = vpop.f32.mrf.mxu1 }
 0x70c   : > { %v15306_v33 = vpop.eup %9598  ;;  %v5440_v25 = vand.u32 2147483647, %v15252_v38  ;;  %v4074_v6 = vmul.f32 1.442695, %v3637_v48  ;;  %v6869_v36 = vadd.f32 1.0, %v6868_v30  ;;  %v3804_v20 = vsub.f32 0.0, %v3484_v35 }
 0x70d   : > { %v9601_v7 = vpop.eup %9600  ;;  %7935 = vst [vmem:[%s11350_s2 + $0x7f8] sm:$0xff] %v7615_v45  ;;  %v6871_v31 = vand.u32 2147483647, %v15259_v59  ;;  %9612 = vlog2.f32 %v5443_v50  ;;  %v6946_v16 = vadd.f32 1.0, %v15306_v33  ;;  %v3646_v58 = vsub.f32 0.0, %v3326_v49  ;;  %v2592_v49 = vpop.f32.mrf.mxu0 }
 0x70e   : > { %v15313_v29 = vpop.eup %9602  ;;  %v5355_v53 = vmul.f32 0.6931472, %v9601_v7  ;;  %9614 = vpow2.f32 %v4074_v6  ;;  %v5446_v40 = vmul.f32 -0.5, %v15288_v23  ;;  %v15318_v18 = vadd.f32 %v2477_v42, %v13219_v13 }
 0x70f   : > { %v9605_v26 = vpop.eup %9604  ;;  %9616 = vlog2.f32 %v6946_v16  ;;  %v5524_v0 = vadd.f32 1.0, %v15313_v29  ;;  %v5439_v60 = vmul.f32 %v15252_v38, %v5438_v9  ;;  %vm15323_vm11 = vcmp.lt.f32.partialorder %v5440_v25, 0.0004427343 }
 0x710   : > { %v5361_v55 = vsel %vm15292_vm9, %v5358_v22, %v5355_v53  ;;  %v6858_v19 = vmul.f32 0.6931472, %v9605_v26  ;;  %v6870_v27 = vmul.f32 %v15259_v59, %v6869_v36  ;;  %vm15330_vm12 = vcmp.lt.f32.partialorder %v6871_v31, 0.0004427343 }
 0x711   : > { %v7457_v63 = vadd.f32 %v5361_v55, %v2977_v10  ;;  %9618 = vlog2.f32 %v5524_v0  ;;  %v5449_v30 = vand.u32 2147483647, %v15288_v23  ;;  %v4408_v38 = vmul.f32 1.442695, %v3804_v20  ;;  %v2481_v0 = vpop.f32.mrf.mxu1 }
 0x712   : > { %v6864_v15 = vsel %vm15301_vm10, %v6861_v17, %v6858_v19  ;;  %v4092_v48 = vmul.f32 1.442695, %v3646_v58  ;;  %v5447_v10 = vadd.f32 1.0, %v5446_v40  ;;  %v6949_v59 = vmul.f32 -0.5, %v15306_v33 }
 0x713   : > { %v9607_v14 = vpop.eup %9606  ;;  %7777 = vst [vmem:[%s11350_s2 + $0x308] sm:$0xff] %v7457_v63  ;;  %v7624_v4 = vadd.f32 %v6864_v15, %v3144_v41  ;;  %v3485_v35 = vand.u32 2147483647, %v15318_v18  ;;  %v6952_v21 = vand.u32 2147483647, %v15306_v33  ;;  %9620 = vpow2.f32 %v4408_v38 }
 0x714   : > { %v9609_v45 = vpop.eup %9608  ;;  %v5436_v22 = vmul.f32 0.6931472, %v9607_v14  ;;  %v15344_v50 = vadd.f32 %v2590_v43, %v14415_v5  ;;  %9622 = vpow2.f32 %v4092_v48  ;;  %v15350_v41 = vadd.f32 %v2479_v51, %v13133_v8 }
 0x715   : > { %v15346_v17 = vpop.eup %9610  ;;  %7944 = vst [vmem:[%s11350_s2 + $0x840] sm:$0xff] %v7624_v4  ;;  %v6867_v9 = vmul.f32 0.6931472, %v9609_v45  ;;  %v3805_v57 = vsub.f32 0.0, %v3485_v35  ;;  %v5527_v6 = vmul.f32 -0.5, %v15313_v29  ;;  %v15357_v7 = vadd.f32 %v2592_v49, %v14371_v11 }
 0x716   : > { %v5442_v25 = vsel %vm15323_vm11, %v5439_v60, %v5436_v22  ;;  %v6955_v42 = vadd.f32 1.0, %v15346_v17  ;;  %v6950_v16 = vadd.f32 1.0, %v6949_v59  ;;  %vm15365_vm13 = vcmp.lt.f32.partialorder %v5449_v30, 0.0004427343  ;;  %v2594_v59 = vpop.f32.mrf.mxu0 }
 0x717   : > { %v7466_v36 = vadd.f32 %v5442_v25, %v2986_v47  ;;  %v6873_v31 = vsel %vm15330_vm12, %v6870_v27, %v6867_v9  ;;  %v4410_v53 = vmul.f32 1.442695, %v3805_v57  ;;  %v2997_v26 = vmax.f32 %v15257_v62, 0.0 }
 0x718   : > { %v7625_v20 = vadd.f32 %v6873_v31, %v3145_v54  ;;  %9624 = vlog2.f32 %v6955_v42  ;;  %vm15371_vm14 = vcmp.lt.f32.partialorder %v6952_v21, 0.0004427343  ;;  %v3327_v47 = vand.u32 2147483647, %v15344_v50 }
 0x719   : > { %7786 = vst [vmem:[%s11350_s2 + $0x350] sm:$0xff] %v7466_v36  ;;  %9626 = vpow2.f32 %v4410_v53  ;;  %v3494_v40 = vand.u32 2147483647, %v15350_v41  ;;  %v5448_v54 = vmul.f32 %v15288_v23, %v5447_v10  ;;  %v5528_v43 = vadd.f32 1.0, %v5527_v6 }
 0x71a   : > { %v9613_v56 = vpop.eup %9612  ;;  %7945 = vst [vmem:[%s11350_s2 + $0x848] sm:$0xff] %v7625_v20  ;;  %v5530_v55 = vand.u32 2147483647, %v15313_v29  ;;  %v3336_v19 = vand.u32 2147483647, %v15357_v7  ;;  %v6951_v63 = vmul.f32 %v15306_v33, %v6950_v16  ;;  %v3647_v27 = vsub.f32 0.0, %v3327_v47  ;;  %v2485_v47 = vpop.f32.mrf.mxu1 }
 0x71b   : > { %v15381_v60 = vpop.eup %9614  ;;  %v5445_v39 = vmul.f32 0.6931472, %v9613_v56  ;;  %v3814_v28 = vsub.f32 0.0, %v3494_v40  ;;  %v6958_v30 = vmul.f32 -0.5, %v15346_v17  ;;  %v15387_v23 = vadd.f32 %v2481_v0, %v13219_v13 }
 0x71c   : > { %v9617_v15 = vpop.eup %9616  ;;  %v5533_v38 = vadd.f32 1.0, %v15381_v60  ;;  %v3656_v48 = vsub.f32 0.0, %v3336_v19  ;;  %v4094_v4 = vmul.f32 1.442695, %v3647_v27  ;;  %v5529_v49 = vmul.f32 %v15313_v29, %v5528_v43 }
 0x71d   : > { %v5451_v51 = vsel %vm15365_vm13, %v5448_v54, %v5445_v39  ;;  %v6948_v14 = vmul.f32 0.6931472, %v9617_v15  ;;  %v4428_v10 = vmul.f32 1.442695, %v3814_v28  ;;  %vm15394_vm15 = vcmp.lt.f32.partialorder %v5530_v55, 0.0004427343 }
 0x71e   : > { %v9619_v33 = vpop.eup %9618  ;;  %v7467_v35 = vadd.f32 %v5451_v51, %v2987_v61  ;;  %9628 = vlog2.f32 %v5533_v38  ;;  %v4112_v9 = vmul.f32 1.442695, %v3656_v48  ;;  %v6961_v3 = vand.u32 2147483647, %v15346_v17 }
 0x71f   : > { %v6954_v22 = vsel %vm15371_vm14, %v6951_v63, %v6948_v14  ;;  %v5526_v21 = vmul.f32 0.6931472, %v9619_v33  ;;  %9630 = vpow2.f32 %v4094_v4  ;;  %v15405_v61 = vadd.f32 %v2594_v59, %v14415_v5 }
 0x720   : > { %7787 = vst [vmem:[%s11350_s2 + $0x358] sm:$0xff] %v7467_v35  ;;  %v7634_v57 = vadd.f32 %v6954_v22, %v3154_v34  ;;  %9632 = vpow2.f32 %v4428_v10  ;;  %v15407_v29 = vpop.eup %9620  ;;  %v6959_v6 = vadd.f32 1.0, %v6958_v30  ;;  %v3495_v42 = vand.u32 2147483647, %v15387_v23 }
 0x721   : > { %v5532_v25 = vsel %vm15394_vm15, %v5529_v49, %v5526_v21  ;;  %9634 = vpow2.f32 %v4112_v9  ;;  %v15412_v36 = vpop.eup %9622  ;;  %v3164_v34 = vmax.f32 %v15273_v44, 0.0  ;;  %v7036_v31 = vadd.f32 1.0, %v15407_v29 }
 0x722   : > { %7954 = vst [vmem:[%s11350_s2 + $0x890] sm:$0xff] %v7634_v57  ;;  %v7476_v46 = vadd.f32 %v5532_v25, %v2996_v2  ;;  %v3006_v16 = vmax.f32 %v15279_v1, 0.0  ;;  %v5536_v53 = vmul.f32 -0.5, %v15381_v60  ;;  %v5614_v20 = vadd.f32 1.0, %v15412_v36 }
 0x723   : > { %v3165_v58 = vmax.f32 %v15318_v18, 0.0  ;;  %v3815_v32 = vsub.f32 0.0, %v3495_v42  ;;  %vm15424_vm0 = vcmp.lt.f32.partialorder %v6961_v3, 0.0004427343  ;;  %9636 = vlog2.f32 %v7036_v31  ;;  %v2487_v42 = vpop.f32.mrf.mxu1 }
 0x724   : > { %7796 = vst [vmem:[%s11350_s2 + $0x3a0] sm:$0xff] %v7476_v46  ;;  %v3007_v24 = vmax.f32 %v15344_v50, 0.0  ;;  %v3337_v2 = vand.u32 2147483647, %v15405_v61  ;;  %v6960_v56 = vmul.f32 %v15346_v17, %v6959_v6  ;;  %9638 = vlog2.f32 %v5614_v20  ;;  %v2598_v17 = vpop.f32.mrf.mxu0 }
 0x725   : > { %v9625_v0 = vpop.eup %9624  ;;  %v3174_v54 = vmax.f32 %v15350_v41, 0.0  ;;  %v4430_v43 = vmul.f32 1.442695, %v3815_v32  ;;  %v5539_v39 = vand.u32 2147483647, %v15381_v60  ;;  %v15434_v27 = vadd.f32 %v2485_v47, %v13133_v8 }
 0x726   : > { %v9627_v55 = vpop.eup %9626  ;;  %v6957_v19 = vmul.f32 0.6931472, %v9625_v0  ;;  %v3657_v63 = vsub.f32 0.0, %v3337_v2  ;;  %v5537_v28 = vadd.f32 1.0, %v5536_v53  ;;  %v7039_v15 = vmul.f32 -0.5, %v15407_v29 }
 0x727   : > { %v5617_v30 = vmul.f32 -0.5, %v15412_v36  ;;  %v7045_v38 = vadd.f32 1.0, %v9627_v55  ;;  %v3016_v51 = vmax.f32 %v15357_v7, 0.0  ;;  %9640 = vpow2.f32 %v4430_v43 }
 0x728   : > { %v6963_v48 = vsel %vm15424_vm0, %v6960_v56, %v6957_v19  ;;  %v4114_v14 = vmul.f32 1.442695, %v3657_v63  ;;  %v7042_v10 = vand.u32 2147483647, %v15407_v29  ;;  %v7048_v59 = vmul.f32 -0.5, %v9627_v55  ;;  %v2600_v56 = vpop.f32.mrf.mxu0 }
 0x729   : > { %v7635_v4 = vadd.f32 %v6963_v48, %v3155_v12  ;;  %9642 = vlog2.f32 %v7045_v38  ;;  %v5620_v33 = vand.u32 2147483647, %v15412_v36  ;;  %v3504_v35 = vand.u32 2147483647, %v15434_v27 }
 0x72a   : > { %9644 = vpow2.f32 %v4114_v14  ;;  %v15447_v49 = vadd.f32 %v2598_v17, %v14371_v11  ;;  %v5538_v22 = vmul.f32 %v15381_v60, %v5537_v28  ;;  %vm15451_vm1 = vcmp.lt.f32.partialorder %v5539_v39, 0.0004427343 }
 0x72b   : > { %v9629_v45 = vpop.eup %9628  ;;  %7955 = vst [vmem:[%s11350_s2 + $0x898] sm:$0xff] %v7635_v4  ;;  %v7040_v52 = vadd.f32 1.0, %v7039_v15  ;;  %v5618_v12 = vadd.f32 1.0, %v5617_v30  ;;  %v7051_v3 = vand.u32 2147483647, %v9627_v55  ;;  %v3175_v25 = vmax.f32 %v15387_v23, 0.0  ;;  %v2489_v30 = vpop.f32.mrf.mxu1 }
 0x72c   : > { %v15455_v9 = vpop.eup %9630  ;;  %v5535_v57 = vmul.f32 0.6931472, %v9629_v45  ;;  %v3017_v6 = vmax.f32 %v15405_v61, 0.0  ;;  %vm15461_vm2 = vcmp.lt.f32.partialorder %v7042_v10, 0.0004427343  ;;  %v7049_v60 = vadd.f32 1.0, %v7048_v59 }
 0x72d   : > { %v15459_v46 = vpop.eup %9632  ;;  %v5623_v53 = vadd.f32 1.0, %v15455_v9  ;;  %v3824_v20 = vsub.f32 0.0, %v3504_v35  ;;  %vm15470_vm3 = vcmp.lt.f32.partialorder %v5620_v33, 0.0004427343  ;;  %v3346_v0 = vand.u32 2147483647, %v15447_v49 }
 0x72e   : > { %v15466_v32 = vpop.eup %9634  ;;  %v5541_v47 = vsel %vm15451_vm1, %v5538_v22, %v5535_v57  ;;  %v7126_v2 = vadd.f32 1.0, %v15459_v46  ;;  %v7041_v19 = vmul.f32 %v15407_v29, %v7040_v52  ;;  %v5619_v39 = vmul.f32 %v15412_v36, %v5618_v12 }
 0x72f   : > { %v7477_v43 = vadd.f32 %v5541_v47, %v2997_v26  ;;  %9646 = vlog2.f32 %v5623_v53  ;;  %vm15480_vm4 = vcmp.lt.f32.partialorder %v7051_v3, 0.0004427343  ;;  %v5704_v28 = vadd.f32 1.0, %v15466_v32  ;;  %v2602_v3 = vpop.f32.mrf.mxu0 }
 0x730   : > { %9648 = vlog2.f32 %v7126_v2  ;;  %v15486_v15 = vadd.f32 %v2487_v42, %v13219_v13  ;;  %v9637_v38 = vpop.eup %9636  ;;  %v7050_v62 = vmul.f32 %v9627_v55, %v7049_v60  ;;  %v5626_v26 = vmul.f32 -0.5, %v15455_v9 }
 0x731   : > { %7797 = vst [vmem:[%s11350_s2 + $0x3a8] sm:$0xff] %v7477_v43  ;;  %v4448_v29 = vmul.f32 1.442695, %v3824_v20  ;;  %v15491_v36 = vadd.f32 %v2600_v56, %v14415_v5  ;;  %v9639_v17 = vpop.eup %9638  ;;  %v7038_v48 = vmul.f32 0.6931472, %v9637_v38  ;;  %v7129_v14 = vmul.f32 -0.5, %v15459_v46  ;;  %v2491_v38 = vpop.f32.mrf.mxu1 }
 0x732   : > { %9650 = vlog2.f32 %v5704_v28  ;;  %v3666_v4 = vsub.f32 0.0, %v3346_v0  ;;  %v5616_v10 = vmul.f32 0.6931472, %v9639_v17  ;;  %v5629_v59 = vand.u32 2147483647, %v15455_v9 }
 0x733   : > { %9652 = vpow2.f32 %v4448_v29  ;;  %v15496_v33 = vadd.f32 %v2489_v30, %v13133_v8  ;;  %v7044_v55 = vsel %vm15461_vm2, %v7041_v19, %v7038_v48  ;;  %v7132_v35 = vand.u32 2147483647, %v15459_v46 }
 0x734   : > { %v4132_v45 = vmul.f32 1.442695, %v3666_v4  ;;  %v3505_v22 = vand.u32 2147483647, %v15486_v15  ;;  %v15502_v21 = vpop.eup %9640  ;;  %v7644_v52 = vadd.f32 %v7044_v55, %v3164_v34  ;;  %v5622_v12 = vsel %vm15470_vm3, %v5619_v39, %v5616_v10 }
 0x735   : > { %v5707_v8 = vmul.f32 -0.5, %v15466_v32  ;;  %v3347_v57 = vand.u32 2147483647, %v15491_v36  ;;  %v7486_v31 = vadd.f32 %v5622_v12, %v3006_v16  ;;  %v5627_v60 = vadd.f32 1.0, %v5626_v26  ;;  %v2604_v26 = vpop.f32.mrf.mxu0 }
 0x736   : > { %v9643_v42 = vpop.eup %9642  ;;  %v7130_v53 = vadd.f32 1.0, %v7129_v14  ;;  %v7135_v20 = vadd.f32 1.0, %v15502_v21  ;;  %7964 = vst [vmem:[%s11350_s2 + $0x8e0] sm:$0xff] %v7644_v52  ;;  %9654 = vpow2.f32 %v4132_v45  ;;  %v3825_v34 = vsub.f32 0.0, %v3505_v22 }
 0x737   : > { %v15513_v47 = vpop.eup %9644  ;;  %v7047_v44 = vmul.f32 0.6931472, %v9643_v42  ;;  %v3667_v40 = vsub.f32 0.0, %v3347_v57  ;;  %7806 = vst [vmem:[%s11350_s2 + $0x3f0] sm:$0xff] %v7486_v31  ;;  %v5710_v2 = vand.u32 2147483647, %v15466_v32  ;;  %v15520_v1 = vadd.f32 %v2602_v3, %v14371_v11  ;;  %v2608_v22 = vpop.f32.mrf.mxu0 }
 0x738   : > { %9656 = vlog2.f32 %v7135_v20  ;;  %v5713_v0 = vadd.f32 1.0, %v15513_v47  ;;  %v5708_v56 = vadd.f32 1.0, %v5707_v8  ;;  %v3184_v43 = vmax.f32 %v15434_v27, 0.0 }
 0x739   : > { %v7053_v16 = vsel %vm15480_vm4, %v7050_v62, %v7047_v44  ;;  %v4450_v19 = vmul.f32 1.442695, %v3825_v34  ;;  %vm15527_vm5 = vcmp.lt.f32.partialorder %v5629_v59, 0.0004427343  ;;  %v4134_v30 = vmul.f32 1.442695, %v3667_v40 }
 0x73a   : > { %v7645_v39 = vadd.f32 %v7053_v16, %v3165_v58  ;;  %9658 = vlog2.f32 %v5713_v0  ;;  %v5628_v29 = vmul.f32 %v15455_v9, %v5627_v60  ;;  %v7131_v63 = vmul.f32 %v15459_v46, %v7130_v53 }
 0x73b   : > { %vm15533_vm6 = vcmp.lt.f32.partialorder %v7132_v35, 0.0004427343  ;;  %9660 = vpow2.f32 %v4450_v19  ;;  %vm15538_vm7 = vcmp.lt.f32.partialorder %v5710_v2, 0.0004427343  ;;  %v3514_v58 = vand.u32 2147483647, %v15496_v33 }
 0x73c   : > { %v9647_v17 = vpop.eup %9646  ;;  %7965 = vst [vmem:[%s11350_s2 + $0x8e8] sm:$0xff] %v7645_v39  ;;  %9662 = vpow2.f32 %v4134_v30  ;;  %v3356_v48 = vand.u32 2147483647, %v15520_v1  ;;  %v5709_v46 = vmul.f32 %v15466_v32, %v5708_v56  ;;  %v7138_v4 = vmul.f32 -0.5, %v15502_v21 }
 0x73d   : > { %v9649_v14 = vpop.eup %9648  ;;  %v5625_v9 = vmul.f32 0.6931472, %v9647_v17  ;;  %v15547_v10 = vadd.f32 %v2491_v38, %v13219_v13  ;;  %v7141_v55 = vand.u32 2147483647, %v15502_v21  ;;  %v3834_v35 = vsub.f32 0.0, %v3514_v58 }
 0x73e   : > { %v7128_v59 = vmul.f32 0.6931472, %v9649_v14  ;;  %v3676_v45 = vsub.f32 0.0, %v3356_v48  ;;  %v5716_v8 = vmul.f32 -0.5, %v15513_v47  ;;  %v15555_v57 = vadd.f32 %v2604_v26, %v14415_v5  ;;  %v1462_v38 = vld [vmem:[#allocation14 + $0x8] sm:$0x3] }
 0x73f   : > { %v9651_v52 = vpop.eup %9650  ;;  %v5631_v12 = vsel %vm15527_vm5, %v5628_v29, %v5625_v9  ;;  %v3515_v32 = vand.u32 2147483647, %v15547_v10  ;;  %v4468_v60 = vmul.f32 1.442695, %v3834_v35  ;;  %v7139_v20 = vadd.f32 1.0, %v7138_v4 }
 0x740   : > { %v15557_v13 = vpop.eup %9652  ;;  %v7487_v3 = vadd.f32 %v5631_v12, %v3007_v24  ;;  %v7134_v42 = vsel %vm15533_vm6, %v7131_v63, %v7128_v59  ;;  %v5706_v31 = vmul.f32 0.6931472, %v9651_v52  ;;  %v15567_v34 = vadd.f32 %v2608_v22, %v14371_v11 }
 0x741   : > { %v7654_v53 = vadd.f32 %v7134_v42, %v3174_v54  ;;  %v7216_v44 = vadd.f32 1.0, %v15557_v13  ;;  %9664 = vpow2.f32 %v4468_v60  ;;  %v4152_v24 = vmul.f32 1.442695, %v3676_v45 }
 0x742   : > { %7807 = vst [vmem:[%s11350_s2 + $0x3f8] sm:$0xff] %v7487_v3  ;;  %v5712_v50 = vsel %vm15538_vm7, %v5709_v46, %v5706_v31  ;;  %v3835_v40 = vsub.f32 0.0, %v3515_v32  ;;  %v5717_v41 = vadd.f32 1.0, %v5716_v8  ;;  %v5719_v54 = vand.u32 2147483647, %v15513_v47  ;;  %v2721_v8 = vpop.f32.mrf.mxu1  ;;  %v2610_v3 = vpop.f32.mrf.mxu0 }
 0x743   : > { %7974 = vst [vmem:[%s11350_s2 + $0x930] sm:$0xff] %v7654_v53  ;;  %v7496_v2 = vadd.f32 %v5712_v50, %v3016_v51  ;;  %9666 = vlog2.f32 %v7216_v44  ;;  %v15576_v0 = vpop.eup %9654  ;;  %v3026_v16 = vmax.f32 %v15447_v49, 0.0  ;;  %v3357_v19 = vand.u32 2147483647, %v15555_v57 }
 0x744   : > { %9668 = vpow2.f32 %v4152_v24  ;;  %v4470_v56 = vmul.f32 1.442695, %v3835_v40  ;;  %v7140_v28 = vmul.f32 %v15502_v21, %v7139_v20  ;;  %v5794_v30 = vadd.f32 1.0, %v15576_v0 }
 0x745   : > { %v9657_v39 = vpop.eup %9656  ;;  %7816 = vst [vmem:[%s11350_s2 + $0x440] sm:$0xff] %v7496_v2  ;;  %v3185_v7 = vmax.f32 %v15486_v15, 0.0  ;;  %v3027_v51 = vmax.f32 %v15491_v36, 0.0  ;;  %v3677_v29 = vsub.f32 0.0, %v3357_v19  ;;  %v3366_v63 = vand.u32 2147483647, %v15567_v34 }
 0x746   : > { %v7137_v26 = vmul.f32 0.6931472, %v9657_v39  ;;  %9670 = vpow2.f32 %v4470_v56  ;;  %vm7142_vm8 = vcmp.lt.f32.partialorder %v7141_v55, 0.0004427343  ;;  %v5718_v17 = vmul.f32 %v15513_v47, %v5717_v41 }
 0x747   : > { %v9659_v62 = vpop.eup %9658  ;;  %vm15587_vm9 = vcmp.lt.f32.partialorder %v5719_v54, 0.0004427343  ;;  %9672 = vlog2.f32 %v5794_v30  ;;  %v7219_v14 = vmul.f32 -0.5, %v15557_v13  ;;  %v3686_v9 = vsub.f32 0.0, %v3366_v63 }
 0x748   : > { %v15591_v21 = vpop.eup %9660  ;;  %v7143_v58 = vsel %vm7142_vm8, %v7140_v28, %v7137_v26  ;;  %v5715_v48 = vmul.f32 0.6931472, %v9659_v62  ;;  %v4154_v59 = vmul.f32 1.442695, %v3677_v29  ;;  %v18049_v55 = vsub.s32 0, %v17824_v37 }
 0x749   : > { %v15594_v46 = vpop.eup %9662  ;;  %v7655_v4 = vadd.f32 %v7143_v58, %v3175_v25  ;;  %v7225_v47 = vadd.f32 1.0, %v15591_v21  ;;  %v7222_v22 = vand.u32 2147483647, %v15557_v13  ;;  %v3194_v12 = vmax.f32 %v15496_v33, 0.0  ;;  %v2723_v58 = vpop.f32.mrf.mxu1 }
 0x74a   : > { %v15601_v35 = vrot.slane %v1462_v38, %v18049_v55  ;;  %v5721_v45 = vsel %vm15587_vm9, %v5718_v17, %v5715_v48  ;;  %v5803_v52 = vadd.f32 1.0, %v15594_v46  ;;  %v5797_v25 = vmul.f32 -0.5, %v15576_v0 }
 0x74b   : > { %7975 = vst [vmem:[%s11350_s2 + $0x938] sm:$0xff] %v7655_v4  ;;  %v7497_v23 = vadd.f32 %v5721_v45, %v3017_v6  ;;  %9674 = vlog2.f32 %v7225_v47  ;;  %v3036_v32 = vmax.f32 %v15520_v1, 0.0  ;;  %v7220_v42 = vadd.f32 1.0, %v7219_v14 }
 0x74c   : > { %v5800_v31 = vand.u32 2147483647, %v15576_v0  ;;  %9676 = vlog2.f32 %v5803_v52  ;;  %v4172_v60 = vmul.f32 1.442695, %v3686_v9  ;;  %v7228_v53 = vmul.f32 -0.5, %v15591_v21  ;;  %v2612_v52 = vpop.f32.mrf.mxu0 }
 0x74d   : > { %7817 = vst [vmem:[%s11350_s2 + $0x448] sm:$0xff] %v7497_v23  ;;  %v3195_v20 = vmax.f32 %v15547_v10, 0.0  ;;  %9678 = vpow2.f32 %v4154_v59  ;;  %v15618_v61 = vadd.f32 %v2721_v8, %v15601_v35  ;;  %vm15620_vm10 = vcmp.lt.f32.partialorder %v7222_v22, 0.0004427343 }
 0x74e   : > { %v5806_v44 = vmul.f32 -0.5, %v15594_v46  ;;  %9680 = vpow2.f32 %v4172_v60  ;;  %v15626_v50 = vadd.f32 %v2610_v3, %v14415_v5  ;;  %v15628_v24 = vpop.eup %9664  ;;  %v5798_v40 = vadd.f32 1.0, %v5797_v25 }
 0x74f   : > { %v7231_v2 = vand.u32 2147483647, %v15591_v21  ;;  %v3037_v41 = vmax.f32 %v15555_v57, 0.0  ;;  %v3208_v54 = vand.u32 2147483647, %v15618_v61  ;;  %v7221_v19 = vmul.f32 %v15557_v13, %v7220_v42  ;;  %v2725_v42 = vpop.f32.mrf.mxu1 }
 0x750   : > { %v9667_v56 = vpop.eup %9666  ;;  %vm15634_vm11 = vcmp.lt.f32.partialorder %v5800_v31, 0.0004427343  ;;  %v7306_v28 = vadd.f32 1.0, %v15628_v24  ;;  %v18054_v30 = vsub.s32 1, %v17824_v37  ;;  %v7229_v62 = vadd.f32 1.0, %v7228_v53 }
 0x751   : > { %v15643_v29 = vpop.eup %9668  ;;  %v7218_v63 = vmul.f32 0.6931472, %v9667_v56  ;;  %v5809_v17 = vand.u32 2147483647, %v15594_v46  ;;  %v3528_v18 = vsub.f32 0.0, %v3208_v54  ;;  %v5807_v48 = vadd.f32 1.0, %v5806_v44 }
 0x752   : > { %v15641_v26 = vrot.slane %v1462_v38, %v18054_v30  ;;  %9682 = vlog2.f32 %v7306_v28  ;;  %v5884_v13 = vadd.f32 1.0, %v15643_v29  ;;  %v3367_v14 = vand.u32 2147483647, %v15626_v50 }
 0x753   : > { %v15648_v9 = vpop.eup %9670  ;;  %v7224_v37 = vsel %vm15620_vm10, %v7221_v19, %v7218_v63  ;;  %v5799_v38 = vmul.f32 %v15576_v0, %v5798_v40  ;;  %vm15653_vm12 = vcmp.lt.f32.partialorder %v7231_v2, 0.0004427343  ;;  %v3856_v47 = vmul.f32 1.442695, %v3528_v18 }
 0x754   : > { %v9673_v59 = vpop.eup %9672  ;;  %v7664_v55 = vadd.f32 %v7224_v37, %v3184_v43  ;;  %9684 = vlog2.f32 %v5884_v13  ;;  %v7315_v45 = vadd.f32 1.0, %v15648_v9  ;;  %v15661_v22 = vadd.f32 %v2723_v58, %v15641_v26 }
 0x755   : > { %v5796_v8 = vmul.f32 0.6931472, %v9673_v59  ;;  %v7230_v23 = vmul.f32 %v15591_v21, %v7229_v62  ;;  %vm15664_vm13 = vcmp.lt.f32.partialorder %v5809_v17, 0.0004427343  ;;  %v7309_v25 = vmul.f32 -0.5, %v15628_v24 }
 0x756   : > { %7984 = vst [vmem:[%s11350_s2 + $0x980] sm:$0xff] %v7664_v55  ;;  %v5808_v27 = vmul.f32 %v15594_v46, %v5807_v48  ;;  %v5887_v43 = vmul.f32 -0.5, %v15643_v29  ;;  %9686 = vlog2.f32 %v7315_v45  ;;  %v3687_v3 = vsub.f32 0.0, %v3367_v14 }
 0x757   : > { %v5802_v31 = vsel %vm15634_vm11, %v5799_v38, %v5796_v8  ;;  %v7312_v21 = vand.u32 2147483647, %v15628_v24  ;;  %9688 = vpow2.f32 %v3856_v47  ;;  %v15676_v60 = vadd.f32 %v2612_v52, %v14371_v11  ;;  %v2614_v38 = vpop.f32.mrf.mxu0 }
 0x758   : > { %v9675_v53 = vpop.eup %9674  ;;  %v7506_v6 = vadd.f32 %v5802_v31, %v3026_v16  ;;  %v7318_v46 = vmul.f32 -0.5, %v15648_v9  ;;  %v4174_v44 = vmul.f32 1.442695, %v3687_v3  ;;  %v3209_v40 = vand.u32 2147483647, %v15661_v22 }
 0x759   : > { %v9677_v2 = vpop.eup %9676  ;;  %v7227_v54 = vmul.f32 0.6931472, %v9675_v53  ;;  %v7310_v56 = vadd.f32 1.0, %v7309_v25  ;;  %v5890_v19 = vand.u32 2147483647, %v15643_v29  ;;  %v15684_v39 = vadd.f32 %v2725_v42, %v15601_v35 }
 0x75a   : > { %v15686_v28 = vpop.eup %9678  ;;  %7826 = vst [vmem:[%s11350_s2 + $0x490] sm:$0xff] %v7506_v6  ;;  %v5805_v30 = vmul.f32 0.6931472, %v9677_v2  ;;  %v5888_v63 = vadd.f32 1.0, %v5887_v43  ;;  %9690 = vpow2.f32 %v4174_v44  ;;  %v3529_v49 = vsub.f32 0.0, %v3209_v40  ;;  %v2618_v6 = vpop.f32.mrf.mxu0 }
 0x75b   : > { %v15689_v16 = vpop.eup %9680  ;;  %v7233_v62 = vsel %vm15653_vm12, %v7230_v23, %v7227_v54  ;;  %v7321_v17 = vand.u32 2147483647, %v15648_v9  ;;  %v5893_v18 = vadd.f32 1.0, %v15686_v28  ;;  %v3376_v58 = vand.u32 2147483647, %v15676_v60  ;;  %v2727_v23 = vpop.f32.mrf.mxu1 }
 0x75c   : > { %v7665_v48 = vadd.f32 %v7233_v62, %v3185_v7  ;;  %v5811_v13 = vsel %vm15664_vm13, %v5808_v27, %v5805_v30  ;;  %v7319_v14 = vadd.f32 1.0, %v7318_v46  ;;  %v5974_v37 = vadd.f32 1.0, %v15689_v16  ;;  %v2620_v47 = vpop.f32.mrf.mxu0 }
 0x75d   : > { %v7507_v4 = vadd.f32 %v5811_v13, %v3027_v51  ;;  %vm15703_vm14 = vcmp.lt.f32.partialorder %v7312_v21, 0.0004427343  ;;  %9692 = vlog2.f32 %v5893_v18  ;;  %v3046_v59 = vmax.f32 %v15567_v34, 0.0 }
 0x75e   : > { %7985 = vst [vmem:[%s11350_s2 + $0x988] sm:$0xff] %v7665_v48  ;;  %v7311_v15 = vmul.f32 %v15628_v24, %v7310_v56  ;;  %vm15710_vm15 = vcmp.lt.f32.partialorder %v5890_v19, 0.0004427343  ;;  %9694 = vlog2.f32 %v5974_v37  ;;  %v3858_v55 = vmul.f32 1.442695, %v3529_v49 }
 0x75f   : > { %v9683_v45 = vpop.eup %9682  ;;  %7827 = vst [vmem:[%s11350_s2 + $0x498] sm:$0xff] %v7507_v4  ;;  %v5889_v36 = vmul.f32 %v15643_v29, %v5888_v63  ;;  %v3696_v51 = vsub.f32 0.0, %v3376_v58  ;;  %v3218_v52 = vand.u32 2147483647, %v15684_v39  ;;  %v15718_v8 = vadd.f32 %v2614_v38, %v14415_v5 }
 0x760   : > { %v7308_v0 = vmul.f32 0.6931472, %v9683_v45  ;;  %v7320_v24 = vmul.f32 %v15648_v9, %v7319_v14  ;;  %vm15721_vm0 = vcmp.lt.f32.partialorder %v7321_v17, 0.0004427343  ;;  %9696 = vpow2.f32 %v3858_v55  ;;  %v2731_v14 = vpop.f32.mrf.mxu1 }
 0x761   : > { %v9685_v27 = vpop.eup %9684  ;;  %v5896_v43 = vmul.f32 -0.5, %v15686_v28  ;;  %v4192_v3 = vmul.f32 1.442695, %v3696_v51  ;;  %v3538_v29 = vsub.f32 0.0, %v3218_v52  ;;  %v3377_v42 = vand.u32 2147483647, %v15718_v8 }
 0x762   : > { %v7314_v31 = vsel %vm15703_vm14, %v7311_v15, %v7308_v0  ;;  %v5886_v21 = vmul.f32 0.6931472, %v9685_v27  ;;  %v5899_v53 = vand.u32 2147483647, %v15686_v28  ;;  %v15731_v9 = vadd.f32 %v2727_v23, %v15641_v26 }
 0x763   : > { %v9687_v46 = vpop.eup %9686  ;;  %v7674_v44 = vadd.f32 %v7314_v31, %v3194_v12  ;;  %9698 = vpow2.f32 %v4192_v3  ;;  %v3876_v40 = vmul.f32 1.442695, %v3538_v29  ;;  %v3697_v2 = vsub.f32 0.0, %v3377_v42  ;;  %v2733_v31 = vpop.f32.mrf.mxu1 }
 0x764   : > { %v15735_v54 = vpop.eup %9688  ;;  %v5892_v56 = vsel %vm15710_vm15, %v5889_v36, %v5886_v21  ;;  %v7317_v19 = vmul.f32 0.6931472, %v9687_v46  ;;  %v5977_v30 = vmul.f32 -0.5, %v15689_v16  ;;  %v3219_v63 = vand.u32 2147483647, %v15731_v9 }
 0x765   : > { %7994 = vst [vmem:[%s11350_s2 + $0x9d0] sm:$0xff] %v7674_v44  ;;  %v7516_v49 = vadd.f32 %v5892_v56, %v3036_v32  ;;  %v5897_v33 = vadd.f32 1.0, %v5896_v43  ;;  %v4552_v12 = vadd.f32 1.0, %v15735_v54  ;;  %v15746_v62 = vadd.f32 %v2618_v6, %v14371_v11 }
 0x766   : > { %v7323_v17 = vsel %vm15721_vm0, %v7320_v24, %v7317_v19  ;;  %9700 = vpow2.f32 %v3876_v40  ;;  %v4194_v18 = vmul.f32 1.442695, %v3697_v2  ;;  %v3539_v58 = vsub.f32 0.0, %v3219_v63 }
 0x767   : > { %v15750_v48 = vpop.eup %9690  ;;  %7836 = vst [vmem:[%s11350_s2 + $0x4e0] sm:$0xff] %v7516_v49  ;;  %v7675_v1 = vadd.f32 %v7323_v17, %v3195_v20  ;;  %v2888_v32 = vmax.f32 %v15618_v61, 0.0  ;;  %9702 = vlog2.f32 %v4552_v12  ;;  %v3047_v13 = vmax.f32 %v15626_v50, 0.0 }
 0x768   : > { %v5978_v37 = vadd.f32 1.0, %v5977_v30  ;;  %v5983_v38 = vadd.f32 1.0, %v15750_v48  ;;  %v2889_v4 = vmax.f32 %v15661_v22, 0.0  ;;  %9704 = vpow2.f32 %v4194_v18 }
 0x769   : > { %7995 = vst [vmem:[%s11350_s2 + $0x9d8] sm:$0xff] %v7675_v1  ;;  %v5980_v15 = vand.u32 2147483647, %v15689_v16  ;;  %v3878_v7 = vmul.f32 1.442695, %v3539_v58  ;;  %v5898_v55 = vmul.f32 %v15686_v28, %v5897_v33  ;;  %v15768_v36 = vadd.f32 %v2731_v14, %v15601_v35 }
 0x76a   : > { %v3386_v10 = vand.u32 2147483647, %v15746_v62  ;;  %v9693_v20 = vpop.eup %9692  ;;  %vm15763_vm1 = vcmp.lt.f32.partialorder %v5899_v53, 0.0004427343  ;;  %9706 = vlog2.f32 %v5983_v38  ;;  %v15771_v0 = vadd.f32 %v2620_v47, %v14415_v5 }
 0x76b   : > { %v9695_v51 = vpop.eup %9694  ;;  %v5895_v52 = vmul.f32 0.6931472, %v9693_v20  ;;  %9708 = vpow2.f32 %v3878_v7  ;;  %v5979_v25 = vmul.f32 %v15689_v16, %v5978_v37  ;;  %v4555_v28 = vmul.f32 -0.5, %v15735_v54 }
 0x76c   : > { %v3706_v23 = vsub.f32 0.0, %v3386_v10  ;;  %v5976_v24 = vmul.f32 0.6931472, %v9695_v51  ;;  %v3228_v27 = vand.u32 2147483647, %v15768_v36  ;;  %v5986_v53 = vmul.f32 -0.5, %v15750_v48 }
 0x76d   : > { %v15776_v43 = vpop.eup %9696  ;;  %v5901_v3 = vsel %vm15763_vm1, %v5898_v55, %v5895_v52  ;;  %vm5981_vm2 = vcmp.lt.f32.partialorder %v5980_v15, 0.0004427343  ;;  %v3387_v42 = vand.u32 2147483647, %v15771_v0  ;;  %v4558_v44 = vand.u32 2147483647, %v15735_v54 }
 0x76e   : > { %v4212_v29 = vmul.f32 1.442695, %v3706_v23  ;;  %v7517_v21 = vadd.f32 %v5901_v3, %v3037_v41  ;;  %v5982_v16 = vsel %vm5981_vm2, %v5979_v25, %v5976_v24  ;;  %v4561_v6 = vadd.f32 1.0, %v15776_v43 }
 0x76f   : > { %v7526_v46 = vadd.f32 %v5982_v16, %v3046_v59  ;;  %v3548_v40 = vsub.f32 0.0, %v3228_v27  ;;  %v4556_v56 = vadd.f32 1.0, %v4555_v28  ;;  %v3707_v19 = vsub.f32 0.0, %v3387_v42  ;;  %v2622_v28 = vpop.f32.mrf.mxu0 }
 0x770   : > { %9710 = vpow2.f32 %v4212_v29  ;;  %v15788_v2 = vpop.eup %9698  ;;  %7837 = vst [vmem:[%s11350_s2 + $0x4e8] sm:$0xff] %v7517_v21  ;;  %v15792_v57 = vadd.f32 %v2733_v31, %v15641_v26  ;;  %v5989_v41 = vand.u32 2147483647, %v15750_v48  ;;  %v3056_v30 = vmax.f32 %v15676_v60, 0.0 }
 0x771   : > { %9712 = vlog2.f32 %v4561_v6  ;;  %7846 = vst [vmem:[%s11350_s2 + $0x530] sm:$0xff] %v7526_v46  ;;  %v6064_v34 = vadd.f32 1.0, %v15788_v2  ;;  %v2898_v59 = vmax.f32 %v15684_v39, 0.0  ;;  %v5987_v63 = vadd.f32 1.0, %v5986_v53  ;;  %v2735_v53 = vpop.f32.mrf.mxu1 }
 0x772   : > { %v3057_v49 = vmax.f32 %v15718_v8, 0.0  ;;  %v3896_v33 = vmul.f32 1.442695, %v3548_v40  ;;  %v4214_v12 = vmul.f32 1.442695, %v3707_v19  ;;  %v2899_v58 = vmax.f32 %v15731_v9, 0.0 }
 0x773   : > { %v15800_v17 = vpop.eup %9700  ;;  %vm15802_vm3 = vcmp.lt.f32.partialorder %v4558_v44, 0.0004427343  ;;  %9714 = vlog2.f32 %v6064_v34  ;;  %v3229_v1 = vand.u32 2147483647, %v15792_v57  ;;  %v4557_v37 = vmul.f32 %v15735_v54, %v4556_v56 }
 0x774   : > { %v9703_v14 = vpop.eup %9702  ;;  %v4642_v38 = vadd.f32 1.0, %v15800_v17  ;;  %v3066_v47 = vmax.f32 %v15746_v62, 0.0  ;;  %9716 = vpow2.f32 %v3896_v33  ;;  %vm15813_vm4 = vcmp.lt.f32.partialorder %v5989_v41, 0.0004427343 }
 0x775   : > { %v15811_v15 = vpop.eup %9704  ;;  %v4554_v7 = vmul.f32 0.6931472, %v9703_v14  ;;  %9718 = vpow2.f32 %v4214_v12  ;;  %v3549_v20 = vsub.f32 0.0, %v3229_v1  ;;  %v5988_v55 = vmul.f32 %v15750_v48, %v5987_v63 }
 0x776   : > { %v4564_v45 = vmul.f32 -0.5, %v15776_v43  ;;  %9720 = vlog2.f32 %v4642_v38  ;;  %v6073_v54 = vadd.f32 1.0, %v15811_v15  ;;  %v6067_v23 = vmul.f32 -0.5, %v15788_v2 }
 0x777   : > { %v9707_v51 = vpop.eup %9706  ;;  %v4560_v52 = vsel %vm15802_vm3, %v4557_v37, %v4554_v7  ;;  %v2908_v24 = vmax.f32 %v15768_v36, 0.0  ;;  %v3898_v25 = vmul.f32 1.442695, %v3549_v20  ;;  %v4645_v29 = vmul.f32 -0.5, %v15800_v17 }
 0x778   : > { %v15824_v27 = vpop.eup %9708  ;;  %v7368_v48 = vadd.f32 %v4560_v52, %v2888_v32  ;;  %v5985_v3 = vmul.f32 0.6931472, %v9707_v51  ;;  %9722 = vlog2.f32 %v6073_v54  ;;  %v4567_v42 = vand.u32 2147483647, %v15776_v43  ;;  %v2624_v52 = vpop.f32.mrf.mxu0 }
 0x779   : > { %v6070_v31 = vand.u32 2147483647, %v15788_v2  ;;  %v4651_v21 = vadd.f32 1.0, %v15824_v27  ;;  %v3067_v16 = vmax.f32 %v15771_v0, 0.0  ;;  %v4565_v61 = vadd.f32 1.0, %v4564_v45 }
 0x77a   : > { %7688 = vst [vmem:[%s11350_s2 + $0x40] sm:$0xff] %v7368_v48  ;;  %v5991_v6 = vsel %vm15813_vm4, %v5988_v55, %v5985_v3  ;;  %9724 = vpow2.f32 %v3898_v25  ;;  %v15837_v32 = vadd.f32 %v2622_v28, %v14371_v11  ;;  %v6068_v44 = vadd.f32 1.0, %v6067_v23 }
 0x77b   : > { %v7527_v46 = vadd.f32 %v5991_v6, %v3047_v13  ;;  %v4648_v40 = vand.u32 2147483647, %v15800_v17  ;;  %9726 = vlog2.f32 %v4651_v21  ;;  %v4646_v19 = vadd.f32 1.0, %v4645_v29  ;;  %v2737_v6 = vpop.f32.mrf.mxu1 }
 0x77c   : > { %v6076_v41 = vmul.f32 -0.5, %v15811_v15  ;;  %v3396_v34 = vand.u32 2147483647, %v15837_v32  ;;  %v15847_v63 = vadd.f32 %v2735_v53, %v15601_v35  ;;  %vm15850_vm5 = vcmp.lt.f32.partialorder %v4567_v42, 0.0004427343 }
 0x77d   : > { %v15842_v56 = vpop.eup %9710  ;;  %7847 = vst [vmem:[%s11350_s2 + $0x538] sm:$0xff] %v7527_v46  ;;  %vm15854_vm6 = vcmp.lt.f32.partialorder %v6070_v31, 0.0004427343  ;;  %v4654_v13 = vmul.f32 -0.5, %v15824_v27  ;;  %v4566_v14 = vmul.f32 %v15776_v43, %v4565_v61  ;;  %v6069_v7 = vmul.f32 %v15788_v2, %v6068_v44  ;;  %v2741_v39 = vpop.f32.mrf.mxu1 }
 0x77e   : > { %v9713_v33 = vpop.eup %9712  ;;  %v6154_v18 = vadd.f32 1.0, %v15842_v56  ;;  %v3716_v37 = vsub.f32 0.0, %v3396_v34  ;;  %v3238_v38 = vand.u32 2147483647, %v15847_v63  ;;  %vm15863_vm7 = vcmp.lt.f32.partialorder %v4648_v40, 0.0004427343 }
 0x77f   : > { %v4563_v1 = vmul.f32 0.6931472, %v9713_v33  ;;  %v6079_v20 = vand.u32 2147483647, %v15811_v15  ;;  %v4647_v54 = vmul.f32 %v15800_v17, %v4646_v19  ;;  %v6077_v43 = vadd.f32 1.0, %v6076_v41  ;;  %v2628_v33 = vpop.f32.mrf.mxu0 }
 0x780   : > { %9728 = vlog2.f32 %v6154_v18  ;;  %v9715_v55 = vpop.eup %9714  ;;  %v4232_v51 = vmul.f32 1.442695, %v3716_v37  ;;  %v4655_v28 = vadd.f32 1.0, %v4654_v13  ;;  %v4657_v48 = vand.u32 2147483647, %v15824_v27 }
 0x781   : > { %v4569_v45 = vsel %vm15850_vm5, %v4566_v14, %v4563_v1  ;;  %v15871_v23 = vpop.eup %9716  ;;  %v6066_v25 = vmul.f32 0.6931472, %v9715_v55  ;;  %v6157_v29 = vmul.f32 -0.5, %v15842_v56  ;;  %v3558_v17 = vsub.f32 0.0, %v3238_v38 }
 0x782   : > { %v7369_v2 = vadd.f32 %v4569_v45, %v2889_v4  ;;  %v15876_v3 = vpop.eup %9718  ;;  %v4732_v42 = vadd.f32 1.0, %v15871_v23  ;;  %9730 = vpow2.f32 %v4232_v51  ;;  %v6160_v22 = vand.u32 2147483647, %v15842_v56  ;;  %v2630_v45 = vpop.f32.mrf.mxu0 }
 0x783   : > { %v9721_v31 = vpop.eup %9720  ;;  %v6072_v21 = vsel %vm15854_vm6, %v6069_v7, %v6066_v25  ;;  %v6163_v4 = vadd.f32 1.0, %v15876_v3  ;;  %v15886_v53 = vadd.f32 %v2624_v52, %v14415_v5  ;;  %vm15890_vm8 = vcmp.lt.f32.partialorder %v6079_v20, 0.0004427343 }
 0x784   : > { %7689 = vst [vmem:[%s11350_s2 + $0x48] sm:$0xff] %v7369_v2  ;;  %v7536_v61 = vadd.f32 %v6072_v21, %v3056_v30  ;;  %v4644_v46 = vmul.f32 0.6931472, %v9721_v31  ;;  %9732 = vlog2.f32 %v4732_v42  ;;  %v6078_v19 = vmul.f32 %v15811_v15, %v6077_v43 }
 0x785   : > { %v9723_v40 = vpop.eup %9722  ;;  %v4656_v41 = vmul.f32 %v15824_v27, %v4655_v28  ;;  %vm15896_vm9 = vcmp.lt.f32.partialorder %v4657_v48, 0.0004427343  ;;  %9734 = vlog2.f32 %v6163_v4  ;;  %v3916_v12 = vmul.f32 1.442695, %v3558_v17 }
 0x786   : > { %7856 = vst [vmem:[%s11350_s2 + $0x580] sm:$0xff] %v7536_v61  ;;  %v4650_v60 = vsel %vm15863_vm7, %v4647_v54, %v4644_v46  ;;  %v6075_v30 = vmul.f32 0.6931472, %v9723_v40  ;;  %v15904_v50 = vadd.f32 %v2737_v6, %v15641_v26  ;;  %v6158_v27 = vadd.f32 1.0, %v6157_v29 }
 0x787   : > { %v15906_v13 = vpop.eup %9724  ;;  %v7378_v15 = vadd.f32 %v4650_v60, %v2898_v59  ;;  %vm15910_vm10 = vcmp.lt.f32.partialorder %v6160_v22, 0.0004427343  ;;  %v3397_v1 = vand.u32 2147483647, %v15886_v53  ;;  %v4735_v38 = vmul.f32 -0.5, %v15871_v23  ;;  %v2743_v22 = vpop.f32.mrf.mxu1 }
 0x788   : > { %v9727_v14 = vpop.eup %9726  ;;  %v6081_v37 = vsel %vm15890_vm8, %v6078_v19, %v6075_v30  ;;  %v4738_v7 = vand.u32 2147483647, %v15871_v23  ;;  %v4741_v10 = vadd.f32 1.0, %v15906_v13  ;;  %9736 = vpow2.f32 %v3916_v12 }
 0x789   : > { %7698 = vst [vmem:[%s11350_s2 + $0x90] sm:$0xff] %v7378_v15  ;;  %v7537_v59 = vadd.f32 %v6081_v37, %v3057_v49  ;;  %v4653_v20 = vmul.f32 0.6931472, %v9727_v14  ;;  %v3717_v55 = vsub.f32 0.0, %v3397_v1  ;;  %v6166_v54 = vmul.f32 -0.5, %v15876_v3 }
 0x78a   : > { %v6169_v43 = vand.u32 2147483647, %v15876_v3  ;;  %9738 = vlog2.f32 %v4741_v10  ;;  %v3239_v51 = vand.u32 2147483647, %v15904_v50  ;;  %v15930_v8 = vadd.f32 %v2628_v33, %v14371_v11 }
 0x78b   : > { %7857 = vst [vmem:[%s11350_s2 + $0x588] sm:$0xff] %v7537_v59  ;;  %v4659_v52 = vsel %vm15896_vm9, %v4656_v41, %v4653_v20  ;;  %v4234_v2 = vmul.f32 1.442695, %v3717_v55  ;;  %v15933_v49 = vadd.f32 %v2741_v39, %v15601_v35  ;;  %v6159_v48 = vmul.f32 %v15842_v56, %v6158_v27 }
 0x78c   : > { %v7379_v28 = vadd.f32 %v4659_v52, %v2899_v58  ;;  %v3559_v29 = vsub.f32 0.0, %v3239_v51  ;;  %v15939_v42 = vadd.f32 %v2630_v45, %v14415_v5  ;;  %vm15941_vm11 = vcmp.lt.f32.partialorder %v4738_v7, 0.0004427343  ;;  %v2745_v7 = vpop.f32.mrf.mxu1 }
 0x78d   : > { %v9729_v25 = vpop.eup %9728  ;;  %9740 = vpow2.f32 %v4234_v2  ;;  %v3406_v21 = vand.u32 2147483647, %v15930_v8  ;;  %v4736_v4 = vadd.f32 1.0, %v4735_v38  ;;  %v6167_v6 = vadd.f32 1.0, %v6166_v54 }
 0x78e   : > { %v6156_v17 = vmul.f32 0.6931472, %v9729_v25  ;;  %7699 = vst [vmem:[%s11350_s2 + $0x98] sm:$0xff] %v7379_v28  ;;  %v3918_v9 = vmul.f32 1.442695, %v3559_v29  ;;  %v4744_v41 = vmul.f32 -0.5, %v15906_v13  ;;  %v15962_v33 = vadd.f32 %v2743_v22, %v15641_v26 }
 0x78f   : > { %v3248_v58 = vand.u32 2147483647, %v15933_v49  ;;  %v15948_v56 = vpop.eup %9730  ;;  %vm15952_vm12 = vcmp.lt.f32.partialorder %v6169_v43, 0.0004427343  ;;  %v3726_v44 = vsub.f32 0.0, %v3406_v21  ;;  %v4737_v1 = vmul.f32 %v15871_v23, %v4736_v4 }
 0x790   : > { %v6162_v61 = vsel %vm15910_vm10, %v6159_v48, %v6156_v17  ;;  %v3407_v40 = vand.u32 2147483647, %v15939_v42  ;;  %v6244_v34 = vadd.f32 1.0, %v15948_v56  ;;  %9742 = vpow2.f32 %v3918_v9 }
 0x791   : > { %v7546_v19 = vadd.f32 %v6162_v61, %v3066_v47  ;;  %v9733_v60 = vpop.eup %9732  ;;  %v4252_v30 = vmul.f32 1.442695, %v3726_v44  ;;  %v3568_v12 = vsub.f32 0.0, %v3248_v58  ;;  %v6168_v62 = vmul.f32 %v15876_v3, %v6167_v6  ;;  %v2632_v47 = vpop.f32.mrf.mxu0 }
 0x792   : > { %v3727_v15 = vsub.f32 0.0, %v3407_v40  ;;  %v9735_v27 = vpop.eup %9734  ;;  %v4734_v18 = vmul.f32 0.6931472, %v9733_v60  ;;  %9744 = vlog2.f32 %v6244_v34  ;;  %v4745_v39 = vadd.f32 1.0, %v4744_v41 }
 0x793   : > { %7866 = vst [vmem:[%s11350_s2 + $0x5d0] sm:$0xff] %v7546_v19  ;;  %v6165_v14 = vmul.f32 0.6931472, %v9735_v27  ;;  %9746 = vpow2.f32 %v4252_v30  ;;  %v3936_v37 = vmul.f32 1.442695, %v3568_v12  ;;  %v15976_v55 = vadd.f32 %v2632_v47, %v14371_v11  ;;  %v2634_v36 = vpop.f32.mrf.mxu0 }
 0x794   : > { %v4254_v38 = vmul.f32 1.442695, %v3727_v15  ;;  %v4740_v10 = vsel %vm15941_vm11, %v4737_v1, %v4734_v18  ;;  %v4747_v59 = vand.u32 2147483647, %v15906_v13  ;;  %v3249_v20 = vand.u32 2147483647, %v15962_v33 }
 0x795   : > { %v7388_v23 = vadd.f32 %v4740_v10, %v2908_v24  ;;  %v6171_v3 = vsel %vm15952_vm12, %v6168_v62, %v6165_v14  ;;  %9748 = vpow2.f32 %v3936_v37  ;;  %v15978_v45 = vpop.eup %9736  ;;  %v15983_v51 = vadd.f32 %v2745_v7, %v15601_v35 }
 0x796   : > { %v7547_v54 = vadd.f32 %v6171_v3, %v3067_v16  ;;  %9750 = vpow2.f32 %v4254_v38  ;;  %v3569_v43 = vsub.f32 0.0, %v3249_v20  ;;  %v2909_v52 = vmax.f32 %v15792_v57, 0.0 }
 0x797   : > { %v9739_v24 = vpop.eup %9738  ;;  %7708 = vst [vmem:[%s11350_s2 + $0xe0] sm:$0xff] %v7388_v23  ;;  %v3076_v2 = vmax.f32 %v15837_v32, 0.0  ;;  %v6247_v25 = vmul.f32 -0.5, %v15948_v56  ;;  %v4822_v28 = vadd.f32 1.0, %v15978_v45  ;;  %v4746_v0 = vmul.f32 %v15906_v13, %v4745_v39 }
 0x798   : > { %7867 = vst [vmem:[%s11350_s2 + $0x5d8] sm:$0xff] %v7547_v54  ;;  %v4743_v48 = vmul.f32 0.6931472, %v9739_v24  ;;  %v3938_v16 = vmul.f32 1.442695, %v3569_v43  ;;  %v2918_v17 = vmax.f32 %v15847_v63, 0.0  ;;  %v15995_v57 = vadd.f32 %v2634_v36, %v14415_v5  ;;  %v2747_v54 = vpop.f32.mrf.mxu1 }
 0x799   : > { %v3416_v29 = vand.u32 2147483647, %v15976_v55  ;;  %vm4748_vm13 = vcmp.lt.f32.partialorder %v4747_v59, 0.0004427343  ;;  %9752 = vlog2.f32 %v4822_v28  ;;  %v3258_v22 = vand.u32 2147483647, %v15983_v51 }
 0x79a   : > { %v15997_v32 = vpop.eup %9740  ;;  %v4749_v31 = vsel %vm4748_vm13, %v4746_v0, %v4743_v48  ;;  %9754 = vpow2.f32 %v3938_v16  ;;  %v6248_v13 = vadd.f32 1.0, %v6247_v25  ;;  %v6250_v6 = vand.u32 2147483647, %v15948_v56  ;;  %v2638_v16 = vpop.f32.mrf.mxu0 }
 0x79b   : > { %v3736_v21 = vsub.f32 0.0, %v3416_v29  ;;  %v7389_v4 = vadd.f32 %v4749_v31, %v2909_v52  ;;  %v6253_v9 = vadd.f32 1.0, %v15997_v32  ;;  %v3077_v58 = vmax.f32 %v15886_v53, 0.0 }
 0x79c   : > { %v2919_v61 = vmax.f32 %v15904_v50, 0.0  ;;  %v3578_v44 = vsub.f32 0.0, %v3258_v22  ;;  %v3086_v40 = vmax.f32 %v15930_v8, 0.0  ;;  %v2928_v19 = vmax.f32 %v15933_v49, 0.0 }
 0x79d   : > { %v4272_v46 = vmul.f32 1.442695, %v3736_v21  ;;  %7709 = vst [vmem:[%s11350_s2 + $0xe8] sm:$0xff] %v7389_v4  ;;  %9756 = vlog2.f32 %v6253_v9  ;;  %v3417_v41 = vand.u32 2147483647, %v15995_v57  ;;  %v9743_v34 = vpop.eup %9742  ;;  %v4825_v60 = vmul.f32 -0.5, %v15978_v45  ;;  %v2640_v4 = vpop.f32.mrf.mxu0 }
 0x79e   : > { %v3087_v30 = vmax.f32 %v15939_v42, 0.0  ;;  %v3956_v12 = vmul.f32 1.442695, %v3578_v44  ;;  %v6249_v27 = vmul.f32 %v15948_v56, %v6248_v13  ;;  %vm16011_vm14 = vcmp.lt.f32.partialorder %v6250_v6, 0.0004427343 }
 0x79f   : > { %9758 = vpow2.f32 %v4272_v46  ;;  %v9745_v15 = vpop.eup %9744  ;;  %v6256_v1 = vmul.f32 -0.5, %v15997_v32  ;;  %v4831_v62 = vadd.f32 1.0, %v9743_v34  ;;  %v4828_v37 = vand.u32 2147483647, %v15978_v45 }
 0x7a0   : > { %v9747_v47 = vpop.eup %9746  ;;  %v6246_v14 = vmul.f32 0.6931472, %v9745_v15  ;;  %9760 = vpow2.f32 %v3956_v12  ;;  %v3737_v38 = vsub.f32 0.0, %v3417_v41  ;;  %v4834_v7 = vmul.f32 -0.5, %v9743_v34 }
 0x7a1   : > { %9762 = vlog2.f32 %v4831_v62  ;;  %v6334_v10 = vadd.f32 1.0, %v9747_v47  ;;  %v2929_v39 = vmax.f32 %v15962_v33, 0.0  ;;  %v4826_v20 = vadd.f32 1.0, %v4825_v60 }
 0x7a2   : > { %v16018_v59 = vpop.eup %9748  ;;  %v6252_v56 = vsel %vm16011_vm14, %v6249_v27, %v6246_v14  ;;  %v6259_v23 = vand.u32 2147483647, %v15997_v32  ;;  %v4274_v3 = vmul.f32 1.442695, %v3737_v38  ;;  %v6257_v24 = vadd.f32 1.0, %v6256_v1  ;;  %v2751_v1 = vpop.f32.mrf.mxu1 }
 0x7a3   : > { %v16023_v43 = vpop.eup %9750  ;;  %v7556_v36 = vadd.f32 %v6252_v56, %v3076_v2  ;;  %9764 = vlog2.f32 %v6334_v10  ;;  %v4912_v52 = vadd.f32 1.0, %v16018_v59  ;;  %vm16026_vm15 = vcmp.lt.f32.partialorder %v4828_v37, 0.0004427343 }
 0x7a4   : > { %v4837_v28 = vand.u32 2147483647, %v9743_v34  ;;  %v6337_v48 = vmul.f32 -0.5, %v9747_v47  ;;  %v3096_v0 = vmax.f32 %v15976_v55, 0.0  ;;  %v4835_v29 = vadd.f32 1.0, %v4834_v7 }
 0x7a5   : > { %7876 = vst [vmem:[%s11350_s2 + $0x620] sm:$0xff] %v7556_v36  ;;  %9766 = vlog2.f32 %v4912_v52  ;;  %v6343_v31 = vadd.f32 1.0, %v16023_v43  ;;  %v16034_v2 = vadd.f32 %v2747_v54, %v15641_v26  ;;  %v4827_v22 = vmul.f32 %v15978_v45, %v4826_v20 }
 0x7a6   : > { %v9753_v21 = vpop.eup %9752  ;;  %vm16037_vm0 = vcmp.lt.f32.partialorder %v6259_v23, 0.0004427343  ;;  %v2938_v13 = vmax.f32 %v15983_v51, 0.0  ;;  %9768 = vpow2.f32 %v4274_v3  ;;  %v6258_v46 = vmul.f32 %v15997_v32, %v6257_v24 }
 0x7a7   : > { %v16042_v6 = vpop.eup %9754  ;;  %v4824_v9 = vmul.f32 0.6931472, %v9753_v21  ;;  %9770 = vlog2.f32 %v6343_v31  ;;  %v16046_v44 = vadd.f32 %v2638_v16, %v14371_v11  ;;  %vm16048_vm1 = vcmp.lt.f32.partialorder %v4837_v28, 0.0004427343 }
 0x7a8   : > { %v6338_v45 = vadd.f32 1.0, %v6337_v48  ;;  %v6340_v60 = vand.u32 2147483647, %v9747_v47  ;;  %v4921_v12 = vadd.f32 1.0, %v16042_v6  ;;  %v4836_v27 = vmul.f32 %v9743_v34, %v4835_v29 }
 0x7a9   : > { %v4830_v15 = vsel %vm16026_vm15, %v4827_v22, %v4824_v9  ;;  %v4915_v18 = vmul.f32 -0.5, %v16018_v59  ;;  %v3259_v32 = vand.u32 2147483647, %v16034_v2  ;;  %v4918_v37 = vand.u32 2147483647, %v16018_v59 }
 0x7aa   : > { %v9757_v62 = vpop.eup %9756  ;;  %v7398_v14 = vadd.f32 %v4830_v15, %v2918_v17  ;;  %v6349_v38 = vand.u32 2147483647, %v16023_v43  ;;  %9772 = vlog2.f32 %v4921_v12  ;;  %v6346_v56 = vmul.f32 -0.5, %v16023_v43 }
 0x7ab   : > { %v6255_v10 = vmul.f32 0.6931472, %v9757_v62  ;;  %v3579_v34 = vsub.f32 0.0, %v3259_v32  ;;  %v3426_v20 = vand.u32 2147483647, %v16046_v44  ;;  %v6339_v23 = vmul.f32 %v9747_v47, %v6338_v45 }
 0x7ac   : > { %v16061_v7 = vpop.eup %9758  ;;  %7718 = vst [vmem:[%s11350_s2 + $0x130] sm:$0xff] %v7398_v14  ;;  %vm16066_vm2 = vcmp.lt.f32.partialorder %v6340_v60, 0.0004427343  ;;  %v16072_v17 = vadd.f32 %v2751_v1, %v15601_v35  ;;  %v4916_v24 = vadd.f32 1.0, %v4915_v18  ;;  %vm16080_vm3 = vcmp.lt.f32.partialorder %v4918_v37, 0.0004427343 }
 0x7ad   : > { %v6424_v63 = vadd.f32 1.0, %v16061_v7  ;;  %v16074_v54 = vpop.eup %9760  ;;  %v6261_v36 = vsel %vm16037_vm0, %v6258_v46, %v6255_v10  ;;  %v3958_v52 = vmul.f32 1.442695, %v3579_v34  ;;  %v3746_v25 = vsub.f32 0.0, %v3426_v20 }
 0x7ae   : > { %v9763_v28 = vpop.eup %9762  ;;  %v7557_v47 = vadd.f32 %v6261_v36, %v3077_v58  ;;  %v4924_v16 = vmul.f32 -0.5, %v16042_v6  ;;  %v6347_v31 = vadd.f32 1.0, %v6346_v56  ;;  %vm16085_vm4 = vcmp.lt.f32.partialorder %v6349_v38, 0.0004427343  ;;  %v2642_v38 = vpop.f32.mrf.mxu0 }
 0x7af   : > { %9774 = vlog2.f32 %v6424_v63  ;;  %v4833_v29 = vmul.f32 0.6931472, %v9763_v28  ;;  %v5002_v22 = vadd.f32 1.0, %v16074_v54  ;;  %v4927_v53 = vand.u32 2147483647, %v16042_v6 }
 0x7b0   : > { %v9765_v9 = vpop.eup %9764  ;;  %7877 = vst [vmem:[%s11350_s2 + $0x628] sm:$0xff] %v7557_v47  ;;  %9776 = vpow2.f32 %v3958_v52  ;;  %v4292_v58 = vmul.f32 1.442695, %v3746_v25  ;;  %v3268_v46 = vand.u32 2147483647, %v16072_v17  ;;  %v4917_v12 = vmul.f32 %v16018_v59, %v4916_v24  ;;  %v2753_v59 = vpop.f32.mrf.mxu1 }
 0x7b1   : > { %v4839_v45 = vsel %vm16048_vm1, %v4836_v27, %v4833_v29  ;;  %v6336_v60 = vmul.f32 0.6931472, %v9765_v9  ;;  %9778 = vlog2.f32 %v5002_v22  ;;  %v4925_v32 = vadd.f32 1.0, %v4924_v16  ;;  %v2644_v47 = vpop.f32.mrf.mxu0 }
 0x7b2   : > { %v9767_v15 = vpop.eup %9766  ;;  %v7399_v18 = vadd.f32 %v4839_v45, %v2919_v61  ;;  %9780 = vpow2.f32 %v4292_v58  ;;  %v3588_v1 = vsub.f32 0.0, %v3268_v46  ;;  %v6348_v27 = vmul.f32 %v16023_v43, %v6347_v31  ;;  %v2755_v28 = vpop.f32.mrf.mxu1 }
 0x7b3   : > { %v16098_v62 = vpop.eup %9768  ;;  %v6342_v14 = vsel %vm16066_vm2, %v6339_v23, %v6336_v60  ;;  %v4914_v41 = vmul.f32 0.6931472, %v9767_v15  ;;  %v16104_v37 = vadd.f32 %v2640_v4, %v14415_v5  ;;  %vm16109_vm5 = vcmp.lt.f32.partialorder %v4927_v53, 0.0004427343 }
 0x7b4   : > { %v9771_v10 = vpop.eup %9770  ;;  %7719 = vst [vmem:[%s11350_s2 + $0x138] sm:$0xff] %v7399_v18  ;;  %v7566_v50 = vadd.f32 %v6342_v14, %v3086_v40  ;;  %v6427_v56 = vmul.f32 -0.5, %v16061_v7  ;;  %v6433_v34 = vadd.f32 1.0, %v16098_v62  ;;  %v5005_v23 = vmul.f32 -0.5, %v16074_v54 }
 0x7b5   : > { %v4920_v43 = vsel %vm16080_vm3, %v4917_v12, %v4914_v41  ;;  %v6345_v20 = vmul.f32 0.6931472, %v9771_v10  ;;  %v3976_v3 = vmul.f32 1.442695, %v3588_v1  ;;  %v4926_v40 = vmul.f32 %v16042_v6, %v4925_v32 }
 0x7b6   : > { %7886 = vst [vmem:[%s11350_s2 + $0x670] sm:$0xff] %v7566_v50  ;;  %v7408_v8 = vadd.f32 %v4920_v43, %v2928_v19  ;;  %v6430_v63 = vand.u32 2147483647, %v16061_v7  ;;  %9782 = vlog2.f32 %v6433_v34  ;;  %v3427_v52 = vand.u32 2147483647, %v16104_v37 }
 0x7b7   : > { %v9773_v36 = vpop.eup %9772  ;;  %v6351_v24 = vsel %vm16085_vm4, %v6348_v27, %v6345_v20  ;;  %9784 = vpow2.f32 %v3976_v3  ;;  %v16127_v25 = vadd.f32 %v2753_v59, %v15641_v26  ;;  %v6428_v6 = vadd.f32 1.0, %v6427_v56 }
 0x7b8   : > { %7728 = vst [vmem:[%s11350_s2 + $0x180] sm:$0xff] %v7408_v8  ;;  %v7567_v49 = vadd.f32 %v6351_v24, %v3087_v30  ;;  %v4923_v19 = vmul.f32 0.6931472, %v9773_v36  ;;  %v16133_v48 = vadd.f32 %v2642_v38, %v14371_v11  ;;  %v5006_v16 = vadd.f32 1.0, %v5005_v23  ;;  %v2648_v23 = vpop.f32.mrf.mxu0 }
 0x7b9   : > { %v6436_v29 = vmul.f32 -0.5, %v16098_v62  ;;  %v3747_v31 = vsub.f32 0.0, %v3427_v52  ;;  %v3269_v21 = vand.u32 2147483647, %v16127_v25  ;;  %v16142_v42 = vadd.f32 %v2755_v28, %v15601_v35 }
 0x7ba   : > { %7887 = vst [vmem:[%s11350_s2 + $0x678] sm:$0xff] %v7567_v49  ;;  %v4929_v22 = vsel %vm16109_vm5, %v4926_v40, %v4923_v19  ;;  %v3436_v4 = vand.u32 2147483647, %v16133_v48  ;;  %v16145_v30 = vadd.f32 %v2644_v47, %v14415_v5  ;;  %vm16149_vm6 = vcmp.lt.f32.partialorder %v6430_v63, 0.0004427343 }
 0x7bb   : > { %v7409_v53 = vadd.f32 %v4929_v22, %v2929_v39  ;;  %v4294_v46 = vmul.f32 1.442695, %v3747_v31  ;;  %v3589_v45 = vsub.f32 0.0, %v3269_v21  ;;  %v6429_v12 = vmul.f32 %v16061_v7, %v6428_v6  ;;  %v2757_v39 = vpop.f32.mrf.mxu1 }
 0x7bc   : > { %v9775_v9 = vpop.eup %9774  ;;  %v5008_v15 = vand.u32 2147483647, %v16074_v54  ;;  %v3756_v18 = vsub.f32 0.0, %v3436_v4  ;;  %v5007_v1 = vmul.f32 %v16074_v54, %v5006_v16  ;;  %v6437_v14 = vadd.f32 1.0, %v6436_v29 }
 0x7bd   : > { %v6426_v60 = vmul.f32 0.6931472, %v9775_v9  ;;  %v16155_v32 = vpop.eup %9776  ;;  %7729 = vst [vmem:[%s11350_s2 + $0x188] sm:$0xff] %v7409_v53  ;;  %9786 = vpow2.f32 %v4294_v46  ;;  %v3978_v33 = vmul.f32 1.442695, %v3589_v45  ;;  %v16170_v34 = vadd.f32 %v2757_v39, %v15641_v26  ;;  %v2761_v21 = vpop.f32.mrf.mxu1 }
 0x7be   : > { %v9779_v41 = vpop.eup %9778  ;;  %v5011_v59 = vadd.f32 1.0, %v16155_v32  ;;  %v3278_v7 = vand.u32 2147483647, %v16142_v42  ;;  %v3437_v38 = vand.u32 2147483647, %v16145_v30  ;;  %v3097_v8 = vmax.f32 %v15995_v57, 0.0  ;;  %v2650_v39 = vpop.f32.mrf.mxu0 }
 0x7bf   : > { %v6432_v27 = vsel %vm16149_vm6, %v6429_v12, %v6426_v60  ;;  %v16164_v10 = vpop.eup %9780  ;;  %v5004_v50 = vmul.f32 0.6931472, %v9779_v41  ;;  %9788 = vpow2.f32 %v3978_v33  ;;  %v4312_v61 = vmul.f32 1.442695, %v3756_v18 }
 0x7c0   : > { %v7576_v54 = vadd.f32 %v6432_v27, %v3096_v0  ;;  %vm5009_vm7 = vcmp.lt.f32.partialorder %v5008_v15, 0.0004427343  ;;  %9790 = vlog2.f32 %v5011_v59  ;;  %v6514_v56 = vadd.f32 1.0, %v16164_v10 }
 0x7c1   : > { %v5010_v43 = vsel %vm5009_vm7, %v5007_v1, %v5004_v50  ;;  %v6439_v20 = vand.u32 2147483647, %v16098_v62  ;;  %9792 = vpow2.f32 %v4312_v61  ;;  %v3598_v0 = vsub.f32 0.0, %v3278_v7 }
 0x7c2   : > { %7896 = vst [vmem:[%s11350_s2 + $0x6c0] sm:$0xff] %v7576_v54  ;;  %v7418_v55 = vadd.f32 %v5010_v43, %v2938_v13  ;;  %9794 = vlog2.f32 %v6514_v56  ;;  %v6438_v40 = vmul.f32 %v16098_v62, %v6437_v14  ;;  %v5014_v63 = vmul.f32 -0.5, %v16155_v32  ;;  %v2763_v54 = vpop.f32.mrf.mxu1 }
 0x7c3   : > { %v9783_v3 = vpop.eup %9782  ;;  %v3757_v36 = vsub.f32 0.0, %v3437_v38  ;;  %v3996_v28 = vmul.f32 1.442695, %v3598_v0  ;;  %v3279_v47 = vand.u32 2147483647, %v16170_v34  ;;  %v16184_v51 = vadd.f32 %v2648_v23, %v14371_v11 }
 0x7c4   : > { %v16179_v24 = vpop.eup %9784  ;;  %7738 = vst [vmem:[%s11350_s2 + $0x1d0] sm:$0xff] %v7418_v55  ;;  %v6435_v52 = vmul.f32 0.6931472, %v9783_v3  ;;  %vm6440_vm8 = vcmp.lt.f32.partialorder %v6439_v20, 0.0004427343  ;;  %v2939_v13 = vmax.f32 %v16034_v2, 0.0  ;;  %v16201_v15 = vadd.f32 %v2761_v21, %v15601_v35 }
 0x7c5   : > { %v3106_v57 = vmax.f32 %v16046_v44, 0.0  ;;  %v5092_v62 = vadd.f32 1.0, %v16179_v24  ;;  %9796 = vpow2.f32 %v3996_v28  ;;  %v4314_v19 = vmul.f32 1.442695, %v3757_v36 }
 0x7c6   : > { %v6441_v49 = vsel %vm6440_vm8, %v6438_v40, %v6435_v52  ;;  %v3599_v6 = vsub.f32 0.0, %v3279_v47  ;;  %v5015_v29 = vadd.f32 1.0, %v5014_v63  ;;  %v5017_v31 = vand.u32 2147483647, %v16155_v32 }
 0x7c7   : > { %v7577_v16 = vadd.f32 %v6441_v49, %v3097_v8  ;;  %9798 = vlog2.f32 %v5092_v62  ;;  %v6517_v22 = vmul.f32 -0.5, %v16164_v10  ;;  %v3446_v2 = vand.u32 2147483647, %v16184_v51 }
 0x7c8   : > { %9800 = vpow2.f32 %v4314_v19  ;;  %v3998_v4 = vmul.f32 1.442695, %v3599_v6  ;;  %v6520_v9 = vand.u32 2147483647, %v16164_v10  ;;  %v2948_v53 = vmax.f32 %v16072_v17, 0.0 }
 0x7c9   : > { %7897 = vst [vmem:[%s11350_s2 + $0x6c8] sm:$0xff] %v7577_v16  ;;  %v3107_v58 = vmax.f32 %v16104_v37, 0.0  ;;  %v2949_v46 = vmax.f32 %v16127_v25, 0.0  ;;  %v3116_v60 = vmax.f32 %v16133_v48, 0.0  ;;  %v3766_v12 = vsub.f32 0.0, %v3446_v2 }
 0x7ca   : > { %v16197_v45 = vpop.eup %9786  ;;  %9802 = vpow2.f32 %v3998_v4  ;;  %vm16203_vm9 = vcmp.lt.f32.partialorder %v5017_v31, 0.0004427343  ;;  %v2958_v14 = vmax.f32 %v16142_v42, 0.0  ;;  %v3117_v33 = vmax.f32 %v16145_v30, 0.0  ;;  %v2652_v31 = vpop.f32.mrf.mxu0 }
 0x7cb   : > { %v6523_v1 = vadd.f32 1.0, %v16197_v45  ;;  %v5016_v27 = vmul.f32 %v16155_v32, %v5015_v29  ;;  %v6518_v59 = vadd.f32 1.0, %v6517_v22  ;;  %v5095_v7 = vmul.f32 -0.5, %v16179_v24 }
 0x7cc   : > { %v16210_v41 = vpop.eup %9788  ;;  %v4332_v38 = vmul.f32 1.442695, %v3766_v12  ;;  %vm16214_vm10 = vcmp.lt.f32.partialorder %v6520_v9, 0.0004427343  ;;  %v5098_v56 = vand.u32 2147483647, %v16179_v24  ;;  %v16224_v55 = vadd.f32 %v2650_v39, %v14415_v5 }
 0x7cd   : > { %v9791_v50 = vpop.eup %9790  ;;  %9804 = vlog2.f32 %v6523_v1  ;;  %v5101_v43 = vadd.f32 1.0, %v16210_v41  ;;  %v3288_v32 = vand.u32 2147483647, %v16201_v15  ;;  %v2959_v8 = vmax.f32 %v16170_v34, 0.0 }
 0x7ce   : > { %v16220_v20 = vpop.eup %9792  ;;  %v5013_v23 = vmul.f32 0.6931472, %v9791_v50  ;;  %9806 = vpow2.f32 %v4332_v38  ;;  %v16229_v40 = vadd.f32 %v2763_v54, %v15641_v26  ;;  %v6519_v52 = vmul.f32 %v16164_v10, %v6518_v59  ;;  %v2765_v54 = vpop.f32.mrf.mxu1 }
 0x7cf   : > { %v9795_v0 = vpop.eup %9794  ;;  %9808 = vlog2.f32 %v5101_v43  ;;  %v6604_v3 = vadd.f32 1.0, %v16220_v20  ;;  %v5096_v28 = vadd.f32 1.0, %v5095_v7  ;;  %vm16234_vm11 = vcmp.lt.f32.partialorder %v5098_v56, 0.0004427343 }
 0x7d0   : > { %v5019_v63 = vsel %vm16203_vm9, %v5016_v27, %v5013_v23  ;;  %v6516_v36 = vmul.f32 0.6931472, %v9795_v0  ;;  %v6526_v49 = vmul.f32 -0.5, %v16197_v45  ;;  %v3126_v6 = vmax.f32 %v16184_v51, 0.0 }
 0x7d1   : > { %v7419_v47 = vadd.f32 %v5019_v63, %v2939_v13  ;;  %9810 = vlog2.f32 %v6604_v3  ;;  %v3608_v16 = vsub.f32 0.0, %v3288_v32  ;;  %v3447_v29 = vand.u32 2147483647, %v16224_v55 }
 0x7d2   : > { %v6522_v19 = vsel %vm16214_vm10, %v6519_v52, %v6516_v36  ;;  %v16243_v10 = vpop.eup %9796  ;;  %v5104_v21 = vmul.f32 -0.5, %v16210_v41  ;;  %v6607_v22 = vmul.f32 -0.5, %v16220_v20  ;;  %v3289_v4 = vand.u32 2147483647, %v16229_v40 }
 0x7d3   : > { %7739 = vst [vmem:[%s11350_s2 + $0x1d8] sm:$0xff] %v7419_v47  ;;  %v7586_v13 = vadd.f32 %v6522_v19, %v3106_v57  ;;  %v5097_v9 = vmul.f32 %v16179_v24, %v5096_v28  ;;  %v6529_v12 = vand.u32 2147483647, %v16197_v45  ;;  %v5182_v18 = vadd.f32 1.0, %v16243_v10 }
 0x7d4   : > { %v9799_v2 = vpop.eup %9798  ;;  %v4016_v1 = vmul.f32 1.442695, %v3608_v16  ;;  %v6527_v44 = vadd.f32 1.0, %v6526_v49  ;;  %v5107_v57 = vand.u32 2147483647, %v16210_v41  ;;  %v16259_v59 = vadd.f32 %v2652_v31, %v14371_v11 }
 0x7d5   : > { %v16254_v39 = vpop.eup %9800  ;;  %7906 = vst [vmem:[%s11350_s2 + $0x710] sm:$0xff] %v7586_v13  ;;  %v5094_v27 = vmul.f32 0.6931472, %v9799_v2  ;;  %9812 = vlog2.f32 %v5182_v18  ;;  %v3767_v38 = vsub.f32 0.0, %v3447_v29  ;;  %v3609_v24 = vsub.f32 0.0, %v3289_v4  ;;  %v2654_v2 = vpop.f32.mrf.mxu0 }
 0x7d6   : > { %v6613_v7 = vadd.f32 1.0, %v16254_v39  ;;  %v5105_v56 = vadd.f32 1.0, %v5104_v21  ;;  %v6608_v43 = vadd.f32 1.0, %v6607_v22  ;;  %9814 = vpow2.f32 %v4016_v1  ;;  %v2767_v1 = vpop.f32.mrf.mxu1 }
 0x7d7   : > { %v16262_v50 = vpop.eup %9802  ;;  %v5100_v61 = vsel %vm16234_vm11, %v5097_v9, %v5094_v27  ;;  %v6610_v32 = vand.u32 2147483647, %v16220_v20  ;;  %v6528_v3 = vmul.f32 %v16197_v45, %v6527_v44  ;;  %vm16271_vm12 = vcmp.lt.f32.partialorder %v6529_v12, 0.0004427343 }
 0x7d8   : > { %v7428_v23 = vadd.f32 %v5100_v61, %v2948_v53  ;;  %9816 = vlog2.f32 %v6613_v7  ;;  %v5191_v0 = vadd.f32 1.0, %v16262_v50  ;;  %v5185_v36 = vmul.f32 -0.5, %v16243_v10 }
 0x7d9   : > { %v16277_v52 = vadd.f32 %v2765_v54, %v15601_v35  ;;  %v5188_v17 = vand.u32 2147483647, %v16243_v10  ;;  %v4334_v53 = vmul.f32 1.442695, %v3767_v38  ;;  %v4018_v47 = vmul.f32 1.442695, %v3609_v24 }
 0x7da   : > { %v9805_v28 = vpop.eup %9804  ;;  %7748 = vst [vmem:[%s11350_s2 + $0x220] sm:$0xff] %v7428_v23  ;;  %9818 = vlog2.f32 %v5191_v0  ;;  %v5106_v45 = vmul.f32 %v16210_v41, %v5105_v56  ;;  %vm16284_vm13 = vcmp.lt.f32.partialorder %v5107_v57, 0.0004427343  ;;  %v3456_v16 = vand.u32 2147483647, %v16259_v59  ;;  %v2658_v0 = vpop.f32.mrf.mxu0 }
 0x7db   : > { %v16281_v62 = vpop.eup %9806  ;;  %v6525_v49 = vmul.f32 0.6931472, %v9805_v28  ;;  %v6609_v31 = vmul.f32 %v16220_v20, %v6608_v43  ;;  %vm16290_vm14 = vcmp.lt.f32.partialorder %v6610_v32, 0.0004427343  ;;  %9820 = vpow2.f32 %v4334_v53 }
 0x7dc   : > { %v9809_v29 = vpop.eup %9808  ;;  %v6694_v21 = vadd.f32 1.0, %v16281_v62  ;;  %v6616_v4 = vmul.f32 -0.5, %v16254_v39  ;;  %9822 = vpow2.f32 %v4018_v47  ;;  %v5186_v12 = vadd.f32 1.0, %v5185_v36 }
 0x7dd   : > { %v6531_v41 = vsel %vm16271_vm12, %v6528_v3, %v6525_v49  ;;  %v5103_v22 = vmul.f32 0.6931472, %v9809_v29  ;;  %vm16300_vm15 = vcmp.lt.f32.partialorder %v5188_v17, 0.0004427343  ;;  %v5194_v57 = vmul.f32 -0.5, %v16262_v50 }
 0x7de   : > { %v9811_v9 = vpop.eup %9810  ;;  %v7587_v20 = vadd.f32 %v6531_v41, %v3107_v58  ;;  %9824 = vlog2.f32 %v6694_v21  ;;  %v3776_v7 = vsub.f32 0.0, %v3456_v16  ;;  %v6619_v58 = vand.u32 2147483647, %v16254_v39 }
 0x7df   : > { %v5109_v27 = vsel %vm16284_vm13, %v5106_v45, %v5103_v22  ;;  %v6606_v44 = vmul.f32 0.6931472, %v9811_v9  ;;  %v3298_v38 = vand.u32 2147483647, %v16277_v52  ;;  %v16313_v24 = vadd.f32 %v2654_v2, %v14415_v5  ;;  %v2771_v22 = vpop.f32.mrf.mxu1 }
 0x7e0   : > { %7907 = vst [vmem:[%s11350_s2 + $0x718] sm:$0xff] %v7587_v20  ;;  %v7429_v37 = vadd.f32 %v5109_v27, %v2949_v46  ;;  %v6617_v61 = vadd.f32 1.0, %v6616_v4  ;;  %v4352_v56 = vmul.f32 1.442695, %v3776_v7  ;;  %v16318_v43 = vadd.f32 %v2767_v1, %v15641_v26 }
 0x7e1   : > { %v6612_v54 = vsel %vm16290_vm14, %v6609_v31, %v6606_v44  ;;  %v5187_v46 = vmul.f32 %v16243_v10, %v5186_v12  ;;  %v3618_v23 = vsub.f32 0.0, %v3298_v38  ;;  %v3457_v32 = vand.u32 2147483647, %v16313_v24 }
 0x7e2   : > { %7749 = vst [vmem:[%s11350_s2 + $0x228] sm:$0xff] %v7429_v37  ;;  %v7596_v25 = vadd.f32 %v6612_v54, %v3116_v60  ;;  %v9813_v3 = vpop.eup %9812  ;;  %v5195_v63 = vadd.f32 1.0, %v5194_v57  ;;  %v5197_v36 = vand.u32 2147483647, %v16262_v50  ;;  %9826 = vpow2.f32 %v4352_v56 }
 0x7e3   : > { %v3299_v28 = vand.u32 2147483647, %v16318_v43  ;;  %v16327_v17 = vpop.eup %9814  ;;  %v5184_v53 = vmul.f32 0.6931472, %v9813_v3  ;;  %v6697_v48 = vmul.f32 -0.5, %v16281_v62  ;;  %v3777_v47 = vsub.f32 0.0, %v3457_v32 }
 0x7e4   : > { %7916 = vst [vmem:[%s11350_s2 + $0x760] sm:$0xff] %v7596_v25  ;;  %v4036_v60 = vmul.f32 1.442695, %v3618_v23  ;;  %v6618_v49 = vmul.f32 %v16254_v39, %v6617_v61  ;;  %v5272_v45 = vadd.f32 1.0, %v16327_v17  ;;  %v16334_v16 = vadd.f32 %v2658_v0, %v14371_v11  ;;  %v2660_v61 = vpop.f32.mrf.mxu0 }
 0x7e5   : > { %v9817_v10 = vpop.eup %9816  ;;  %v3619_v19 = vsub.f32 0.0, %v3299_v28  ;;  %v5190_v29 = vsel %vm16300_vm15, %v5187_v46, %v5184_v53  ;;  %v4354_v13 = vmul.f32 1.442695, %v3777_v47  ;;  %vm6620_vm0 = vcmp.lt.f32.partialorder %v6619_v58, 0.0004427343 }
 0x7e6   : > { %v6615_v31 = vmul.f32 0.6931472, %v9817_v10  ;;  %9828 = vpow2.f32 %v4036_v60  ;;  %v7438_v41 = vadd.f32 %v5190_v29, %v2958_v14  ;;  %v5196_v39 = vmul.f32 %v16262_v50, %v5195_v63 }
 0x7e7   : > { %v9819_v21 = vpop.eup %9818  ;;  %9830 = vlog2.f32 %v5272_v45  ;;  %v6698_v9 = vadd.f32 1.0, %v6697_v48  ;;  %vm5198_vm1 = vcmp.lt.f32.partialorder %v5197_v36, 0.0004427343  ;;  %v6700_v42 = vand.u32 2147483647, %v16281_v62 }
 0x7e8   : > { %v6621_v4 = vsel %vm6620_vm0, %v6618_v49, %v6615_v31  ;;  %v5193_v2 = vmul.f32 0.6931472, %v9819_v21  ;;  %9832 = vpow2.f32 %v4354_v13  ;;  %v16341_v20 = vpop.eup %9820  ;;  %7758 = vst [vmem:[%s11350_s2 + $0x270] sm:$0xff] %v7438_v41  ;;  %v3466_v14 = vand.u32 2147483647, %v16334_v16  ;;  %v2662_v13 = vpop.f32.mrf.mxu0 }
 0x7e9   : > { %v7597_v12 = vadd.f32 %v6621_v4, %v3117_v33  ;;  %v16348_v18 = vpop.eup %9822  ;;  %v6703_v1 = vadd.f32 1.0, %v16341_v20  ;;  %v4038_v27 = vmul.f32 1.442695, %v3619_v19  ;;  %v16352_v44 = vadd.f32 %v2771_v22, %v15601_v35 }
 0x7ea   : > { %v5199_v50 = vsel %vm5198_vm1, %v5196_v39, %v5193_v2  ;;  %v2968_v33 = vmax.f32 %v16201_v15, 0.0  ;;  %v5275_v7 = vmul.f32 -0.5, %v16327_v17  ;;  %v5281_v37 = vadd.f32 1.0, %v16348_v18 }
 0x7eb   : > { %v9825_v57 = vpop.eup %9824  ;;  %7917 = vst [vmem:[%s11350_s2 + $0x768] sm:$0xff] %v7597_v12  ;;  %v7439_v30 = vadd.f32 %v5199_v50, %v2959_v8  ;;  %v6699_v38 = vmul.f32 %v16281_v62, %v6698_v9  ;;  %v3127_v54 = vmax.f32 %v16224_v55, 0.0  ;;  %9834 = vlog2.f32 %v6703_v1  ;;  %v2773_v8 = vpop.f32.mrf.mxu1 }
 0x7ec   : > { %v6696_v58 = vmul.f32 0.6931472, %v9825_v57  ;;  %vm6701_vm2 = vcmp.lt.f32.partialorder %v6700_v42, 0.0004427343  ;;  %v2969_v56 = vmax.f32 %v16229_v40, 0.0  ;;  %9836 = vlog2.f32 %v5281_v37 }
 0x7ed   : > { %7759 = vst [vmem:[%s11350_s2 + $0x278] sm:$0xff] %v7439_v30  ;;  %v3786_v34 = vsub.f32 0.0, %v3466_v14  ;;  %v5278_v25 = vand.u32 2147483647, %v16327_v17  ;;  %9838 = vpow2.f32 %v4038_v27  ;;  %v3308_v46 = vand.u32 2147483647, %v16352_v44  ;;  %v2775_v4 = vpop.f32.mrf.mxu1 }
 0x7ee   : > { %v6702_v15 = vsel %vm6701_vm2, %v6699_v38, %v6696_v58  ;;  %v5276_v23 = vadd.f32 1.0, %v5275_v7  ;;  %v16369_v0 = vadd.f32 %v2660_v61, %v14415_v5  ;;  %v3136_v63 = vmax.f32 %v16259_v59, 0.0 }
 0x7ef   : > { %v7606_v62 = vadd.f32 %v6702_v15, %v3126_v6  ;;  %v4372_v32 = vmul.f32 1.442695, %v3786_v34  ;;  %v16371_v3 = vpop.eup %9826  ;;  %v2978_v36 = vmax.f32 %v16277_v52, 0.0  ;;  %v3628_v28 = vsub.f32 0.0, %v3308_v46 }
 0x7f0   : > { %v16376_v53 = vadd.f32 %v2773_v8, %v15641_v26  ;;  %v6706_v48 = vmul.f32 -0.5, %v16341_v20  ;;  %v6784_v51 = vadd.f32 1.0, %v16371_v3  ;;  %v3137_v6 = vmax.f32 %v16313_v24, 0.0 }
 0x7f1   : > { %7926 = vst [vmem:[%s11350_s2 + $0x7b0] sm:$0xff] %v7606_v62  ;;  %9840 = vpow2.f32 %v4372_v32  ;;  %v5284_v60 = vmul.f32 -0.5, %v16348_v18  ;;  %v2979_v47 = vmax.f32 %v16318_v43, 0.0  ;;  %v4056_v10 = vmul.f32 1.442695, %v3628_v28 }
 0x7f2   : > { %v3467_v49 = vand.u32 2147483647, %v16369_v0  ;;  %v5277_v19 = vmul.f32 %v16327_v17, %v5276_v23  ;;  %vm16388_vm3 = vcmp.lt.f32.partialorder %v5278_v25, 0.0004427343  ;;  %9842 = vlog2.f32 %v6784_v51  ;;  %v2664_v25 = vpop.f32.mrf.mxu0 }
 0x7f3   : > { %v16385_v45 = vpop.eup %9828  ;;  %v3309_v31 = vand.u32 2147483647, %v16376_v53  ;;  %v6709_v41 = vand.u32 2147483647, %v16341_v20  ;;  %v5287_v39 = vand.u32 2147483647, %v16348_v18  ;;  %9844 = vpow2.f32 %v4056_v10 }
 0x7f4   : > { %v9831_v21 = vpop.eup %9830  ;;  %v5362_v22 = vadd.f32 1.0, %v16385_v45  ;;  %v6707_v9 = vadd.f32 1.0, %v6706_v48  ;;  %v3787_v12 = vsub.f32 0.0, %v3467_v49  ;;  %v5285_v14 = vadd.f32 1.0, %v5284_v60 }
 0x7f5   : > { %v16396_v2 = vpop.eup %9832  ;;  %v5274_v17 = vmul.f32 0.6931472, %v9831_v21  ;;  %v3629_v42 = vsub.f32 0.0, %v3309_v31  ;;  %v16400_v1 = vadd.f32 %v2662_v13, %v14371_v11  ;;  %v6787_v57 = vmul.f32 -0.5, %v16371_v3 }
 0x7f6   : > { %9846 = vlog2.f32 %v5362_v22  ;;  %v6793_v50 = vadd.f32 1.0, %v16396_v2  ;;  %v4374_v30 = vmul.f32 1.442695, %v3787_v12  ;;  %v16406_v7 = vadd.f32 %v2775_v4, %v15601_v35 }
 0x7f7   : > { %v5280_v27 = vsel %vm16388_vm3, %v5277_v19, %v5274_v17  ;;  %v3146_v58 = vmax.f32 %v16334_v16, 0.0  ;;  %v4058_v38 = vmul.f32 1.442695, %v3629_v42  ;;  %v6708_v34 = vmul.f32 %v16341_v20, %v6707_v9 }
 0x7f8   : > { %v7448_v37 = vadd.f32 %v5280_v27, %v2968_v33  ;;  %9848 = vlog2.f32 %v6793_v50  ;;  %v9835_v61 = vpop.eup %9834  ;;  %vm16410_vm4 = vcmp.lt.f32.partialorder %v6709_v41, 0.0004427343  ;;  %vm16414_vm5 = vcmp.lt.f32.partialorder %v5287_v39, 0.0004427343 }
 0x7f9   : > { %9850 = vpow2.f32 %v4374_v30  ;;  %v9837_v46 = vpop.eup %9836  ;;  %v6705_v33 = vmul.f32 0.6931472, %v9835_v61  ;;  %v5286_v62 = vmul.f32 %v16348_v18, %v5285_v14  ;;  %v3476_v23 = vand.u32 2147483647, %v16400_v1 }
 0x7fa   : > { %7768 = vst [vmem:[%s11350_s2 + $0x2c0] sm:$0xff] %v7448_v37  ;;  %9852 = vpow2.f32 %v4058_v38  ;;  %v16421_v32 = vpop.eup %9838  ;;  %v5283_v20 = vmul.f32 0.6931472, %v9837_v46  ;;  %v6788_v28 = vadd.f32 1.0, %v6787_v57  ;;  %v5365_v48 = vmul.f32 -0.5, %v16385_v45 }
 0x7fb   : > { %v3318_v51 = vand.u32 2147483647, %v16406_v7  ;;  %v6711_v60 = vsel %vm16410_vm4, %v6708_v34, %v6705_v33  ;;  %v6796_v10 = vmul.f32 -0.5, %v16396_v2  ;;  %v5371_v49 = vadd.f32 1.0, %v16421_v32 }
 0x7fc   : > { %v16430_v18 = vadd.f32 %v2664_v25, %v14415_v5  ;;  %v7607_v19 = vadd.f32 %v6711_v60, %v3127_v54  ;;  %v5289_v29 = vsel %vm16414_vm5, %v5286_v62, %v5283_v20  ;;  %v3796_v31 = vsub.f32 0.0, %v3476_v23 }
 0x7fd   : > { %v3638_v13 = vsub.f32 0.0, %v3318_v51  ;;  %v7449_v41 = vadd.f32 %v5289_v29, %v2969_v56  ;;  %v6790_v39 = vand.u32 2147483647, %v16371_v3  ;;  %v5368_v22 = vand.u32 2147483647, %v16385_v45 }
 0x7fe   : > { %v16436_v21 = vpop.eup %9840  ;;  %9854 = vlog2.f32 %v5371_v49  ;;  %7927 = vst [vmem:[%s11350_s2 + $0x7b8] sm:$0xff] %v7607_v19  ;;  %v5366_v4 = vadd.f32 1.0, %v5365_v48  ;;  %v2988_v54 = vmax.f32 %v16352_v44, 0.0  ;;  %v4392_v17 = vmul.f32 1.442695, %v3796_v31 }
 0x7ff   : > { %v6874_v55 = vadd.f32 1.0, %v16436_v21  ;;  %v9843_v9 = vpop.eup %9842  ;;  %7769 = vst [vmem:[%s11350_s2 + $0x2c8] sm:$0xff] %v7449_v41  ;;  %v6789_v12 = vmul.f32 %v16371_v3, %v6788_v28  ;;  %v3147_v42 = vmax.f32 %v16369_v0, 0.0  ;;  %v4076_v40 = vmul.f32 1.442695, %v3638_v13  ;;  %v2777_v3 = vpop.f32.mrf.mxu1 }
 0x800   : > { %v3477_v56 = vand.u32 2147483647, %v16430_v18  ;;  %v16449_v14 = vpop.eup %9844  ;;  %v6786_v50 = vmul.f32 0.6931472, %v9843_v9  ;;  %v6797_v27 = vadd.f32 1.0, %v6796_v10  ;;  %v5367_v34 = vmul.f32 %v16385_v45, %v5366_v4  ;;  %v2668_v28 = vpop.f32.mrf.mxu0 }
 0x801   : > { %v6799_v57 = vand.u32 2147483647, %v16396_v2  ;;  %9856 = vlog2.f32 %v6874_v55  ;;  %vm6791_vm6 = vcmp.lt.f32.partialorder %v6790_v39, 0.0004427343  ;;  %vm16452_vm7 = vcmp.lt.f32.partialorder %v5368_v22, 0.0004427343  ;;  %v2781_v60 = vpop.f32.mrf.mxu1 }
 0x802   : > { %v5452_v37 = vadd.f32 1.0, %v16449_v14  ;;  %9858 = vpow2.f32 %v4392_v17  ;;  %v6792_v61 = vsel %vm6791_vm6, %v6789_v12, %v6786_v50  ;;  %v3797_v8 = vsub.f32 0.0, %v3477_v56  ;;  %v2670_v30 = vpop.f32.mrf.mxu0 }
 0x803   : > { %v9847_v38 = vpop.eup %9846  ;;  %9860 = vpow2.f32 %v4076_v40  ;;  %v7616_v15 = vadd.f32 %v6792_v61, %v3136_v63  ;;  %v5374_v46 = vmul.f32 -0.5, %v16421_v32  ;;  %v6798_v62 = vmul.f32 %v16396_v2, %v6797_v27 }
 0x804   : > { %v5364_v25 = vmul.f32 0.6931472, %v9847_v38  ;;  %9862 = vlog2.f32 %v5452_v37  ;;  %vm16462_vm8 = vcmp.lt.f32.partialorder %v6799_v57, 0.0004427343  ;;  %v5377_v20 = vand.u32 2147483647, %v16421_v32 }
 0x805   : > { %v9849_v33 = vpop.eup %9848  ;;  %v6877_v45 = vmul.f32 -0.5, %v16436_v21  ;;  %7936 = vst [vmem:[%s11350_s2 + $0x800] sm:$0xff] %v7616_v15  ;;  %v6880_v51 = vand.u32 2147483647, %v16436_v21  ;;  %v5455_v2 = vmul.f32 -0.5, %v16449_v14  ;;  %v16481_v31 = vadd.f32 %v2777_v3, %v15641_v26 }
 0x806   : > { %v16468_v48 = vpop.eup %9850  ;;  %v5370_v59 = vsel %vm16452_vm7, %v5367_v34, %v5364_v25  ;;  %v6795_v63 = vmul.f32 0.6931472, %v9849_v33  ;;  %v4394_v29 = vmul.f32 1.442695, %v3797_v8  ;;  %v5375_v41 = vadd.f32 1.0, %v5374_v46  ;;  %v2783_v34 = vpop.f32.mrf.mxu1 }
 0x807   : > { %v16475_v10 = vpop.eup %9852  ;;  %v7458_v49 = vadd.f32 %v5370_v59, %v2978_v36  ;;  %v6883_v19 = vadd.f32 1.0, %v16468_v48  ;;  %v16487_v22 = vadd.f32 %v2668_v28, %v14371_v11  ;;  %v6878_v36 = vadd.f32 1.0, %v6877_v45 }
 0x808   : > { %v6801_v13 = vsel %vm16462_vm8, %v6798_v62, %v6795_v63  ;;  %v5461_v39 = vadd.f32 1.0, %v16475_v10  ;;  %v16493_v4 = vadd.f32 %v2781_v60, %v15601_v35  ;;  %v5456_v55 = vadd.f32 1.0, %v5455_v2 }
 0x809   : > { %7778 = vst [vmem:[%s11350_s2 + $0x310] sm:$0xff] %v7458_v49  ;;  %v7617_v52 = vadd.f32 %v6801_v13, %v3137_v6  ;;  %9864 = vlog2.f32 %v6883_v19  ;;  %v2989_v17 = vmax.f32 %v16376_v53, 0.0  ;;  %v3156_v9 = vmax.f32 %v16400_v1, 0.0  ;;  %v2785_v19 = vpop.f32.mrf.mxu1 }
 0x80a   : > { %9866 = vlog2.f32 %v5461_v39  ;;  %vm16498_vm9 = vcmp.lt.f32.partialorder %v5377_v20, 0.0004427343  ;;  %vm16502_vm10 = vcmp.lt.f32.partialorder %v6880_v51, 0.0004427343  ;;  %v3319_v6 = vand.u32 2147483647, %v16481_v31  ;;  %v2672_v51 = vpop.f32.mrf.mxu0 }
 0x80b   : > { %v9855_v12 = vpop.eup %9854  ;;  %7937 = vst [vmem:[%s11350_s2 + $0x808] sm:$0xff] %v7617_v52  ;;  %9868 = vpow2.f32 %v4394_v29  ;;  %v5376_v50 = vmul.f32 %v16421_v32, %v5375_v41  ;;  %v6886_v27 = vmul.f32 -0.5, %v16468_v48  ;;  %v3486_v57 = vand.u32 2147483647, %v16487_v22 }
 0x80c   : > { %v5373_v56 = vmul.f32 0.6931472, %v9855_v12  ;;  %v6879_v37 = vmul.f32 %v16436_v21, %v6878_v36  ;;  %v5458_v3 = vand.u32 2147483647, %v16449_v14  ;;  %v3639_v38 = vsub.f32 0.0, %v3319_v6 }
 0x80d   : > { %v3328_v61 = vand.u32 2147483647, %v16493_v4  ;;  %v5457_v32 = vmul.f32 %v16449_v14, %v5456_v55  ;;  %v6889_v25 = vand.u32 2147483647, %v16468_v48  ;;  %v3806_v46 = vsub.f32 0.0, %v3486_v57 }
 0x80e   : > { %v9857_v8 = vpop.eup %9856  ;;  %v5379_v15 = vsel %vm16498_vm9, %v5376_v50, %v5373_v56  ;;  %v5464_v23 = vmul.f32 -0.5, %v16475_v10  ;;  %v5467_v20 = vand.u32 2147483647, %v16475_v10  ;;  %v6887_v28 = vadd.f32 1.0, %v6886_v27 }
 0x80f   : > { %v16517_v33 = vpop.eup %9858  ;;  %v7459_v21 = vadd.f32 %v5379_v15, %v2979_v47  ;;  %v6876_v62 = vmul.f32 0.6931472, %v9857_v8  ;;  %v4078_v63 = vmul.f32 1.442695, %v3639_v38  ;;  %v3648_v14 = vsub.f32 0.0, %v3328_v61 }
 0x810   : > { %v16523_v45 = vpop.eup %9860  ;;  %v6964_v59 = vadd.f32 1.0, %v16517_v33  ;;  %v4412_v60 = vmul.f32 1.442695, %v3806_v46  ;;  %v16531_v49 = vadd.f32 %v2670_v30, %v14415_v5  ;;  %v16536_v41 = vadd.f32 %v2783_v34, %v15641_v26 }
 0x811   : > { %v9863_v2 = vpop.eup %9862  ;;  %7779 = vst [vmem:[%s11350_s2 + $0x318] sm:$0xff] %v7459_v21  ;;  %v6882_v43 = vsel %vm16502_vm10, %v6879_v37, %v6876_v62  ;;  %v5542_v47 = vadd.f32 1.0, %v16523_v45  ;;  %vm5459_vm11 = vcmp.lt.f32.partialorder %v5458_v3, 0.0004427343  ;;  %v5465_v39 = vadd.f32 1.0, %v5464_v23  ;;  %v2787_v23 = vpop.f32.mrf.mxu1 }
 0x812   : > { %v7626_v29 = vadd.f32 %v6882_v43, %v3146_v58  ;;  %v5454_v13 = vmul.f32 0.6931472, %v9863_v2  ;;  %9870 = vlog2.f32 %v6964_v59  ;;  %v16539_v52 = vadd.f32 %v2672_v51, %v14371_v11 }
 0x813   : > { %9872 = vlog2.f32 %v5542_v47  ;;  %v4096_v55 = vmul.f32 1.442695, %v3648_v14  ;;  %v16543_v12 = vadd.f32 %v2785_v19, %v15601_v35  ;;  %vm16547_vm12 = vcmp.lt.f32.partialorder %v6889_v25, 0.0004427343 }
 0x814   : > { %7946 = vst [vmem:[%s11350_s2 + $0x850] sm:$0xff] %v7626_v29  ;;  %v5460_v36 = vsel %vm5459_vm11, %v5457_v32, %v5454_v13  ;;  %9874 = vpow2.f32 %v4078_v63  ;;  %vm16551_vm13 = vcmp.lt.f32.partialorder %v5467_v20, 0.0004427343  ;;  %v6888_v6 = vmul.f32 %v16468_v48, %v6887_v28  ;;  %v2674_v32 = vpop.f32.mrf.mxu0 }
 0x815   : > { %v7468_v16 = vadd.f32 %v5460_v36, %v2988_v54  ;;  %9876 = vpow2.f32 %v4412_v60  ;;  %v3487_v56 = vand.u32 2147483647, %v16531_v49  ;;  %v3329_v50 = vand.u32 2147483647, %v16536_v41 }
 0x816   : > { %v9865_v24 = vpop.eup %9864  ;;  %9878 = vpow2.f32 %v4096_v55  ;;  %v5466_v54 = vmul.f32 %v16475_v10, %v5465_v39  ;;  %v6967_v57 = vmul.f32 -0.5, %v16517_v33  ;;  %v3496_v30 = vand.u32 2147483647, %v16539_v52  ;;  %v2678_v13 = vpop.f32.mrf.mxu0 }
 0x817   : > { %v9867_v27 = vpop.eup %9866  ;;  %7788 = vst [vmem:[%s11350_s2 + $0x360] sm:$0xff] %v7468_v16  ;;  %v6885_v44 = vmul.f32 0.6931472, %v9865_v24  ;;  %v3807_v38 = vsub.f32 0.0, %v3487_v56  ;;  %v3649_v61 = vsub.f32 0.0, %v3329_v50  ;;  %v5545_v15 = vmul.f32 -0.5, %v16523_v45 }
 0x818   : > { %v16562_v37 = vpop.eup %9868  ;;  %v5463_v3 = vmul.f32 0.6931472, %v9867_v27  ;;  %v3338_v48 = vand.u32 2147483647, %v16543_v12  ;;  %v6970_v8 = vand.u32 2147483647, %v16517_v33  ;;  %v16579_v0 = vadd.f32 %v2674_v32, %v14415_v5  ;;  %v2680_v16 = vpop.f32.mrf.mxu0 }
 0x819   : > { %v6891_v34 = vsel %vm16547_vm12, %v6888_v6, %v6885_v44  ;;  %v6973_v10 = vadd.f32 1.0, %v16562_v37  ;;  %v4414_v21 = vmul.f32 1.442695, %v3807_v38  ;;  %v4098_v62 = vmul.f32 1.442695, %v3649_v61 }
 0x81a   : > { %v7627_v25 = vadd.f32 %v6891_v34, %v3147_v42  ;;  %v5469_v46 = vsel %vm16551_vm13, %v5466_v54, %v5463_v3  ;;  %v6968_v28 = vadd.f32 1.0, %v6967_v57  ;;  %v5548_v59 = vand.u32 2147483647, %v16523_v45 }
 0x81b   : > { %v7469_v20 = vadd.f32 %v5469_v46, %v2989_v17  ;;  %9880 = vlog2.f32 %v6973_v10  ;;  %v3816_v63 = vsub.f32 0.0, %v3496_v30  ;;  %v3658_v14 = vsub.f32 0.0, %v3338_v48 }
 0x81c   : > { %7947 = vst [vmem:[%s11350_s2 + $0x858] sm:$0xff] %v7627_v25  ;;  %9882 = vpow2.f32 %v4414_v21  ;;  %v2998_v42 = vmax.f32 %v16406_v7, 0.0  ;;  %v5546_v51 = vadd.f32 1.0, %v5545_v15  ;;  %v16584_v2 = vadd.f32 %v2787_v23, %v15641_v26 }
 0x81d   : > { %7789 = vst [vmem:[%s11350_s2 + $0x368] sm:$0xff] %v7469_v20  ;;  %9884 = vpow2.f32 %v4098_v62  ;;  %v3157_v53 = vmax.f32 %v16430_v18, 0.0  ;;  %v2999_v17 = vmax.f32 %v16481_v31, 0.0  ;;  %v4432_v43 = vmul.f32 1.442695, %v3816_v63 }
 0x81e   : > { %v4116_v47 = vmul.f32 1.442695, %v3658_v14  ;;  %vm16588_vm14 = vcmp.lt.f32.partialorder %v6970_v8, 0.0004427343  ;;  %v3497_v29 = vand.u32 2147483647, %v16579_v0  ;;  %v6969_v55 = vmul.f32 %v16517_v33, %v6968_v28 }
 0x81f   : > { %v9871_v60 = vpop.eup %9870  ;;  %v3339_v7 = vand.u32 2147483647, %v16584_v2  ;;  %vm16595_vm15 = vcmp.lt.f32.partialorder %v5548_v59, 0.0004427343  ;;  %9886 = vpow2.f32 %v4432_v43  ;;  %v5547_v24 = vmul.f32 %v16523_v45, %v5546_v51 }
 0x820   : > { %v9873_v39 = vpop.eup %9872  ;;  %v6966_v36 = vmul.f32 0.6931472, %v9871_v60  ;;  %v6976_v6 = vmul.f32 -0.5, %v16562_v37  ;;  %9888 = vpow2.f32 %v4116_v47  ;;  %v3817_v27 = vsub.f32 0.0, %v3497_v29 }
 0x821   : > { %v16599_v58 = vpop.eup %9874  ;;  %v5544_v40 = vmul.f32 0.6931472, %v9873_v39  ;;  %v16609_v44 = vadd.f32 %v2678_v13, %v14371_v11  ;;  %v3659_v3 = vsub.f32 0.0, %v3339_v7  ;;  %v3166_v61 = vmax.f32 %v16487_v22, 0.0 }
 0x822   : > { %v16603_v56 = vpop.eup %9876  ;;  %v6972_v50 = vsel %vm16588_vm14, %v6969_v55, %v6966_v36  ;;  %v5551_v33 = vadd.f32 1.0, %v16599_v58  ;;  %v3008_v48 = vmax.f32 %v16493_v4, 0.0  ;;  %v6977_v34 = vadd.f32 1.0, %v6976_v6 }
 0x823   : > { %v16611_v54 = vpop.eup %9878  ;;  %v7636_v45 = vadd.f32 %v6972_v50, %v3156_v9  ;;  %v5550_v57 = vsel %vm16595_vm15, %v5547_v24, %v5544_v40  ;;  %v7054_v30 = vadd.f32 1.0, %v16603_v56  ;;  %v6979_v8 = vand.u32 2147483647, %v16562_v37  ;;  %v2791_v9 = vpop.f32.mrf.mxu1 }
 0x824   : > { %v7478_v38 = vadd.f32 %v5550_v57, %v2998_v42  ;;  %9890 = vlog2.f32 %v5551_v33  ;;  %v5632_v1 = vadd.f32 1.0, %v16611_v54  ;;  %v5554_v15 = vmul.f32 -0.5, %v16599_v58 }
 0x825   : > { %7956 = vst [vmem:[%s11350_s2 + $0x8a0] sm:$0xff] %v7636_v45  ;;  %9892 = vlog2.f32 %v7054_v30  ;;  %v3167_v10 = vmax.f32 %v16531_v49, 0.0  ;;  %v4434_v32 = vmul.f32 1.442695, %v3817_v27  ;;  %v3506_v25 = vand.u32 2147483647, %v16609_v44 }
 0x826   : > { %7798 = vst [vmem:[%s11350_s2 + $0x3b0] sm:$0xff] %v7478_v38  ;;  %v5557_v46 = vand.u32 2147483647, %v16599_v58  ;;  %9894 = vlog2.f32 %v5632_v1  ;;  %v3009_v21 = vmax.f32 %v16536_v41, 0.0  ;;  %v4118_v62 = vmul.f32 1.442695, %v3659_v3 }
 0x827   : > { %v7057_v20 = vmul.f32 -0.5, %v16603_v56  ;;  %v3176_v28 = vmax.f32 %v16539_v52, 0.0  ;;  %9896 = vpow2.f32 %v4434_v32  ;;  %v16632_v59 = vadd.f32 %v2791_v9, %v15601_v35 }
 0x828   : > { %v9881_v23 = vpop.eup %9880  ;;  %v6978_v42 = vmul.f32 %v16562_v37, %v6977_v34  ;;  %v5635_v51 = vmul.f32 -0.5, %v16611_v54  ;;  %9898 = vpow2.f32 %v4118_v62  ;;  %vm6980_vm0 = vcmp.lt.f32.partialorder %v6979_v8, 0.0004427343 }
 0x829   : > { %v16634_v63 = vpop.eup %9882  ;;  %v6975_v14 = vmul.f32 0.6931472, %v9881_v23  ;;  %v5555_v47 = vadd.f32 1.0, %v5554_v15  ;;  %v3826_v19 = vsub.f32 0.0, %v3506_v25  ;;  %vm16641_vm1 = vcmp.lt.f32.partialorder %v5557_v46, 0.0004427343  ;;  %v2793_v23 = vpop.f32.mrf.mxu1 }
 0x82a   : > { %v16638_v43 = vpop.eup %9884  ;;  %v7063_v60 = vadd.f32 1.0, %v16634_v63  ;;  %v3018_v37 = vmax.f32 %v16543_v12, 0.0  ;;  %v7058_v36 = vadd.f32 1.0, %v7057_v20  ;;  %v3348_v55 = vand.u32 2147483647, %v16632_v59 }
 0x82b   : > { %v6981_v29 = vsel %vm6980_vm0, %v6978_v42, %v6975_v14  ;;  %v5641_v13 = vadd.f32 1.0, %v16638_v43  ;;  %v7060_v24 = vand.u32 2147483647, %v16603_v56  ;;  %v5636_v6 = vadd.f32 1.0, %v5635_v51  ;;  %v2795_v31 = vpop.f32.mrf.mxu1 }
 0x82c   : > { %v7637_v39 = vadd.f32 %v6981_v29, %v3157_v53  ;;  %9900 = vlog2.f32 %v7063_v60  ;;  %v16650_v40 = vpop.eup %9886  ;;  %v5638_v50 = vand.u32 2147483647, %v16611_v54  ;;  %v5556_v27 = vmul.f32 %v16599_v58, %v5555_v47 }
 0x82d   : > { %9902 = vlog2.f32 %v5641_v13  ;;  %v16654_v33 = vpop.eup %9888  ;;  %v7066_v18 = vmul.f32 -0.5, %v16634_v63  ;;  %v7144_v53 = vadd.f32 1.0, %v16650_v40  ;;  %v4452_v45 = vmul.f32 1.442695, %v3826_v19  ;;  %v2797_v32 = vpop.f32.mrf.mxu1 }
 0x82e   : > { %7957 = vst [vmem:[%s11350_s2 + $0x8a8] sm:$0xff] %v7637_v39  ;;  %v7069_v57 = vand.u32 2147483647, %v16634_v63  ;;  %v5644_v30 = vmul.f32 -0.5, %v16638_v43  ;;  %v5722_v3 = vadd.f32 1.0, %v16654_v33  ;;  %v16664_v38 = vadd.f32 %v2680_v16, %v14415_v5 }
 0x82f   : > { %v7059_v34 = vmul.f32 %v16603_v56, %v7058_v36  ;;  %v5647_v8 = vand.u32 2147483647, %v16638_v43  ;;  %9904 = vlog2.f32 %v7144_v53  ;;  %v3668_v58 = vsub.f32 0.0, %v3348_v55 }
 0x830   : > { %vm16668_vm2 = vcmp.lt.f32.partialorder %v7060_v24, 0.0004427343  ;;  %v5637_v15 = vmul.f32 %v16611_v54, %v5636_v6  ;;  %vm16673_vm3 = vcmp.lt.f32.partialorder %v5638_v50, 0.0004427343  ;;  %9906 = vlog2.f32 %v5722_v3  ;;  %v2682_v24 = vpop.f32.mrf.mxu0 }
 0x831   : > { %v9891_v1 = vpop.eup %9890  ;;  %v7067_v62 = vadd.f32 1.0, %v7066_v18  ;;  %9908 = vpow2.f32 %v4452_v45  ;;  %v4136_v56 = vmul.f32 1.442695, %v3668_v58  ;;  %vm16677_vm4 = vcmp.lt.f32.partialorder %v7069_v57, 0.0004427343 }
 0x832   : > { %v9893_v25 = vpop.eup %9892  ;;  %v5553_v46 = vmul.f32 0.6931472, %v9891_v1  ;;  %v5645_v42 = vadd.f32 1.0, %v5644_v30  ;;  %v7147_v51 = vmul.f32 -0.5, %v16650_v40  ;;  %v3507_v54 = vand.u32 2147483647, %v16664_v38 }
 0x833   : > { %v7056_v20 = vmul.f32 0.6931472, %v9893_v25  ;;  %v9895_v47 = vpop.eup %9894  ;;  %vm16685_vm5 = vcmp.lt.f32.partialorder %v5647_v8, 0.0004427343  ;;  %v7150_v29 = vand.u32 2147483647, %v16650_v40  ;;  %9910 = vpow2.f32 %v4136_v56 }
 0x834   : > { %v5559_v60 = vsel %vm16641_vm1, %v5556_v27, %v5553_v46  ;;  %v5725_v13 = vmul.f32 -0.5, %v16654_v33  ;;  %v16691_v39 = vpop.eup %9896  ;;  %v5634_v55 = vmul.f32 0.6931472, %v9895_v47  ;;  %v3827_v16 = vsub.f32 0.0, %v3507_v54 }
 0x835   : > { %v7479_v36 = vadd.f32 %v5559_v60, %v2999_v17  ;;  %v7062_v7 = vsel %vm16668_vm2, %v7059_v34, %v7056_v20  ;;  %v16697_v6 = vpop.eup %9898  ;;  %v5728_v27 = vand.u32 2147483647, %v16654_v33  ;;  %v7153_v18 = vadd.f32 1.0, %v16691_v39 }
 0x836   : > { %v7646_v50 = vadd.f32 %v7062_v7, %v3166_v61  ;;  %v16704_v53 = vadd.f32 %v2793_v23, %v15641_v26  ;;  %v5640_v17 = vsel %vm16673_vm3, %v5637_v15, %v5634_v55  ;;  %v7068_v45 = vmul.f32 %v16634_v63, %v7067_v62  ;;  %v2801_v7 = vpop.f32.mrf.mxu1 }
 0x837   : > { %7799 = vst [vmem:[%s11350_s2 + $0x3b8] sm:$0xff] %v7479_v36  ;;  %v7148_v57 = vadd.f32 1.0, %v7147_v51  ;;  %v5731_v30 = vadd.f32 1.0, %v16697_v6  ;;  %v7488_v22 = vadd.f32 %v5640_v17, %v3008_v48  ;;  %vm16714_vm6 = vcmp.lt.f32.partialorder %v7150_v29, 0.0004427343 }
 0x838   : > { %7966 = vst [vmem:[%s11350_s2 + $0x8f0] sm:$0xff] %v7646_v50  ;;  %9912 = vlog2.f32 %v7153_v18  ;;  %v16719_v3 = vadd.f32 %v2682_v24, %v14371_v11  ;;  %v5726_v8 = vadd.f32 1.0, %v5725_v13  ;;  %v4454_v58 = vmul.f32 1.442695, %v3827_v16  ;;  %v2684_v11 = vpop.f32.mrf.mxu0 }
 0x839   : > { %v9901_v34 = vpop.eup %9900  ;;  %9914 = vlog2.f32 %v5731_v30  ;;  %v16722_v63 = vadd.f32 %v2795_v31, %v15601_v35  ;;  %7808 = vst [vmem:[%s11350_s2 + $0x400] sm:$0xff] %v7488_v22  ;;  %v5646_v4 = vmul.f32 %v16638_v43, %v5645_v42  ;;  %vm16726_vm7 = vcmp.lt.f32.partialorder %v5728_v27, 0.0004427343 }
 0x83a   : > { %v9903_v1 = vpop.eup %9902  ;;  %v7065_v9 = vmul.f32 0.6931472, %v9901_v34  ;;  %v3349_v15 = vand.u32 2147483647, %v16704_v53  ;;  %v7149_v46 = vmul.f32 %v16650_v40, %v7148_v57  ;;  %v7156_v62 = vmul.f32 -0.5, %v16691_v39 }
 0x83b   : > { %v5643_v25 = vmul.f32 0.6931472, %v9903_v1  ;;  %9916 = vpow2.f32 %v4454_v58  ;;  %v7159_v43 = vand.u32 2147483647, %v16691_v39  ;;  %v3516_v20 = vand.u32 2147483647, %v16719_v3 }
 0x83c   : > { %v7071_v56 = vsel %vm16677_vm4, %v7068_v45, %v7065_v9  ;;  %v3669_v23 = vsub.f32 0.0, %v3349_v15  ;;  %v9905_v42 = vpop.eup %9904  ;;  %v3358_v54 = vand.u32 2147483647, %v16722_v63  ;;  %v16743_v47 = vadd.f32 %v2684_v11, %v14415_v5  ;;  %v2803_v45 = vpop.f32.mrf.mxu1 }
 0x83d   : > { %v7647_v51 = vadd.f32 %v7071_v56, %v3167_v10  ;;  %v5649_v40 = vsel %vm16685_vm5, %v5646_v4, %v5643_v25  ;;  %v9907_v14 = vpop.eup %9906  ;;  %v7146_v29 = vmul.f32 0.6931472, %v9905_v42  ;;  %v3836_v36 = vsub.f32 0.0, %v3516_v20 }
 0x83e   : > { %v7489_v60 = vadd.f32 %v5649_v40, %v3009_v21  ;;  %v4138_v13 = vmul.f32 1.442695, %v3669_v23  ;;  %v16747_v55 = vpop.eup %9908  ;;  %v5724_v49 = vmul.f32 0.6931472, %v9907_v14  ;;  %v5727_v10 = vmul.f32 %v16654_v33, %v5726_v8  ;;  %v2805_v4 = vpop.f32.mrf.mxu1 }
 0x83f   : > { %7967 = vst [vmem:[%s11350_s2 + $0x8f8] sm:$0xff] %v7647_v51  ;;  %v5734_v19 = vmul.f32 -0.5, %v16697_v6  ;;  %v5737_v5 = vand.u32 2147483647, %v16697_v6  ;;  %v7152_v41 = vsel %vm16714_vm6, %v7149_v46, %v7146_v29  ;;  %v7234_v21 = vadd.f32 1.0, %v16747_v55 }
 0x840   : > { %7809 = vst [vmem:[%s11350_s2 + $0x408] sm:$0xff] %v7489_v60  ;;  %v3678_v16 = vsub.f32 0.0, %v3358_v54  ;;  %v3517_v24 = vand.u32 2147483647, %v16743_v47  ;;  %v16758_v50 = vpop.eup %9910  ;;  %v7656_v33 = vadd.f32 %v7152_v41, %v3176_v28  ;;  %v5730_v27 = vsel %vm16726_vm7, %v5727_v10, %v5724_v49  ;;  %v2807_v40 = vpop.f32.mrf.mxu1 }
 0x841   : > { %9918 = vpow2.f32 %v4138_v13  ;;  %v4472_v18 = vmul.f32 1.442695, %v3836_v36  ;;  %v7498_v31 = vadd.f32 %v5730_v27, %v3018_v37  ;;  %v7157_v17 = vadd.f32 1.0, %v7156_v62 }
 0x842   : > { %9920 = vlog2.f32 %v7234_v21  ;;  %7976 = vst [vmem:[%s11350_s2 + $0x940] sm:$0xff] %v7656_v33  ;;  %v3177_v57 = vmax.f32 %v16579_v0, 0.0  ;;  %v5735_v30 = vadd.f32 1.0, %v5734_v19  ;;  %v5812_v22 = vadd.f32 1.0, %v16758_v50 }
 0x843   : > { %9922 = vpow2.f32 %v4472_v18  ;;  %7818 = vst [vmem:[%s11350_s2 + $0x450] sm:$0xff] %v7498_v31  ;;  %v3019_v52 = vmax.f32 %v16584_v2, 0.0  ;;  %v4156_v28 = vmul.f32 1.442695, %v3678_v16  ;;  %v3837_v61 = vsub.f32 0.0, %v3517_v24  ;;  %v2811_v24 = vpop.f32.mrf.mxu1 }
 0x844   : > { %v16772_v34 = vadd.f32 %v2797_v32, %v15641_v26  ;;  %vm16774_vm8 = vcmp.lt.f32.partialorder %v7159_v43, 0.0004427343  ;;  %vm16778_vm9 = vcmp.lt.f32.partialorder %v5737_v5, 0.0004427343  ;;  %9924 = vlog2.f32 %v5812_v22 }
 0x845   : > { %v9913_v12 = vpop.eup %9912  ;;  %v16783_v0 = vadd.f32 %v2801_v7, %v15601_v35  ;;  %v7158_v1 = vmul.f32 %v16691_v39, %v7157_v17  ;;  %9926 = vpow2.f32 %v4156_v28  ;;  %v4474_v9 = vmul.f32 1.442695, %v3837_v61 }
 0x846   : > { %v9915_v58 = vpop.eup %9914  ;;  %v7155_v2 = vmul.f32 0.6931472, %v9913_v12  ;;  %v5736_v15 = vmul.f32 %v16697_v6, %v5735_v30  ;;  %v7237_v11 = vmul.f32 -0.5, %v16747_v55  ;;  %v3359_v32 = vand.u32 2147483647, %v16772_v34 }
 0x847   : > { %v5733_v48 = vmul.f32 0.6931472, %v9915_v58  ;;  %9928 = vpow2.f32 %v4474_v9  ;;  %v3368_v39 = vand.u32 2147483647, %v16783_v0  ;;  %v16795_v62 = vadd.f32 %v2803_v45, %v15641_v26 }
 0x848   : > { %v16789_v25 = vpop.eup %9916  ;;  %v7161_v46 = vsel %vm16774_vm8, %v7158_v1, %v7155_v2  ;;  %v5815_v20 = vmul.f32 -0.5, %v16758_v50  ;;  %v3679_v42 = vsub.f32 0.0, %v3359_v32  ;;  %v3186_v54 = vmax.f32 %v16609_v44, 0.0 }
 0x849   : > { %v7657_v56 = vadd.f32 %v7161_v46, %v3177_v57  ;;  %v5739_v6 = vsel %vm16778_vm9, %v5736_v15, %v5733_v48  ;;  %v7243_v43 = vadd.f32 1.0, %v16789_v25  ;;  %v3688_v51 = vsub.f32 0.0, %v3368_v39 }
 0x84a   : > { %v7499_v23 = vadd.f32 %v5739_v6, %v3019_v52  ;;  %v7240_v14 = vand.u32 2147483647, %v16747_v55  ;;  %v3369_v60 = vand.u32 2147483647, %v16795_v62  ;;  %v7238_v29 = vadd.f32 1.0, %v7237_v11 }
 0x84b   : > { %7977 = vst [vmem:[%s11350_s2 + $0x948] sm:$0xff] %v7657_v56  ;;  %9930 = vlog2.f32 %v7243_v43  ;;  %v4158_v13 = vmul.f32 1.442695, %v3679_v42  ;;  %v4176_v36 = vmul.f32 1.442695, %v3688_v51  ;;  %v16807_v7 = vadd.f32 %v2805_v4, %v15601_v35 }
 0x84c   : > { %7819 = vst [vmem:[%s11350_s2 + $0x458] sm:$0xff] %v7499_v23  ;;  %v3028_v49 = vmax.f32 %v16632_v59, 0.0  ;;  %v3187_v10 = vmax.f32 %v16664_v38, 0.0  ;;  %v3029_v19 = vmax.f32 %v16704_v53, 0.0  ;;  %v3689_v5 = vsub.f32 0.0, %v3369_v60 }
 0x84d   : > { %v5816_v41 = vadd.f32 1.0, %v5815_v20  ;;  %v3196_v21 = vmax.f32 %v16719_v3, 0.0  ;;  %9932 = vpow2.f32 %v4158_v13  ;;  %v3378_v16 = vand.u32 2147483647, %v16807_v7 }
 0x84e   : > { %v16812_v44 = vpop.eup %9918  ;;  %vm16816_vm10 = vcmp.lt.f32.partialorder %v7240_v14, 0.0004427343  ;;  %v7246_v59 = vmul.f32 -0.5, %v16789_v25  ;;  %9934 = vpow2.f32 %v4176_v36  ;;  %v7239_v45 = vmul.f32 %v16747_v55, %v7238_v29  ;;  %v2813_v55 = vpop.f32.mrf.mxu1 }
 0x84f   : > { %v9921_v33 = vpop.eup %9920  ;;  %v5821_v18 = vadd.f32 1.0, %v16812_v44  ;;  %v5818_v57 = vand.u32 2147483647, %v16758_v50  ;;  %v4178_v30 = vmul.f32 1.442695, %v3689_v5  ;;  %v3698_v52 = vsub.f32 0.0, %v3378_v16 }
 0x850   : > { %v16822_v31 = vpop.eup %9922  ;;  %v7236_v17 = vmul.f32 0.6931472, %v9921_v33  ;;  %v16828_v28 = vadd.f32 %v2807_v40, %v15641_v26  ;;  %v5817_v37 = vmul.f32 %v16758_v50, %v5816_v41  ;;  %v7249_v8 = vand.u32 2147483647, %v16789_v25  ;;  %v2815_v23 = vpop.f32.mrf.mxu1 }
 0x851   : > { %9936 = vlog2.f32 %v5821_v18  ;;  %v7324_v22 = vadd.f32 1.0, %v16822_v31  ;;  %v9925_v61 = vpop.eup %9924  ;;  %v7247_v9 = vadd.f32 1.0, %v7246_v59  ;;  %vm5819_vm11 = vcmp.lt.f32.partialorder %v5818_v57, 0.0004427343 }
 0x852   : > { %v7242_v12 = vsel %vm16816_vm10, %v7239_v45, %v7236_v17  ;;  %9938 = vpow2.f32 %v4178_v30  ;;  %v16834_v58 = vpop.eup %9926  ;;  %v5814_v1 = vmul.f32 0.6931472, %v9925_v61  ;;  %v3038_v4 = vmax.f32 %v16722_v63, 0.0 }
 0x853   : > { %v7666_v2 = vadd.f32 %v7242_v12, %v3186_v54  ;;  %9940 = vlog2.f32 %v7324_v22  ;;  %v5902_v48 = vadd.f32 1.0, %v16834_v58  ;;  %v3197_v15 = vmax.f32 %v16743_v47, 0.0 }
 0x854   : > { %v16839_v11 = vpop.eup %9928  ;;  %v5820_v50 = vsel %vm5819_vm11, %v5817_v37, %v5814_v1  ;;  %v5824_v32 = vmul.f32 -0.5, %v16812_v44  ;;  %v4196_v46 = vmul.f32 1.442695, %v3698_v52  ;;  %v3379_v39 = vand.u32 2147483647, %v16828_v28 }
 0x855   : > { %7986 = vst [vmem:[%s11350_s2 + $0x990] sm:$0xff] %v7666_v2  ;;  %v7508_v56 = vadd.f32 %v5820_v50, %v3028_v49  ;;  %v7327_v6 = vmul.f32 -0.5, %v16822_v31  ;;  %9942 = vlog2.f32 %v5902_v48  ;;  %v16846_v43 = vadd.f32 %v2811_v24, %v15601_v35  ;;  %v2817_v24 = vpop.f32.mrf.mxu1 }
 0x856   : > { %v7248_v20 = vmul.f32 %v16789_v25, %v7247_v9  ;;  %vm16849_vm12 = vcmp.lt.f32.partialorder %v7249_v8, 0.0004427343  ;;  %v7333_v51 = vadd.f32 1.0, %v16839_v11  ;;  %v3039_v40 = vmax.f32 %v16772_v34, 0.0 }
 0x857   : > { %7828 = vst [vmem:[%s11350_s2 + $0x4a0] sm:$0xff] %v7508_v56  ;;  %v5827_v14 = vand.u32 2147483647, %v16812_v44  ;;  %v5905_v60 = vmul.f32 -0.5, %v16834_v58  ;;  %9944 = vpow2.f32 %v4196_v46  ;;  %v3699_v29 = vsub.f32 0.0, %v3379_v39  ;;  %v2821_v2 = vpop.f32.mrf.mxu1 }
 0x858   : > { %v9931_v54 = vpop.eup %9930  ;;  %v5825_v36 = vadd.f32 1.0, %v5824_v32  ;;  %v7330_v25 = vand.u32 2147483647, %v16822_v31  ;;  %9946 = vlog2.f32 %v7333_v51  ;;  %v7328_v49 = vadd.f32 1.0, %v7327_v6 }
 0x859   : > { %v7245_v13 = vmul.f32 0.6931472, %v9931_v54  ;;  %v7336_v5 = vmul.f32 -0.5, %v16839_v11  ;;  %v4198_v41 = vmul.f32 1.442695, %v3699_v29  ;;  %v3048_v18 = vmax.f32 %v16783_v0, 0.0 }
 0x85a   : > { %v3388_v16 = vand.u32 2147483647, %v16846_v43  ;;  %v16861_v33 = vpop.eup %9932  ;;  %v5908_v59 = vand.u32 2147483647, %v16834_v58  ;;  %v16868_v17 = vadd.f32 %v2813_v55, %v15641_v26  ;;  %vm16874_vm13 = vcmp.lt.f32.partialorder %v5827_v14, 0.0004427343  ;;  %v2823_v14 = vpop.f32.mrf.mxu1 }
 0x85b   : > { %v7251_v27 = vsel %vm16849_vm12, %v7248_v20, %v7245_v13  ;;  %v16870_v45 = vpop.eup %9934  ;;  %v5906_v22 = vadd.f32 1.0, %v5905_v60  ;;  %v5911_v52 = vadd.f32 1.0, %v16861_v33  ;;  %v5826_v61 = vmul.f32 %v16812_v44, %v5825_v36 }
 0x85c   : > { %v7667_v57 = vadd.f32 %v7251_v27, %v3187_v10  ;;  %vm16880_vm14 = vcmp.lt.f32.partialorder %v7330_v25, 0.0004427343  ;;  %v5992_v37 = vadd.f32 1.0, %v16870_v45  ;;  %9948 = vpow2.f32 %v4198_v41 }
 0x85d   : > { %v7329_v38 = vmul.f32 %v16822_v31, %v7328_v49  ;;  %v7337_v10 = vadd.f32 1.0, %v7336_v5  ;;  %9950 = vlog2.f32 %v5911_v52  ;;  %v3708_v55 = vsub.f32 0.0, %v3388_v16 }
 0x85e   : > { %v9937_v8 = vpop.eup %9936  ;;  %7987 = vst [vmem:[%s11350_s2 + $0x998] sm:$0xff] %v7667_v57  ;;  %vm16889_vm15 = vcmp.lt.f32.partialorder %v5908_v59, 0.0004427343  ;;  %9952 = vlog2.f32 %v5992_v37  ;;  %v3389_v48 = vand.u32 2147483647, %v16868_v17  ;;  %v5907_v32 = vmul.f32 %v16834_v58, %v5906_v22  ;;  %v2825_v57 = vpop.f32.mrf.mxu1 }
 0x85f   : > { %v16887_v1 = vpop.eup %9938  ;;  %v5823_v9 = vmul.f32 0.6931472, %v9937_v8  ;;  %v7339_v46 = vand.u32 2147483647, %v16839_v11  ;;  %v16898_v39 = vadd.f32 %v2815_v23, %v15601_v35  ;;  %v4216_v20 = vmul.f32 1.442695, %v3708_v55 }
 0x860   : > { %v9941_v50 = vpop.eup %9940  ;;  %v6001_v31 = vadd.f32 1.0, %v16887_v1  ;;  %v16903_v42 = vadd.f32 %v2817_v24, %v15641_v26  ;;  %v7338_v58 = vmul.f32 %v16839_v11, %v7337_v10  ;;  %v5914_v54 = vmul.f32 -0.5, %v16861_v33  ;;  %v2827_v44 = vpop.f32.mrf.mxu1 }
 0x861   : > { %v5829_v56 = vsel %vm16874_vm13, %v5826_v61, %v5823_v9  ;;  %v7326_v6 = vmul.f32 0.6931472, %v9941_v50  ;;  %v5917_v29 = vand.u32 2147483647, %v16861_v33  ;;  %v3709_v13 = vsub.f32 0.0, %v3389_v48 }
 0x862   : > { %v7509_v51 = vadd.f32 %v5829_v56, %v3029_v19  ;;  %9954 = vlog2.f32 %v6001_v31  ;;  %v9943_v60 = vpop.eup %9942  ;;  %v5995_v11 = vmul.f32 -0.5, %v16870_v45  ;;  %v3398_v36 = vand.u32 2147483647, %v16898_v39 }
 0x863   : > { %v7332_v23 = vsel %vm16880_vm14, %v7329_v38, %v7326_v6  ;;  %9956 = vpow2.f32 %v4216_v20  ;;  %v5904_v19 = vmul.f32 0.6931472, %v9943_v60  ;;  %v5998_v49 = vand.u32 2147483647, %v16870_v45  ;;  %v2831_v60 = vpop.f32.mrf.mxu1 }
 0x864   : > { %7829 = vst [vmem:[%s11350_s2 + $0x4a8] sm:$0xff] %v7509_v51  ;;  %v7676_v53 = vadd.f32 %v7332_v23, %v3196_v21  ;;  %v16917_v25 = vpop.eup %9944  ;;  %v4218_v5 = vmul.f32 1.442695, %v3709_v13  ;;  %v3399_v41 = vand.u32 2147483647, %v16903_v42  ;;  %v16922_v16 = vadd.f32 %v2821_v2, %v15601_v35 }
 0x865   : > { %v9947_v24 = vpop.eup %9946  ;;  %v5910_v3 = vsel %vm16889_vm15, %v5907_v32, %v5904_v19  ;;  %v5915_v21 = vadd.f32 1.0, %v5914_v54  ;;  %v6004_v27 = vmul.f32 -0.5, %v16887_v1  ;;  %v6082_v59 = vadd.f32 1.0, %v16917_v25  ;;  %v2833_v0 = vpop.f32.mrf.mxu1 }
 0x866   : > { %7996 = vst [vmem:[%s11350_s2 + $0x9e0] sm:$0xff] %v7676_v53  ;;  %v7518_v30 = vadd.f32 %v5910_v3, %v3038_v4  ;;  %v7335_v22 = vmul.f32 0.6931472, %v9947_v24  ;;  %9958 = vpow2.f32 %v4218_v5  ;;  %v3718_v52 = vsub.f32 0.0, %v3398_v36 }
 0x867   : > { %vm7340_vm0 = vcmp.lt.f32.partialorder %v7339_v46, 0.0004427343  ;;  %vm16931_vm1 = vcmp.lt.f32.partialorder %v5917_v29, 0.0004427343  ;;  %9960 = vlog2.f32 %v6082_v59  ;;  %v3719_v12 = vsub.f32 0.0, %v3399_v41 }
 0x868   : > { %7838 = vst [vmem:[%s11350_s2 + $0x4f0] sm:$0xff] %v7518_v30  ;;  %v7341_v37 = vsel %vm7340_vm0, %v7338_v58, %v7335_v22  ;;  %v5996_v8 = vadd.f32 1.0, %v5995_v11  ;;  %v4236_v38 = vmul.f32 1.442695, %v3718_v52  ;;  %v3408_v10 = vand.u32 2147483647, %v16922_v16 }
 0x869   : > { %v16937_v55 = vpop.eup %9948  ;;  %v7677_v63 = vadd.f32 %v7341_v37, %v3197_v15  ;;  %vm16941_vm2 = vcmp.lt.f32.partialorder %v5998_v49, 0.0004427343  ;;  %v4238_v2 = vmul.f32 1.442695, %v3719_v12  ;;  %v16946_v9 = vadd.f32 %v2823_v14, %v15641_v26 }
 0x86a   : > { %v9951_v48 = vpop.eup %9950  ;;  %v5916_v50 = vmul.f32 %v16861_v33, %v5915_v21  ;;  %v6005_v32 = vadd.f32 1.0, %v6004_v27  ;;  %v6091_v46 = vadd.f32 1.0, %v16937_v55  ;;  %9962 = vpow2.f32 %v4236_v38 }
 0x86b   : > { %v9953_v31 = vpop.eup %9952  ;;  %7997 = vst [vmem:[%s11350_s2 + $0x9e8] sm:$0xff] %v7677_v63  ;;  %v5913_v47 = vmul.f32 0.6931472, %v9951_v48  ;;  %v6007_v15 = vand.u32 2147483647, %v16887_v1  ;;  %9964 = vpow2.f32 %v4238_v2  ;;  %v3728_v56 = vsub.f32 0.0, %v3408_v10  ;;  %v2835_v63 = vpop.f32.mrf.mxu1 }
 0x86c   : > { %v5994_v6 = vmul.f32 0.6931472, %v9953_v31  ;;  %v5997_v20 = vmul.f32 %v16870_v45, %v5996_v8  ;;  %v6085_v51 = vmul.f32 -0.5, %v16917_v25  ;;  %9966 = vlog2.f32 %v6091_v46 }
 0x86d   : > { %v5919_v33 = vsel %vm16931_vm1, %v5916_v50, %v5913_v47  ;;  %v4256_v58 = vmul.f32 1.442695, %v3728_v56  ;;  %v3409_v54 = vand.u32 2147483647, %v16946_v9  ;;  %v16958_v14 = vadd.f32 %v2825_v57, %v15601_v35 }
 0x86e   : > { %v7519_v29 = vadd.f32 %v5919_v33, %v3039_v40  ;;  %v6000_v45 = vsel %vm16941_vm2, %v5997_v20, %v5994_v6  ;;  %v6006_v13 = vmul.f32 %v16887_v1, %v6005_v32  ;;  %v16966_v53 = vadd.f32 %v2827_v44, %v15641_v26  ;;  %v2837_v33 = vpop.f32.mrf.mxu1 }
 0x86f   : > { %v9955_v23 = vpop.eup %9954  ;;  %v7528_v11 = vadd.f32 %v6000_v45, %v3048_v18  ;;  %9968 = vpow2.f32 %v4256_v58  ;;  %v3729_v49 = vsub.f32 0.0, %v3409_v54  ;;  %v3049_v34 = vmax.f32 %v16795_v62, 0.0 }
 0x870   : > { %v16968_v19 = vpop.eup %9956  ;;  %v6003_v36 = vmul.f32 0.6931472, %v9955_v23  ;;  %7839 = vst [vmem:[%s11350_s2 + $0x4f8] sm:$0xff] %v7519_v29  ;;  %vm6008_vm3 = vcmp.lt.f32.partialorder %v6007_v15, 0.0004427343  ;;  %v6086_v40 = vadd.f32 1.0, %v6085_v51  ;;  %v16984_v30 = vadd.f32 %v2831_v60, %v15601_v35 }
 0x871   : > { %v6172_v5 = vadd.f32 1.0, %v16968_v19  ;;  %7848 = vst [vmem:[%s11350_s2 + $0x540] sm:$0xff] %v7528_v11  ;;  %v6094_v41 = vmul.f32 -0.5, %v16937_v55  ;;  %v4258_v24 = vmul.f32 1.442695, %v3729_v49  ;;  %v3058_v21 = vmax.f32 %v16807_v7, 0.0 }
 0x872   : > { %v6009_v1 = vsel %vm6008_vm3, %v6006_v13, %v6003_v36  ;;  %v3418_v3 = vand.u32 2147483647, %v16958_v14  ;;  %v6088_v27 = vand.u32 2147483647, %v16917_v25  ;;  %v3419_v57 = vand.u32 2147483647, %v16966_v53 }
 0x873   : > { %v7529_v18 = vadd.f32 %v6009_v1, %v3049_v34  ;;  %9970 = vlog2.f32 %v6172_v5  ;;  %v16980_v62 = vpop.eup %9958  ;;  %v6087_v52 = vmul.f32 %v16917_v25, %v6086_v40  ;;  %v3059_v61 = vmax.f32 %v16828_v28, 0.0  ;;  %v2841_v5 = vpop.f32.mrf.mxu1 }
 0x874   : > { %9972 = vpow2.f32 %v4258_v24  ;;  %v3738_v59 = vsub.f32 0.0, %v3418_v3  ;;  %v9961_v22 = vpop.eup %9960  ;;  %v3068_v7 = vmax.f32 %v16846_v43, 0.0  ;;  %v6181_v12 = vadd.f32 1.0, %v16980_v62 }
 0x875   : > { %7849 = vst [vmem:[%s11350_s2 + $0x548] sm:$0xff] %v7529_v18  ;;  %v6084_v37 = vmul.f32 0.6931472, %v9961_v22  ;;  %v6095_v8 = vadd.f32 1.0, %v6094_v41  ;;  %v3739_v10 = vsub.f32 0.0, %v3419_v57  ;;  %v3069_v4 = vmax.f32 %v16868_v17, 0.0 }
 0x876   : > { %v4276_v38 = vmul.f32 1.442695, %v3738_v59  ;;  %vm6089_vm4 = vcmp.lt.f32.partialorder %v6088_v27, 0.0004427343  ;;  %9974 = vlog2.f32 %v6181_v12  ;;  %v3428_v2 = vand.u32 2147483647, %v16984_v30 }
 0x877   : > { %v16993_v44 = vpop.eup %9962  ;;  %v6090_v25 = vsel %vm6089_vm4, %v6087_v52, %v6084_v37  ;;  %v6097_v28 = vand.u32 2147483647, %v16937_v55  ;;  %v3078_v48 = vmax.f32 %v16898_v39, 0.0  ;;  %v6175_v46 = vmul.f32 -0.5, %v16968_v19 }
 0x878   : > { %9976 = vpow2.f32 %v4276_v38  ;;  %v16997_v50 = vpop.eup %9964  ;;  %v7538_v32 = vadd.f32 %v6090_v25, %v3058_v21  ;;  %v6262_v31 = vadd.f32 1.0, %v16993_v44  ;;  %v4278_v47 = vmul.f32 1.442695, %v3739_v10  ;;  %v2843_v38 = vpop.f32.mrf.mxu1 }
 0x879   : > { %v9967_v15 = vpop.eup %9966  ;;  %v6096_v56 = vmul.f32 %v16937_v55, %v6095_v8  ;;  %v6184_v6 = vmul.f32 -0.5, %v16980_v62  ;;  %v3079_v20 = vmax.f32 %v16903_v42, 0.0  ;;  %v6271_v51 = vadd.f32 1.0, %v16997_v50 }
 0x87a   : > { %7858 = vst [vmem:[%s11350_s2 + $0x590] sm:$0xff] %v7538_v32  ;;  %v6093_v58 = vmul.f32 0.6931472, %v9967_v15  ;;  %9978 = vlog2.f32 %v6262_v31  ;;  %v3748_v54 = vsub.f32 0.0, %v3428_v2  ;;  %v17007_v60 = vadd.f32 %v2833_v0, %v15641_v26 }
 0x87b   : > { %vm6098_vm5 = vcmp.lt.f32.partialorder %v6097_v28, 0.0004427343  ;;  %v6178_v23 = vand.u32 2147483647, %v16968_v19  ;;  %9980 = vlog2.f32 %v6271_v51  ;;  %v3088_v55 = vmax.f32 %v16922_v16, 0.0 }
 0x87c   : > { %v17011_v29 = vpop.eup %9968  ;;  %v6099_v45 = vsel %vm6098_vm5, %v6096_v56, %v6093_v58  ;;  %v6176_v13 = vadd.f32 1.0, %v6175_v46  ;;  %9982 = vpow2.f32 %v4278_v47  ;;  %v4296_v11 = vmul.f32 1.442695, %v3748_v54 }
 0x87d   : > { %v7539_v36 = vadd.f32 %v6099_v45, %v3059_v61  ;;  %v6185_v49 = vadd.f32 1.0, %v6184_v6  ;;  %v6352_v34 = vadd.f32 1.0, %v17011_v29  ;;  %v3089_v40 = vmax.f32 %v16946_v9, 0.0 }
 0x87e   : > { %v3098_v1 = vmax.f32 %v16958_v14, 0.0  ;;  %v3099_v41 = vmax.f32 %v16966_v53, 0.0  ;;  %9984 = vpow2.f32 %v4296_v11  ;;  %v3429_v24 = vand.u32 2147483647, %v17007_v60 }
 0x87f   : > { %7859 = vst [vmem:[%s11350_s2 + $0x598] sm:$0xff] %v7539_v36  ;;  %vm17019_vm6 = vcmp.lt.f32.partialorder %v6178_v23, 0.0004427343  ;;  %v6265_v18 = vmul.f32 -0.5, %v16993_v44  ;;  %9986 = vlog2.f32 %v6352_v34  ;;  %v17025_v21 = vadd.f32 %v2835_v63, %v15601_v35 }
 0x880   : > { %v9971_v3 = vpop.eup %9970  ;;  %v6177_v57 = vmul.f32 %v16968_v19, %v6176_v13  ;;  %v6187_v22 = vand.u32 2147483647, %v16980_v62  ;;  %v3749_v52 = vsub.f32 0.0, %v3429_v24  ;;  %v6186_v61 = vmul.f32 %v16980_v62, %v6185_v49 }
 0x881   : > { %v17027_v27 = vpop.eup %9972  ;;  %v6174_v59 = vmul.f32 0.6931472, %v9971_v3  ;;  %v6274_v12 = vmul.f32 -0.5, %v16997_v50  ;;  %v6355_v37 = vmul.f32 -0.5, %v17011_v29  ;;  %v3438_v2 = vand.u32 2147483647, %v17025_v21 }
 0x882   : > { %v6361_v8 = vadd.f32 1.0, %v17027_v27  ;;  %v4298_v63 = vmul.f32 1.442695, %v3749_v52  ;;  %v17039_v19 = vadd.f32 %v2837_v33, %v15641_v26  ;;  %v6266_v28 = vadd.f32 1.0, %v6265_v18 }
 0x883   : > { %v6180_v10 = vsel %vm17019_vm6, %v6177_v57, %v6174_v59  ;;  %v9975_v25 = vpop.eup %9974  ;;  %v6268_v32 = vand.u32 2147483647, %v16993_v44  ;;  %v3758_v47 = vsub.f32 0.0, %v3438_v2  ;;  %v17047_v15 = vadd.f32 %v2841_v5, %v15601_v35 }
 0x884   : > { %v7548_v62 = vadd.f32 %v6180_v10, %v3068_v7  ;;  %9988 = vlog2.f32 %v6361_v8  ;;  %v6183_v31 = vmul.f32 0.6931472, %v9975_v25  ;;  %vm6188_vm7 = vcmp.lt.f32.partialorder %v6187_v22, 0.0004427343  ;;  %v2845_v7 = vpop.f32.mrf.mxu1 }
 0x885   : > { %v17044_v46 = vpop.eup %9976  ;;  %9990 = vpow2.f32 %v4298_v63  ;;  %v6275_v56 = vadd.f32 1.0, %v6274_v12  ;;  %v6277_v6 = vand.u32 2147483647, %v16997_v50  ;;  %v6356_v33 = vadd.f32 1.0, %v6355_v37 }
 0x886   : > { %7868 = vst [vmem:[%s11350_s2 + $0x5e0] sm:$0xff] %v7548_v62  ;;  %v6442_v43 = vadd.f32 1.0, %v17044_v46  ;;  %v6189_v51 = vsel %vm6188_vm7, %v6186_v61, %v6183_v31  ;;  %v4316_v58 = vmul.f32 1.442695, %v3758_v47  ;;  %v3439_v54 = vand.u32 2147483647, %v17039_v19 }
 0x887   : > { %v9979_v23 = vpop.eup %9978  ;;  %v7549_v45 = vadd.f32 %v6189_v51, %v3069_v4  ;;  %v6267_v13 = vmul.f32 %v16993_v44, %v6266_v28  ;;  %vm17056_vm8 = vcmp.lt.f32.partialorder %v6268_v32, 0.0004427343  ;;  %v3448_v5 = vand.u32 2147483647, %v17047_v15  ;;  %v2847_v44 = vpop.f32.mrf.mxu1 }
 0x888   : > { %9992 = vlog2.f32 %v6442_v43  ;;  %v9981_v36 = vpop.eup %9980  ;;  %v6264_v49 = vmul.f32 0.6931472, %v9979_v23  ;;  %v3759_v34 = vsub.f32 0.0, %v3439_v54  ;;  %v6276_v17 = vmul.f32 %v16997_v50, %v6275_v56 }
 0x889   : > { %9994 = vpow2.f32 %v4316_v58  ;;  %v17061_v24 = vpop.eup %9982  ;;  %7869 = vst [vmem:[%s11350_s2 + $0x5e8] sm:$0xff] %v7549_v45  ;;  %v6273_v3 = vmul.f32 0.6931472, %v9981_v36  ;;  %vm6278_vm9 = vcmp.lt.f32.partialorder %v6277_v6, 0.0004427343  ;;  %v6364_v4 = vmul.f32 -0.5, %v17027_v27  ;;  %v2851_v25 = vpop.f32.mrf.mxu1 }
 0x88a   : > { %v6270_v0 = vsel %vm17056_vm8, %v6267_v13, %v6264_v49  ;;  %v6357_v18 = vmul.f32 %v17011_v29, %v6356_v33  ;;  %v6358_v59 = vand.u32 2147483647, %v17011_v29  ;;  %v6451_v57 = vadd.f32 1.0, %v17061_v24 }
 0x88b   : > { %v17071_v22 = vpop.eup %9984  ;;  %v7558_v50 = vadd.f32 %v6270_v0, %v3078_v48  ;;  %v6279_v52 = vsel %vm6278_vm9, %v6276_v17, %v6273_v3  ;;  %v4318_v61 = vmul.f32 1.442695, %v3759_v34  ;;  %v3768_v12 = vsub.f32 0.0, %v3448_v5  ;;  %v2853_v58 = vpop.f32.mrf.mxu1 }
 0x88c   : > { %v9987_v37 = vpop.eup %9986  ;;  %v7559_v8 = vadd.f32 %v6279_v52, %v3079_v20  ;;  %v6445_v10 = vmul.f32 -0.5, %v17044_v46  ;;  %9996 = vlog2.f32 %v6451_v57  ;;  %v17079_v29 = vadd.f32 %v2843_v38, %v15641_v26 }
 0x88d   : > { %7878 = vst [vmem:[%s11350_s2 + $0x630] sm:$0xff] %v7558_v50  ;;  %v6354_v63 = vmul.f32 0.6931472, %v9987_v37  ;;  %v6365_v2 = vadd.f32 1.0, %v6364_v4  ;;  %v6532_v39 = vadd.f32 1.0, %v17071_v22  ;;  %v17084_v48 = vadd.f32 %v2845_v7, %v15601_v35  ;;  %v2855_v0 = vpop.f32.mrf.mxu1 }
 0x88e   : > { %7879 = vst [vmem:[%s11350_s2 + $0x638] sm:$0xff] %v7559_v8  ;;  %vm6359_vm10 = vcmp.lt.f32.partialorder %v6358_v59, 0.0004427343  ;;  %v6367_v42 = vand.u32 2147483647, %v17027_v27  ;;  %9998 = vpow2.f32 %v4318_v61  ;;  %v3108_v28 = vmax.f32 %v16984_v30, 0.0 }
 0x88f   : > { %v4336_v20 = vmul.f32 1.442695, %v3768_v12  ;;  %v6360_v62 = vsel %vm6359_vm10, %v6357_v18, %v6354_v63  ;;  %v6448_v38 = vand.u32 2147483647, %v17044_v46  ;;  %10000 = vlog2.f32 %v6532_v39 }
 0x890   : > { %v7568_v31 = vadd.f32 %v6360_v62, %v3088_v55  ;;  %v6446_v47 = vadd.f32 1.0, %v6445_v10  ;;  %v3449_v56 = vand.u32 2147483647, %v17079_v29  ;;  %v6366_v7 = vmul.f32 %v17027_v27, %v6365_v2  ;;  %v2857_v2 = vpop.f32.mrf.mxu1 }
 0x891   : > { %v9989_v32 = vpop.eup %9988  ;;  %10002 = vpow2.f32 %v4336_v20  ;;  %v3458_v51 = vand.u32 2147483647, %v17084_v48  ;;  %v17098_v33 = vadd.f32 %v2847_v44, %v15641_v26  ;;  %vm6368_vm11 = vcmp.lt.f32.partialorder %v6367_v42, 0.0004427343 }
 0x892   : > { %v17093_v6 = vpop.eup %9990  ;;  %v6363_v43 = vmul.f32 0.6931472, %v9989_v32  ;;  %7888 = vst [vmem:[%s11350_s2 + $0x680] sm:$0xff] %v7568_v31  ;;  %v6454_v16 = vmul.f32 -0.5, %v17061_v24  ;;  %v3769_v54 = vsub.f32 0.0, %v3449_v56  ;;  %v6535_v45 = vmul.f32 -0.5, %v17071_v22 }
 0x893   : > { %v6541_v55 = vadd.f32 1.0, %v17093_v6  ;;  %v3778_v13 = vsub.f32 0.0, %v3458_v51  ;;  %v3459_v27 = vand.u32 2147483647, %v17098_v33  ;;  %v6447_v49 = vmul.f32 %v17044_v46, %v6446_v47 }
 0x894   : > { %v6369_v23 = vsel %vm6368_vm11, %v6366_v7, %v6363_v43  ;;  %vm17108_vm12 = vcmp.lt.f32.partialorder %v6448_v38, 0.0004427343  ;;  %v4338_v17 = vmul.f32 1.442695, %v3769_v54  ;;  %v17115_v44 = vadd.f32 %v2851_v25, %v15601_v35 }
 0x895   : > { %v9993_v11 = vpop.eup %9992  ;;  %v7569_v36 = vadd.f32 %v6369_v23, %v3089_v40  ;;  %10004 = vlog2.f32 %v6541_v55  ;;  %v4356_v4 = vmul.f32 1.442695, %v3778_v13  ;;  %v6455_v18 = vadd.f32 1.0, %v6454_v16 }
 0x896   : > { %v17112_v5 = vpop.eup %9994  ;;  %v6444_v3 = vmul.f32 0.6931472, %v9993_v11  ;;  %v6457_v9 = vand.u32 2147483647, %v17061_v24  ;;  %v6538_v40 = vand.u32 2147483647, %v17071_v22  ;;  %10006 = vpow2.f32 %v4338_v17 }
 0x897   : > { %7889 = vst [vmem:[%s11350_s2 + $0x688] sm:$0xff] %v7569_v36  ;;  %v6622_v46 = vadd.f32 1.0, %v17112_v5  ;;  %v6536_v57 = vadd.f32 1.0, %v6535_v45  ;;  %v3779_v50 = vsub.f32 0.0, %v3459_v27  ;;  %v3109_v61 = vmax.f32 %v17007_v60, 0.0 }
 0x898   : > { %v6450_v59 = vsel %vm17108_vm12, %v6447_v49, %v6444_v3  ;;  %v6544_v12 = vmul.f32 -0.5, %v17093_v6  ;;  %v3468_v10 = vand.u32 2147483647, %v17115_v44  ;;  %v17129_v63 = vadd.f32 %v2853_v58, %v15641_v26  ;;  %v2861_v58 = vpop.f32.mrf.mxu1 }
 0x899   : > { %v7578_v52 = vadd.f32 %v6450_v59, %v3098_v1  ;;  %10008 = vlog2.f32 %v6622_v46  ;;  %v9997_v37 = vpop.eup %9996  ;;  %v4358_v8 = vmul.f32 1.442695, %v3779_v50  ;;  %v6456_v25 = vmul.f32 %v17061_v24, %v6455_v18 }
 0x89a   : > { %10010 = vpow2.f32 %v4356_v4  ;;  %v6453_v39 = vmul.f32 0.6931472, %v9997_v37  ;;  %vm6458_vm13 = vcmp.lt.f32.partialorder %v6457_v9, 0.0004427343  ;;  %vm17133_vm14 = vcmp.lt.f32.partialorder %v6538_v40, 0.0004427343  ;;  %v2863_v17 = vpop.f32.mrf.mxu1 }
 0x89b   : > { %7898 = vst [vmem:[%s11350_s2 + $0x6d0] sm:$0xff] %v7578_v52  ;;  %v17137_v1 = vpop.eup %9998  ;;  %v6537_v42 = vmul.f32 %v17071_v22, %v6536_v57  ;;  %10012 = vpow2.f32 %v4358_v8  ;;  %v3788_v20 = vsub.f32 0.0, %v3468_v10  ;;  %v3469_v62 = vand.u32 2147483647, %v17129_v63 }
 0x89c   : > { %v10001_v38 = vpop.eup %10000  ;;  %v6459_v32 = vsel %vm6458_vm13, %v6456_v25, %v6453_v39  ;;  %v6545_v31 = vadd.f32 1.0, %v6544_v12  ;;  %v6631_v47 = vadd.f32 1.0, %v17137_v1  ;;  %v17143_v24 = vadd.f32 %v2855_v0, %v15601_v35  ;;  %v2865_v8 = vpop.f32.mrf.mxu1 }
 0x89d   : > { %v7579_v43 = vadd.f32 %v6459_v32, %v3099_v41  ;;  %v6534_v7 = vmul.f32 0.6931472, %v10001_v38  ;;  %v4376_v22 = vmul.f32 1.442695, %v3788_v20  ;;  %v3789_v51 = vsub.f32 0.0, %v3469_v62 }
 0x89e   : > { %v17145_v56 = vpop.eup %10002  ;;  %v6625_v16 = vmul.f32 -0.5, %v17112_v5  ;;  %10014 = vlog2.f32 %v6631_v47  ;;  %v17152_v54 = vadd.f32 %v2857_v2, %v15641_v26  ;;  %v6547_v53 = vand.u32 2147483647, %v17093_v6 }
 0x89f   : > { %v6712_v55 = vadd.f32 1.0, %v17145_v56  ;;  %7899 = vst [vmem:[%s11350_s2 + $0x6d8] sm:$0xff] %v7579_v43  ;;  %v6540_v23 = vsel %vm17133_vm14, %v6537_v42, %v6534_v7  ;;  %v3118_v41 = vmax.f32 %v17025_v21, 0.0  ;;  %10016 = vpow2.f32 %v4376_v22  ;;  %v2867_v43 = vpop.f32.mrf.mxu1 }
 0x8a0   : > { %v7588_v45 = vadd.f32 %v6540_v23, %v3108_v28  ;;  %v6628_v13 = vand.u32 2147483647, %v17112_v5  ;;  %v4378_v27 = vmul.f32 1.442695, %v3789_v51  ;;  %v6546_v36 = vmul.f32 %v17093_v6, %v6545_v31 }
 0x8a1   : > { %10018 = vlog2.f32 %v6712_v55  ;;  %v3119_v49 = vmax.f32 %v17039_v19, 0.0  ;;  %v6634_v34 = vmul.f32 -0.5, %v17137_v1  ;;  %v3478_v3 = vand.u32 2147483647, %v17143_v24 }
 0x8a2   : > { %v10005_v11 = vpop.eup %10004  ;;  %7908 = vst [vmem:[%s11350_s2 + $0x720] sm:$0xff] %v7588_v45  ;;  %v6626_v4 = vadd.f32 1.0, %v6625_v16  ;;  %10020 = vpow2.f32 %v4378_v27  ;;  %v3479_v30 = vand.u32 2147483647, %v17152_v54  ;;  %vm6548_vm15 = vcmp.lt.f32.partialorder %v6547_v53, 0.0004427343 }
 0x8a3   : > { %v6543_v21 = vmul.f32 0.6931472, %v10005_v11  ;;  %v3128_v28 = vmax.f32 %v17047_v15, 0.0  ;;  %v6715_v0 = vmul.f32 -0.5, %v17145_v56  ;;  %v3798_v18 = vsub.f32 0.0, %v3478_v3  ;;  %v17170_v6 = vpop.eup %10006  ;;  %v2871_v3 = vpop.f32.mrf.mxu1 }
 0x8a4   : > { %vm17172_vm0 = vcmp.lt.f32.partialorder %v6628_v13, 0.0004427343  ;;  %v6637_v46 = vand.u32 2147483647, %v17137_v1  ;;  %v3129_v59 = vmax.f32 %v17079_v29, 0.0  ;;  %v6635_v52 = vadd.f32 1.0, %v6634_v34 }
 0x8a5   : > { %v6549_v9 = vsel %vm6548_vm15, %v6546_v36, %v6543_v21  ;;  %v6721_v12 = vadd.f32 1.0, %v17170_v6  ;;  %v3799_v37 = vsub.f32 0.0, %v3479_v30  ;;  %v6627_v39 = vmul.f32 %v17112_v5, %v6626_v4 }
 0x8a6   : > { %v10009_v57 = vpop.eup %10008  ;;  %v7589_v50 = vadd.f32 %v6549_v9, %v3109_v61  ;;  %v6718_v25 = vand.u32 2147483647, %v17145_v56  ;;  %v4396_v14 = vmul.f32 1.442695, %v3798_v18  ;;  %v6716_v42 = vadd.f32 1.0, %v6715_v0 }
 0x8a7   : > { %v17181_v10 = vpop.eup %10010  ;;  %v6624_v2 = vmul.f32 0.6931472, %v10009_v57  ;;  %10022 = vlog2.f32 %v6721_v12  ;;  %v17188_v60 = vadd.f32 %v2861_v58, %v15601_v35  ;;  %v6724_v38 = vmul.f32 -0.5, %v17170_v6 }
 0x8a8   : > { %7909 = vst [vmem:[%s11350_s2 + $0x728] sm:$0xff] %v7589_v50  ;;  %v6802_v20 = vadd.f32 1.0, %v17181_v10  ;;  %v17190_v61 = vpop.eup %10012  ;;  %v3138_v5 = vmax.f32 %v17084_v48, 0.0  ;;  %10024 = vpow2.f32 %v4396_v14  ;;  %v4398_v47 = vmul.f32 1.442695, %v3799_v37  ;;  %v2873_v14 = vpop.f32.mrf.mxu1 }
 0x8a9   : > { %v6630_v62 = vsel %vm17172_vm0, %v6627_v39, %v6624_v2  ;;  %v6811_v31 = vadd.f32 1.0, %v17190_v61  ;;  %v6636_v7 = vmul.f32 %v17137_v1, %v6635_v52  ;;  %vm17198_vm1 = vcmp.lt.f32.partialorder %v6637_v46, 0.0004427343 }
 0x8aa   : > { %v7598_v32 = vadd.f32 %v6630_v62, %v3118_v41  ;;  %10026 = vlog2.f32 %v6802_v20  ;;  %v3139_v51 = vmax.f32 %v17098_v33, 0.0  ;;  %v3148_v58 = vmax.f32 %v17115_v44, 0.0 }
 0x8ab   : > { %v10015_v16 = vpop.eup %10014  ;;  %v6717_v55 = vmul.f32 %v17145_v56, %v6716_v42  ;;  %vm17206_vm2 = vcmp.lt.f32.partialorder %v6718_v25, 0.0004427343  ;;  %10028 = vlog2.f32 %v6811_v31  ;;  %v3488_v53 = vand.u32 2147483647, %v17188_v60 }
 0x8ac   : > { %7918 = vst [vmem:[%s11350_s2 + $0x770] sm:$0xff] %v7598_v32  ;;  %v17211_v1 = vpop.eup %10016  ;;  %v6633_v41 = vmul.f32 0.6931472, %v10015_v16  ;;  %v6727_v45 = vand.u32 2147483647, %v17170_v6  ;;  %v6805_v13 = vmul.f32 -0.5, %v17181_v10  ;;  %v17216_v27 = vadd.f32 %v2863_v17, %v15641_v26 }
 0x8ad   : > { %v6725_v36 = vadd.f32 1.0, %v6724_v38  ;;  %v6814_v56 = vmul.f32 -0.5, %v17190_v61  ;;  %v6892_v34 = vadd.f32 1.0, %v17211_v1  ;;  %10030 = vpow2.f32 %v4398_v47 }
 0x8ae   : > { %v10019_v11 = vpop.eup %10018  ;;  %v6639_v21 = vsel %vm17198_vm1, %v6636_v7, %v6633_v41  ;;  %v6808_v30 = vand.u32 2147483647, %v17181_v10  ;;  %v3808_v0 = vsub.f32 0.0, %v3488_v53  ;;  %v17228_v9 = vadd.f32 %v2865_v8, %v15601_v35 }
 0x8af   : > { %v6714_v4 = vmul.f32 0.6931472, %v10019_v11  ;;  %v17223_v18 = vpop.eup %10020  ;;  %v7599_v17 = vadd.f32 %v6639_v21, %v3119_v49  ;;  %10032 = vlog2.f32 %v6892_v34  ;;  %v17231_v40 = vadd.f32 %v2867_v43, %v15641_v26 }
 0x8b0   : > { %v6806_v57 = vadd.f32 1.0, %v6805_v13  ;;  %v6901_v50 = vadd.f32 1.0, %v17223_v18  ;;  %v17237_v52 = vadd.f32 %v2871_v3, %v15601_v35  ;;  %v6815_v49 = vadd.f32 1.0, %v6814_v56  ;;  %v2875_v13 = vpop.f32.mrf.mxu1 }
 0x8b1   : > { %v6720_v46 = vsel %vm17206_vm2, %v6717_v55, %v6714_v4  ;;  %7919 = vst [vmem:[%s11350_s2 + $0x778] sm:$0xff] %v7599_v17  ;;  %v4416_v12 = vmul.f32 1.442695, %v3808_v0  ;;  %v3489_v37 = vand.u32 2147483647, %v17216_v27  ;;  %v6726_v8 = vmul.f32 %v17170_v6, %v6725_v36 }
 0x8b2   : > { %v7608_v19 = vadd.f32 %v6720_v46, %v3128_v28  ;;  %vm17244_vm3 = vcmp.lt.f32.partialorder %v6727_v45, 0.0004427343  ;;  %vm17248_vm4 = vcmp.lt.f32.partialorder %v6808_v30, 0.0004427343  ;;  %10034 = vlog2.f32 %v6901_v50  ;;  %v2877_v50 = vpop.f32.mrf.mxu1 }
 0x8b3   : > { %v6817_v25 = vand.u32 2147483647, %v17190_v61  ;;  %10036 = vpow2.f32 %v4416_v12  ;;  %v3809_v15 = vsub.f32 0.0, %v3489_v37  ;;  %v3498_v28 = vand.u32 2147483647, %v17228_v9 }
 0x8b4   : > { %7928 = vst [vmem:[%s11350_s2 + $0x7c0] sm:$0xff] %v7608_v19  ;;  %v10023_v42 = vpop.eup %10022  ;;  %v6807_v6 = vmul.f32 %v17181_v10, %v6806_v57  ;;  %v6895_v20 = vmul.f32 -0.5, %v17211_v1  ;;  %v6898_v62 = vand.u32 2147483647, %v17211_v1  ;;  %v3499_v38 = vand.u32 2147483647, %v17231_v40 }
 0x8b5   : > { %v17259_v32 = vpop.eup %10024  ;;  %v6723_v31 = vmul.f32 0.6931472, %v10023_v42  ;;  %v6816_v47 = vmul.f32 %v17190_v61, %v6815_v49  ;;  %v4418_v43 = vmul.f32 1.442695, %v3809_v15  ;;  %v3818_v7 = vsub.f32 0.0, %v3498_v28 }
 0x8b6   : > { %v6904_v16 = vmul.f32 -0.5, %v17223_v18  ;;  %v6982_v55 = vadd.f32 1.0, %v17259_v32  ;;  %v3819_v23 = vsub.f32 0.0, %v3499_v38  ;;  %v3508_v10 = vand.u32 2147483647, %v17237_v52 }
 0x8b7   : > { %v10027_v22 = vpop.eup %10026  ;;  %v6729_v53 = vsel %vm17244_vm3, %v6726_v8, %v6723_v31  ;;  %10038 = vpow2.f32 %v4418_v43  ;;  %v4436_v45 = vmul.f32 1.442695, %v3818_v7  ;;  %v6896_v36 = vadd.f32 1.0, %v6895_v20 }
 0x8b8   : > { %v6804_v41 = vmul.f32 0.6931472, %v10027_v22  ;;  %v10029_v11 = vpop.eup %10028  ;;  %v7609_v61 = vadd.f32 %v6729_v53, %v3129_v59  ;;  %10040 = vlog2.f32 %v6982_v55  ;;  %v17270_v56 = vadd.f32 %v2873_v14, %v15641_v26 }
 0x8b9   : > { %v6813_v3 = vmul.f32 0.6931472, %v10029_v11  ;;  %10042 = vpow2.f32 %v4436_v45  ;;  %v4438_v21 = vmul.f32 1.442695, %v3819_v23  ;;  %vm6818_vm5 = vcmp.lt.f32.partialorder %v6817_v25, 0.0004427343 }
 0x8ba   : > { %v6810_v34 = vsel %vm17248_vm4, %v6807_v6, %v6804_v41  ;;  %v17274_v4 = vpop.eup %10030  ;;  %7929 = vst [vmem:[%s11350_s2 + $0x7c8] sm:$0xff] %v7609_v61  ;;  %vm17279_vm6 = vcmp.lt.f32.partialorder %v6898_v62, 0.0004427343  ;;  %v3828_v59 = vsub.f32 0.0, %v3508_v10  ;;  %v6905_v17 = vadd.f32 1.0, %v6904_v16 }
 0x8bb   : > { %v7618_v30 = vadd.f32 %v6810_v34, %v3138_v5  ;;  %v6819_v0 = vsel %vm6818_vm5, %v6816_v47, %v6813_v3  ;;  %v6907_v46 = vand.u32 2147483647, %v17223_v18  ;;  %v6991_v57 = vadd.f32 1.0, %v17274_v4 }
 0x8bc   : > { %v10033_v19 = vpop.eup %10032  ;;  %v7619_v48 = vadd.f32 %v6819_v0, %v3139_v51  ;;  %10044 = vpow2.f32 %v4438_v21  ;;  %v4456_v5 = vmul.f32 1.442695, %v3828_v59  ;;  %v3509_v49 = vand.u32 2147483647, %v17270_v56 }
 0x8bd   : > { %7938 = vst [vmem:[%s11350_s2 + $0x810] sm:$0xff] %v7618_v30  ;;  %v6894_v12 = vmul.f32 0.6931472, %v10033_v19  ;;  %v6897_v37 = vmul.f32 %v17211_v1, %v6896_v36  ;;  %v6985_v8 = vmul.f32 -0.5, %v17259_v32  ;;  %10046 = vlog2.f32 %v6991_v57 }
 0x8be   : > { %7939 = vst [vmem:[%s11350_s2 + $0x818] sm:$0xff] %v7619_v48  ;;  %10048 = vpow2.f32 %v4456_v5  ;;  %v3829_v2 = vsub.f32 0.0, %v3509_v49  ;;  %v17293_v39 = vadd.f32 %v2875_v13, %v15601_v35  ;;  %v17296_v33 = vadd.f32 %v2877_v50, %v15641_v26 }
 0x8bf   : > { %v10035_v51 = vpop.eup %10034  ;;  %v6900_v25 = vsel %vm17279_vm6, %v6897_v37, %v6894_v12  ;;  %vm6908_vm7 = vcmp.lt.f32.partialorder %v6907_v46, 0.0004427343  ;;  %v6906_v14 = vmul.f32 %v17223_v18, %v6905_v17  ;;  %v3149_v35 = vmax.f32 %v17129_v63, 0.0 }
 0x8c0   : > { %v17300_v15 = vpop.eup %10036  ;;  %v7628_v1 = vadd.f32 %v6900_v25, %v3148_v58  ;;  %v6903_v28 = vmul.f32 0.6931472, %v10035_v51  ;;  %v4458_v42 = vmul.f32 1.442695, %v3829_v2  ;;  %v6988_v26 = vand.u32 2147483647, %v17259_v32 }
 0x8c1   : > { %v7072_v6 = vadd.f32 1.0, %v17300_v15  ;;  %v3518_v20 = vand.u32 2147483647, %v17293_v39  ;;  %v6986_v38 = vadd.f32 1.0, %v6985_v8  ;;  %v3519_v44 = vand.u32 2147483647, %v17296_v33 }
 0x8c2   : > { %7948 = vst [vmem:[%s11350_s2 + $0x860] sm:$0xff] %v7628_v1  ;;  %v6909_v62 = vsel %vm6908_vm7, %v6906_v14, %v6903_v28  ;;  %10050 = vpow2.f32 %v4458_v42  ;;  %v6994_v31 = vmul.f32 -0.5, %v17274_v4  ;;  %v3158_v7 = vmax.f32 %v17143_v24, 0.0 }
 0x8c3   : > { %v7629_v58 = vadd.f32 %v6909_v62, %v3149_v35  ;;  %10052 = vlog2.f32 %v7072_v6  ;;  %v3838_v63 = vsub.f32 0.0, %v3518_v20  ;;  %v3839_v47 = vsub.f32 0.0, %v3519_v44 }
 0x8c4   : > { %v17312_v18 = vpop.eup %10038  ;;  %v6987_v23 = vmul.f32 %v17259_v32, %v6986_v38  ;;  %vm6989_vm8 = vcmp.lt.f32.partialorder %v6988_v26, 0.0004427343  ;;  %v6995_v53 = vadd.f32 1.0, %v6994_v31  ;;  %v6997_v11 = vand.u32 2147483647, %v17274_v4 }
 0x8c5   : > { %v10041_v43 = vpop.eup %10040  ;;  %7949 = vst [vmem:[%s11350_s2 + $0x868] sm:$0xff] %v7629_v58  ;;  %v7081_v22 = vadd.f32 1.0, %v17312_v18  ;;  %v4476_v10 = vmul.f32 1.442695, %v3838_v63  ;;  %v4478_v45 = vmul.f32 1.442695, %v3839_v47 }
 0x8c6   : > { %v17317_v16 = vpop.eup %10042  ;;  %v6984_v55 = vmul.f32 0.6931472, %v10041_v43  ;;  %v7075_v36 = vmul.f32 -0.5, %v17300_v15  ;;  %v6996_v30 = vmul.f32 %v17274_v4, %v6995_v53  ;;  %v3159_v29 = vmax.f32 %v17152_v54, 0.0 }
 0x8c7   : > { %10054 = vlog2.f32 %v7081_v22  ;;  %v7162_v41 = vadd.f32 1.0, %v17317_v16  ;;  %vm6998_vm9 = vcmp.lt.f32.partialorder %v6997_v11, 0.0004427343  ;;  %v7078_v46 = vand.u32 2147483647, %v17300_v15 }
 0x8c8   : > { %v6990_v13 = vsel %vm6989_vm8, %v6987_v23, %v6984_v55  ;;  %10056 = vpow2.f32 %v4476_v10  ;;  %v7076_v17 = vadd.f32 1.0, %v7075_v36  ;;  %v7084_v57 = vmul.f32 -0.5, %v17312_v18 }
 0x8c9   : > { %v17322_v24 = vpop.eup %10044  ;;  %v7638_v61 = vadd.f32 %v6990_v13, %v3158_v7  ;;  %10058 = vlog2.f32 %v7162_v41  ;;  %v7165_v48 = vmul.f32 -0.5, %v17317_v16  ;;  %v3168_v54 = vmax.f32 %v17188_v60, 0.0 }
 0x8ca   : > { %v10047_v34 = vpop.eup %10046  ;;  %v7171_v32 = vadd.f32 1.0, %v17322_v24  ;;  %10060 = vpow2.f32 %v4478_v45  ;;  %v7077_v12 = vmul.f32 %v17300_v15, %v7076_v17  ;;  %vm7079_vm10 = vcmp.lt.f32.partialorder %v7078_v46, 0.0004427343 }
 0x8cb   : > { %v17326_v3 = vpop.eup %10048  ;;  %7958 = vst [vmem:[%s11350_s2 + $0x8b0] sm:$0xff] %v7638_v61  ;;  %v6993_v21 = vmul.f32 0.6931472, %v10047_v34  ;;  %v7085_v37 = vadd.f32 1.0, %v7084_v57  ;;  %v7087_v8 = vand.u32 2147483647, %v17312_v18 }
 0x8cc   : > { %10062 = vlog2.f32 %v7171_v32  ;;  %v7252_v59 = vadd.f32 1.0, %v17326_v3  ;;  %v7168_v2 = vand.u32 2147483647, %v17317_v16  ;;  %v7174_v51 = vmul.f32 -0.5, %v17322_v24 }
 0x8cd   : > { %v6999_v0 = vsel %vm6998_vm9, %v6996_v30, %v6993_v21  ;;  %v7166_v1 = vadd.f32 1.0, %v7165_v48  ;;  %v7255_v60 = vmul.f32 -0.5, %v17326_v3  ;;  %v3169_v15 = vmax.f32 %v17216_v27, 0.0 }
 0x8ce   : > { %v7639_v50 = vadd.f32 %v6999_v0, %v3159_v29  ;;  %10064 = vlog2.f32 %v7252_v59  ;;  %v7086_v26 = vmul.f32 %v17312_v18, %v7085_v37  ;;  %v3178_v6 = vmax.f32 %v17228_v9, 0.0 }
 0x8cf   : > { %v17334_v19 = vpop.eup %10050  ;;  %vm7088_vm11 = vcmp.lt.f32.partialorder %v7087_v8, 0.0004427343  ;;  %vm17351_vm12 = vcmp.lt.f32.partialorder %v7168_v2, 0.0004427343  ;;  %v7175_v38 = vadd.f32 1.0, %v7174_v51  ;;  %v7167_v27 = vmul.f32 %v17317_v16, %v7166_v1 }
 0x8d0   : > { %v10053_v4 = vpop.eup %10052  ;;  %7959 = vst [vmem:[%s11350_s2 + $0x8b8] sm:$0xff] %v7639_v50  ;;  %v7261_v5 = vadd.f32 1.0, %v17334_v19  ;;  %v7177_v63 = vand.u32 2147483647, %v17322_v24  ;;  %v7256_v9 = vadd.f32 1.0, %v7255_v60  ;;  %v7264_v43 = vmul.f32 -0.5, %v17334_v19 }
 0x8d1   : > { %v7074_v49 = vmul.f32 0.6931472, %v10053_v4  ;;  %v7258_v55 = vand.u32 2147483647, %v17326_v3  ;;  %v7176_v16 = vmul.f32 %v17322_v24, %v7175_v38  ;;  %v3179_v45 = vmax.f32 %v17231_v40, 0.0 }
 0x8d2   : > { %10066 = vlog2.f32 %v7261_v5  ;;  %vm7178_vm13 = vcmp.lt.f32.partialorder %v7177_v63, 0.0004427343  ;;  %v7257_v61 = vmul.f32 %v17326_v3, %v7256_v9  ;;  %v7265_v36 = vadd.f32 1.0, %v7264_v43 }
 0x8d3   : > { %v7080_v25 = vsel %vm7079_vm10, %v7077_v12, %v7074_v49  ;;  %v3188_v32 = vmax.f32 %v17237_v52, 0.0  ;;  %vm7259_vm14 = vcmp.lt.f32.partialorder %v7258_v55, 0.0004427343  ;;  %v7267_v21 = vand.u32 2147483647, %v17334_v19 }
 0x8d4   : > { %v10055_v28 = vpop.eup %10054  ;;  %v7648_v14 = vadd.f32 %v7080_v25, %v3168_v54  ;;  %v7266_v0 = vmul.f32 %v17334_v19, %v7265_v36  ;;  %v3189_v3 = vmax.f32 %v17270_v56, 0.0  ;;  %v3198_v49 = vmax.f32 %v17293_v39, 0.0 }
 0x8d5   : > { %v17345_v42 = vpop.eup %10056  ;;  %v7083_v35 = vmul.f32 0.6931472, %v10055_v28  ;;  %vm7268_vm15 = vcmp.lt.f32.partialorder %v7267_v21, 0.0004427343  ;;  %v3199_v51 = vmax.f32 %v17296_v33, 0.0 }
 0x8d6   : > { %v10059_v20 = vpop.eup %10058  ;;  %7968 = vst [vmem:[%s11350_s2 + $0x900] sm:$0xff] %v7648_v14  ;;  %v7342_v44 = vadd.f32 1.0, %v17345_v42  ;;  %v7345_v30 = vmul.f32 -0.5, %v17345_v42  ;;  %v7348_v50 = vand.u32 2147483647, %v17345_v42 }
 0x8d7   : > { %v7089_v58 = vsel %vm7088_vm11, %v7086_v26, %v7083_v35  ;;  %v7164_v31 = vmul.f32 0.6931472, %v10059_v20  ;;  %v10061_v18 = vpop.eup %10060 }
 0x8d8   : > { %v7649_v47 = vadd.f32 %v7089_v58, %v3169_v15  ;;  %10068 = vlog2.f32 %v7342_v44  ;;  %v7351_v23 = vadd.f32 1.0, %v10061_v18  ;;  %v7354_v17 = vmul.f32 -0.5, %v10061_v18 }
 0x8d9   : > { %v10063_v7 = vpop.eup %10062  ;;  %v7170_v22 = vsel %vm17351_vm12, %v7167_v27, %v7164_v31  ;;  %v7346_v46 = vadd.f32 1.0, %v7345_v30  ;;  %v7357_v19 = vand.u32 2147483647, %v10061_v18  ;;  %vm7349_vm0 = vcmp.lt.f32.partialorder %v7348_v50, 0.0004427343 }
 0x8da   : > { %7969 = vst [vmem:[%s11350_s2 + $0x908] sm:$0xff] %v7649_v47  ;;  %v7658_v10 = vadd.f32 %v7170_v22, %v3178_v6  ;;  %v7173_v53 = vmul.f32 0.6931472, %v10063_v7  ;;  %10070 = vlog2.f32 %v7351_v23  ;;  %v7355_v4 = vadd.f32 1.0, %v7354_v17 }
 0x8db   : > { %v10065_v41 = vpop.eup %10064  ;;  %v7347_v5 = vmul.f32 %v17345_v42, %v7346_v46  ;;  %vm7358_vm1 = vcmp.lt.f32.partialorder %v7357_v19, 0.0004427343 }
 0x8dc   : > { %7978 = vst [vmem:[%s11350_s2 + $0x950] sm:$0xff] %v7658_v10  ;;  %v7179_v13 = vsel %vm7178_vm13, %v7176_v16, %v7173_v53  ;;  %v7254_v11 = vmul.f32 0.6931472, %v10065_v41  ;;  %v7356_v2 = vmul.f32 %v10061_v18, %v7355_v4 }
 0x8dd   : > { %v7659_v34 = vadd.f32 %v7179_v13, %v3179_v45 }
 0x8de   : > { %v7260_v24 = vsel %vm7259_vm14, %v7257_v61, %v7254_v11 }
 0x8df   : > { %v10067_v40 = vpop.eup %10066  ;;  %7979 = vst [vmem:[%s11350_s2 + $0x958] sm:$0xff] %v7659_v34  ;;  %v7668_v29 = vadd.f32 %v7260_v24, %v3188_v32 }
 0x8e0   : > { %v7263_v59 = vmul.f32 0.6931472, %v10067_v40 }
 0x8e1   : > { %7988 = vst [vmem:[%s11350_s2 + $0x9a0] sm:$0xff] %v7668_v29 }
 0x8e2   : > { %v7269_v52 = vsel %vm7268_vm15, %v7266_v0, %v7263_v59 }
 0x8e3   : > { %v7669_v57 = vadd.f32 %v7269_v52, %v3189_v3 }
 0x8e5   : > { %v10069_v48 = vpop.eup %10068  ;;  %7989 = vst [vmem:[%s11350_s2 + $0x9a8] sm:$0xff] %v7669_v57 }
 0x8e6   : > { %v7344_v54 = vmul.f32 0.6931472, %v10069_v48 }
 0x8e7   : > { %v10071_v56 = vpop.eup %10070 }
 0x8e8   : > { %v7350_v12 = vsel %vm7349_vm0, %v7347_v5, %v7344_v54  ;;  %v7353_v8 = vmul.f32 0.6931472, %v10071_v56 }
 0x8e9   : > { %v7678_v37 = vadd.f32 %v7350_v12, %v3198_v49 }
 0x8ea   : > { %v7359_v25 = vsel %vm7358_vm1, %v7356_v2, %v7353_v8 }
 0x8eb   : > { %7998 = vst [vmem:[%s11350_s2 + $0x9f0] sm:$0xff] %v7678_v37  ;;  %v7679_v39 = vadd.f32 %v7359_v25, %v3199_v51 }
 0x8ed   : > { %7999 = vst [vmem:[%s11350_s2 + $0x9f8] sm:$0xff] %v7679_v39 }
 0x8ee   : > { %10296 = shalt.err (!%p10293_p0)
}
 0x8ef   : > { %s10297_s28 = scalar_lea.hbm %s17385_s27, 40960  ;;  %s10301_s2 = scalar_lea.hbm %s17441_s9, 81920 }
 0x8f0   : > { %p10298_p12 = scmp.ne.s32.totalorder %s17385_s27, %s10297_s28  ;;  %p10302_p9 = scmp.lt.s32.totalorder %s17385_s27, %s17441_s9 }
 0x8f1   : > { %p10303_p3 = scmp.lt.s32.totalorder %s10301_s2, %s10297_s28 }
 0x8f2   : > { %p10299_p1 = pnand %p10298_p12, %p18195_p10 }
 0x8f3   : > { %p10304_p5 = por %p10303_p3, %p10302_p9 }
 0x8f4   : > { %p10300_p2 = pneg %p10299_p1 }
 0x8f6   : > { %p10305_p6 = pnand %p10304_p5, %p10300_p2 }
 0x8f8   : > { %10308 = shalt.err (!%p10305_p6)
}
 0x8f9   : > { %s10379_s24 = smov 1280   ;;  %s10380_s21 = smov 80  }
 0x8fa   : > { %8557 = dma.vmem_to_hbm [thread:$0]  (%p18195_p10), %s17387_s23, 40960, %s17385_s27, %s17392_s13, %s10379_s24, %s10379_s24, %s10380_s21  }
 0x8fb PF: > { %p8604_p4 = scmp.ge.s32.totalorder %s10363_s12, 2  ;;  %s8030_s26 = sand.u32 1, %s10351_s30  }
 0x8fc   : > { %p18196_p7 = scmp.ne.s32.totalorder %s17500_s20, 0  ;;  %s8031_s29 = scalar_lea.sflag [#allocation4], %s8030_s26 }
 0x8fe   : > { %p8585_p13 = pnand %p8604_p4, %p18196_p7 }
 0x900   : > { %p8586_p8 = pneg %p8585_p13 }
 0x902   : > { %10346 = dma.done.wait (%p8586_p8), %s8031_s29, 40960  }
 0x903   : > { %10348 = vsyncadd (%p8586_p8), %s8031_s29, 4294926336  ;;  %p24_p11 = scmp.ge.s32.totalorder %s10456_s15, 4   ;;  %s18197_s30 = smov %s10355_s10 }
 0x904   : > { %s18198_s10 = smov %s10359_s11  ;;  %s18199_s11 = smov %s10467_s18 }
 0x905   : > { %s18200_s12 = smov %s10456_s15  ;;  %26 = sbr.rel (!%p24_p11) target bundleno = 10 (0xa), region = 124 }
 0x90a   :  { %8036 = vsyncpa [#allocation3], 1 }
 0x90b   :  { %8038 = vsyncpa [#allocation3 + $0x1], 1 }
 0x90c   :  { %8039 = vsyncpa [#allocation6], 1 }
 0x90d   :  { %8040 = vsyncpa [#allocation9], 1 }
 0x90e   :  { %8041 = vsyncpa [#allocation12], 1 }
 0x90f   :  { %8042 = vsyncpa [#allocation15], 1 }
 0x910   :  { %8043 = vsyncpa [#allocation4], 1 }
 0x911   :  { %8045 = vsyncpa [#allocation4 + $0x1], 1 }

</bundles_post_ra>
